<compile_context>
chip_gen: v7x
topology: tpu7x:2x2x1
jax: 0.10.0
libtpu: 0.0.40
codegen_flags: <defaults>
</compile_context>

<pallas_src>
import functools

import jax
import jax.numpy as jnp
from jax import lax
from jax.experimental import pallas as pl
from jax.experimental.pallas import tpu as pltpu


_VMEM_LIMIT = 32 * 1024 * 1024   # explicit scoped-VMEM limit (>= default on v5e/v6e/v7x)


def _pick_tile_h(h):
    """Even H-tile that divides h and leaves >=2 grid steps (pipelining/megacore)."""
    for th in (32, 16, 8, 4, 2):
        if th < h and h % th == 0:
            return th
    return h


# ---------------------------------------------------------------------------
# conv1_1: im2col'd (K=27) pointwise matmul + bias + ReLU
# ---------------------------------------------------------------------------
def _matmul_bias_relu_kernel(x_ref, w_ref, b_ref, o_ref):
    """x_ref: (TH, W, K) bf16;  w_ref: (K, Cout) bf16;  b_ref: (1, Cout) f32."""
    th, w, k = x_ref.shape
    cout = o_ref.shape[-1]
    acc = jnp.dot(x_ref[...].reshape(th * w, k), w_ref[...],
                  preferred_element_type=jnp.float32)
    y = jnp.maximum(acc + b_ref[...], 0.0)
    o_ref[...] = y.reshape(th, w, cout).astype(o_ref.dtype)


def conv1_1_im2col_relu(x, w27, bias_row):
    """x: (B, H, W, 3) bf16 -> (B, H, W, 64) bf16.

    Cin=3 would waste 125/128 lanes and make descriptor-bound DMAs, so the 3x3
    neighbourhood is gathered at the JAX level into 27 channels and the layer is a
    single K=27 MXU matmul per tile."""
    b, h, w, cin = x.shape
    cout = w27.shape[-1]
    xp = jnp.pad(x, ((0, 0), (1, 1), (1, 1), (0, 0)))
    patches = jnp.concatenate(
        [xp[:, dy:dy + h, dx:dx + w, :] for dy in range(3) for dx in range(3)],
        axis=-1)                                                 # (B, H, W, 27)
    k = 9 * cin
    th = _pick_tile_h(h)
    return pl.pallas_call(
        _matmul_bias_relu_kernel,
        out_shape=jax.ShapeDtypeStruct((b, h, w, cout), jnp.bfloat16),
        grid=(b, h // th),
        in_specs=[
            pl.BlockSpec((None, th, w, k), lambda bi, ti: (bi, ti, 0, 0)),
            pl.BlockSpec((k, cout), lambda bi, ti: (0, 0)),
            pl.BlockSpec((1, cout), lambda bi, ti: (0, 0)),
        ],
        out_specs=pl.BlockSpec((None, th, w, cout), lambda bi, ti: (bi, ti, 0, 0)),
        compiler_params=pltpu.CompilerParams(
            dimension_semantics=("parallel", "parallel"),
            vmem_limit_bytes=_VMEM_LIMIT),
    )(patches, w27, bias_row)


# ---------------------------------------------------------------------------
# generic 3x3 "same" conv + bias + ReLU, H-tiled with a 1-row halo.
# Optionally fuses a 2x2/stride-2 max-pool of the *input* activation (used for
# conv2_1, which consumes MaxPool(relu1_2)).
# ---------------------------------------------------------------------------
def _conv3x3_relu_kernel(x_mid_ref, x_top_ref, x_bot_ref, w_ref, b_ref, o_ref,
                         *, pool_input):
    t = pl.program_id(1)
    last = pl.num_programs(1) - 1

    def load(ref):
        v = ref[...]
        if pool_input:
            # v is a (rows, 2*Wc, 2*Cin) row-major view packing two pre-pool rows:
            # element (m, n) with m = r*Wc + j, n = s*Cin + c equals pre-pool pixel
            # (2*row + r, 2*j + s, c); MaxPool2d(2,2) = sublane-half max + lane-half max.
            wv, cv = v.shape[-2], v.shape[-1]
            wc, cin = wv // 2, cv // 2
            v = jnp.maximum(v[:, :wc, :], v[:, wc:, :])
            v = jnp.maximum(v[..., :cin], v[..., cin:])
        return v

    mid = load(x_mid_ref)                                   # (TH, Wc, Cin)
    top = load(x_top_ref)                                   # (1,  Wc, Cin)
    bot = load(x_bot_ref)
    top = jnp.where(t > 0, top, jnp.zeros_like(top))        # zero halo at image top
    bot = jnp.where(t < last, bot, jnp.zeros_like(bot))     # zero halo at image bottom

    th, wc, cin = mid.shape
    cout = o_ref.shape[-1]

    xs = jnp.concatenate([top, mid, bot], axis=0)           # (TH+2, Wc, Cin) H-padded
    zcol = jnp.zeros((th + 2, 1, cin), xs.dtype)

    # Tap-stacked MXU matmuls: per horizontal tap kx, stack the 3 vertical taps
    # along K -> 3 matmuls with K = 3*Cin instead of 9 with K = Cin.
    acc = jnp.zeros((th * wc, cout), jnp.float32)
    for kx in range(3):
        if kx == 0:      # needs column w-1: shift right, zero column 0
            shifted = jnp.concatenate([zcol, xs[:, :wc - 1, :]], axis=1)
        elif kx == 1:
            shifted = xs
        else:            # needs column w+1: shift left, zero column Wc-1
            shifted = jnp.concatenate([xs[:, 1:, :], zcol], axis=1)
        patch = jnp.concatenate(
            [shifted[0:th], shifted[1:th + 1], shifted[2:th + 2]], axis=-1)
        acc = acc + jnp.dot(patch.reshape(th * wc, 3 * cin), w_ref[kx],
                            preferred_element_type=jnp.float32)

    y = jnp.maximum(acc + b_ref[...], 0.0)                   # bias + ReLU (f32)
    o_ref[...] = y.reshape(th, wc, cout).astype(o_ref.dtype)


def conv3x3_relu(x, w_kx, bias_row, *, pool_input=False, out_dtype=jnp.bfloat16):
    """x: (B, H, W, Cin) bf16 NHWC.  If pool_input, a 2x2/stride-2 max-pool is
    applied to x on the fly before the conv.  Returns (B, Ho, Wo, Cout)."""
    b, h, w, cin = x.shape
    cout = w_kx.shape[-1]
    if pool_input:
        assert h % 2 == 0 and w % 2 == 0
        ho, wo = h // 2, w // 2
        xv = x.reshape(b, ho, w, 2 * cin)      # free row-major re-view (HBM metadata)
        wv, cv = w, 2 * cin
    else:
        ho, wo = h, w
        xv = x
        wv, cv = w, cin
    th = _pick_tile_h(ho)
    nt = ho // th

    kernel = functools.partial(_conv3x3_relu_kernel, pool_input=pool_input)

    return pl.pallas_call(
        kernel,
        out_shape=jax.ShapeDtypeStruct((b, ho, wo, cout), out_dtype),
        grid=(b, nt),
        in_specs=[
            # main row tile
            pl.BlockSpec((None, th, wv, cv), lambda bi, ti: (bi, ti, 0, 0)),
            # 1-row top halo (clamped; masked to zero in-kernel at the image top)
            pl.BlockSpec((None, 1, wv, cv),
                         lambda bi, ti: (bi, jnp.maximum(ti * th - 1, 0), 0, 0)),
            # 1-row bottom halo (clamped; masked at the image bottom)
            pl.BlockSpec((None, 1, wv, cv),
                         lambda bi, ti: (bi, jnp.minimum((ti + 1) * th, ho - 1), 0, 0)),
            pl.BlockSpec((3, 3 * cin, cout), lambda bi, ti: (0, 0, 0)),   # resident weights
            pl.BlockSpec((1, cout), lambda bi, ti: (0, 0)),
        ],
        out_specs=pl.BlockSpec((None, th, wo, cout), lambda bi, ti: (bi, ti, 0, 0)),
        compiler_params=pltpu.CompilerParams(
            dimension_semantics=("parallel", "parallel"),
            vmem_limit_bytes=_VMEM_LIMIT),
    )(xv, xv, xv, w_kx, bias_row)


# ---------------------------------------------------------------------------
# Parameter prep (done ONCE) and the module forward
# ---------------------------------------------------------------------------
def prep_conv3x3_params(w_oihw, b):
    """PyTorch Conv2d (Cout, Cin, 3, 3)+(Cout,) -> (3, 3*Cin, Cout) bf16, (1, Cout) f32.
    Layout: w[kx][ky*Cin + c, o] == w_oihw[o, c, ky, kx]."""
    cout, cin, kh, kw = w_oihw.shape
    w_kx = jnp.transpose(w_oihw, (3, 2, 1, 0)).reshape(kw, kh * cin, cout)
    return w_kx.astype(jnp.bfloat16), jnp.asarray(b, jnp.float32).reshape(1, cout)


def prep_conv1_1_params(w_oihw, b):
    """(64, 3, 3, 3)+(64,) -> im2col matrix (27, 64) bf16, (1, 64) f32.
    Layout: w[(ky*3 + kx)*Cin + c, o] == w_oihw[o, c, ky, kx]."""
    cout, cin, kh, kw = w_oihw.shape
    w27 = jnp.transpose(w_oihw, (2, 3, 1, 0)).reshape(kh * kw * cin, cout)
    return w27.astype(jnp.bfloat16), jnp.asarray(b, jnp.float32).reshape(1, cout)


def vgg16_relu2_2_nhwc(x_nhwc, params):
    """VGG16 features[0..8] (up to relu2_2). NHWC in -> NHWC out (f32)."""
    h = x_nhwc.astype(jnp.bfloat16)
    h = conv1_1_im2col_relu(h, *params["conv1_1"])                  # (B,H,W,64)
    h = conv3x3_relu(h, *params["conv1_2"])                         # relu1_2
    # MaxPool2d(2,2) is fused into conv2_1's prologue (pool_input=True).
    h = conv3x3_relu(h, *params["conv2_1"], pool_input=True)        # (B,H/2,W/2,128)
    h = conv3x3_relu(h, *params["conv2_2"], out_dtype=jnp.float32)  # relu2_2
    return h


@jax.jit
def vgg16_relu2_2(x_nchw, params):
    """Torch-layout wrapper: (B,3,H,W) f32 -> relu2_2 (B,128,H/2,W/2) f32."""
    h = vgg16_relu2_2_nhwc(jnp.transpose(x_nchw, (0, 2, 3, 1)), params)
    return jnp.transpose(h, (0, 3, 1, 2))


# ---------------------------------------------------------------------------
# Demo + pure-JAX reference check
# ---------------------------------------------------------------------------
if __name__ == "__main__":
    B, C_IN, H, W = 2, 3, 32, 32          # small demo shapes (H-tiling/halos exercised)

    key = jax.random.PRNGKey(0)
    keys = jax.random.split(key, 9)

    # TODO(synk): torchvision's pretrained VGG16 weights cannot be loaded in a
    # self-contained script (no file / network access); deterministic random
    # weights with the exact nn.Conv2d shapes are used instead.
    def mk_w(k, cout, cin):
        scale = 1.0 / (3.0 * (float(cin) ** 0.5))     # ~1/sqrt(fan_in)
        return jax.random.normal(k, (cout, cin, 3, 3), jnp.float32) * scale

    def mk_b(k, cout):
        return jax.random.normal(k, (cout,), jnp.float32) * 0.05

    raw = {
        "conv1_1": (mk_w(keys[0], 64, 3), mk_b(keys[1], 64)),
        "conv1_2": (mk_w(keys[2], 64, 64), mk_b(keys[3], 64)),
        "conv2_1": (mk_w(keys[4], 128, 64), mk_b(keys[5], 128)),
        "conv2_2": (mk_w(keys[6], 128, 128), mk_b(keys[7], 128)),
    }
    params = {
        "conv1_1": prep_conv1_1_params(*raw["conv1_1"]),
        "conv1_2": prep_conv3x3_params(*raw["conv1_2"]),
        "conv2_1": prep_conv3x3_params(*raw["conv2_1"]),
        "conv2_2": prep_conv3x3_params(*raw["conv2_2"]),
    }

    x = jax.random.normal(keys[8], (B, C_IN, H, W), jnp.float32)

    out = jax.block_until_ready(vgg16_relu2_2(x, params))
    assert out.shape == (B, 128, H // 2, W // 2), out.shape

    # Pure-JAX reference mirroring the kernels' bf16-input / f32-accumulate numerics.
    def ref_conv(h, w, b):
        hq = h.astype(jnp.bfloat16).astype(jnp.float32)
        wq = w.astype(jnp.bfloat16).astype(jnp.float32)
        y = lax.conv_general_dilated(
            hq, wq, window_strides=(1, 1), padding=((1, 1), (1, 1)),
            dimension_numbers=("NCHW", "OIHW", "NCHW"),
            precision=lax.Precision.HIGHEST)
        return jnp.maximum(y + b[None, :, None, None], 0.0)

    r = ref_conv(x, *raw["conv1_1"])
    r = ref_conv(r, *raw["conv1_2"])
    r = lax.reduce_window(r, -jnp.inf, lax.max, (1, 1, 2, 2), (1, 1, 2, 2), "VALID")
    r = ref_conv(r, *raw["conv2_1"])
    r = ref_conv(r, *raw["conv2_2"])

    max_err = float(jnp.max(jnp.abs(out - r)))
    assert jnp.allclose(out, r, atol=5e-2, rtol=5e-2), f"max abs err {max_err}"

    print("KERNEL_OK")
</pallas_src>

<mosaic_0001>
module attributes {stable_mosaic.version = 11 : i64} {
  func.func @_matmul_bias_relu_kernel(%arg0: i32, %arg1: i32, %arg2: memref<1x16x32x27xbf16, #tpu.memory_space<vmem>>, %arg3: memref<27x64xbf16, #tpu.memory_space<vmem>>, %arg4: memref<1x64xf32, #tpu.memory_space<vmem>>, %arg5: memref<1x16x32x64xbf16, #tpu.memory_space<vmem>>) attributes {dimension_semantics = [#tpu.dimension_semantics<parallel>, #tpu.dimension_semantics<parallel>], iteration_bounds = array<i64: 2, 2>, scalar_prefetch = 0 : i64, scratch_operands = 0 : i64, tpu.core_type = #tpu.core_type<tc>, window_params = [{transform_indices = @transform_0, window_bounds = array<i64: 1, 16, 32, 27>}, {pipeline_mode = #tpu.pipeline_mode<synchronous>, transform_indices = @transform_1, window_bounds = array<i64: 27, 64>}, {pipeline_mode = #tpu.pipeline_mode<synchronous>, transform_indices = @transform_2, window_bounds = array<i64: 1, 64>}, {transform_indices = @transform_3, window_bounds = array<i64: 1, 16, 32, 64>}]} {
    %c0 = arith.constant 0 : index
    %c0_0 = arith.constant 0 : index
    %c0_1 = arith.constant 0 : index
    %c0_2 = arith.constant 0 : index
    %0 = vector.load %arg2[%c0, %c0_0, %c0_1, %c0_2] : memref<1x16x32x27xbf16, #tpu.memory_space<vmem>>, vector<1x16x32x27xbf16>
    %1 = vector.shape_cast %0 : vector<1x16x32x27xbf16> to vector<16x32x27xbf16>
    %2 = vector.shape_cast %1 : vector<16x32x27xbf16> to vector<512x27xbf16>
    %c0_3 = arith.constant 0 : index
    %c0_4 = arith.constant 0 : index
    %3 = vector.load %arg3[%c0_3, %c0_4] : memref<27x64xbf16, #tpu.memory_space<vmem>>, vector<27x64xbf16>
    %cst = arith.constant dense<0.000000e+00> : vector<512x64xf32>
    %4 = tpu.matmul %2, %3, %cst {dimension_numbers = #tpu.dot_dimension_numbers<[1], [0], [0], [1], [0, 0, 1, 1], [], []>} : vector<512x27xbf16>, vector<27x64xbf16>, vector<512x64xf32> -> vector<512x64xf32>
    %c0_5 = arith.constant 0 : index
    %c0_6 = arith.constant 0 : index
    %5 = vector.load %arg4[%c0_5, %c0_6] : memref<1x64xf32, #tpu.memory_space<vmem>>, vector<1x64xf32>
    %6 = vector.broadcast %5 : vector<1x64xf32> to vector<512x64xf32>
    %7 = arith.addf %4, %6 : vector<512x64xf32>
    %cst_7 = arith.constant 0.000000e+00 : f32
    %8 = vector.broadcast %cst_7 : f32 to vector<512x64xf32>
    %9 = arith.maximumf %7, %8 : vector<512x64xf32>
    %10 = vector.shape_cast %9 : vector<512x64xf32> to vector<16x32x64xf32>
    %11 = arith.truncf %10 : vector<16x32x64xf32> to vector<16x32x64xbf16>
    %c0_8 = arith.constant 0 : index
    %c0_9 = arith.constant 0 : index
    %c0_10 = arith.constant 0 : index
    %c0_11 = arith.constant 0 : index
    %12 = vector.load %arg5[%c0_8, %c0_9, %c0_10, %c0_11] : memref<1x16x32x64xbf16, #tpu.memory_space<vmem>>, vector<1x16x32x64xbf16>
    %13 = vector.shape_cast %12 : vector<1x16x32x64xbf16> to vector<16x32x64xbf16>
    %14 = vector.shape_cast %11 : vector<16x32x64xbf16> to vector<1x16x32x64xbf16>
    tpu.vector_store %arg5[%c0_8, %c0_9, %c0_10, %c0_11], %14 {strides = array<i32>} : memref<1x16x32x64xbf16, #tpu.memory_space<vmem>>, vector<1x16x32x64xbf16>,
    return
  }
  func.func @transform_0(%arg0: i32, %arg1: i32) -> (i32, i32, i32, i32) {
    %c0_i32 = arith.constant 0 : i32
    %c0_i32_0 = arith.constant 0 : i32
    %c0_i32_1 = arith.constant 0 : i32
    return %arg0, %arg1, %c0_i32, %c0_i32_0 : i32, i32, i32, i32
  }
  func.func @transform_1(%arg0: i32, %arg1: i32) -> (i32, i32) {
    %c0_i32 = arith.constant 0 : i32
    %c0_i32_0 = arith.constant 0 : i32
    %c0_i32_1 = arith.constant 0 : i32
    return %c0_i32, %c0_i32_0 : i32, i32
  }
  func.func @transform_2(%arg0: i32, %arg1: i32) -> (i32, i32) {
    %c0_i32 = arith.constant 0 : i32
    %c0_i32_0 = arith.constant 0 : i32
    %c0_i32_1 = arith.constant 0 : i32
    return %c0_i32, %c0_i32_0 : i32, i32
  }
  func.func @transform_3(%arg0: i32, %arg1: i32) -> (i32, i32, i32, i32) {
    %c0_i32 = arith.constant 0 : i32
    %c0_i32_0 = arith.constant 0 : i32
    %c0_i32_1 = arith.constant 0 : i32
    return %arg0, %arg1, %c0_i32, %c0_i32_0 : i32, i32, i32, i32
  }
}

module attributes {stable_mosaic.version = 11 : i64} {
  func.func @_conv3x3_relu_kernel(%arg0: i32, %arg1: i32, %arg2: memref<1x16x32x64xbf16, #tpu.memory_space<vmem>>, %arg3: memref<1x1x32x64xbf16, #tpu.memory_space<vmem>>, %arg4: memref<1x1x32x64xbf16, #tpu.memory_space<vmem>>, %arg5: memref<3x192x64xbf16, #tpu.memory_space<vmem>>, %arg6: memref<1x64xf32, #tpu.memory_space<vmem>>, %arg7: memref<1x16x32x64xbf16, #tpu.memory_space<vmem>>) attributes {dimension_semantics = [#tpu.dimension_semantics<parallel>, #tpu.dimension_semantics<parallel>], iteration_bounds = array<i64: 2, 2>, scalar_prefetch = 0 : i64, scratch_operands = 0 : i64, tpu.core_type = #tpu.core_type<tc>, window_params = [{transform_indices = @transform_0, window_bounds = array<i64: 1, 16, 32, 64>}, {transform_indices = @transform_1, window_bounds = array<i64: 1, 1, 32, 64>}, {transform_indices = @transform_2, window_bounds = array<i64: 1, 1, 32, 64>}, {pipeline_mode = #tpu.pipeline_mode<synchronous>, transform_indices = @transform_3, window_bounds = array<i64: 3, 192, 64>}, {pipeline_mode = #tpu.pipeline_mode<synchronous>, transform_indices = @transform_4, window_bounds = array<i64: 1, 64>}, {transform_indices = @transform_5, window_bounds = array<i64: 1, 16, 32, 64>}]} {
    %c0 = arith.constant 0 : index
    %c0_0 = arith.constant 0 : index
    %c0_1 = arith.constant 0 : index
    %c0_2 = arith.constant 0 : index
    %0 = vector.load %arg2[%c0, %c0_0, %c0_1, %c0_2] : memref<1x16x32x64xbf16, #tpu.memory_space<vmem>>, vector<1x16x32x64xbf16>
    %1 = vector.shape_cast %0 : vector<1x16x32x64xbf16> to vector<16x32x64xbf16>
    %c0_3 = arith.constant 0 : index
    %c0_4 = arith.constant 0 : index
    %c0_5 = arith.constant 0 : index
    %c0_6 = arith.constant 0 : index
    %2 = vector.load %arg3[%c0_3, %c0_4, %c0_5, %c0_6] : memref<1x1x32x64xbf16, #tpu.memory_space<vmem>>, vector<1x1x32x64xbf16>
    %3 = vector.shape_cast %2 : vector<1x1x32x64xbf16> to vector<1x32x64xbf16>
    %c0_7 = arith.constant 0 : index
    %c0_8 = arith.constant 0 : index
    %c0_9 = arith.constant 0 : index
    %c0_10 = arith.constant 0 : index
    %4 = vector.load %arg4[%c0_7, %c0_8, %c0_9, %c0_10] : memref<1x1x32x64xbf16, #tpu.memory_space<vmem>>, vector<1x1x32x64xbf16>
    %5 = vector.shape_cast %4 : vector<1x1x32x64xbf16> to vector<1x32x64xbf16>
    %c0_i32 = arith.constant 0 : i32
    %6 = arith.cmpi sgt, %arg1, %c0_i32 : i32
    %cst = arith.constant 0.000000e+00 : bf16
    %7 = vector.broadcast %cst : bf16 to vector<1x32x64xbf16>
    %8 = arith.select %6, %3, %7 : vector<1x32x64xbf16>
    %c1_i32 = arith.constant 1 : i32
    %9 = arith.cmpi slt, %arg1, %c1_i32 : i32
    %cst_11 = arith.constant 0.000000e+00 : bf16
    %10 = vector.broadcast %cst_11 : bf16 to vector<1x32x64xbf16>
    %11 = arith.select %9, %5, %10 : vector<1x32x64xbf16>
    %12 = tpu.concatenate %8, %1, %11 in 0 : vector<1x32x64xbf16>, vector<16x32x64xbf16>, vector<1x32x64xbf16> -> vector<18x32x64xbf16>
    %cst_12 = arith.constant 0.000000e+00 : bf16
    %13 = vector.broadcast %cst_12 : bf16 to vector<18x1x64xbf16>
    %cst_13 = arith.constant 0.000000e+00 : f32
    %14 = vector.broadcast %cst_13 : f32 to vector<512x64xf32>
    %15 = vector.extract_strided_slice %12 {offsets = [0, 0, 0], sizes = [18, 31, 64], strides = [1, 1, 1]} : vector<18x32x64xbf16> to vector<18x31x64xbf16>
    %16 = tpu.concatenate %13, %15 in 1 : vector<18x1x64xbf16>, vector<18x31x64xbf16> -> vector<18x32x64xbf16>
    %17 = vector.extract_strided_slice %16 {offsets = [0, 0, 0], sizes = [16, 32, 64], strides = [1, 1, 1]} : vector<18x32x64xbf16> to vector<16x32x64xbf16>
    %18 = vector.extract_strided_slice %16 {offsets = [1, 0, 0], sizes = [16, 32, 64], strides = [1, 1, 1]} : vector<18x32x64xbf16> to vector<16x32x64xbf16>
    %19 = vector.extract_strided_slice %16 {offsets = [2, 0, 0], sizes = [16, 32, 64], strides = [1, 1, 1]} : vector<18x32x64xbf16> to vector<16x32x64xbf16>
    %20 = tpu.concatenate %17, %18, %19 in 2 : vector<16x32x64xbf16>, vector<16x32x64xbf16>, vector<16x32x64xbf16> -> vector<16x32x192xbf16>
    %21 = vector.shape_cast %20 : vector<16x32x192xbf16> to vector<512x192xbf16>
    %c0_14 = arith.constant 0 : index
    %c0_15 = arith.constant 0 : index
    %c0_16 = arith.constant 0 : index
    %22 = vector.load %arg5[%c0_14, %c0_15, %c0_16] : memref<3x192x64xbf16, #tpu.memory_space<vmem>>, vector<1x192x64xbf16>
    %23 = vector.shape_cast %22 : vector<1x192x64xbf16> to vector<192x64xbf16>
    %cst_17 = arith.constant dense<0.000000e+00> : vector<512x64xf32>
    %24 = tpu.matmul %21, %23, %cst_17 {dimension_numbers = #tpu.dot_dimension_numbers<[1], [0], [0], [1], [0, 0, 1, 1], [], []>} : vector<512x192xbf16>, vector<192x64xbf16>, vector<512x64xf32> -> vector<512x64xf32>
    %25 = arith.addf %14, %24 : vector<512x64xf32>
    %26 = vector.extract_strided_slice %12 {offsets = [0, 0, 0], sizes = [16, 32, 64], strides = [1, 1, 1]} : vector<18x32x64xbf16> to vector<16x32x64xbf16>
    %27 = vector.extract_strided_slice %12 {offsets = [1, 0, 0], sizes = [16, 32, 64], strides = [1, 1, 1]} : vector<18x32x64xbf16> to vector<16x32x64xbf16>
    %28 = vector.extract_strided_slice %12 {offsets = [2, 0, 0], sizes = [16, 32, 64], strides = [1, 1, 1]} : vector<18x32x64xbf16> to vector<16x32x64xbf16>
    %29 = tpu.concatenate %26, %27, %28 in 2 : vector<16x32x64xbf16>, vector<16x32x64xbf16>, vector<16x32x64xbf16> -> vector<16x32x192xbf16>
    %30 = vector.shape_cast %29 : vector<16x32x192xbf16> to vector<512x192xbf16>
    %c1 = arith.constant 1 : index
    %c0_18 = arith.constant 0 : index
    %c0_19 = arith.constant 0 : index
    %31 = vector.load %arg5[%c1, %c0_18, %c0_19] : memref<3x192x64xbf16, #tpu.memory_space<vmem>>, vector<1x192x64xbf16>
    %32 = vector.shape_cast %31 : vector<1x192x64xbf16> to vector<192x64xbf16>
    %cst_20 = arith.constant dense<0.000000e+00> : vector<512x64xf32>
    %33 = tpu.matmul %30, %32, %cst_20 {dimension_numbers = #tpu.dot_dimension_numbers<[1], [0], [0], [1], [0, 0, 1, 1], [], []>} : vector<512x192xbf16>, vector<192x64xbf16>, vector<512x64xf32> -> vector<512x64xf32>
    %34 = arith.addf %25, %33 : vector<512x64xf32>
    %35 = vector.extract_strided_slice %12 {offsets = [0, 1, 0], sizes = [18, 31, 64], strides = [1, 1, 1]} : vector<18x32x64xbf16> to vector<18x31x64xbf16>
    %36 = tpu.concatenate %35, %13 in 1 : vector<18x31x64xbf16>, vector<18x1x64xbf16> -> vector<18x32x64xbf16>
    %37 = vector.extract_strided_slice %36 {offsets = [0, 0, 0], sizes = [16, 32, 64], strides = [1, 1, 1]} : vector<18x32x64xbf16> to vector<16x32x64xbf16>
    %38 = vector.extract_strided_slice %36 {offsets = [1, 0, 0], sizes = [16, 32, 64], strides = [1, 1, 1]} : vector<18x32x64xbf16> to vector<16x32x64xbf16>
    %39 = vector.extract_strided_slice %36 {offsets = [2, 0, 0], sizes = [16, 32, 64], strides = [1, 1, 1]} : vector<18x32x64xbf16> to vector<16x32x64xbf16>
    %40 = tpu.concatenate %37, %38, %39 in 2 : vector<16x32x64xbf16>, vector<16x32x64xbf16>, vector<16x32x64xbf16> -> vector<16x32x192xbf16>
    %41 = vector.shape_cast %40 : vector<16x32x192xbf16> to vector<512x192xbf16>
    %c2 = arith.constant 2 : index
    %c0_21 = arith.constant 0 : index
    %c0_22 = arith.constant 0 : index
    %42 = vector.load %arg5[%c2, %c0_21, %c0_22] : memref<3x192x64xbf16, #tpu.memory_space<vmem>>, vector<1x192x64xbf16>
    %43 = vector.shape_cast %42 : vector<1x192x64xbf16> to vector<192x64xbf16>
    %cst_23 = arith.constant dense<0.000000e+00> : vector<512x64xf32>
    %44 = tpu.matmul %41, %43, %cst_23 {dimension_numbers = #tpu.dot_dimension_numbers<[1], [0], [0], [1], [0, 0, 1, 1], [], []>} : vector<512x192xbf16>, vector<192x64xbf16>, vector<512x64xf32> -> vector<512x64xf32>
    %45 = arith.addf %34, %44 : vector<512x64xf32>
    %c0_24 = arith.constant 0 : index
    %c0_25 = arith.constant 0 : index
    %46 = vector.load %arg6[%c0_24, %c0_25] : memref<1x64xf32, #tpu.memory_space<vmem>>, vector<1x64xf32>
    %47 = vector.broadcast %46 : vector<1x64xf32> to vector<512x64xf32>
    %48 = arith.addf %45, %47 : vector<512x64xf32>
    %cst_26 = arith.constant 0.000000e+00 : f32
    %49 = vector.broadcast %cst_26 : f32 to vector<512x64xf32>
    %50 = arith.maximumf %48, %49 : vector<512x64xf32>
    %51 = vector.shape_cast %50 : vector<512x64xf32> to vector<16x32x64xf32>
    %52 = arith.truncf %51 : vector<16x32x64xf32> to vector<16x32x64xbf16>
    %c0_27 = arith.constant 0 : index
    %c0_28 = arith.constant 0 : index
    %c0_29 = arith.constant 0 : index
    %c0_30 = arith.constant 0 : index
    %53 = vector.load %arg7[%c0_27, %c0_28, %c0_29, %c0_30] : memref<1x16x32x64xbf16, #tpu.memory_space<vmem>>, vector<1x16x32x64xbf16>
    %54 = vector.shape_cast %53 : vector<1x16x32x64xbf16> to vector<16x32x64xbf16>
    %55 = vector.shape_cast %52 : vector<16x32x64xbf16> to vector<1x16x32x64xbf16>
    tpu.vector_store %arg7[%c0_27, %c0_28, %c0_29, %c0_30], %55 {strides = array<i32>} : memref<1x16x32x64xbf16, #tpu.memory_space<vmem>>, vector<1x16x32x64xbf16>,
    return
  }
  func.func @transform_0(%arg0: i32, %arg1: i32) -> (i32, i32, i32, i32) {
    %c0_i32 = arith.constant 0 : i32
    %c0_i32_0 = arith.constant 0 : i32
    %c0_i32_1 = arith.constant 0 : i32
    return %arg0, %arg1, %c0_i32, %c0_i32_0 : i32, i32, i32, i32
  }
  func.func @transform_1(%arg0: i32, %arg1: i32) -> (i32, i32, i32, i32) {
    %c16_i32 = arith.constant 16 : i32
    %0 = arith.muli %arg1, %c16_i32 : i32
    %c1_i32 = arith.constant 1 : i32
    %1 = arith.subi %0, %c1_i32 : i32
    %c0_i32 = arith.constant 0 : i32
    %2 = arith.maxsi %1, %c0_i32 : i32
    %c0_i32_0 = arith.constant 0 : i32
    %c0_i32_1 = arith.constant 0 : i32
    %c0_i32_2 = arith.constant 0 : i32
    return %arg0, %2, %c0_i32_0, %c0_i32_1 : i32, i32, i32, i32
  }
  func.func @transform_2(%arg0: i32, %arg1: i32) -> (i32, i32, i32, i32) {
    %c1_i32 = arith.constant 1 : i32
    %0 = arith.addi %arg1, %c1_i32 : i32
    %c16_i32 = arith.constant 16 : i32
    %1 = arith.muli %0, %c16_i32 : i32
    %c31_i32 = arith.constant 31 : i32
    %2 = arith.minsi %1, %c31_i32 : i32
    %c0_i32 = arith.constant 0 : i32
    %c0_i32_0 = arith.constant 0 : i32
    %c0_i32_1 = arith.constant 0 : i32
    return %arg0, %2, %c0_i32, %c0_i32_0 : i32, i32, i32, i32
  }
  func.func @transform_3(%arg0: i32, %arg1: i32) -> (i32, i32, i32) {
    %c0_i32 = arith.constant 0 : i32
    %c0_i32_0 = arith.constant 0 : i32
    %c0_i32_1 = arith.constant 0 : i32
    %c0_i32_2 = arith.constant 0 : i32
    return %c0_i32, %c0_i32_0, %c0_i32_1 : i32, i32, i32
  }
  func.func @transform_4(%arg0: i32, %arg1: i32) -> (i32, i32) {
    %c0_i32 = arith.constant 0 : i32
    %c0_i32_0 = arith.constant 0 : i32
    %c0_i32_1 = arith.constant 0 : i32
    return %c0_i32, %c0_i32_0 : i32, i32
  }
  func.func @transform_5(%arg0: i32, %arg1: i32) -> (i32, i32, i32, i32) {
    %c0_i32 = arith.constant 0 : i32
    %c0_i32_0 = arith.constant 0 : i32
    %c0_i32_1 = arith.constant 0 : i32
    return %arg0, %arg1, %c0_i32, %c0_i32_0 : i32, i32, i32, i32
  }
}

module attributes {stable_mosaic.version = 11 : i64} {
  func.func @_conv3x3_relu_kernel(%arg0: i32, %arg1: i32, %arg2: memref<1x8x32x128xbf16, #tpu.memory_space<vmem>>, %arg3: memref<1x1x32x128xbf16, #tpu.memory_space<vmem>>, %arg4: memref<1x1x32x128xbf16, #tpu.memory_space<vmem>>, %arg5: memref<3x192x128xbf16, #tpu.memory_space<vmem>>, %arg6: memref<1x128xf32, #tpu.memory_space<vmem>>, %arg7: memref<1x8x16x128xbf16, #tpu.memory_space<vmem>>) attributes {dimension_semantics = [#tpu.dimension_semantics<parallel>, #tpu.dimension_semantics<parallel>], iteration_bounds = array<i64: 2, 2>, scalar_prefetch = 0 : i64, scratch_operands = 0 : i64, tpu.core_type = #tpu.core_type<tc>, window_params = [{transform_indices = @transform_0, window_bounds = array<i64: 1, 8, 32, 128>}, {transform_indices = @transform_1, window_bounds = array<i64: 1, 1, 32, 128>}, {transform_indices = @transform_2, window_bounds = array<i64: 1, 1, 32, 128>}, {pipeline_mode = #tpu.pipeline_mode<synchronous>, transform_indices = @transform_3, window_bounds = array<i64: 3, 192, 128>}, {pipeline_mode = #tpu.pipeline_mode<synchronous>, transform_indices = @transform_4, window_bounds = array<i64: 1, 128>}, {transform_indices = @transform_5, window_bounds = array<i64: 1, 8, 16, 128>}]} {
    %c0 = arith.constant 0 : index
    %c0_0 = arith.constant 0 : index
    %c0_1 = arith.constant 0 : index
    %c0_2 = arith.constant 0 : index
    %0 = vector.load %arg2[%c0, %c0_0, %c0_1, %c0_2] : memref<1x8x32x128xbf16, #tpu.memory_space<vmem>>, vector<1x8x32x128xbf16>
    %1 = vector.shape_cast %0 : vector<1x8x32x128xbf16> to vector<8x32x128xbf16>
    %2 = vector.extract_strided_slice %1 {offsets = [0, 0, 0], sizes = [8, 16, 128], strides = [1, 1, 1]} : vector<8x32x128xbf16> to vector<8x16x128xbf16>
    %3 = vector.extract_strided_slice %1 {offsets = [0, 16, 0], sizes = [8, 16, 128], strides = [1, 1, 1]} : vector<8x32x128xbf16> to vector<8x16x128xbf16>
    %4 = arith.maximumf %2, %3 : vector<8x16x128xbf16>
    %5 = vector.extract_strided_slice %4 {offsets = [0, 0, 0], sizes = [8, 16, 64], strides = [1, 1, 1]} : vector<8x16x128xbf16> to vector<8x16x64xbf16>
    %6 = vector.extract_strided_slice %4 {offsets = [0, 0, 64], sizes = [8, 16, 64], strides = [1, 1, 1]} : vector<8x16x128xbf16> to vector<8x16x64xbf16>
    %7 = arith.maximumf %5, %6 : vector<8x16x64xbf16>
    %c0_3 = arith.constant 0 : index
    %c0_4 = arith.constant 0 : index
    %c0_5 = arith.constant 0 : index
    %c0_6 = arith.constant 0 : index
    %8 = vector.load %arg3[%c0_3, %c0_4, %c0_5, %c0_6] : memref<1x1x32x128xbf16, #tpu.memory_space<vmem>>, vector<1x1x32x128xbf16>
    %9 = vector.shape_cast %8 : vector<1x1x32x128xbf16> to vector<1x32x128xbf16>
    %10 = vector.extract_strided_slice %9 {offsets = [0, 0, 0], sizes = [1, 16, 128], strides = [1, 1, 1]} : vector<1x32x128xbf16> to vector<1x16x128xbf16>
    %11 = vector.extract_strided_slice %9 {offsets = [0, 16, 0], sizes = [1, 16, 128], strides = [1, 1, 1]} : vector<1x32x128xbf16> to vector<1x16x128xbf16>
    %12 = arith.maximumf %10, %11 : vector<1x16x128xbf16>
    %13 = vector.extract_strided_slice %12 {offsets = [0, 0, 0], sizes = [1, 16, 64], strides = [1, 1, 1]} : vector<1x16x128xbf16> to vector<1x16x64xbf16>
    %14 = vector.extract_strided_slice %12 {offsets = [0, 0, 64], sizes = [1, 16, 64], strides = [1, 1, 1]} : vector<1x16x128xbf16> to vector<1x16x64xbf16>
    %15 = arith.maximumf %13, %14 : vector<1x16x64xbf16>
    %c0_7 = arith.constant 0 : index
    %c0_8 = arith.constant 0 : index
    %c0_9 = arith.constant 0 : index
    %c0_10 = arith.constant 0 : index
    %16 = vector.load %arg4[%c0_7, %c0_8, %c0_9, %c0_10] : memref<1x1x32x128xbf16, #tpu.memory_space<vmem>>, vector<1x1x32x128xbf16>
    %17 = vector.shape_cast %16 : vector<1x1x32x128xbf16> to vector<1x32x128xbf16>
    %18 = vector.extract_strided_slice %17 {offsets = [0, 0, 0], sizes = [1, 16, 128], strides = [1, 1, 1]} : vector<1x32x128xbf16> to vector<1x16x128xbf16>
    %19 = vector.extract_strided_slice %17 {offsets = [0, 16, 0], sizes = [1, 16, 128], strides = [1, 1, 1]} : vector<1x32x128xbf16> to vector<1x16x128xbf16>
    %20 = arith.maximumf %18, %19 : vector<1x16x128xbf16>
    %21 = vector.extract_strided_slice %20 {offsets = [0, 0, 0], sizes = [1, 16, 64], strides = [1, 1, 1]} : vector<1x16x128xbf16> to vector<1x16x64xbf16>
    %22 = vector.extract_strided_slice %20 {offsets = [0, 0, 64], sizes = [1, 16, 64], strides = [1, 1, 1]} : vector<1x16x128xbf16> to vector<1x16x64xbf16>
    %23 = arith.maximumf %21, %22 : vector<1x16x64xbf16>
    %c0_i32 = arith.constant 0 : i32
    %24 = arith.cmpi sgt, %arg1, %c0_i32 : i32
    %cst = arith.constant 0.000000e+00 : bf16
    %25 = vector.broadcast %cst : bf16 to vector<1x16x64xbf16>
    %26 = arith.select %24, %15, %25 : vector<1x16x64xbf16>
    %c1_i32 = arith.constant 1 : i32
    %27 = arith.cmpi slt, %arg1, %c1_i32 : i32
    %cst_11 = arith.constant 0.000000e+00 : bf16
    %28 = vector.broadcast %cst_11 : bf16 to vector<1x16x64xbf16>
    %29 = arith.select %27, %23, %28 : vector<1x16x64xbf16>
    %30 = tpu.concatenate %26, %7, %29 in 0 : vector<1x16x64xbf16>, vector<8x16x64xbf16>, vector<1x16x64xbf16> -> vector<10x16x64xbf16>
    %cst_12 = arith.constant 0.000000e+00 : bf16
    %31 = vector.broadcast %cst_12 : bf16 to vector<10x1x64xbf16>
    %cst_13 = arith.constant 0.000000e+00 : f32
    %32 = vector.broadcast %cst_13 : f32 to vector<128x128xf32>
    %33 = vector.extract_strided_slice %30 {offsets = [0, 0, 0], sizes = [10, 15, 64], strides = [1, 1, 1]} : vector<10x16x64xbf16> to vector<10x15x64xbf16>
    %34 = tpu.concatenate %31, %33 in 1 : vector<10x1x64xbf16>, vector<10x15x64xbf16> -> vector<10x16x64xbf16>
    %35 = vector.extract_strided_slice %34 {offsets = [0, 0, 0], sizes = [8, 16, 64], strides = [1, 1, 1]} : vector<10x16x64xbf16> to vector<8x16x64xbf16>
    %36 = vector.extract_strided_slice %34 {offsets = [1, 0, 0], sizes = [8, 16, 64], strides = [1, 1, 1]} : vector<10x16x64xbf16> to vector<8x16x64xbf16>
    %37 = vector.extract_strided_slice %34 {offsets = [2, 0, 0], sizes = [8, 16, 64], strides = [1, 1, 1]} : vector<10x16x64xbf16> to vector<8x16x64xbf16>
    %38 = tpu.concatenate %35, %36, %37 in 2 : vector<8x16x64xbf16>, vector<8x16x64xbf16>, vector<8x16x64xbf16> -> vector<8x16x192xbf16>
    %39 = vector.shape_cast %38 : vector<8x16x192xbf16> to vector<128x192xbf16>
    %c0_14 = arith.constant 0 : index
    %c0_15 = arith.constant 0 : index
    %c0_16 = arith.constant 0 : index
    %40 = vector.load %arg5[%c0_14, %c0_15, %c0_16] : memref<3x192x128xbf16, #tpu.memory_space<vmem>>, vector<1x192x128xbf16>
    %41 = vector.shape_cast %40 : vector<1x192x128xbf16> to vector<192x128xbf16>
    %cst_17 = arith.constant dense<0.000000e+00> : vector<128x128xf32>
    %42 = tpu.matmul %39, %41, %cst_17 {dimension_numbers = #tpu.dot_dimension_numbers<[1], [0], [0], [1], [0, 0, 1, 1], [], []>} : vector<128x192xbf16>, vector<192x128xbf16>, vector<128x128xf32> -> vector<128x128xf32>
    %43 = arith.addf %32, %42 : vector<128x128xf32>
    %44 = vector.extract_strided_slice %30 {offsets = [0, 0, 0], sizes = [8, 16, 64], strides = [1, 1, 1]} : vector<10x16x64xbf16> to vector<8x16x64xbf16>
    %45 = vector.extract_strided_slice %30 {offsets = [1, 0, 0], sizes = [8, 16, 64], strides = [1, 1, 1]} : vector<10x16x64xbf16> to vector<8x16x64xbf16>
    %46 = vector.extract_strided_slice %30 {offsets = [2, 0, 0], sizes = [8, 16, 64], strides = [1, 1, 1]} : vector<10x16x64xbf16> to vector<8x16x64xbf16>
    %47 = tpu.concatenate %44, %45, %46 in 2 : vector<8x16x64xbf16>, vector<8x16x64xbf16>, vector<8x16x64xbf16> -> vector<8x16x192xbf16>
    %48 = vector.shape_cast %47 : vector<8x16x192xbf16> to vector<128x192xbf16>
    %c1 = arith.constant 1 : index
    %c0_18 = arith.constant 0 : index
    %c0_19 = arith.constant 0 : index
    %49 = vector.load %arg5[%c1, %c0_18, %c0_19] : memref<3x192x128xbf16, #tpu.memory_space<vmem>>, vector<1x192x128xbf16>
    %50 = vector.shape_cast %49 : vector<1x192x128xbf16> to vector<192x128xbf16>
    %cst_20 = arith.constant dense<0.000000e+00> : vector<128x128xf32>
    %51 = tpu.matmul %48, %50, %cst_20 {dimension_numbers = #tpu.dot_dimension_numbers<[1], [0], [0], [1], [0, 0, 1, 1], [], []>} : vector<128x192xbf16>, vector<192x128xbf16>, vector<128x128xf32> -> vector<128x128xf32>
    %52 = arith.addf %43, %51 : vector<128x128xf32>
    %53 = vector.extract_strided_slice %30 {offsets = [0, 1, 0], sizes = [10, 15, 64], strides = [1, 1, 1]} : vector<10x16x64xbf16> to vector<10x15x64xbf16>
    %54 = tpu.concatenate %53, %31 in 1 : vector<10x15x64xbf16>, vector<10x1x64xbf16> -> vector<10x16x64xbf16>
    %55 = vector.extract_strided_slice %54 {offsets = [0, 0, 0], sizes = [8, 16, 64], strides = [1, 1, 1]} : vector<10x16x64xbf16> to vector<8x16x64xbf16>
    %56 = vector.extract_strided_slice %54 {offsets = [1, 0, 0], sizes = [8, 16, 64], strides = [1, 1, 1]} : vector<10x16x64xbf16> to vector<8x16x64xbf16>
    %57 = vector.extract_strided_slice %54 {offsets = [2, 0, 0], sizes = [8, 16, 64], strides = [1, 1, 1]} : vector<10x16x64xbf16> to vector<8x16x64xbf16>
    %58 = tpu.concatenate %55, %56, %57 in 2 : vector<8x16x64xbf16>, vector<8x16x64xbf16>, vector<8x16x64xbf16> -> vector<8x16x192xbf16>
    %59 = vector.shape_cast %58 : vector<8x16x192xbf16> to vector<128x192xbf16>
    %c2 = arith.constant 2 : index
    %c0_21 = arith.constant 0 : index
    %c0_22 = arith.constant 0 : index
    %60 = vector.load %arg5[%c2, %c0_21, %c0_22] : memref<3x192x128xbf16, #tpu.memory_space<vmem>>, vector<1x192x128xbf16>
    %61 = vector.shape_cast %60 : vector<1x192x128xbf16> to vector<192x128xbf16>
    %cst_23 = arith.constant dense<0.000000e+00> : vector<128x128xf32>
    %62 = tpu.matmul %59, %61, %cst_23 {dimension_numbers = #tpu.dot_dimension_numbers<[1], [0], [0], [1], [0, 0, 1, 1], [], []>} : vector<128x192xbf16>, vector<192x128xbf16>, vector<128x128xf32> -> vector<128x128xf32>
    %63 = arith.addf %52, %62 : vector<128x128xf32>
    %c0_24 = arith.constant 0 : index
    %c0_25 = arith.constant 0 : index
    %64 = vector.load %arg6[%c0_24, %c0_25] : memref<1x128xf32, #tpu.memory_space<vmem>>, vector<1x128xf32>
    %65 = vector.broadcast %64 : vector<1x128xf32> to vector<128x128xf32>
    %66 = arith.addf %63, %65 : vector<128x128xf32>
    %cst_26 = arith.constant 0.000000e+00 : f32
    %67 = vector.broadcast %cst_26 : f32 to vector<128x128xf32>
    %68 = arith.maximumf %66, %67 : vector<128x128xf32>
    %69 = vector.shape_cast %68 : vector<128x128xf32> to vector<8x16x128xf32>
    %70 = arith.truncf %69 : vector<8x16x128xf32> to vector<8x16x128xbf16>
    %c0_27 = arith.constant 0 : index
    %c0_28 = arith.constant 0 : index
    %c0_29 = arith.constant 0 : index
    %c0_30 = arith.constant 0 : index
    %71 = vector.load %arg7[%c0_27, %c0_28, %c0_29, %c0_30] : memref<1x8x16x128xbf16, #tpu.memory_space<vmem>>, vector<1x8x16x128xbf16>
    %72 = vector.shape_cast %71 : vector<1x8x16x128xbf16> to vector<8x16x128xbf16>
    %73 = vector.shape_cast %70 : vector<8x16x128xbf16> to vector<1x8x16x128xbf16>
    tpu.vector_store %arg7[%c0_27, %c0_28, %c0_29, %c0_30], %73 {strides = array<i32>} : memref<1x8x16x128xbf16, #tpu.memory_space<vmem>>, vector<1x8x16x128xbf16>,
    return
  }
  func.func @transform_0(%arg0: i32, %arg1: i32) -> (i32, i32, i32, i32) {
    %c0_i32 = arith.constant 0 : i32
    %c0_i32_0 = arith.constant 0 : i32
    %c0_i32_1 = arith.constant 0 : i32
    return %arg0, %arg1, %c0_i32, %c0_i32_0 : i32, i32, i32, i32
  }
  func.func @transform_1(%arg0: i32, %arg1: i32) -> (i32, i32, i32, i32) {
    %c8_i32 = arith.constant 8 : i32
    %0 = arith.muli %arg1, %c8_i32 : i32
    %c1_i32 = arith.constant 1 : i32
    %1 = arith.subi %0, %c1_i32 : i32
    %c0_i32 = arith.constant 0 : i32
    %2 = arith.maxsi %1, %c0_i32 : i32
    %c0_i32_0 = arith.constant 0 : i32
    %c0_i32_1 = arith.constant 0 : i32
    %c0_i32_2 = arith.constant 0 : i32
    return %arg0, %2, %c0_i32_0, %c0_i32_1 : i32, i32, i32, i32
  }
  func.func @transform_2(%arg0: i32, %arg1: i32) -> (i32, i32, i32, i32) {
    %c1_i32 = arith.constant 1 : i32
    %0 = arith.addi %arg1, %c1_i32 : i32
    %c8_i32 = arith.constant 8 : i32
    %1 = arith.muli %0, %c8_i32 : i32
    %c15_i32 = arith.constant 15 : i32
    %2 = arith.minsi %1, %c15_i32 : i32
    %c0_i32 = arith.constant 0 : i32
    %c0_i32_0 = arith.constant 0 : i32
    %c0_i32_1 = arith.constant 0 : i32
    return %arg0, %2, %c0_i32, %c0_i32_0 : i32, i32, i32, i32
  }
  func.func @transform_3(%arg0: i32, %arg1: i32) -> (i32, i32, i32) {
    %c0_i32 = arith.constant 0 : i32
    %c0_i32_0 = arith.constant 0 : i32
    %c0_i32_1 = arith.constant 0 : i32
    %c0_i32_2 = arith.constant 0 : i32
    return %c0_i32, %c0_i32_0, %c0_i32_1 : i32, i32, i32
  }
  func.func @transform_4(%arg0: i32, %arg1: i32) -> (i32, i32) {
    %c0_i32 = arith.constant 0 : i32
    %c0_i32_0 = arith.constant 0 : i32
    %c0_i32_1 = arith.constant 0 : i32
    return %c0_i32, %c0_i32_0 : i32, i32
  }
  func.func @transform_5(%arg0: i32, %arg1: i32) -> (i32, i32, i32, i32) {
    %c0_i32 = arith.constant 0 : i32
    %c0_i32_0 = arith.constant 0 : i32
    %c0_i32_1 = arith.constant 0 : i32
    return %arg0, %arg1, %c0_i32, %c0_i32_0 : i32, i32, i32, i32
  }
}

module attributes {stable_mosaic.version = 11 : i64} {
  func.func @_conv3x3_relu_kernel(%arg0: i32, %arg1: i32, %arg2: memref<1x8x16x128xbf16, #tpu.memory_space<vmem>>, %arg3: memref<1x1x16x128xbf16, #tpu.memory_space<vmem>>, %arg4: memref<1x1x16x128xbf16, #tpu.memory_space<vmem>>, %arg5: memref<3x384x128xbf16, #tpu.memory_space<vmem>>, %arg6: memref<1x128xf32, #tpu.memory_space<vmem>>, %arg7: memref<1x8x16x128xf32, #tpu.memory_space<vmem>>) attributes {dimension_semantics = [#tpu.dimension_semantics<parallel>, #tpu.dimension_semantics<parallel>], iteration_bounds = array<i64: 2, 2>, scalar_prefetch = 0 : i64, scratch_operands = 0 : i64, tpu.core_type = #tpu.core_type<tc>, window_params = [{transform_indices = @transform_0, window_bounds = array<i64: 1, 8, 16, 128>}, {transform_indices = @transform_1, window_bounds = array<i64: 1, 1, 16, 128>}, {transform_indices = @transform_2, window_bounds = array<i64: 1, 1, 16, 128>}, {pipeline_mode = #tpu.pipeline_mode<synchronous>, transform_indices = @transform_3, window_bounds = array<i64: 3, 384, 128>}, {pipeline_mode = #tpu.pipeline_mode<synchronous>, transform_indices = @transform_4, window_bounds = array<i64: 1, 128>}, {transform_indices = @transform_5, window_bounds = array<i64: 1, 8, 16, 128>}]} {
    %c0 = arith.constant 0 : index
    %c0_0 = arith.constant 0 : index
    %c0_1 = arith.constant 0 : index
    %c0_2 = arith.constant 0 : index
    %0 = vector.load %arg2[%c0, %c0_0, %c0_1, %c0_2] : memref<1x8x16x128xbf16, #tpu.memory_space<vmem>>, vector<1x8x16x128xbf16>
    %1 = vector.shape_cast %0 : vector<1x8x16x128xbf16> to vector<8x16x128xbf16>
    %c0_3 = arith.constant 0 : index
    %c0_4 = arith.constant 0 : index
    %c0_5 = arith.constant 0 : index
    %c0_6 = arith.constant 0 : index
    %2 = vector.load %arg3[%c0_3, %c0_4, %c0_5, %c0_6] : memref<1x1x16x128xbf16, #tpu.memory_space<vmem>>, vector<1x1x16x128xbf16>
    %3 = vector.shape_cast %2 : vector<1x1x16x128xbf16> to vector<1x16x128xbf16>
    %c0_7 = arith.constant 0 : index
    %c0_8 = arith.constant 0 : index
    %c0_9 = arith.constant 0 : index
    %c0_10 = arith.constant 0 : index
    %4 = vector.load %arg4[%c0_7, %c0_8, %c0_9, %c0_10] : memref<1x1x16x128xbf16, #tpu.memory_space<vmem>>, vector<1x1x16x128xbf16>
    %5 = vector.shape_cast %4 : vector<1x1x16x128xbf16> to vector<1x16x128xbf16>
    %c0_i32 = arith.constant 0 : i32
    %6 = arith.cmpi sgt, %arg1, %c0_i32 : i32
    %cst = arith.constant 0.000000e+00 : bf16
    %7 = vector.broadcast %cst : bf16 to vector<1x16x128xbf16>
    %8 = arith.select %6, %3, %7 : vector<1x16x128xbf16>
    %c1_i32 = arith.constant 1 : i32
    %9 = arith.cmpi slt, %arg1, %c1_i32 : i32
    %cst_11 = arith.constant 0.000000e+00 : bf16
    %10 = vector.broadcast %cst_11 : bf16 to vector<1x16x128xbf16>
    %11 = arith.select %9, %5, %10 : vector<1x16x128xbf16>
    %12 = tpu.concatenate %8, %1, %11 in 0 : vector<1x16x128xbf16>, vector<8x16x128xbf16>, vector<1x16x128xbf16> -> vector<10x16x128xbf16>
    %cst_12 = arith.constant 0.000000e+00 : bf16
    %13 = vector.broadcast %cst_12 : bf16 to vector<10x1x128xbf16>
    %cst_13 = arith.constant 0.000000e+00 : f32
    %14 = vector.broadcast %cst_13 : f32 to vector<128x128xf32>
    %15 = vector.extract_strided_slice %12 {offsets = [0, 0, 0], sizes = [10, 15, 128], strides = [1, 1, 1]} : vector<10x16x128xbf16> to vector<10x15x128xbf16>
    %16 = tpu.concatenate %13, %15 in 1 : vector<10x1x128xbf16>, vector<10x15x128xbf16> -> vector<10x16x128xbf16>
    %17 = vector.extract_strided_slice %16 {offsets = [0, 0, 0], sizes = [8, 16, 128], strides = [1, 1, 1]} : vector<10x16x128xbf16> to vector<8x16x128xbf16>
    %18 = vector.extract_strided_slice %16 {offsets = [1, 0, 0], sizes = [8, 16, 128], strides = [1, 1, 1]} : vector<10x16x128xbf16> to vector<8x16x128xbf16>
    %19 = vector.extract_strided_slice %16 {offsets = [2, 0, 0], sizes = [8, 16, 128], strides = [1, 1, 1]} : vector<10x16x128xbf16> to vector<8x16x128xbf16>
    %20 = tpu.concatenate %17, %18, %19 in 2 : vector<8x16x128xbf16>, vector<8x16x128xbf16>, vector<8x16x128xbf16> -> vector<8x16x384xbf16>
    %21 = vector.shape_cast %20 : vector<8x16x384xbf16> to vector<128x384xbf16>
    %c0_14 = arith.constant 0 : index
    %c0_15 = arith.constant 0 : index
    %c0_16 = arith.constant 0 : index
    %22 = vector.load %arg5[%c0_14, %c0_15, %c0_16] : memref<3x384x128xbf16, #tpu.memory_space<vmem>>, vector<1x384x128xbf16>
    %23 = vector.shape_cast %22 : vector<1x384x128xbf16> to vector<384x128xbf16>
    %cst_17 = arith.constant dense<0.000000e+00> : vector<128x128xf32>
    %24 = tpu.matmul %21, %23, %cst_17 {dimension_numbers = #tpu.dot_dimension_numbers<[1], [0], [0], [1], [0, 0, 1, 1], [], []>} : vector<128x384xbf16>, vector<384x128xbf16>, vector<128x128xf32> -> vector<128x128xf32>
    %25 = arith.addf %14, %24 : vector<128x128xf32>
    %26 = vector.extract_strided_slice %12 {offsets = [0, 0, 0], sizes = [8, 16, 128], strides = [1, 1, 1]} : vector<10x16x128xbf16> to vector<8x16x128xbf16>
    %27 = vector.extract_strided_slice %12 {offsets = [1, 0, 0], sizes = [8, 16, 128], strides = [1, 1, 1]} : vector<10x16x128xbf16> to vector<8x16x128xbf16>
    %28 = vector.extract_strided_slice %12 {offsets = [2, 0, 0], sizes = [8, 16, 128], strides = [1, 1, 1]} : vector<10x16x128xbf16> to vector<8x16x128xbf16>
    %29 = tpu.concatenate %26, %27, %28 in 2 : vector<8x16x128xbf16>, vector<8x16x128xbf16>, vector<8x16x128xbf16> -> vector<8x16x384xbf16>
    %30 = vector.shape_cast %29 : vector<8x16x384xbf16> to vector<128x384xbf16>
    %c1 = arith.constant 1 : index
    %c0_18 = arith.constant 0 : index
    %c0_19 = arith.constant 0 : index
    %31 = vector.load %arg5[%c1, %c0_18, %c0_19] : memref<3x384x128xbf16, #tpu.memory_space<vmem>>, vector<1x384x128xbf16>
    %32 = vector.shape_cast %31 : vector<1x384x128xbf16> to vector<384x128xbf16>
    %cst_20 = arith.constant dense<0.000000e+00> : vector<128x128xf32>
    %33 = tpu.matmul %30, %32, %cst_20 {dimension_numbers = #tpu.dot_dimension_numbers<[1], [0], [0], [1], [0, 0, 1, 1], [], []>} : vector<128x384xbf16>, vector<384x128xbf16>, vector<128x128xf32> -> vector<128x128xf32>
    %34 = arith.addf %25, %33 : vector<128x128xf32>
    %35 = vector.extract_strided_slice %12 {offsets = [0, 1, 0], sizes = [10, 15, 128], strides = [1, 1, 1]} : vector<10x16x128xbf16> to vector<10x15x128xbf16>
    %36 = tpu.concatenate %35, %13 in 1 : vector<10x15x128xbf16>, vector<10x1x128xbf16> -> vector<10x16x128xbf16>
    %37 = vector.extract_strided_slice %36 {offsets = [0, 0, 0], sizes = [8, 16, 128], strides = [1, 1, 1]} : vector<10x16x128xbf16> to vector<8x16x128xbf16>
    %38 = vector.extract_strided_slice %36 {offsets = [1, 0, 0], sizes = [8, 16, 128], strides = [1, 1, 1]} : vector<10x16x128xbf16> to vector<8x16x128xbf16>
    %39 = vector.extract_strided_slice %36 {offsets = [2, 0, 0], sizes = [8, 16, 128], strides = [1, 1, 1]} : vector<10x16x128xbf16> to vector<8x16x128xbf16>
    %40 = tpu.concatenate %37, %38, %39 in 2 : vector<8x16x128xbf16>, vector<8x16x128xbf16>, vector<8x16x128xbf16> -> vector<8x16x384xbf16>
    %41 = vector.shape_cast %40 : vector<8x16x384xbf16> to vector<128x384xbf16>
    %c2 = arith.constant 2 : index
    %c0_21 = arith.constant 0 : index
    %c0_22 = arith.constant 0 : index
    %42 = vector.load %arg5[%c2, %c0_21, %c0_22] : memref<3x384x128xbf16, #tpu.memory_space<vmem>>, vector<1x384x128xbf16>
    %43 = vector.shape_cast %42 : vector<1x384x128xbf16> to vector<384x128xbf16>
    %cst_23 = arith.constant dense<0.000000e+00> : vector<128x128xf32>
    %44 = tpu.matmul %41, %43, %cst_23 {dimension_numbers = #tpu.dot_dimension_numbers<[1], [0], [0], [1], [0, 0, 1, 1], [], []>} : vector<128x384xbf16>, vector<384x128xbf16>, vector<128x128xf32> -> vector<128x128xf32>
    %45 = arith.addf %34, %44 : vector<128x128xf32>
    %c0_24 = arith.constant 0 : index
    %c0_25 = arith.constant 0 : index
    %46 = vector.load %arg6[%c0_24, %c0_25] : memref<1x128xf32, #tpu.memory_space<vmem>>, vector<1x128xf32>
    %47 = vector.broadcast %46 : vector<1x128xf32> to vector<128x128xf32>
    %48 = arith.addf %45, %47 : vector<128x128xf32>
    %cst_26 = arith.constant 0.000000e+00 : f32
    %49 = vector.broadcast %cst_26 : f32 to vector<128x128xf32>
    %50 = arith.maximumf %48, %49 : vector<128x128xf32>
    %51 = vector.shape_cast %50 : vector<128x128xf32> to vector<8x16x128xf32>
    %c0_27 = arith.constant 0 : index
    %c0_28 = arith.constant 0 : index
    %c0_29 = arith.constant 0 : index
    %c0_30 = arith.constant 0 : index
    %52 = vector.load %arg7[%c0_27, %c0_28, %c0_29, %c0_30] : memref<1x8x16x128xf32, #tpu.memory_space<vmem>>, vector<1x8x16x128xf32>
    %53 = vector.shape_cast %52 : vector<1x8x16x128xf32> to vector<8x16x128xf32>
    %54 = vector.shape_cast %51 : vector<8x16x128xf32> to vector<1x8x16x128xf32>
    tpu.vector_store %arg7[%c0_27, %c0_28, %c0_29, %c0_30], %54 {strides = array<i32>} : memref<1x8x16x128xf32, #tpu.memory_space<vmem>>, vector<1x8x16x128xf32>,
    return
  }
  func.func @transform_0(%arg0: i32, %arg1: i32) -> (i32, i32, i32, i32) {
    %c0_i32 = arith.constant 0 : i32
    %c0_i32_0 = arith.constant 0 : i32
    %c0_i32_1 = arith.constant 0 : i32
    return %arg0, %arg1, %c0_i32, %c0_i32_0 : i32, i32, i32, i32
  }
  func.func @transform_1(%arg0: i32, %arg1: i32) -> (i32, i32, i32, i32) {
    %c8_i32 = arith.constant 8 : i32
    %0 = arith.muli %arg1, %c8_i32 : i32
    %c1_i32 = arith.constant 1 : i32
    %1 = arith.subi %0, %c1_i32 : i32
    %c0_i32 = arith.constant 0 : i32
    %2 = arith.maxsi %1, %c0_i32 : i32
    %c0_i32_0 = arith.constant 0 : i32
    %c0_i32_1 = arith.constant 0 : i32
    %c0_i32_2 = arith.constant 0 : i32
    return %arg0, %2, %c0_i32_0, %c0_i32_1 : i32, i32, i32, i32
  }
  func.func @transform_2(%arg0: i32, %arg1: i32) -> (i32, i32, i32, i32) {
    %c1_i32 = arith.constant 1 : i32
    %0 = arith.addi %arg1, %c1_i32 : i32
    %c8_i32 = arith.constant 8 : i32
    %1 = arith.muli %0, %c8_i32 : i32
    %c15_i32 = arith.constant 15 : i32
    %2 = arith.minsi %1, %c15_i32 : i32
    %c0_i32 = arith.constant 0 : i32
    %c0_i32_0 = arith.constant 0 : i32
    %c0_i32_1 = arith.constant 0 : i32
    return %arg0, %2, %c0_i32, %c0_i32_0 : i32, i32, i32, i32
  }
  func.func @transform_3(%arg0: i32, %arg1: i32) -> (i32, i32, i32) {
    %c0_i32 = arith.constant 0 : i32
    %c0_i32_0 = arith.constant 0 : i32
    %c0_i32_1 = arith.constant 0 : i32
    %c0_i32_2 = arith.constant 0 : i32
    return %c0_i32, %c0_i32_0, %c0_i32_1 : i32, i32, i32
  }
  func.func @transform_4(%arg0: i32, %arg1: i32) -> (i32, i32) {
    %c0_i32 = arith.constant 0 : i32
    %c0_i32_0 = arith.constant 0 : i32
    %c0_i32_1 = arith.constant 0 : i32
    return %c0_i32, %c0_i32_0 : i32, i32
  }
  func.func @transform_5(%arg0: i32, %arg1: i32) -> (i32, i32, i32, i32) {
    %c0_i32 = arith.constant 0 : i32
    %c0_i32_0 = arith.constant 0 : i32
    %c0_i32_1 = arith.constant 0 : i32
    return %arg0, %arg1, %c0_i32, %c0_i32_0 : i32, i32, i32, i32
  }
}

</mosaic_0001>

<bundles_post_ra>
// kernel: vgg16_relu2_2.4
= control target key start
LH: loop header
LB: loop body
LE: loop exit
PB: predicated region body
PF: predicated region fallthrough
CT: control target
= control target key end

     0   :  { %s1791_s12 = smov 0   ;;  %s1793_s13 = smov 0   ;;  %s2123_s0 = inlined_call_operand.vmem [shape: bf16[2,32,32,27], index: 0, kind: input, shape index: {}]   ;;  %s2124_s1 = inlined_call_operand.vmem [shape: bf16[27,64], index: 1, kind: input, shape index: {}]   ;;  %s2125_s2 = inlined_call_operand.vmem [shape: f32[1,64], index: 2, kind: input, shape index: {}]   ;;  %s2126_s3 = inlined_call_operand.vmem [shape: bf16[2,32,32,64], index: 3, kind: output, shape index: {}]  }
   0x1   :  { %s1795_s14 = smov 0   ;;  %s1797_s15 = smov 0  }
   0x2   :  { %s1799_s16 = smov 0  }
   0x3 LB: > { %s22_s17 = sadd.s32 1, %s1760_s14  ;;  %s25_s18 = sadd.s32 1, %s1764_s15  ;;  %s1768_s16 = sphi %s1799_s16, %s13_s16   ;;  %s1764_s15 = sphi %s1797_s15, %s2130_s15   ;;  %s1760_s14 = sphi %s1795_s14, %s2129_s14   ;;  %s1756_s13 = sphi %s1793_s13, %s2128_s13   ;;  %s1752_s12 = sphi %s1791_s12, %s2127_s12  }
   0x4   : > { %p23_p0 = scmp.ge.s32.totalorder %s22_s17, 2  ;;  %p1343_p1 = scmp.ge.s32.totalorder %s1768_s16, 1 }
   0x5   : > { %p159_p2 = scmp.lt.s32.totalorder %s1768_s16, 5 }
   0x6   : > { %s2132_s17 = smov (%p23_p0, %s22_s17), 0  ;;  %s2134_s18 = smov (!%p23_p0, %s25_s18), %s1764_s15 }
   0x7   : > { %p160_p3 = pnand %p1343_p1, %p159_p2  ;;  %p27_p4 = scmp.ge.s32.totalorder %s2134_s18, 2 }
   0x8   : > { %v1696_v0 = vld [vmem:[%s2124_s1] sm:$0xff] (!%p160_p3)   ;;  %vm559_vm0 = vcmask (!%p160_p3), 1044480   ;;  %v1697_v1 = vld [vmem:[%s2124_s1 + $0x8] sm:$0x3f] (!%p160_p3)   ;;  %vm560_vm1 = vcmask (!%p160_p3), 1045504   ;;  %s1344_s23 = sshll.u32 (!%p160_p3), %s1752_s12, 4 }
   0x9   : > { %s2136_s18 = smov (%p27_p4, %s2134_s18), 0  ;;  %163 = sbr.rel (%p160_p3) target bundleno = 302 (0x12e), region = 32 }
   0xa   : > { %1583 = vmatprep.subr.bf16.mxu0 (!%p160_p3), %v1696_v0  ;;  %1651 = vmatprep.subr.bf16.mxu1 (!%p160_p3), %v1696_v0  ;;  %p194_p5 = scmp.lt.s32.totalorder (!%p160_p3), %s1756_s13, 1  ;;  %v1770_v2 = vmov (!%p160_p3), 65535   ;;  %p196_p6 = scmp.lt.s32.totalorder (!%p160_p3), %s1344_s23, 31  ;;  %vm462_vm2 = vcmask (!%p160_p3), 220160   ;;  %v1907_v38 = vld [vmem:[%s2125_s2] ss:$0 sm:$0xff] (!%p160_p3) }
   0xb   : > { %1584 = vmatpush3.bf16.msra.mxu0 (!%p160_p3), %v1696_v0  ;;  %1653 = vmatpush3.bf16.msra.mxu1 (!%p160_p3), %v1696_v0  ;;  %v561_v3 = vsel (!%p160_p3), %vm559_vm0, 4294967295, %v1770_v2  ;;  %vm1175_vm3 = vcmask (!%p160_p3), 519168  }
   0xc   : > { %v562_v4 = vsel (!%p160_p3), %vm560_vm1, %v561_v3, 0 }
   0xd   : > { %v564_v5 = vand.u32 (!%p160_p3), %v1697_v1, %v562_v4 }
   0xf   : > { %1585 = vmatprep.subr.bf16.mxu0 (!%p160_p3), %v564_v5  ;;  %1652 = vmatprep.subr.bf16.mxu1 (!%p160_p3), %v564_v5 }
  0x10   : > { %s2138_s13 = smov (!%p194_p5, %s1756_s13), 1  ;;  %s2140_s23 = smov (!%p196_p6, %s1344_s23), 31  ;;  %1586 = vmatpush3.bf16.msra.mxu0 %v564_v5  ;;  %1654 = vmatpush3.bf16.msra.mxu1 %v564_v5 }
  0x11   : > { %s1346_s24 = sshll.u32 %s2138_s13, 7  ;;  %s1345_s25 = sshll.u32 %s2140_s23, 2 }
  0x12   : > { %s1830_s26 = sadd.s32 %s1346_s24, %s1345_s25 }
  0x13   : > { %s1347_s27 = sshll.u32 %s1830_s26, 2 }
  0x14   : > { %s1838_s30 = scalar_lea.vmem %s2123_s0, %s1347_s27  ;;  %s1919_s8 = scalar_lea.vmem %s2126_s3, %s1347_s27 }
  0x15   : > { %v1698_v6 = vld [vmem:[%s1838_s30] sm:$0xff]   ;;  %v1700_v8 = vld [vmem:[%s1838_s30 + $0x8] sm:$0xff]   ;;  %v1702_v10 = vld [vmem:[%s1838_s30 + $0x10] sm:$0xff]  }
  0x16   : > { %v1699_v7 = vld [vmem:[%s1838_s30 + $0x80] sm:$0xff]   ;;  %1587 = vmatprep.mubr.msk.bf16.mxu0 %vm462_vm2, %v1698_v6  ;;  %v1701_v9 = vld [vmem:[%s1838_s30 + $0x88] sm:$0xff]   ;;  %v1703_v11 = vld [vmem:[%s1838_s30 + $0x90] sm:$0xff]  }
  0x17   : > { %1619 = vmatprep.mubr.msk.bf16.mxu1 %vm462_vm2, %v1699_v7  ;;  %1588 = vmatmul.mubr.msk.bf16.vlgmr.msra.gmra.mrb[0].mxu0 %vm462_vm2, %v1700_v8  ;;  %v1704_v12 = vld [vmem:[%s1838_s30 + $0x18] sm:$0xff]   ;;  %v1706_v14 = vld [vmem:[%s1838_s30 + $0x20] sm:$0xff]   ;;  %v1708_v16 = vld [vmem:[%s1838_s30 + $0x28] sm:$0xff]  }
  0x18   : > { %1620 = vmatmul.mubr.msk.bf16.vlgmr.msra.gmra.mrb[0].mxu1 %vm462_vm2, %v1701_v9  ;;  %1591 = vmatprep.mubr.msk.bf16.mxu0 %vm462_vm2, %v1702_v10  ;;  %v1705_v13 = vld [vmem:[%s1838_s30 + $0x98] sm:$0xff]   ;;  %v1707_v15 = vld [vmem:[%s1838_s30 + $0xa0] sm:$0xff]   ;;  %v1709_v17 = vld [vmem:[%s1838_s30 + $0xa8] sm:$0xff]  }
  0x19   : > { %1623 = vmatprep.mubr.msk.bf16.mxu1 %vm462_vm2, %v1703_v11  ;;  %v1710_v18 = vld [vmem:[%s1838_s30 + $0x30] sm:$0xff]   ;;  %v1712_v20 = vld [vmem:[%s1838_s30 + $0x38] sm:$0xff]   ;;  %v1714_v22 = vld [vmem:[%s1838_s30 + $0x40] sm:$0xff]  }
  0x1a   : > { %v1711_v19 = vld [vmem:[%s1838_s30 + $0xb0] sm:$0xff]   ;;  %v1713_v21 = vld [vmem:[%s1838_s30 + $0xb8] sm:$0xff]   ;;  %v1715_v23 = vld [vmem:[%s1838_s30 + $0xc0] sm:$0xff]  }
  0x1b   : > { %v1716_v24 = vld [vmem:[%s1838_s30 + $0x48] sm:$0xff]   ;;  %v1718_v26 = vld [vmem:[%s1838_s30 + $0x50] sm:$0xff]   ;;  %v1720_v28 = vld [vmem:[%s1838_s30 + $0x58] sm:$0xff]  }
  0x1c   : > { %v1717_v25 = vld [vmem:[%s1838_s30 + $0xc8] sm:$0xff]   ;;  %v1719_v27 = vld [vmem:[%s1838_s30 + $0xd0] sm:$0xff]   ;;  %v1721_v29 = vld [vmem:[%s1838_s30 + $0xd8] sm:$0xff]  }
  0x1d   : > { %v1722_v30 = vld [vmem:[%s1838_s30 + $0x60] sm:$0xff]   ;;  %v1724_v32 = vld [vmem:[%s1838_s30 + $0x68] sm:$0xff]   ;;  %v1726_v34 = vld [vmem:[%s1838_s30 + $0x70] sm:$0xff]  }
  0x1e   : > { %v1723_v31 = vld [vmem:[%s1838_s30 + $0xe0] sm:$0xff]   ;;  %v1725_v33 = vld [vmem:[%s1838_s30 + $0xe8] sm:$0xff]   ;;  %v1727_v35 = vld [vmem:[%s1838_s30 + $0xf0] sm:$0xff]  }
  0x1f   : > { %1592 = vmatmul.mubr.msk.bf16.gmra.mrb[4].mxu0 %vm462_vm2, %v1704_v12  ;;  %v1728_v36 = vld [vmem:[%s1838_s30 + $0x78] sm:$0xff]  }
  0x20   : > { %1624 = vmatmul.mubr.msk.bf16.gmra.mrb[4].mxu1 %vm462_vm2, %v1705_v13  ;;  %1595 = vmatprep.mubr.msk.bf16.mxu0 %vm462_vm2, %v1706_v14  ;;  %v1729_v37 = vld [vmem:[%s1838_s30 + $0xf8] sm:$0xff]  }
  0x21   : > { %1627 = vmatprep.mubr.msk.bf16.mxu1 %vm462_vm2, %v1707_v15 }
  0x27   : > { %1596 = vmatmul.mubr.msk.bf16.gmra.mrb[8].mxu0 %vm462_vm2, %v1708_v16 }
  0x28   : > { %1628 = vmatmul.mubr.msk.bf16.gmra.mrb[8].mxu1 %vm462_vm2, %v1709_v17  ;;  %1599 = vmatprep.mubr.msk.bf16.mxu0 %vm462_vm2, %v1710_v18 }
  0x29   : > { %1631 = vmatprep.mubr.msk.bf16.mxu1 %vm462_vm2, %v1711_v19 }
  0x2f   : > { %1600 = vmatmul.mubr.msk.bf16.gmra.mrb[12].mxu0 %vm462_vm2, %v1712_v20 }
  0x30   : > { %1632 = vmatmul.mubr.msk.bf16.gmra.mrb[12].mxu1 %vm462_vm2, %v1713_v21  ;;  %1603 = vmatprep.mubr.msk.bf16.mxu0 %vm462_vm2, %v1714_v22 }
  0x31   : > { %1635 = vmatprep.mubr.msk.bf16.mxu1 %vm462_vm2, %v1715_v23 }
  0x37   : > { %1604 = vmatmul.mubr.msk.bf16.gmra.mrb[16].mxu0 %vm462_vm2, %v1716_v24 }
  0x38   : > { %1636 = vmatmul.mubr.msk.bf16.gmra.mrb[16].mxu1 %vm462_vm2, %v1717_v25  ;;  %1607 = vmatprep.mubr.msk.bf16.mxu0 %vm462_vm2, %v1718_v26 }
  0x39   : > { %1639 = vmatprep.mubr.msk.bf16.mxu1 %vm462_vm2, %v1719_v27 }
  0x3f   : > { %1608 = vmatmul.mubr.msk.bf16.gmra.mrb[20].mxu0 %vm462_vm2, %v1720_v28 }
  0x40   : > { %1640 = vmatmul.mubr.msk.bf16.gmra.mrb[20].mxu1 %vm462_vm2, %v1721_v29  ;;  %1611 = vmatprep.mubr.msk.bf16.mxu0 %vm462_vm2, %v1722_v30 }
  0x41   : > { %1643 = vmatprep.mubr.msk.bf16.mxu1 %vm462_vm2, %v1723_v31 }
  0x47   : > { %1612 = vmatmul.mubr.msk.bf16.gmra.mrb[24].mxu0 %vm462_vm2, %v1724_v32 }
  0x48   : > { %1644 = vmatmul.mubr.msk.bf16.gmra.mrb[24].mxu1 %vm462_vm2, %v1725_v33  ;;  %1615 = vmatprep.mubr.msk.bf16.mxu0 %vm462_vm2, %v1726_v34 }
  0x49   : > { %1647 = vmatprep.mubr.msk.bf16.mxu1 %vm462_vm2, %v1727_v35 }
  0x4f   : > { %1616 = vmatmul.mubr.msk.bf16.gmra.mrb[28].mxu0 %vm462_vm2, %v1728_v36 }
  0x50   : > { %1648 = vmatmul.mubr.msk.bf16.gmra.mrb[28].mxu1 %vm462_vm2, %v1729_v37 }
  0xea   : > { %v1589_v39 = vpop.f32.mrb[0].mxu0 }
  0xeb   : > { %v609_v40 = vadd.f32 %v1589_v39, %v1907_v38  ;;  %v1621_v41 = vpop.f32.mrb[0].mxu1  ;;  %v600_v42 = vpop.f32.mrb[1].mxu0 }
  0xec   : > { %v737_v43 = vadd.f32 %v1621_v41, %v1907_v38  ;;  %v601_v44 = vadd.f32 %v1907_v38, %v600_v42  ;;  %v728_v45 = vpop.f32.mrb[1].mxu1  ;;  %v1590_v46 = vpop.f32.mrb[2].mxu0 }
  0xed   : > { %v857_v47 = vmax.f32 %v609_v40, 0.0  ;;  %v729_v48 = vadd.f32 %v1907_v38, %v728_v45  ;;  %v612_v49 = vadd.f32 %v1590_v46, %v1907_v38  ;;  %v1622_v50 = vpop.f32.mrb[2].mxu1  ;;  %v603_v51 = vpop.f32.mrb[3].mxu0 }
  0xee   : > { %v889_v52 = vmax.f32 %v737_v43, 0.0  ;;  %v855_v53 = vmax.f32 %v601_v44, 0.0  ;;  %v740_v54 = vadd.f32 %v1622_v50, %v1907_v38  ;;  %v604_v55 = vadd.f32 %v1907_v38, %v603_v51  ;;  %v731_v56 = vpop.f32.mrb[3].mxu1 }
  0xef   : > { %v1487_v57 = vpack.c.bf16 %v857_v47, %v857_v47  ;;  %v887_v58 = vmax.f32 %v729_v48, 0.0  ;;  %v858_v59 = vmax.f32 %v612_v49, 0.0  ;;  %v732_v60 = vadd.f32 %v1907_v38, %v731_v56 }
  0xf0   : > { %v1519_v61 = vpack.c.bf16 %v889_v52, %v889_v52  ;;  %v1485_v62 = vpack.c.bf16 %v855_v53, %v855_v53  ;;  %v890_v63 = vmax.f32 %v740_v54, 0.0  ;;  %v856_v0 = vmax.f32 %v604_v55, 0.0 }
  0xf1   : > { %1178 = vst.msk [vmem:[%s1919_s8 + $0x8] sm:$0xf] %vm1175_vm3, %v1487_v57  ;;  %v1517_v1 = vpack.c.bf16 %v887_v58, %v887_v58  ;;  %v1488_v2 = vpack.c.bf16 %v858_v59, %v858_v59  ;;  %v888_v3 = vmax.f32 %v732_v60, 0.0 }
  0xf2   : > { %1210 = vst.msk [vmem:[%s1919_s8 + $0x88] sm:$0xf] %vm1175_vm3, %v1519_v61  ;;  %1176 = vst.msk [vmem:[%s1919_s8] sm:$0xf] %vm1175_vm3, %v1485_v62  ;;  %v1520_v4 = vpack.c.bf16 %v890_v63, %v890_v63  ;;  %v1486_v5 = vpack.c.bf16 %v856_v0, %v856_v0  ;;  %v1593_v6 = vpop.f32.mrb[4].mxu0 }
  0xf3   : > { %1208 = vst.msk [vmem:[%s1919_s8 + $0x80] sm:$0xf] %vm1175_vm3, %v1517_v1  ;;  %1179 = vst.msk [vmem:[%s1919_s8 + $0xc] sm:$0xf] %vm1175_vm3, %v1488_v2  ;;  %v1518_v7 = vpack.c.bf16 %v888_v3, %v888_v3  ;;  %v625_v8 = vadd.f32 %v1593_v6, %v1907_v38  ;;  %v1625_v9 = vpop.f32.mrb[4].mxu1  ;;  %v616_v10 = vpop.f32.mrb[5].mxu0 }
  0xf4   : > { %1211 = vst.msk [vmem:[%s1919_s8 + $0x8c] sm:$0xf] %vm1175_vm3, %v1520_v4  ;;  %1177 = vst.msk [vmem:[%s1919_s8 + $0x4] sm:$0xf] %vm1175_vm3, %v1486_v5  ;;  %v753_v11 = vadd.f32 %v1625_v9, %v1907_v38  ;;  %v617_v12 = vadd.f32 %v1907_v38, %v616_v10  ;;  %v744_v13 = vpop.f32.mrb[5].mxu1  ;;  %v1594_v14 = vpop.f32.mrb[6].mxu0 }
  0xf5   : > { %1209 = vst.msk [vmem:[%s1919_s8 + $0x84] sm:$0xf] %vm1175_vm3, %v1518_v7  ;;  %v861_v15 = vmax.f32 %v625_v8, 0.0  ;;  %v745_v16 = vadd.f32 %v1907_v38, %v744_v13  ;;  %v628_v17 = vadd.f32 %v1594_v14, %v1907_v38  ;;  %v1626_v18 = vpop.f32.mrb[6].mxu1  ;;  %v619_v19 = vpop.f32.mrb[7].mxu0 }
  0xf6   : > { %v893_v20 = vmax.f32 %v753_v11, 0.0  ;;  %v859_v21 = vmax.f32 %v617_v12, 0.0  ;;  %v756_v22 = vadd.f32 %v1626_v18, %v1907_v38  ;;  %v620_v23 = vadd.f32 %v1907_v38, %v619_v19  ;;  %v747_v24 = vpop.f32.mrb[7].mxu1 }
  0xf7   : > { %v1491_v25 = vpack.c.bf16 %v861_v15, %v861_v15  ;;  %v891_v26 = vmax.f32 %v745_v16, 0.0  ;;  %v862_v27 = vmax.f32 %v628_v17, 0.0  ;;  %v748_v28 = vadd.f32 %v1907_v38, %v747_v24 }
  0xf8   : > { %v1523_v29 = vpack.c.bf16 %v893_v20, %v893_v20  ;;  %v1489_v30 = vpack.c.bf16 %v859_v21, %v859_v21  ;;  %v894_v31 = vmax.f32 %v756_v22, 0.0  ;;  %v860_v32 = vmax.f32 %v620_v23, 0.0 }
  0xf9   : > { %1182 = vst.msk [vmem:[%s1919_s8 + $0x18] sm:$0xf] %vm1175_vm3, %v1491_v25  ;;  %v1521_v33 = vpack.c.bf16 %v891_v26, %v891_v26  ;;  %v1492_v34 = vpack.c.bf16 %v862_v27, %v862_v27  ;;  %v892_v35 = vmax.f32 %v748_v28, 0.0 }
  0xfa   : > { %1214 = vst.msk [vmem:[%s1919_s8 + $0x98] sm:$0xf] %vm1175_vm3, %v1523_v29  ;;  %1180 = vst.msk [vmem:[%s1919_s8 + $0x10] sm:$0xf] %vm1175_vm3, %v1489_v30  ;;  %v1524_v36 = vpack.c.bf16 %v894_v31, %v894_v31  ;;  %v1490_v37 = vpack.c.bf16 %v860_v32, %v860_v32  ;;  %v1597_v39 = vpop.f32.mrb[8].mxu0 }
  0xfb   : > { %1212 = vst.msk [vmem:[%s1919_s8 + $0x90] sm:$0xf] %vm1175_vm3, %v1521_v33  ;;  %1183 = vst.msk [vmem:[%s1919_s8 + $0x1c] sm:$0xf] %vm1175_vm3, %v1492_v34  ;;  %v1522_v40 = vpack.c.bf16 %v892_v35, %v892_v35  ;;  %v641_v41 = vadd.f32 %v1597_v39, %v1907_v38  ;;  %v1629_v42 = vpop.f32.mrb[8].mxu1  ;;  %v632_v43 = vpop.f32.mrb[9].mxu0 }
  0xfc   : > { %1215 = vst.msk [vmem:[%s1919_s8 + $0x9c] sm:$0xf] %vm1175_vm3, %v1524_v36  ;;  %1181 = vst.msk [vmem:[%s1919_s8 + $0x14] sm:$0xf] %vm1175_vm3, %v1490_v37  ;;  %v769_v44 = vadd.f32 %v1629_v42, %v1907_v38  ;;  %v633_v45 = vadd.f32 %v1907_v38, %v632_v43  ;;  %v760_v46 = vpop.f32.mrb[9].mxu1  ;;  %v1598_v47 = vpop.f32.mrb[10].mxu0 }
  0xfd   : > { %1213 = vst.msk [vmem:[%s1919_s8 + $0x94] sm:$0xf] %vm1175_vm3, %v1522_v40  ;;  %v865_v48 = vmax.f32 %v641_v41, 0.0  ;;  %v761_v49 = vadd.f32 %v1907_v38, %v760_v46  ;;  %v644_v50 = vadd.f32 %v1598_v47, %v1907_v38  ;;  %v1630_v51 = vpop.f32.mrb[10].mxu1  ;;  %v635_v52 = vpop.f32.mrb[11].mxu0 }
  0xfe   : > { %v897_v53 = vmax.f32 %v769_v44, 0.0  ;;  %v863_v54 = vmax.f32 %v633_v45, 0.0  ;;  %v772_v55 = vadd.f32 %v1630_v51, %v1907_v38  ;;  %v636_v56 = vadd.f32 %v1907_v38, %v635_v52  ;;  %v763_v57 = vpop.f32.mrb[11].mxu1 }
  0xff   : > { %v1495_v58 = vpack.c.bf16 %v865_v48, %v865_v48  ;;  %v895_v59 = vmax.f32 %v761_v49, 0.0  ;;  %v866_v60 = vmax.f32 %v644_v50, 0.0  ;;  %v764_v61 = vadd.f32 %v1907_v38, %v763_v57 }
 0x100   : > { %v1527_v62 = vpack.c.bf16 %v897_v53, %v897_v53  ;;  %v1493_v63 = vpack.c.bf16 %v863_v54, %v863_v54  ;;  %v898_v0 = vmax.f32 %v772_v55, 0.0  ;;  %v864_v1 = vmax.f32 %v636_v56, 0.0 }
 0x101   : > { %1186 = vst.msk [vmem:[%s1919_s8 + $0x28] sm:$0xf] %vm1175_vm3, %v1495_v58  ;;  %v1525_v2 = vpack.c.bf16 %v895_v59, %v895_v59  ;;  %v1496_v3 = vpack.c.bf16 %v866_v60, %v866_v60  ;;  %v896_v4 = vmax.f32 %v764_v61, 0.0 }
 0x102   : > { %1218 = vst.msk [vmem:[%s1919_s8 + $0xa8] sm:$0xf] %vm1175_vm3, %v1527_v62  ;;  %1184 = vst.msk [vmem:[%s1919_s8 + $0x20] sm:$0xf] %vm1175_vm3, %v1493_v63  ;;  %v1528_v5 = vpack.c.bf16 %v898_v0, %v898_v0  ;;  %v1494_v6 = vpack.c.bf16 %v864_v1, %v864_v1  ;;  %v1601_v7 = vpop.f32.mrb[12].mxu0 }
 0x103   : > { %1216 = vst.msk [vmem:[%s1919_s8 + $0xa0] sm:$0xf] %vm1175_vm3, %v1525_v2  ;;  %1187 = vst.msk [vmem:[%s1919_s8 + $0x2c] sm:$0xf] %vm1175_vm3, %v1496_v3  ;;  %v1526_v8 = vpack.c.bf16 %v896_v4, %v896_v4  ;;  %v657_v9 = vadd.f32 %v1601_v7, %v1907_v38  ;;  %v1633_v10 = vpop.f32.mrb[12].mxu1  ;;  %v648_v11 = vpop.f32.mrb[13].mxu0 }
 0x104   : > { %1219 = vst.msk [vmem:[%s1919_s8 + $0xac] sm:$0xf] %vm1175_vm3, %v1528_v5  ;;  %1185 = vst.msk [vmem:[%s1919_s8 + $0x24] sm:$0xf] %vm1175_vm3, %v1494_v6  ;;  %v785_v12 = vadd.f32 %v1633_v10, %v1907_v38  ;;  %v649_v13 = vadd.f32 %v1907_v38, %v648_v11  ;;  %v776_v14 = vpop.f32.mrb[13].mxu1  ;;  %v1602_v15 = vpop.f32.mrb[14].mxu0 }
 0x105   : > { %1217 = vst.msk [vmem:[%s1919_s8 + $0xa4] sm:$0xf] %vm1175_vm3, %v1526_v8  ;;  %v869_v16 = vmax.f32 %v657_v9, 0.0  ;;  %v777_v17 = vadd.f32 %v1907_v38, %v776_v14  ;;  %v660_v18 = vadd.f32 %v1602_v15, %v1907_v38  ;;  %v1634_v19 = vpop.f32.mrb[14].mxu1  ;;  %v651_v20 = vpop.f32.mrb[15].mxu0 }
 0x106   : > { %v901_v21 = vmax.f32 %v785_v12, 0.0  ;;  %v867_v22 = vmax.f32 %v649_v13, 0.0  ;;  %v788_v23 = vadd.f32 %v1634_v19, %v1907_v38  ;;  %v652_v24 = vadd.f32 %v1907_v38, %v651_v20  ;;  %v779_v25 = vpop.f32.mrb[15].mxu1 }
 0x107   : > { %v1499_v26 = vpack.c.bf16 %v869_v16, %v869_v16  ;;  %v899_v27 = vmax.f32 %v777_v17, 0.0  ;;  %v870_v28 = vmax.f32 %v660_v18, 0.0  ;;  %v780_v29 = vadd.f32 %v1907_v38, %v779_v25 }
 0x108   : > { %v1531_v30 = vpack.c.bf16 %v901_v21, %v901_v21  ;;  %v1497_v31 = vpack.c.bf16 %v867_v22, %v867_v22  ;;  %v902_v32 = vmax.f32 %v788_v23, 0.0  ;;  %v868_v33 = vmax.f32 %v652_v24, 0.0 }
 0x109   : > { %1190 = vst.msk [vmem:[%s1919_s8 + $0x38] sm:$0xf] %vm1175_vm3, %v1499_v26  ;;  %v1529_v34 = vpack.c.bf16 %v899_v27, %v899_v27  ;;  %v1500_v35 = vpack.c.bf16 %v870_v28, %v870_v28  ;;  %v900_v36 = vmax.f32 %v780_v29, 0.0 }
 0x10a   : > { %1222 = vst.msk [vmem:[%s1919_s8 + $0xb8] sm:$0xf] %vm1175_vm3, %v1531_v30  ;;  %1188 = vst.msk [vmem:[%s1919_s8 + $0x30] sm:$0xf] %vm1175_vm3, %v1497_v31  ;;  %v1532_v37 = vpack.c.bf16 %v902_v32, %v902_v32  ;;  %v1498_v39 = vpack.c.bf16 %v868_v33, %v868_v33  ;;  %v1605_v40 = vpop.f32.mrb[16].mxu0 }
 0x10b   : > { %1220 = vst.msk [vmem:[%s1919_s8 + $0xb0] sm:$0xf] %vm1175_vm3, %v1529_v34  ;;  %1191 = vst.msk [vmem:[%s1919_s8 + $0x3c] sm:$0xf] %vm1175_vm3, %v1500_v35  ;;  %v1530_v41 = vpack.c.bf16 %v900_v36, %v900_v36  ;;  %v673_v42 = vadd.f32 %v1605_v40, %v1907_v38  ;;  %v1637_v43 = vpop.f32.mrb[16].mxu1  ;;  %v664_v44 = vpop.f32.mrb[17].mxu0 }
 0x10c   : > { %1223 = vst.msk [vmem:[%s1919_s8 + $0xbc] sm:$0xf] %vm1175_vm3, %v1532_v37  ;;  %1189 = vst.msk [vmem:[%s1919_s8 + $0x34] sm:$0xf] %vm1175_vm3, %v1498_v39  ;;  %v801_v45 = vadd.f32 %v1637_v43, %v1907_v38  ;;  %v665_v46 = vadd.f32 %v1907_v38, %v664_v44  ;;  %v792_v47 = vpop.f32.mrb[17].mxu1  ;;  %v1606_v48 = vpop.f32.mrb[18].mxu0 }
 0x10d   : > { %1221 = vst.msk [vmem:[%s1919_s8 + $0xb4] sm:$0xf] %vm1175_vm3, %v1530_v41  ;;  %v873_v49 = vmax.f32 %v673_v42, 0.0  ;;  %v793_v50 = vadd.f32 %v1907_v38, %v792_v47  ;;  %v676_v51 = vadd.f32 %v1606_v48, %v1907_v38  ;;  %v1638_v52 = vpop.f32.mrb[18].mxu1  ;;  %v667_v53 = vpop.f32.mrb[19].mxu0 }
 0x10e   : > { %v905_v54 = vmax.f32 %v801_v45, 0.0  ;;  %v871_v55 = vmax.f32 %v665_v46, 0.0  ;;  %v804_v56 = vadd.f32 %v1638_v52, %v1907_v38  ;;  %v668_v57 = vadd.f32 %v1907_v38, %v667_v53  ;;  %v795_v58 = vpop.f32.mrb[19].mxu1 }
 0x10f   : > { %v1503_v59 = vpack.c.bf16 %v873_v49, %v873_v49  ;;  %v903_v60 = vmax.f32 %v793_v50, 0.0  ;;  %v874_v61 = vmax.f32 %v676_v51, 0.0  ;;  %v796_v62 = vadd.f32 %v1907_v38, %v795_v58 }
 0x110   : > { %v1535_v63 = vpack.c.bf16 %v905_v54, %v905_v54  ;;  %v1501_v0 = vpack.c.bf16 %v871_v55, %v871_v55  ;;  %v906_v1 = vmax.f32 %v804_v56, 0.0  ;;  %v872_v2 = vmax.f32 %v668_v57, 0.0 }
 0x111   : > { %1194 = vst.msk [vmem:[%s1919_s8 + $0x48] sm:$0xf] %vm1175_vm3, %v1503_v59  ;;  %v1533_v3 = vpack.c.bf16 %v903_v60, %v903_v60  ;;  %v1504_v4 = vpack.c.bf16 %v874_v61, %v874_v61  ;;  %v904_v5 = vmax.f32 %v796_v62, 0.0 }
 0x112   : > { %1226 = vst.msk [vmem:[%s1919_s8 + $0xc8] sm:$0xf] %vm1175_vm3, %v1535_v63  ;;  %1192 = vst.msk [vmem:[%s1919_s8 + $0x40] sm:$0xf] %vm1175_vm3, %v1501_v0  ;;  %v1536_v6 = vpack.c.bf16 %v906_v1, %v906_v1  ;;  %v1502_v7 = vpack.c.bf16 %v872_v2, %v872_v2  ;;  %v1609_v8 = vpop.f32.mrb[20].mxu0 }
 0x113   : > { %1224 = vst.msk [vmem:[%s1919_s8 + $0xc0] sm:$0xf] %vm1175_vm3, %v1533_v3  ;;  %1195 = vst.msk [vmem:[%s1919_s8 + $0x4c] sm:$0xf] %vm1175_vm3, %v1504_v4  ;;  %v1534_v9 = vpack.c.bf16 %v904_v5, %v904_v5  ;;  %v689_v10 = vadd.f32 %v1609_v8, %v1907_v38  ;;  %v1641_v11 = vpop.f32.mrb[20].mxu1  ;;  %v680_v12 = vpop.f32.mrb[21].mxu0 }
 0x114   : > { %1227 = vst.msk [vmem:[%s1919_s8 + $0xcc] sm:$0xf] %vm1175_vm3, %v1536_v6  ;;  %1193 = vst.msk [vmem:[%s1919_s8 + $0x44] sm:$0xf] %vm1175_vm3, %v1502_v7  ;;  %v817_v13 = vadd.f32 %v1641_v11, %v1907_v38  ;;  %v681_v14 = vadd.f32 %v1907_v38, %v680_v12  ;;  %v808_v15 = vpop.f32.mrb[21].mxu1  ;;  %v1610_v16 = vpop.f32.mrb[22].mxu0 }
 0x115   : > { %1225 = vst.msk [vmem:[%s1919_s8 + $0xc4] sm:$0xf] %vm1175_vm3, %v1534_v9  ;;  %v877_v17 = vmax.f32 %v689_v10, 0.0  ;;  %v809_v18 = vadd.f32 %v1907_v38, %v808_v15  ;;  %v692_v19 = vadd.f32 %v1610_v16, %v1907_v38  ;;  %v1642_v20 = vpop.f32.mrb[22].mxu1  ;;  %v683_v21 = vpop.f32.mrb[23].mxu0 }
 0x116   : > { %v909_v22 = vmax.f32 %v817_v13, 0.0  ;;  %v875_v23 = vmax.f32 %v681_v14, 0.0  ;;  %v820_v24 = vadd.f32 %v1642_v20, %v1907_v38  ;;  %v684_v25 = vadd.f32 %v1907_v38, %v683_v21  ;;  %v811_v26 = vpop.f32.mrb[23].mxu1 }
 0x117   : > { %v1507_v27 = vpack.c.bf16 %v877_v17, %v877_v17  ;;  %v907_v28 = vmax.f32 %v809_v18, 0.0  ;;  %v878_v29 = vmax.f32 %v692_v19, 0.0  ;;  %v812_v30 = vadd.f32 %v1907_v38, %v811_v26 }
 0x118   : > { %v1539_v31 = vpack.c.bf16 %v909_v22, %v909_v22  ;;  %v1505_v32 = vpack.c.bf16 %v875_v23, %v875_v23  ;;  %v910_v33 = vmax.f32 %v820_v24, 0.0  ;;  %v876_v34 = vmax.f32 %v684_v25, 0.0 }
 0x119   : > { %1198 = vst.msk [vmem:[%s1919_s8 + $0x58] sm:$0xf] %vm1175_vm3, %v1507_v27  ;;  %v1537_v35 = vpack.c.bf16 %v907_v28, %v907_v28  ;;  %v1508_v36 = vpack.c.bf16 %v878_v29, %v878_v29  ;;  %v908_v37 = vmax.f32 %v812_v30, 0.0 }
 0x11a   : > { %1230 = vst.msk [vmem:[%s1919_s8 + $0xd8] sm:$0xf] %vm1175_vm3, %v1539_v31  ;;  %1196 = vst.msk [vmem:[%s1919_s8 + $0x50] sm:$0xf] %vm1175_vm3, %v1505_v32  ;;  %v1540_v39 = vpack.c.bf16 %v910_v33, %v910_v33  ;;  %v1506_v40 = vpack.c.bf16 %v876_v34, %v876_v34  ;;  %v1613_v41 = vpop.f32.mrb[24].mxu0 }
 0x11b   : > { %1228 = vst.msk [vmem:[%s1919_s8 + $0xd0] sm:$0xf] %vm1175_vm3, %v1537_v35  ;;  %1199 = vst.msk [vmem:[%s1919_s8 + $0x5c] sm:$0xf] %vm1175_vm3, %v1508_v36  ;;  %v1538_v42 = vpack.c.bf16 %v908_v37, %v908_v37  ;;  %v705_v43 = vadd.f32 %v1613_v41, %v1907_v38  ;;  %v1645_v44 = vpop.f32.mrb[24].mxu1  ;;  %v696_v45 = vpop.f32.mrb[25].mxu0 }
 0x11c   : > { %1231 = vst.msk [vmem:[%s1919_s8 + $0xdc] sm:$0xf] %vm1175_vm3, %v1540_v39  ;;  %1197 = vst.msk [vmem:[%s1919_s8 + $0x54] sm:$0xf] %vm1175_vm3, %v1506_v40  ;;  %v833_v46 = vadd.f32 %v1645_v44, %v1907_v38  ;;  %v697_v47 = vadd.f32 %v1907_v38, %v696_v45  ;;  %v824_v48 = vpop.f32.mrb[25].mxu1  ;;  %v1614_v49 = vpop.f32.mrb[26].mxu0 }
 0x11d   : > { %1229 = vst.msk [vmem:[%s1919_s8 + $0xd4] sm:$0xf] %vm1175_vm3, %v1538_v42  ;;  %v881_v50 = vmax.f32 %v705_v43, 0.0  ;;  %v825_v51 = vadd.f32 %v1907_v38, %v824_v48  ;;  %v708_v52 = vadd.f32 %v1614_v49, %v1907_v38  ;;  %v1646_v53 = vpop.f32.mrb[26].mxu1  ;;  %v699_v54 = vpop.f32.mrb[27].mxu0 }
 0x11e   : > { %v913_v55 = vmax.f32 %v833_v46, 0.0  ;;  %v879_v56 = vmax.f32 %v697_v47, 0.0  ;;  %v836_v57 = vadd.f32 %v1646_v53, %v1907_v38  ;;  %v700_v58 = vadd.f32 %v1907_v38, %v699_v54  ;;  %v827_v59 = vpop.f32.mrb[27].mxu1 }
 0x11f   : > { %v1511_v60 = vpack.c.bf16 %v881_v50, %v881_v50  ;;  %v911_v61 = vmax.f32 %v825_v51, 0.0  ;;  %v882_v62 = vmax.f32 %v708_v52, 0.0  ;;  %v828_v63 = vadd.f32 %v1907_v38, %v827_v59 }
 0x120   : > { %v1543_v0 = vpack.c.bf16 %v913_v55, %v913_v55  ;;  %v1509_v1 = vpack.c.bf16 %v879_v56, %v879_v56  ;;  %v914_v2 = vmax.f32 %v836_v57, 0.0  ;;  %v880_v3 = vmax.f32 %v700_v58, 0.0 }
 0x121   : > { %1202 = vst.msk [vmem:[%s1919_s8 + $0x68] sm:$0xf] %vm1175_vm3, %v1511_v60  ;;  %v1541_v4 = vpack.c.bf16 %v911_v61, %v911_v61  ;;  %v1512_v5 = vpack.c.bf16 %v882_v62, %v882_v62  ;;  %v912_v6 = vmax.f32 %v828_v63, 0.0 }
 0x122   : > { %1234 = vst.msk [vmem:[%s1919_s8 + $0xe8] sm:$0xf] %vm1175_vm3, %v1543_v0  ;;  %1200 = vst.msk [vmem:[%s1919_s8 + $0x60] sm:$0xf] %vm1175_vm3, %v1509_v1  ;;  %v1544_v7 = vpack.c.bf16 %v914_v2, %v914_v2  ;;  %v1510_v8 = vpack.c.bf16 %v880_v3, %v880_v3  ;;  %v1617_v9 = vpop.f32.mrb[28].mxu0 }
 0x123   : > { %1232 = vst.msk [vmem:[%s1919_s8 + $0xe0] sm:$0xf] %vm1175_vm3, %v1541_v4  ;;  %1203 = vst.msk [vmem:[%s1919_s8 + $0x6c] sm:$0xf] %vm1175_vm3, %v1512_v5  ;;  %v1542_v10 = vpack.c.bf16 %v912_v6, %v912_v6  ;;  %v721_v11 = vadd.f32 %v1617_v9, %v1907_v38  ;;  %v1649_v12 = vpop.f32.mrb[28].mxu1  ;;  %v712_v13 = vpop.f32.mrb[29].mxu0 }
 0x124   : > { %1235 = vst.msk [vmem:[%s1919_s8 + $0xec] sm:$0xf] %vm1175_vm3, %v1544_v7  ;;  %1201 = vst.msk [vmem:[%s1919_s8 + $0x64] sm:$0xf] %vm1175_vm3, %v1510_v8  ;;  %v849_v14 = vadd.f32 %v1649_v12, %v1907_v38  ;;  %v713_v15 = vadd.f32 %v1907_v38, %v712_v13  ;;  %v840_v16 = vpop.f32.mrb[29].mxu1  ;;  %v1618_v17 = vpop.f32.mrb[30].mxu0 }
 0x125   : > { %1233 = vst.msk [vmem:[%s1919_s8 + $0xe4] sm:$0xf] %vm1175_vm3, %v1542_v10  ;;  %v885_v18 = vmax.f32 %v721_v11, 0.0  ;;  %v841_v19 = vadd.f32 %v1907_v38, %v840_v16  ;;  %v724_v20 = vadd.f32 %v1618_v17, %v1907_v38  ;;  %v1650_v21 = vpop.f32.mrb[30].mxu1  ;;  %v715_v22 = vpop.f32.mrb[31].mxu0 }
 0x126   : > { %v917_v23 = vmax.f32 %v849_v14, 0.0  ;;  %v883_v24 = vmax.f32 %v713_v15, 0.0  ;;  %v852_v25 = vadd.f32 %v1650_v21, %v1907_v38  ;;  %v716_v26 = vadd.f32 %v1907_v38, %v715_v22  ;;  %v843_v27 = vpop.f32.mrb[31].mxu1 }
 0x127   : > { %v1515_v28 = vpack.c.bf16 %v885_v18, %v885_v18  ;;  %v915_v29 = vmax.f32 %v841_v19, 0.0  ;;  %v886_v30 = vmax.f32 %v724_v20, 0.0  ;;  %v844_v31 = vadd.f32 %v1907_v38, %v843_v27 }
 0x128   : > { %v1547_v32 = vpack.c.bf16 %v917_v23, %v917_v23  ;;  %v1513_v33 = vpack.c.bf16 %v883_v24, %v883_v24  ;;  %v918_v34 = vmax.f32 %v852_v25, 0.0  ;;  %v884_v35 = vmax.f32 %v716_v26, 0.0 }
 0x129   : > { %1206 = vst.msk [vmem:[%s1919_s8 + $0x78] sm:$0xf] %vm1175_vm3, %v1515_v28  ;;  %v1545_v36 = vpack.c.bf16 %v915_v29, %v915_v29  ;;  %v1516_v37 = vpack.c.bf16 %v886_v30, %v886_v30  ;;  %v916_v39 = vmax.f32 %v844_v31, 0.0 }
 0x12a   : > { %1238 = vst.msk [vmem:[%s1919_s8 + $0xf8] sm:$0xf] %vm1175_vm3, %v1547_v32  ;;  %1204 = vst.msk [vmem:[%s1919_s8 + $0x70] sm:$0xf] %vm1175_vm3, %v1513_v33  ;;  %v1548_v40 = vpack.c.bf16 %v918_v34, %v918_v34  ;;  %v1514_v41 = vpack.c.bf16 %v884_v35, %v884_v35 }
 0x12b   : > { %1236 = vst.msk [vmem:[%s1919_s8 + $0xf0] sm:$0xf] %vm1175_vm3, %v1545_v36  ;;  %1207 = vst.msk [vmem:[%s1919_s8 + $0x7c] sm:$0xf] %vm1175_vm3, %v1516_v37  ;;  %v1546_v38 = vpack.c.bf16 %v916_v39, %v916_v39 }
 0x12c   : > { %1239 = vst.msk [vmem:[%s1919_s8 + $0xfc] sm:$0xf] %vm1175_vm3, %v1548_v40  ;;  %1205 = vst.msk [vmem:[%s1919_s8 + $0x74] sm:$0xf] %vm1175_vm3, %v1514_v41 }
 0x12d   : > { %1237 = vst.msk [vmem:[%s1919_s8 + $0xf4] sm:$0xf] %vm1175_vm3, %v1546_v38 }
 0x12e PF: > { %s13_s16 = sadd.s32 1, %s1768_s16   ;;  %s2127_s12 = smov %s1760_s14 }
 0x12f   : > { %p10_p7 = scmp.ge.s32.totalorder %s13_s16, 6   ;;  %s2128_s13 = smov %s1764_s15 }
 0x130   : > { %s2129_s14 = smov %s2132_s17  ;;  %s2130_s15 = smov %s2136_s18 }
 0x131   :  { %12 = sbr.rel (!%p10_p7) target bundleno = 3 (0x3), region = 62 }

// kernel: vgg16_relu2_2.6
= control target key start
LH: loop header
LB: loop body
LE: loop exit
PB: predicated region body
PF: predicated region fallthrough
CT: control target
= control target key end

     0   :  { %s2232_s18 = smov 0   ;;  %s2234_s19 = smov 0   ;;  %s2996_s0 = inlined_call_operand.vmem [shape: bf16[2,16,32,128], index: 0, kind: input, shape index: {}, may-alias: {0,1,2}]   ;;  %s2997_s1 = inlined_call_operand.vmem [shape: bf16[2,16,32,128], index: 1, kind: input, shape index: {}, may-alias: {0,1,2}]   ;;  %s2998_s2 = inlined_call_operand.vmem [shape: bf16[2,16,32,128], index: 2, kind: input, shape index: {}, may-alias: {0,1,2}]   ;;  %s2999_s3 = inlined_call_operand.vmem [shape: bf16[3,192,128], index: 3, kind: input, shape index: {}]   ;;  %s3000_s4 = inlined_call_operand.vmem [shape: f32[1,128], index: 4, kind: input, shape index: {}]   ;;  %s3001_s5 = inlined_call_operand.vmem [shape: bf16[2,16,16,128], index: 5, kind: output, shape index: {}]  }
   0x1   :  { %s2236_s20 = smov 0   ;;  %s2238_s21 = smov 0  }
   0x2   :  { %s2240_s22 = smov 0  }
   0x3 LB: > { %s24_s23 = sadd.s32 1, %s2190_s20  ;;  %s27_s24 = sadd.s32 1, %s2194_s21  ;;  %s2198_s22 = sphi %s2240_s22, %s15_s22   ;;  %s2194_s21 = sphi %s2238_s21, %s3010_s21   ;;  %s2190_s20 = sphi %s2236_s20, %s3009_s20   ;;  %s2186_s19 = sphi %s2234_s19, %s3008_s19   ;;  %s2182_s18 = sphi %s2232_s18, %s3007_s18  }
   0x4   : > { %p25_p0 = scmp.ge.s32.totalorder %s24_s23, 2  ;;  %p1824_p1 = scmp.ge.s32.totalorder %s2198_s22, 1 }
   0x5   : > { %p273_p2 = scmp.lt.s32.totalorder %s2198_s22, 5 }
   0x6   : > { %s3012_s23 = smov (%p25_p0, %s24_s23), 0  ;;  %s3014_s24 = smov (!%p25_p0, %s27_s24), %s2194_s21 }
   0x7   : > { %p274_p3 = pnand %p1824_p1, %p273_p2  ;;  %p29_p4 = scmp.ge.s32.totalorder %s3014_s24, 2 }
   0x8   : > { %s2265_s25 = sshll.u32 (!%p274_p3), %s2182_s18, 3  ;;  %p338_p5 = scmp.lt.s32.totalorder (!%p274_p3), %s2186_s19, 1  ;;  %v2124_v54 = vld [vmem:[%s2999_s3 + $0x60] sm:$0xff] (!%p274_p3)   ;;  %v2201_v56 = vmov (!%p274_p3), 0   ;;  %v2125_v57 = vld [vmem:[%s2999_s3 + $0x68] sm:$0xff] (!%p274_p3)   ;;  %v2127_v59 = vld [vmem:[%s2999_s3 + $0x70] sm:$0xff] (!%p274_p3)  }
   0x9   : > { %s3016_s24 = smov (%p29_p4, %s3014_s24), 0  ;;  %277 = sbr.rel (%p274_p3) target bundleno = 583 (0x247), region = 40 }
   0xa   : > { %p340_p6 = scmp.lt.s32.totalorder (!%p274_p3), %s2265_s25, 15  ;;  %s2200_s9 = smov (!%p274_p3), 64   ;;  %v2126_v55 = vld [vmem:[%s2999_s3] sm:$0xff] (!%p274_p3)   ;;  %943 = vmatprep.subr.bf16.mxu0 (!%p274_p3), %v2201_v56  ;;  %1130 = vmatprep.subr.bf16.mxu1 (!%p274_p3), %v2201_v56  ;;  %v2128_v58 = vld [vmem:[%s2999_s3 + $0x8] sm:$0xff] (!%p274_p3)   ;;  %v2130_v60 = vld [vmem:[%s2999_s3 + $0x10] sm:$0xff] (!%p274_p3)   ;;  %vm733_vm0 = vcmask (!%p274_p3), 523264  }
   0xb   : > { %s1830_s10 = sadd.s32 (!%p274_p3), 4294967295, %s2265_s25  ;;  %s1994_s11 = sadd.s32 (!%p274_p3), 8, %s2265_s25  ;;  %944 = vmatpush1.bf16.msra.mxu0 (!%p274_p3), %v2124_v54  ;;  %1131 = vmatpush1.bf16.msra.mxu1 (!%p274_p3), %v2126_v55  ;;  %v2129_v61 = vld [vmem:[%s2999_s3 + $0x78] sm:$0xff] (!%p274_p3)   ;;  %v2131_v63 = vld [vmem:[%s2999_s3 + $0x80] sm:$0xff] (!%p274_p3)   ;;  %vm696_vm1 = vcmask (!%p274_p3), 1040384   ;;  %vm1257_vm4 = vcmask (!%p274_p3), 1047552  }
   0xc   : > { %p350_p7 = scmp.gt.s32.totalorder (!%p274_p3), %s1830_s10, 0  ;;  %p1831_p8 = scmp.lt.s32.totalorder (!%p274_p3), %s1830_s10, 15  ;;  %945 = vmatprep.subr.bf16.mxu0 (!%p274_p3), %v2201_v56  ;;  %1132 = vmatprep.subr.bf16.mxu1 (!%p274_p3), %v2201_v56  ;;  %v2132_v62 = vld [vmem:[%s2999_s3 + $0x18] sm:$0xff] (!%p274_p3)   ;;  %vm697_vm2 = vsmask.f32 (!%p274_p3), 256 }
   0xd   : > { %p2334_p9 = scmp.lt.s32.totalorder (!%p274_p3), %s1994_s11, 15  ;;  %vm2524_vm3 = vmand (!%p274_p3), %vm696_vm1, %vm697_vm2  ;;  %vm1258_vm5 = vsmask.f32 (!%p274_p3), 7424  ;;  %p554_p10 = scmp.gt.s32.totalorder (!%p274_p3), %s2182_s18, 0 }
   0xe   : > { %vm2651_vm6 = vmand (!%p274_p3), %vm1257_vm4, %vm1258_vm5  ;;  %p560_p11 = scmp.lt.s32.totalorder (!%p274_p3), %s2182_s18, 1 }
   0xf   : > { %946 = vmatpush1.bf16.msra.mxu0 (!%p274_p3), %v2125_v57  ;;  %1133 = vmatpush1.bf16.msra.mxu1 (!%p274_p3), %v2128_v58 }
  0x10   : > { %s3018_s19 = smov (!%p338_p5, %s2186_s19), 1  ;;  %s3020_s10 = smov (!%p350_p7, %s1830_s10), 0  ;;  %947 = vmatprep.subr.bf16.mxu0 %v2201_v56  ;;  %1134 = vmatprep.subr.bf16.mxu1 %v2201_v56 }
  0x11   : > { %s2271_s26 = scalar_select %p340_p6, %s2265_s25, 15 }
  0x12   : > { %s2274_s27 = sshll.u32 %s3018_s19, 6  ;;  %s3022_s10 = smov (!%p1831_p8, %s3020_s10), 15 }
  0x13   : > { %s1826_s28 = sshll.u32 %s2271_s26, 2  ;;  %s1836_s12 = sshll.u32 %s3022_s10, 2  ;;  %948 = vmatpush1.bf16.msra.mxu0 %v2127_v59  ;;  %1135 = vmatpush1.bf16.msra.mxu1 %v2130_v60 }
  0x14   : > { %s344_s29 = sadd.s32 %s2274_s27, %s1826_s28  ;;  %s358_s14 = sadd.s32 %s1836_s12, %s2274_s27  ;;  %949 = vmatprep.subr.bf16.mxu0 %v2201_v56  ;;  %1136 = vmatprep.subr.bf16.mxu1 %v2201_v56 }
  0x15   : > { %s1828_s30 = sshll.u32 %s344_s29, 2  ;;  %s1838_s15 = sshll.u32 %s358_s14, 2 }
  0x16   : > { %s2281_s8 = scalar_lea.vmem %s2996_s0, %s1828_s30  ;;  %s3024_s11 = smov (!%p2334_p9, %s1994_s11), 15 }
  0x17   : > { %v394_v0 = vld [vmem:[%s2281_s8] sm:$0xf]  ;;  %v396_v1 = vld [vmem:[%s2281_s8 + $0x8] sm:$0xf]  ;;  %v398_v2 = vld [vmem:[%s2281_s8 + $0x10] sm:$0xf]  ;;  %s360_s28 = scalar_lea.vmem %s2997_s1, %s1838_s15  ;;  %950 = vmatpush1.bf16.msra.mxu0 %v2129_v61  ;;  %1137 = vmatpush1.bf16.msra.mxu1 %v2132_v62 }
  0x18   : > { %v2286_v3 = vmax.bf16 %v396_v1, %v394_v0  ;;  %v400_v4 = vld [vmem:[%s2281_s8 + $0x18] sm:$0xf]  ;;  %v395_v5 = vld [vmem:[%s2281_s8 + $0x4] sm:$0xf]  ;;  %v397_v6 = vld [vmem:[%s2281_s8 + $0xc] sm:$0xf]  ;;  %951 = vmatprep.subr.bf16.mxu0 %v2201_v56  ;;  %1138 = vmatprep.subr.bf16.mxu1 %v2201_v56 }
  0x19   : > { %v2291_v7 = vmax.bf16 %v400_v4, %v398_v2  ;;  %v399_v8 = vld [vmem:[%s2281_s8 + $0x14] sm:$0xf]  ;;  %v401_v9 = vld [vmem:[%s2281_s8 + $0x1c] sm:$0xf]  ;;  %v2297_v10 = vmax.bf16 %v397_v6, %v395_v5  ;;  %v402_v12 = vld [vmem:[%s2281_s8 + $0x20] sm:$0xf] }
  0x1a   : > { %458 = vrot.lane.b32.xlu0 %v2286_v3, %s2200_s9  ;;  %v2302_v11 = vmax.bf16 %v401_v9, %v399_v8  ;;  %v404_v13 = vld [vmem:[%s2281_s8 + $0x28] sm:$0xf]  ;;  %v403_v14 = vld [vmem:[%s2281_s8 + $0x24] sm:$0xf]  ;;  %v405_v15 = vld [vmem:[%s2281_s8 + $0x2c] sm:$0xf] }
  0x1b   : > { %462 = vrot.lane.b32.xlu1 %v2291_v7, %s2200_s9  ;;  %v2310_v16 = vmax.bf16 %v404_v13, %v402_v12  ;;  %v2314_v17 = vmax.bf16 %v405_v15, %v403_v14  ;;  %v406_v18 = vld [vmem:[%s2281_s8 + $0x30] sm:$0xf]  ;;  %v408_v19 = vld [vmem:[%s2281_s8 + $0x38] sm:$0xf]  ;;  %v407_v20 = vld [vmem:[%s2281_s8 + $0x34] sm:$0xf]  ;;  %952 = vmatpush1.bf16.msra.mxu0 %v2131_v63 }
  0x1c   : > { %v409_v21 = vld [vmem:[%s2281_s8 + $0x3c] sm:$0xf]  ;;  %v2322_v22 = vmax.bf16 %v408_v19, %v406_v18  ;;  %v411_v23 = vld [vmem:[%s2281_s8 + $0x44] sm:$0xf]  ;;  %v410_v24 = vld [vmem:[%s2281_s8 + $0x40] sm:$0xf]  ;;  %953 = vmatprep.subr.bf16.mxu0 %v2201_v56 }
  0x1d   : > { %v2329_v25 = vmax.bf16 %v409_v21, %v407_v20  ;;  %v412_v26 = vld [vmem:[%s2281_s8 + $0x48] sm:$0xf]  ;;  %v413_v27 = vld [vmem:[%s2281_s8 + $0x4c] sm:$0xf]  ;;  %v414_v28 = vld [vmem:[%s2281_s8 + $0x50] sm:$0xf] }
  0x1e   : > { %460 = vrot.lane.b32.xlu0 %v2297_v10, %s2200_s9  ;;  %v2340_v29 = vmax.bf16 %v412_v26, %v410_v24  ;;  %v415_v30 = vld [vmem:[%s2281_s8 + $0x54] sm:$0xf]  ;;  %v417_v31 = vld [vmem:[%s2281_s8 + $0x5c] sm:$0xf]  ;;  %v2347_v32 = vmax.bf16 %v413_v27, %v411_v23  ;;  %v416_v33 = vld [vmem:[%s2281_s8 + $0x58] sm:$0xf] }
  0x1f   : > { %464 = vrot.lane.b32.xlu1 %v2302_v11, %s2200_s9  ;;  %v418_v34 = vld [vmem:[%s2281_s8 + $0x60] sm:$0xf]  ;;  %v2353_v35 = vmax.bf16 %v416_v33, %v414_v28  ;;  %v419_v36 = vld [vmem:[%s2281_s8 + $0x64] sm:$0xf]  ;;  %v421_v37 = vld [vmem:[%s2281_s8 + $0x6c] sm:$0xf]  ;;  %v2362_v39 = vmax.bf16 %v417_v31, %v415_v30 }
  0x20   : > { %v420_v38 = vld [vmem:[%s2281_s8 + $0x68] sm:$0xf]  ;;  %s3026_s11 = smov (!%p2334_p9, %s3024_s11), 15  ;;  %v422_v40 = vld [vmem:[%s2281_s8 + $0x70] sm:$0xf]  ;;  %v2377_v44 = vmax.bf16 %v421_v37, %v419_v36  ;;  %v2134_v0 = vld [vmem:[%s2999_s3 + $0x20] sm:$0xff]  }
  0x21   : > { %v424_v41 = vld [vmem:[%s2281_s8 + $0x78] sm:$0xf]  ;;  %v2370_v42 = vmax.bf16 %v420_v38, %v418_v34  ;;  %v423_v43 = vld [vmem:[%s2281_s8 + $0x74] sm:$0xf]  ;;  %s2373_s16 = sshll.u32 %s3026_s11, 2  ;;  %v2133_v1 = vld [vmem:[%s2999_s3 + $0x88] sm:$0xff]   ;;  %1139 = vmatpush1.bf16.msra.mxu1 %v2134_v0 }
  0x22   : > { %466 = vrot.lane.b32.xlu0 %v2310_v16, %s2200_s9  ;;  %s375_s29 = sadd.s32 %s2373_s16, %s2274_s27  ;;  %v425_v45 = vld [vmem:[%s2281_s8 + $0x7c] sm:$0xf]  ;;  %v2387_v46 = vmax.bf16 %v424_v41, %v422_v40  ;;  %v523_v47 = vld [vmem:[%s360_s28 + $0x4] sm:$0xf]  ;;  %v525_v48 = vld [vmem:[%s360_s28 + $0xc] sm:$0xf]  ;;  %1140 = vmatprep.subr.bf16.mxu1 %v2201_v56 }
  0x23   : > { %468 = vrot.lane.b32.xlu1 %v2314_v17, %s2200_s9  ;;  %v522_v49 = vld [vmem:[%s360_s28] sm:$0xf]  ;;  %v2391_v50 = vmax.bf16 %v425_v45, %v423_v43  ;;  %v524_v51 = vld [vmem:[%s360_s28 + $0x8] sm:$0xf]  ;;  %v2399_v53 = vmax.bf16 %v525_v48, %v523_v47  ;;  %954 = vmatpush1.bf16.msra.mxu0 %v2133_v1  ;;  %v2135_v4 = vld [vmem:[%s2999_s3 + $0x90] sm:$0xff]   ;;  %s1845_s15 = sshll.u32 %s375_s29, 2 }
  0x24   : > { %v2395_v52 = vmax.bf16 %v524_v51, %v522_v49  ;;  %v2136_v2 = vld [vmem:[%s2999_s3 + $0x28] sm:$0xff]   ;;  %v2138_v5 = vld [vmem:[%s2999_s3 + $0x30] sm:$0xff]   ;;  %955 = vmatprep.subr.bf16.mxu0 %v2201_v56  ;;  %v2137_v6 = vld [vmem:[%s2999_s3 + $0x98] sm:$0xff]   ;;  %s2589_s29 = scalar_lea.vmem %s2998_s2, %s1845_s15  ;;  %s1847_s10 = sshll.u32 %s2271_s26, 1 }
  0x25   : > { %1141 = vmatpush1.bf16.msra.mxu1 %v2136_v2  ;;  %v2140_v8 = vld [vmem:[%s2999_s3 + $0x38] sm:$0xff]   ;;  %v2139_v9 = vld [vmem:[%s2999_s3 + $0xa0] sm:$0xff]   ;;  %v2141_v13 = vld [vmem:[%s2999_s3 + $0xa8] sm:$0xff]   ;;  %s555_s17 = scalar_select %p554_p10, 1, 0 }
  0x26   : > { %470 = vrot.lane.b32.xlu0 %v2322_v22, %s2200_s9  ;;  %1142 = vmatprep.subr.bf16.mxu1 %v2201_v56  ;;  %v2142_v12 = vld [vmem:[%s2999_s3 + $0x40] sm:$0xff]   ;;  %v2144_v14 = vld [vmem:[%s2999_s3 + $0x48] sm:$0xff]   ;;  %v2143_v15 = vld [vmem:[%s2999_s3 + $0xb0] sm:$0xff]   ;;  %s561_s18 = scalar_select %p560_p11, 1, 0 }
  0x27   : > { %472 = vrot.lane.b32.xlu1 %v2329_v25, %s2200_s9  ;;  %956 = vmatpush1.bf16.msra.mxu0 %v2135_v4  ;;  %v2145_v18 = vld [vmem:[%s2999_s3 + $0xb8] sm:$0xff]   ;;  %v2146_v19 = vld [vmem:[%s2999_s3 + $0x50] sm:$0xff]   ;;  %s1848_s11 = sshll.u32 %s3018_s19, 5 }
  0x28   : > { %957 = vmatprep.subr.bf16.mxu0 %v2201_v56  ;;  %v2147_v20 = vld [vmem:[%s2999_s3 + $0x58] sm:$0xff]   ;;  %s389_s14 = sadd.s32 %s1848_s11, %s1847_s10 }
  0x29   : > { %1143 = vmatpush1.bf16.msra.mxu1 %v2138_v5  ;;  %s1849_s19 = sshll.u32 %s389_s14, 2 }
  0x2a   : > { %474 = vrot.lane.b32.xlu0 %v2340_v29, %s2200_s9  ;;  %1144 = vmatprep.subr.bf16.mxu1 %v2201_v56  ;;  %s2945_s27 = scalar_lea.vmem %s3001_s5, %s1849_s19 }
  0x2b   : > { %476 = vrot.lane.b32.xlu1 %v2347_v32, %s2200_s9  ;;  %958 = vmatpush1.bf16.msra.mxu0 %v2137_v6 }
  0x2c   : > { %959 = vmatprep.subr.bf16.mxu0 %v2201_v56 }
  0x2d   : > { %1145 = vmatpush1.bf16.msra.mxu1 %v2140_v8 }
  0x2e   : > { %478 = vrot.lane.b32.xlu0 %v2353_v35, %s2200_s9  ;;  %1146 = vmatprep.subr.bf16.mxu1 %v2201_v56 }
  0x2f   : > { %480 = vrot.lane.b32.xlu1 %v2362_v39, %s2200_s9  ;;  %960 = vmatpush1.bf16.msra.mxu0 %v2139_v9 }
  0x30   : > { %961 = vmatprep.subr.bf16.mxu0 %v2201_v56 }
  0x31   : > { %1147 = vmatpush1.bf16.msra.mxu1 %v2142_v12 }
  0x32   : > { %482 = vrot.lane.b32.xlu0 %v2370_v42, %s2200_s9  ;;  %1148 = vmatprep.subr.bf16.mxu1 %v2201_v56 }
  0x33   : > { %484 = vrot.lane.b32.xlu1 %v2377_v44, %s2200_s9  ;;  %962 = vmatpush1.bf16.msra.mxu0 %v2141_v13 }
  0x34   : > { %963 = vmatprep.subr.bf16.mxu0 %v2201_v56 }
  0x35   : > { %1149 = vmatpush1.bf16.msra.mxu1 %v2144_v14 }
  0x36   : > { %486 = vrot.lane.b32.xlu0 %v2387_v46, %s2200_s9  ;;  %1150 = vmatprep.subr.bf16.mxu1 %v2201_v56 }
  0x37   : > { %488 = vrot.lane.b32.xlu1 %v2391_v50, %s2200_s9  ;;  %964 = vmatpush1.bf16.msra.mxu0 %v2143_v15 }
  0x38   : > { %965 = vmatprep.subr.bf16.mxu0 %v2201_v56 }
  0x39   : > { %1151 = vmatpush1.bf16.msra.mxu1 %v2146_v19 }
  0x3a   : > { %530 = vrot.lane.b32.xlu0 %v2395_v52, %s2200_s9  ;;  %1152 = vmatprep.subr.bf16.mxu1 %v2201_v56 }
  0x3b   : > { %532 = vrot.lane.b32.xlu1 %v2399_v53, %s2200_s9  ;;  %966 = vmatpush1.bf16.msra.mxu0 %v2145_v18 }
  0x3c   : > { %1441 = vmatprep.subr.bf16.mxu0 %v2201_v56 }
  0x3d   : > { %1153 = vmatpush1.bf16.msra.mxu1 %v2147_v20 }
  0x3e   : > { %2058 = vmatprep.subr.bf16.mxu1 %v2201_v56 }
  0x8c   : > { %v459_v21 = vpop.permute.xlu0 %458 }
  0x8d   : > { %v463_v23 = vpop.permute.xlu1 %462  ;;  %v506_v27 = vmax.bf16 %v459_v21, %v2286_v3 }
  0x8e   : > { %v508_v24 = vmax.bf16 %v463_v23, %v2291_v7 }
  0x90   : > { %v461_v26 = vpop.permute.xlu0 %460 }
  0x91   : > { %v507_v28 = vmax.bf16 %v461_v26, %v2297_v10  ;;  %v465_v30 = vpop.permute.xlu1 %464  ;;  %v541_v26 = vld [vmem:[%s2589_s29 + $0xc] sm:$0xf] }
  0x92   : > { %v509_v31 = vmax.bf16 %v465_v30, %v2302_v11 }
  0x93   : > { %v2507_v33 = vcombine.low %v506_v27, %v507_v28 }
  0x94   : > { %v2509_v34 = vcombine.low %v508_v24, %v509_v31  ;;  %v467_v36 = vpop.permute.xlu0 %466  ;;  %v539_v24 = vld [vmem:[%s2589_s29 + $0x4] sm:$0xf] }
  0x95   : > { %790 = vrot.lane.b32.xlu1 %v2507_v33, %s2200_s9  ;;  %v469_v37 = vpop.permute.xlu1 %468  ;;  %v510_v7 = vmax.bf16 %v467_v36, %v2310_v16  ;;  %v624_v38 = vshrl.u32 %v2507_v33, 16  ;;  %v627_v40 = vshll.u32 %v2507_v33, 16 }
  0x96   : > { %v511_v3 = vmax.bf16 %v469_v37, %v2314_v17  ;;  %1896 = vmatprep.mubr.msk.bf16.mxu0 %vm733_vm0, %v2509_v34  ;;  %v631_v10 = vshrl.u32 %v2509_v34, 16  ;;  %v634_v45 = vshll.u32 %v2509_v34, 16 }
  0x97   : > { %v626_v11 = vrot.slane %v624_v38, 7 }
  0x98   : > { %v2522_v41 = vcombine.low %v510_v7, %v511_v3  ;;  %v471_v43 = vpop.permute.xlu0 %470  ;;  %v633_v17 = vrot.slane %v631_v10, 7 }
  0x99   : > { %792 = vrot.lane.b32.xlu1 %v2509_v34, %s2200_s9  ;;  %v473_v47 = vpop.permute.xlu1 %472  ;;  %v629_v48 = vor.u32 %v627_v40, %v626_v11  ;;  %v512_v49 = vmax.bf16 %v471_v43, %v2322_v22 }
  0x9a   : > { %v513_v51 = vmax.bf16 %v473_v47, %v2329_v25  ;;  %v636_v54 = vor.u32 %v634_v45, %v633_v17  ;;  %v638_v55 = vshrl.u32 %v2522_v41, 16  ;;  %v641_v57 = vshll.u32 %v2522_v41, 16  ;;  %v538_v47 = vld [vmem:[%s2589_s29] sm:$0xf] }
  0x9b   : > { %v2543_v58 = vsel %vm2524_vm3, 0, %v629_v48 }
  0x9c   : > { %717 = vrot.lane.b32.xlu0 %v2543_v58, %s2200_s9  ;;  %v2547_v59 = vcombine.low %v512_v49, %v513_v51  ;;  %v2551_v22 = vsel %vm2524_vm3, 0, %v636_v54  ;;  %v475_v25 = vpop.permute.xlu0 %474  ;;  %v640_v60 = vrot.slane %v638_v55, 7  ;;  %v540_v49 = vld [vmem:[%s2589_s29 + $0x8] sm:$0xf] }
  0x9d   : > { %794 = vrot.lane.b32.xlu1 %v2522_v41, %s2200_s9  ;;  %1916 = vmatprep.mubr.msk.bf16.mxu1 %vm733_vm0, %v2551_v22  ;;  %v477_v61 = vpop.permute.xlu1 %476  ;;  %v514_v62 = vmax.bf16 %v475_v25, %v2340_v29  ;;  %v2638_v25 = vmax.bf16 %v540_v49, %v538_v47 }
  0x9e   : > { %v515_v63 = vmax.bf16 %v477_v61, %v2347_v32  ;;  %v643_v0 = vor.u32 %v641_v57, %v640_v60  ;;  %v645_v1 = vshrl.u32 %v2547_v59, 16  ;;  %v648_v2 = vshll.u32 %v2547_v59, 16 }
  0xa0   : > { %719 = vrot.lane.b32.xlu0 %v2551_v22, %s2200_s9  ;;  %v2567_v4 = vcombine.low %v514_v62, %v515_v63  ;;  %v479_v5 = vpop.permute.xlu0 %478  ;;  %v647_v6 = vrot.slane %v645_v1, 7  ;;  %v2578_v32 = vsel %vm2524_vm3, 0, %v643_v0 }
  0xa1   : > { %796 = vrot.lane.b32.xlu1 %v2547_v59, %s2200_s9  ;;  %v481_v29 = vpop.permute.xlu1 %480  ;;  %v516_v8 = vmax.bf16 %v479_v5, %v2353_v35 }
  0xa2   : > { %v517_v9 = vmax.bf16 %v481_v29, %v2362_v39  ;;  %v650_v12 = vor.u32 %v648_v2, %v647_v6  ;;  %v652_v13 = vshrl.u32 %v2567_v4, 16  ;;  %v655_v14 = vshll.u32 %v2567_v4, 16 }
  0xa4   : > { %721 = vrot.lane.b32.xlu0 %v2578_v32, %s2200_s9  ;;  %v2593_v35 = vcombine.low %v516_v8, %v517_v9  ;;  %v654_v39 = vrot.slane %v652_v13, 7  ;;  %v483_v15 = vpop.permute.xlu0 %482  ;;  %v2599_v18 = vsel %vm2524_vm3, 0, %v650_v12  ;;  %v1237_v51 = vrot.slane %v655_v14, 1 }
  0xa5   : > { %798 = vrot.lane.b32.xlu1 %v2567_v4, %s2200_s9  ;;  %v485_v19 = vpop.permute.xlu1 %484  ;;  %v518_v20 = vmax.bf16 %v483_v15, %v2370_v42 }
  0xa6   : > { %v519_v21 = vmax.bf16 %v485_v19, %v2377_v44  ;;  %v657_v23 = vor.u32 %v655_v14, %v654_v39  ;;  %v659_v27 = vshrl.u32 %v2593_v35, 16  ;;  %v662_v28 = vshll.u32 %v2593_v35, 16 }
  0xa7   : > { %v2617_v44 = vmax.bf16 %v541_v26, %v539_v24  ;;  %v1238_v63 = vor.u32 %v1237_v51, %v652_v13  ;;  %v1229_v13 = vrot.slane %v627_v40, 1  ;;  %v1231_v40 = vrot.slane %v634_v45, 1 }
  0xa8   : > { %723 = vrot.lane.b32.xlu0 %v2599_v18, %s2200_s9  ;;  %v2609_v30 = vcombine.low %v518_v20, %v519_v21  ;;  %v661_v31 = vrot.slane %v659_v27, 7  ;;  %v487_v36 = vpop.permute.xlu0 %486  ;;  %v2615_v42 = vsel %vm2524_vm3, 0, %v657_v23  ;;  %v1239_v0 = vrot.slane %v662_v28, 1 }
  0xa9   : > { %800 = vrot.lane.b32.xlu1 %v2593_v35, %s2200_s9  ;;  %v489_v37 = vpop.permute.xlu1 %488  ;;  %v520_v7 = vmax.bf16 %v487_v36, %v2387_v46  ;;  %v2657_v8 = vsel %vm2651_vm6, %v1238_v63, 0  ;;  %v1230_v20 = vor.u32 %v1229_v13, %v624_v38  ;;  %v1232_v38 = vor.u32 %v1231_v40, %v631_v10  ;;  %v2151_v13 = vld [vmem:[%s2999_s3 + $0xd8] sm:$0xff]  }
  0xaa   : > { %v521_v3 = vmax.bf16 %v489_v37, %v2391_v50  ;;  %v664_v11 = vor.u32 %v662_v28, %v661_v31  ;;  %v666_v43 = vshrl.u32 %v2609_v30, 16  ;;  %v669_v50 = vshll.u32 %v2609_v30, 16 }
  0xab   : > { %v1240_v9 = vor.u32 %v1239_v0, %v659_v27  ;;  %v2687_v24 = vsel %vm2651_vm6, %v1230_v20, 0  ;;  %v1233_v45 = vrot.slane %v641_v57, 1  ;;  %v2703_v27 = vsel %vm2651_vm6, %v1232_v38, 0  ;;  %v2152_v20 = vld [vmem:[%s2999_s3 + $0xe0] sm:$0xff]   ;;  %v2153_v38 = vld [vmem:[%s2999_s3 + $0xe8] sm:$0xff]  }
  0xac   : > { %725 = vrot.lane.b32.xlu0 %v2615_v42, %s2200_s9  ;;  %v2624_v17 = vcombine.low %v520_v7, %v521_v3  ;;  %v2631_v48 = vsel %vm2524_vm3, 0, %v664_v11  ;;  %v668_v46 = vrot.slane %v666_v43, 7  ;;  %v1241_v12 = vrot.slane %v669_v50, 1  ;;  %v531_v36 = vpop.permute.xlu0 %530 }
  0xad   : > { %548 = vrot.lane.b32.xlu1 %v2617_v44, %s2200_s9  ;;  %v2671_v39 = vsel %vm2651_vm6, %v1240_v9, 0  ;;  %v1234_v10 = vor.u32 %v1233_v45, %v638_v55  ;;  %v1235_v57 = vrot.slane %v648_v2, 1  ;;  %v533_v2 = vpop.permute.xlu1 %532  ;;  %v556_v37 = vstv %s555_s17 }
  0xae   : > { %v673_v54 = vshrl.u32 %v2624_v17, 16  ;;  %v671_v60 = vor.u32 %v669_v50, %v668_v46  ;;  %v676_v62 = vshll.u32 %v2624_v17, 16  ;;  %v1242_v15 = vor.u32 %v1241_v12, %v666_v43  ;;  %v2148_v46 = vld [vmem:[%s2999_s3 + $0xc0] sm:$0xff]  }
  0xaf   : > { %v2715_v28 = vsel %vm2651_vm6, %v1234_v10, 0  ;;  %v1236_v31 = vor.u32 %v1235_v57, %v645_v1  ;;  %v537_v7 = vmax.bf16 %v533_v2, %v2399_v53  ;;  %v536_v3 = vmax.bf16 %v531_v36, %v2395_v52  ;;  %v2154_v10 = vld [vmem:[%s2999_s3 + $0xf0] sm:$0xff]   ;;  %v2155_v2 = vld [vmem:[%s2999_s3 + $0xf8] sm:$0xff]  }
  0xb0   : > { %727 = vrot.lane.b32.xlu0 %v2631_v48, %s2200_s9  ;;  %v675_v61 = vrot.slane %v673_v54, 7  ;;  %v2649_v5 = vsel %vm2524_vm3, 0, %v671_v60  ;;  %v1243_v19 = vrot.slane %v676_v62, 1  ;;  %v2683_v21 = vsel %vm2651_vm6, %v1242_v15, 0 }
  0xb1   : > { %802 = vrot.lane.b32.xlu1 %v2609_v30, %s2200_s9  ;;  %v2723_v55 = vsel %vm2651_vm6, %v1236_v31, 0  ;;  %vm557_vm7 = vcmp.eq.s32.totalorder %v556_v37, 1 }
  0xb2   : > { %v678_v29 = vor.u32 %v676_v62, %v675_v61  ;;  %v1244_v23 = vor.u32 %v1243_v19, %v673_v54  ;;  %v559_v1 = vsel %vm557_vm7, %v537_v7, 0  ;;  %v558_v11 = vsel %vm557_vm7, %v536_v3, 0  ;;  %v2149_v54 = vld [vmem:[%s2999_s3 + $0xc8] sm:$0xff]  }
  0xb3   : > { %v2730_v43 = vcombine.low %v558_v11, %v559_v1  ;;  %v2156_v11 = vld [vmem:[%s2999_s3 + $0x100] sm:$0xff]  }
  0xb4   : > { %546 = vrot.lane.b32.xlu0 %v2638_v25, %s2200_s9  ;;  %v2667_v14 = vsel %vm2524_vm3, 0, %v678_v29  ;;  %v2699_v26 = vsel %vm2651_vm6, %v1244_v23, 0  ;;  %v2150_v29 = vld [vmem:[%s2999_s3 + $0xd0] sm:$0xff]  }
  0xb5   : > { %804 = vrot.lane.b32.xlu1 %v2624_v17, %s2200_s9  ;;  %v617_v47 = vshrl.u32 %v2730_v43, 16  ;;  %v620_v52 = vshll.u32 %v2730_v43, 16 }
  0xb7   : > { %v619_v49 = vrot.slane %v617_v47, 7 }
  0xb8   : > { %729 = vrot.lane.b32.xlu0 %v2649_v5, %s2200_s9 }
  0xb9   : > { %1286 = vrot.lane.b32.xlu1 %v2657_v8, %s2200_s9  ;;  %v622_v51 = vor.u32 %v620_v52, %v619_v49 }
  0xbb   : > { %v699_v62 = vsel %vm2524_vm3, 0, %v622_v51 }
  0xbc   : > { %731 = vrot.lane.b32.xlu0 %v2667_v14, %s2200_s9 }
  0xbd   : > { %1288 = vrot.lane.b32.xlu1 %v2671_v39, %s2200_s9 }
  0xc0   : > { %1278 = vrot.lane.b32.xlu0 %v2687_v24, %s2200_s9 }
  0xc1   : > { %1290 = vrot.lane.b32.xlu1 %v2683_v21, %s2200_s9 }
  0xc4   : > { %1280 = vrot.lane.b32.xlu0 %v2703_v27, %s2200_s9 }
  0xc5   : > { %1292 = vrot.lane.b32.xlu1 %v2699_v26, %s2200_s9 }
  0xc8   : > { %1282 = vrot.lane.b32.xlu0 %v2715_v28, %s2200_s9 }
  0xcc   : > { %1284 = vrot.lane.b32.xlu0 %v2723_v55, %s2200_s9 }
 0x107   : > { %v791_v50 = vpop.permute.xlu1 %790 }
 0x108   : > { %v807_v53 = vsel %vm733_vm0, %v2730_v43, %v791_v50  ;;  %v2158_v50 = vld [vmem:[%s2999_s3 + $0x110] sm:$0xff]  }
 0x109   : > { %976 = vmatmul.mubr.bf16.vlgmr.msra.gmra.mrb[0].mxu0 %v807_v53 }
 0x10a   : > { %1897 = vmatprep.mubr.msk.bf16.mxu0 %vm733_vm0, %v2522_v41  ;;  %1442 = vmatpush1.bf16.msra.mxu0 %v2148_v46 }
 0x10b   : > { %v793_v60 = vpop.permute.xlu1 %792  ;;  %1443 = vmatprep.subr.bf16.mxu0 %v2201_v56 }
 0x10c   : > { %v810_v9 = vsel %vm733_vm0, %v2507_v33, %v793_v60 }
 0x10e   : > { %v718_v61 = vpop.permute.xlu0 %717  ;;  %1444 = vmatpush1.bf16.msra.mxu0 %v2149_v54 }
 0x10f   : > { %v795_v63 = vpop.permute.xlu1 %794  ;;  %v736_v0 = vsel %vm733_vm0, %v699_v62, %v718_v61  ;;  %1445 = vmatprep.subr.bf16.mxu0 %v2201_v56 }
 0x110   : > { %1163 = vmatmul.mubr.bf16.vlgmr.msra.gmra.mrb[0].mxu1 %v736_v0  ;;  %v813_v40 = vsel %vm733_vm0, %v2509_v34, %v795_v63 }
 0x111   : > { %2070 = vmatpush1.bf16.msra.mxu1 %v2148_v46  ;;  %984 = vmatmul.mubr.bf16.gmra.mrb[4].mxu0 %v810_v9 }
 0x112   : > { %1917 = vmatprep.mubr.msk.bf16.mxu1 %vm733_vm0, %v2578_v32  ;;  %1898 = vmatprep.mubr.msk.bf16.mxu0 %vm733_vm0, %v2547_v59  ;;  %v720_v12 = vpop.permute.xlu0 %719 }
 0x113   : > { %2059 = vmatprep.subr.bf16.mxu1 %v2201_v56  ;;  %1446 = vmatpush1.bf16.msra.mxu0 %v2150_v29  ;;  %v797_v15 = vpop.permute.xlu1 %796  ;;  %v740_v19 = vsel %vm733_vm0, %v2543_v58, %v720_v12 }
 0x114   : > { %1447 = vmatprep.subr.bf16.mxu0 %v2201_v56  ;;  %v816_v31 = vsel %vm733_vm0, %v2522_v41, %v797_v15  ;;  %v562_v41 = vstv %s561_s18 }
 0x115   : > { %2071 = vmatpush1.bf16.msra.mxu1 %v2149_v54  ;;  %vm563_vm8 = vcmp.eq.s32.totalorder %v562_v41, 1 }
 0x116   : > { %v722_v33 = vpop.permute.xlu0 %721  ;;  %2060 = vmatprep.subr.bf16.mxu1 %v2201_v56 }
 0x117   : > { %1448 = vmatpush1.bf16.msra.mxu0 %v2151_v13  ;;  %v799_v23 = vpop.permute.xlu1 %798  ;;  %v744_v45 = vsel %vm733_vm0, %v2551_v22, %v722_v33 }
 0x118   : > { %1171 = vmatmul.mubr.bf16.gmra.mrb[4].mxu1 %v740_v19  ;;  %1449 = vmatprep.subr.bf16.mxu0 %v2201_v56  ;;  %v819_v49 = vsel %vm733_vm0, %v2547_v59, %v799_v23 }
 0x119   : > { %992 = vmatmul.mubr.bf16.gmra.mrb[8].mxu0 %v813_v40  ;;  %1918 = vmatprep.mubr.msk.bf16.mxu1 %vm733_vm0, %v2599_v18 }
 0x11a   : > { %1899 = vmatprep.mubr.msk.bf16.mxu0 %vm733_vm0, %v2567_v4  ;;  %v724_v58 = vpop.permute.xlu0 %723  ;;  %2072 = vmatpush1.bf16.msra.mxu1 %v2150_v29  ;;  %v1227_v29 = vrot.slane %v620_v52, 1 }
 0x11b   : > { %2061 = vmatprep.subr.bf16.mxu1 %v2201_v56  ;;  %1450 = vmatpush1.bf16.msra.mxu0 %v2152_v20  ;;  %v801_v57 = vpop.permute.xlu1 %800  ;;  %v748_v1 = vsel %vm733_vm0, %v2578_v32, %v724_v58 }
 0x11c   : > { %1451 = vmatprep.subr.bf16.mxu0 %v2201_v56  ;;  %v822_v53 = vsel %vm733_vm0, %v2567_v4, %v801_v57 }
 0x11e   : > { %v726_v34 = vpop.permute.xlu0 %725  ;;  %2073 = vmatpush1.bf16.msra.mxu1 %v2151_v13 }
 0x11f   : > { %2062 = vmatprep.subr.bf16.mxu1 %v2201_v56  ;;  %1452 = vmatpush1.bf16.msra.mxu0 %v2153_v38  ;;  %v549_v36 = vpop.permute.xlu1 %548  ;;  %v752_v46 = vsel %vm733_vm0, %v2599_v18, %v726_v34  ;;  %v2159_v18 = vld [vmem:[%s2999_s3 + $0x118] sm:$0xff]  }
 0x120   : > { %1179 = vmatmul.mubr.bf16.gmra.mrb[8].mxu1 %v744_v45  ;;  %1453 = vmatprep.subr.bf16.mxu0 %v2201_v56  ;;  %v553_v7 = vmax.bf16 %v549_v36, %v2617_v44 }
 0x121   : > { %1000 = vmatmul.mubr.bf16.gmra.mrb[12].mxu0 %v816_v31  ;;  %1919 = vmatprep.mubr.msk.bf16.mxu1 %vm733_vm0, %v2615_v42 }
 0x122   : > { %1900 = vmatprep.mubr.msk.bf16.mxu0 %vm733_vm0, %v2593_v35  ;;  %v728_v22 = vpop.permute.xlu0 %727  ;;  %2074 = vmatpush1.bf16.msra.mxu1 %v2152_v20  ;;  %v565_v32 = vsel %vm563_vm8, %v553_v7, 0 }
 0x123   : > { %2063 = vmatprep.subr.bf16.mxu1 %v2201_v56  ;;  %1454 = vmatpush1.bf16.msra.mxu0 %v2154_v10  ;;  %v803_v4 = vpop.permute.xlu1 %802  ;;  %v756_v60 = vsel %vm733_vm0, %v2615_v42, %v728_v22 }
 0x124   : > { %1455 = vmatprep.subr.bf16.mxu0 %v2201_v56 }
 0x126   : > { %v547_v37 = vpop.permute.xlu0 %546  ;;  %2075 = vmatpush1.bf16.msra.mxu1 %v2153_v38 }
 0x127   : > { %v552_v3 = vmax.bf16 %v547_v37, %v2638_v25  ;;  %2064 = vmatprep.subr.bf16.mxu1 %v2201_v56  ;;  %1456 = vmatpush1.bf16.msra.mxu0 %v2155_v2  ;;  %v2157_v25 = vld [vmem:[%s2999_s3 + $0x108] sm:$0xff]   ;;  %v805_v42 = vpop.permute.xlu1 %804 }
 0x128   : > { %1187 = vmatmul.mubr.bf16.gmra.mrb[12].mxu1 %v748_v1  ;;  %1457 = vmatprep.subr.bf16.mxu0 %v2201_v56 }
 0x129   : > { %1008 = vmatmul.mubr.bf16.gmra.mrb[16].mxu0 %v819_v49  ;;  %1920 = vmatprep.mubr.msk.bf16.mxu1 %vm733_vm0, %v2631_v48  ;;  %v564_v44 = vsel %vm563_vm8, %v552_v3, 0 }
 0x12a   : > { %1901 = vmatprep.mubr.msk.bf16.mxu0 %vm733_vm0, %v2609_v30  ;;  %2076 = vmatpush1.bf16.msra.mxu1 %v2154_v10  ;;  %v2824_v59 = vcombine.low %v564_v44, %v565_v32  ;;  %v730_v62 = vpop.permute.xlu0 %729 }
 0x12b   : > { %2065 = vmatprep.subr.bf16.mxu1 %v2201_v56  ;;  %1458 = vmatpush1.bf16.msra.mxu0 %v2156_v11  ;;  %v760_v9 = vsel %vm733_vm0, %v2631_v48, %v730_v62 }
 0x12c   : > { %1459 = vmatprep.subr.bf16.mxu0 %v2201_v56  ;;  %v680_v51 = vshrl.u32 %v2824_v59, 16  ;;  %v683_v61 = vshll.u32 %v2824_v59, 16 }
 0x12e   : > { %2077 = vmatpush1.bf16.msra.mxu1 %v2155_v2  ;;  %v682_v54 = vrot.slane %v680_v51, 7  ;;  %v1245_v20 = vrot.slane %v683_v61, 1 }
 0x12f   : > { %2066 = vmatprep.subr.bf16.mxu1 %v2201_v56  ;;  %1460 = vmatpush1.bf16.msra.mxu0 %v2157_v25 }
 0x130   : > { %1195 = vmatmul.mubr.bf16.gmra.mrb[16].mxu1 %v752_v46  ;;  %1461 = vmatprep.subr.bf16.mxu0 %v2201_v56  ;;  %v685_v63 = vor.u32 %v683_v61, %v682_v54  ;;  %v1246_v40 = vor.u32 %v1245_v20, %v680_v51 }
 0x131   : > { %1016 = vmatmul.mubr.bf16.gmra.mrb[20].mxu0 %v822_v53  ;;  %1921 = vmatprep.mubr.msk.bf16.mxu1 %vm733_vm0, %v2649_v5 }
 0x132   : > { %1902 = vmatprep.mubr.msk.bf16.mxu0 %vm733_vm0, %v2624_v17  ;;  %2078 = vmatpush1.bf16.msra.mxu1 %v2156_v11  ;;  %v825_v17 = vsel %vm733_vm0, %v2593_v35, %v803_v4  ;;  %v708_v0 = vsel %vm2524_vm3, 0, %v685_v63  ;;  %v732_v35 = vpop.permute.xlu0 %731 }
 0x133   : > { %2067 = vmatprep.subr.bf16.mxu1 %v2201_v56  ;;  %1462 = vmatpush1.bf16.msra.mxu0 %v2158_v50  ;;  %v764_v48 = vsel %vm733_vm0, %v2649_v5, %v732_v35 }
 0x134   : > { %1463 = vmatprep.subr.bf16.mxu0 %v2201_v56 }
 0x136   : > { %2079 = vmatpush1.bf16.msra.mxu1 %v2157_v25  ;;  %v1279_v16 = vpop.permute.xlu0 %1278 }
 0x137   : > { %2068 = vmatprep.subr.bf16.mxu1 %v2201_v56  ;;  %1464 = vmatpush1.bf16.msra.mxu0 %v2159_v18 }
 0x138   : > { %1203 = vmatmul.mubr.bf16.gmra.mrb[20].mxu1 %v756_v60 }
 0x139   : > { %1024 = vmatmul.mubr.bf16.gmra.mrb[24].mxu0 %v825_v17  ;;  %1922 = vmatprep.mubr.msk.bf16.mxu1 %vm733_vm0, %v2667_v14  ;;  %v828_v14 = vsel %vm733_vm0, %v2609_v30, %v805_v42  ;;  %v1287_v30 = vpop.permute.xlu1 %1286 }
 0x13a   : > { %1903 = vmatprep.mubr.msk.bf16.mxu0 %vm733_vm0, %v2824_v59  ;;  %2080 = vmatpush1.bf16.msra.mxu1 %v2158_v50  ;;  %v1281_v43 = vpop.permute.xlu0 %1280 }
 0x13b   : > { %2069 = vmatprep.subr.bf16.mxu1 %v2201_v56  ;;  %v1228_v56 = vor.u32 %v1227_v29, %v617_v47  ;;  %v1312_v47 = vsel %vm733_vm0, %v2723_v55, %v1287_v30  ;;  %v1300_v13 = vsel %vm733_vm0, %v2687_v24, %v1281_v43 }
 0x13d   : > { %v1260_v52 = vsel %vm2651_vm6, %v1228_v56, 0  ;;  %v1289_v5 = vpop.permute.xlu1 %1288 }
 0x13e   : > { %2081 = vmatpush1.bf16.msra.mxu1 %v2159_v18  ;;  %v1296_v12 = vsel %vm733_vm0, %v1260_v52, %v1279_v16  ;;  %v1283_v15 = vpop.permute.xlu0 %1282  ;;  %v1316_v33 = vsel %vm733_vm0, %v2657_v8, %v1289_v5 }
 0x13f   : > { %v1304_v19 = vsel %vm733_vm0, %v2703_v27, %v1283_v15 }
 0x140   : > { %1211 = vmatmul.mubr.bf16.gmra.mrb[24].mxu1 %v760_v9 }
 0x141   : > { %1032 = vmatmul.mubr.bf16.gmra.mrb[28].mxu0 %v828_v14  ;;  %1923 = vmatprep.mubr.msk.bf16.mxu1 %vm733_vm0, %v708_v0  ;;  %v1291_v24 = vpop.permute.xlu1 %1290 }
 0x142   : > { %1960 = vmatprep.mubr.msk.bf16.mxu0 %vm733_vm0, %v2703_v27  ;;  %v1320_v23 = vsel %vm733_vm0, %v2671_v39, %v1291_v24  ;;  %v1269_v27 = vsel %vm2651_vm6, %v1246_v40, 0 }
 0x148   : > { %1219 = vmatmul.mubr.bf16.gmra.mrb[28].mxu1 %v764_v48 }
 0x149   : > { %1474 = vmatmul.mubr.bf16.vlgmr.msra.gmra.mrb[32].mxu0 %v1296_v12  ;;  %1964 = vmatprep.mubr.msk.bf16.mxu1 %vm733_vm0, %v2671_v39 }
 0x14a   : > { %1961 = vmatprep.mubr.msk.bf16.mxu0 %vm733_vm0, %v2715_v28 }
 0x150   : > { %1506 = vmatmul.mubr.bf16.vlgmr.msra.gmra.mrb[32].mxu1 %v1312_v47 }
 0x151   : > { %1482 = vmatmul.mubr.bf16.gmra.mrb[36].mxu0 %v1300_v13  ;;  %1965 = vmatprep.mubr.msk.bf16.mxu1 %vm733_vm0, %v2683_v21 }
 0x152   : > { %1962 = vmatprep.mubr.msk.bf16.mxu0 %vm733_vm0, %v2723_v55  ;;  %v1285_v55 = vpop.permute.xlu0 %1284 }
 0x153   : > { %v1308_v58 = vsel %vm733_vm0, %v2715_v28, %v1285_v55 }
 0x158   : > { %1514 = vmatmul.mubr.bf16.gmra.mrb[36].mxu1 %v1316_v33 }
 0x159   : > { %1490 = vmatmul.mubr.bf16.gmra.mrb[40].mxu0 %v1304_v19  ;;  %1966 = vmatprep.mubr.msk.bf16.mxu1 %vm733_vm0, %v2699_v26  ;;  %v1293_v26 = vpop.permute.xlu1 %1292 }
 0x15a   : > { %1963 = vmatprep.mubr.msk.bf16.mxu0 %vm733_vm0, %v2657_v8  ;;  %v1324_v8 = vsel %vm733_vm0, %v2683_v21, %v1293_v26 }
 0x160   : > { %1522 = vmatmul.mubr.bf16.gmra.mrb[40].mxu1 %v1320_v23 }
 0x161   : > { %1498 = vmatmul.mubr.bf16.gmra.mrb[44].mxu0 %v1308_v58  ;;  %1967 = vmatprep.mubr.msk.bf16.mxu1 %vm733_vm0, %v1269_v27 }
 0x168   : > { %1530 = vmatmul.mubr.bf16.gmra.mrb[44].mxu1 %v1324_v8 }
 0x1dc   : > { %v977_v38 = vpop.f32.mrb[0].mxu0 }
 0x1dd   : > { %v979_v34 = vpop.f32.mrb[1].mxu0 }
 0x1de   : > { %v980_v45 = vpop.f32.mrb[2].mxu0 }
 0x1df   : > { %v982_v10 = vpop.f32.mrb[3].mxu0 }
 0x1e3   : > { %v1164_v39 = vpop.f32.mrb[0].mxu1 }
 0x1e4   : > { %v2903_v57 = vadd.f32 %v1164_v39, %v977_v38  ;;  %v985_v31 = vpop.f32.mrb[4].mxu0  ;;  %v1166_v28 = vpop.f32.mrb[1].mxu1 }
 0x1e5   : > { %v987_v22 = vpop.f32.mrb[5].mxu0  ;;  %v1167_v6 = vpop.f32.mrb[2].mxu1 }
 0x1e6   : > { %v2905_v2 = vadd.f32 %v1167_v6, %v980_v45  ;;  %v988_v41 = vpop.f32.mrb[6].mxu0  ;;  %v1169_v36 = vpop.f32.mrb[3].mxu1 }
 0x1e7   : > { %v990_v37 = vpop.f32.mrb[7].mxu0 }
 0x1eb   : > { %v1172_v7 = vpop.f32.mrb[4].mxu1 }
 0x1ec   : > { %v2907_v3 = vadd.f32 %v1172_v7, %v985_v31  ;;  %v993_v21 = vpop.f32.mrb[8].mxu0  ;;  %v1174_v1 = vpop.f32.mrb[5].mxu1 }
 0x1ed   : > { %v995_v11 = vpop.f32.mrb[9].mxu0  ;;  %v1175_v49 = vpop.f32.mrb[6].mxu1  ;;  %v2934_v1 = vld [vmem:[%s3000_s4] ss:$0 sm:$0xff] }
 0x1ee   : > { %v2909_v32 = vadd.f32 %v1175_v49, %v988_v41  ;;  %v996_v44 = vpop.f32.mrb[10].mxu0  ;;  %v1177_v25 = vpop.f32.mrb[7].mxu1 }
 0x1ef   : > { %v998_v59 = vpop.f32.mrb[11].mxu0 }
 0x1f3   : > { %v1180_v46 = vpop.f32.mrb[8].mxu1 }
 0x1f4   : > { %v2911_v50 = vadd.f32 %v1180_v46, %v993_v21  ;;  %v1001_v53 = vpop.f32.mrb[12].mxu0  ;;  %v1182_v51 = vpop.f32.mrb[9].mxu1 }
 0x1f5   : > { %v1003_v18 = vpop.f32.mrb[13].mxu0  ;;  %v1183_v4 = vpop.f32.mrb[10].mxu1 }
 0x1f6   : > { %v2913_v54 = vadd.f32 %v1183_v4, %v996_v44  ;;  %v1004_v60 = vpop.f32.mrb[14].mxu0  ;;  %v1185_v17 = vpop.f32.mrb[11].mxu1 }
 0x1f7   : > { %v1006_v61 = vpop.f32.mrb[15].mxu0 }
 0x1fb   : > { %v1188_v62 = vpop.f32.mrb[12].mxu1 }
 0x1fc   : > { %v2915_v63 = vadd.f32 %v1188_v62, %v1001_v53  ;;  %v1009_v42 = vpop.f32.mrb[16].mxu0  ;;  %v1190_v0 = vpop.f32.mrb[13].mxu1 }
 0x1fd   : > { %v1011_v35 = vpop.f32.mrb[17].mxu0  ;;  %v1191_v29 = vpop.f32.mrb[14].mxu1 }
 0x1fe   : > { %v2917_v9 = vadd.f32 %v1191_v29, %v1004_v60  ;;  %v1012_v14 = vpop.f32.mrb[18].mxu0  ;;  %v1193_v56 = vpop.f32.mrb[15].mxu1 }
 0x1ff   : > { %v1014_v16 = vpop.f32.mrb[19].mxu0 }
 0x203   : > { %v1196_v52 = vpop.f32.mrb[16].mxu1 }
 0x204   : > { %v1197_v48 = vadd.f32 %v1196_v52, %v1009_v42  ;;  %v1017_v12 = vpop.f32.mrb[20].mxu0  ;;  %v1198_v30 = vpop.f32.mrb[17].mxu1 }
 0x205   : > { %v1019_v43 = vpop.f32.mrb[21].mxu0  ;;  %v1199_v47 = vpop.f32.mrb[18].mxu1 }
 0x206   : > { %v1200_v13 = vadd.f32 %v1199_v47, %v1012_v14  ;;  %v1020_v5 = vpop.f32.mrb[22].mxu0  ;;  %v1201_v15 = vpop.f32.mrb[19].mxu1 }
 0x207   : > { %v1022_v33 = vpop.f32.mrb[23].mxu0 }
 0x20b   : > { %v1204_v19 = vpop.f32.mrb[20].mxu1 }
 0x20c   : > { %v2919_v20 = vadd.f32 %v1204_v19, %v1017_v12  ;;  %v1025_v24 = vpop.f32.mrb[24].mxu0  ;;  %v1206_v40 = vpop.f32.mrb[21].mxu1 }
 0x20d   : > { %v1027_v55 = vpop.f32.mrb[25].mxu0  ;;  %v1207_v23 = vpop.f32.mrb[22].mxu1 }
 0x20e   : > { %v2921_v58 = vadd.f32 %v1207_v23, %v1020_v5  ;;  %v1028_v27 = vpop.f32.mrb[26].mxu0  ;;  %v1209_v26 = vpop.f32.mrb[23].mxu1 }
 0x20f   : > { %v1030_v8 = vpop.f32.mrb[27].mxu0 }
 0x213   : > { %v1212_v38 = vpop.f32.mrb[24].mxu1 }
 0x214   : > { %v2923_v34 = vadd.f32 %v1212_v38, %v1025_v24  ;;  %v1033_v45 = vpop.f32.mrb[28].mxu0  ;;  %v1214_v10 = vpop.f32.mrb[25].mxu1 }
 0x215   : > { %v1035_v39 = vpop.f32.mrb[29].mxu0  ;;  %v1215_v31 = vpop.f32.mrb[26].mxu1 }
 0x216   : > { %v2925_v28 = vadd.f32 %v1215_v31, %v1028_v27  ;;  %v1036_v22 = vpop.f32.mrb[30].mxu0  ;;  %v1217_v6 = vpop.f32.mrb[27].mxu1 }
 0x217   : > { %v1038_v41 = vpop.f32.mrb[31].mxu0 }
 0x21b   : > { %v1220_v36 = vpop.f32.mrb[28].mxu1 }
 0x21c   : > { %v2929_v37 = vadd.f32 %v1220_v36, %v1033_v45  ;;  %v1222_v7 = vpop.f32.mrb[29].mxu1  ;;  %v1475_v21 = vpop.f32.mrb[32].mxu0 }
 0x21d   : > { %v1538_v11 = vadd.f32 %v1475_v21, %v2903_v57  ;;  %v1223_v49 = vpop.f32.mrb[30].mxu1  ;;  %v1477_v44 = vpop.f32.mrb[33].mxu0 }
 0x21e   : > { %v2937_v25 = vadd.f32 %v1223_v49, %v1036_v22  ;;  %v1225_v59 = vpop.f32.mrb[31].mxu1  ;;  %v1478_v46 = vpop.f32.mrb[34].mxu0 }
 0x21f   : > { %v1561_v53 = vadd.f32 %v2934_v1, %v1538_v11  ;;  %v1539_v51 = vadd.f32 %v1478_v46, %v2905_v2  ;;  %v1480_v18 = vpop.f32.mrb[35].mxu0 }
 0x221   : > { %v1562_v4 = vadd.f32 %v2934_v1, %v1539_v51  ;;  %v1577_v60 = vmax.f32 %v1561_v53, 0.0 }
 0x223   : > { %v1578_v17 = vmax.f32 %v1562_v4, 0.0  ;;  %v1507_v61 = vpop.f32.mrb[32].mxu1 }
 0x224   : > { %v1546_v57 = vadd.f32 %v1507_v61, %v1197_v48  ;;  %v1483_v62 = vpop.f32.mrb[36].mxu0  ;;  %v1509_v42 = vpop.f32.mrb[33].mxu1 }
 0x225   : > { %v2014_v0 = vpack.c.bf16 %v1578_v17, %v1577_v60  ;;  %v1540_v35 = vadd.f32 %v1483_v62, %v2907_v3  ;;  %v1485_v2 = vpop.f32.mrb[37].mxu0  ;;  %v1510_v29 = vpop.f32.mrb[34].mxu1 }
 0x226   : > { %v1569_v14 = vadd.f32 %v2934_v1, %v1546_v57  ;;  %v1547_v56 = vadd.f32 %v1510_v29, %v1200_v13  ;;  %v1486_v16 = vpop.f32.mrb[38].mxu0  ;;  %v1512_v52 = vpop.f32.mrb[35].mxu1 }
 0x227   : > { %2015 = vst [vmem:[%s2945_s27] sm:$0xff] %v2014_v0   ;;  %v1563_v12 = vadd.f32 %v2934_v1, %v1540_v35  ;;  %v1541_v30 = vadd.f32 %v1486_v16, %v2909_v32  ;;  %v1488_v43 = vpop.f32.mrb[39].mxu0 }
 0x228   : > { %v1570_v48 = vadd.f32 %v2934_v1, %v1547_v56  ;;  %v1585_v5 = vmax.f32 %v1569_v14, 0.0 }
 0x229   : > { %v1564_v47 = vadd.f32 %v2934_v1, %v1541_v30  ;;  %v1579_v15 = vmax.f32 %v1563_v12, 0.0 }
 0x22a   : > { %v1586_v3 = vmax.f32 %v1570_v48, 0.0 }
 0x22b   : > { %v1580_v33 = vmax.f32 %v1564_v47, 0.0  ;;  %v1515_v19 = vpop.f32.mrb[36].mxu1 }
 0x22c   : > { %v2034_v13 = vpack.c.bf16 %v1586_v3, %v1585_v5  ;;  %v1548_v24 = vadd.f32 %v1515_v19, %v2919_v20  ;;  %v1491_v40 = vpop.f32.mrb[40].mxu0  ;;  %v1517_v55 = vpop.f32.mrb[37].mxu1 }
 0x22d   : > { %v2019_v23 = vpack.c.bf16 %v1580_v33, %v1579_v15  ;;  %v1542_v32 = vadd.f32 %v1491_v40, %v2911_v50  ;;  %v1493_v27 = vpop.f32.mrb[41].mxu0  ;;  %v1518_v26 = vpop.f32.mrb[38].mxu1 }
 0x22e   : > { %2054 = vst [vmem:[%s2945_s27 + $0x20] sm:$0xff] %v2034_v13   ;;  %v1571_v8 = vadd.f32 %v2934_v1, %v1548_v24  ;;  %v1549_v38 = vadd.f32 %v1518_v26, %v2921_v58  ;;  %v1494_v45 = vpop.f32.mrb[42].mxu0  ;;  %v1520_v10 = vpop.f32.mrb[39].mxu1 }
 0x22f   : > { %2051 = vst [vmem:[%s2945_s27 + $0x8] sm:$0xff] %v2019_v23   ;;  %v1565_v39 = vadd.f32 %v2934_v1, %v1542_v32  ;;  %v1543_v31 = vadd.f32 %v1494_v45, %v2913_v54  ;;  %v1496_v20 = vpop.f32.mrb[43].mxu0 }
 0x230   : > { %v1572_v22 = vadd.f32 %v2934_v1, %v1549_v38  ;;  %v1587_v6 = vmax.f32 %v1571_v8, 0.0 }
 0x231   : > { %v1566_v50 = vadd.f32 %v2934_v1, %v1543_v31  ;;  %v1581_v36 = vmax.f32 %v1565_v39, 0.0 }
 0x232   : > { %v1588_v41 = vmax.f32 %v1572_v22, 0.0 }
 0x233   : > { %v1582_v7 = vmax.f32 %v1566_v50, 0.0  ;;  %v1523_v21 = vpop.f32.mrb[40].mxu1 }
 0x234   : > { %v2039_v58 = vpack.c.bf16 %v1588_v41, %v1587_v6  ;;  %v1550_v11 = vadd.f32 %v1523_v21, %v2923_v34  ;;  %v1499_v49 = vpop.f32.mrb[44].mxu0  ;;  %v1525_v44 = vpop.f32.mrb[41].mxu1 }
 0x235   : > { %v2024_v59 = vpack.c.bf16 %v1582_v7, %v1581_v36  ;;  %v1544_v54 = vadd.f32 %v1499_v49, %v2915_v63  ;;  %v1501_v46 = vpop.f32.mrb[45].mxu0  ;;  %v1526_v53 = vpop.f32.mrb[42].mxu1 }
 0x236   : > { %2055 = vst [vmem:[%s2945_s27 + $0x28] sm:$0xff] %v2039_v58   ;;  %v1573_v51 = vadd.f32 %v2934_v1, %v1550_v11  ;;  %v1551_v18 = vadd.f32 %v1526_v53, %v2925_v28  ;;  %v1502_v4 = vpop.f32.mrb[46].mxu0  ;;  %v1528_v60 = vpop.f32.mrb[43].mxu1 }
 0x237   : > { %2052 = vst [vmem:[%s2945_s27 + $0x10] sm:$0xff] %v2024_v59   ;;  %v1567_v17 = vadd.f32 %v2934_v1, %v1544_v54  ;;  %v1545_v34 = vadd.f32 %v1502_v4, %v2917_v9  ;;  %v1504_v61 = vpop.f32.mrb[47].mxu0 }
 0x238   : > { %v1574_v57 = vadd.f32 %v2934_v1, %v1551_v18  ;;  %v1589_v62 = vmax.f32 %v1573_v51, 0.0 }
 0x239   : > { %v1568_v63 = vadd.f32 %v2934_v1, %v1545_v34  ;;  %v1583_v0 = vmax.f32 %v1567_v17, 0.0 }
 0x23a   : > { %v1590_v42 = vmax.f32 %v1574_v57, 0.0 }
 0x23b   : > { %v1584_v35 = vmax.f32 %v1568_v63, 0.0  ;;  %v1531_v28 = vpop.f32.mrb[44].mxu1 }
 0x23c   : > { %v2044_v2 = vpack.c.bf16 %v1590_v42, %v1589_v62  ;;  %v1552_v29 = vadd.f32 %v1531_v28, %v2929_v37  ;;  %v1533_v14 = vpop.f32.mrb[45].mxu1 }
 0x23d   : > { %v2029_v56 = vpack.c.bf16 %v1584_v35, %v1583_v0  ;;  %v1534_v16 = vpop.f32.mrb[46].mxu1 }
 0x23e   : > { %2056 = vst [vmem:[%s2945_s27 + $0x30] sm:$0xff] %v2044_v2   ;;  %v1575_v9 = vadd.f32 %v2934_v1, %v1552_v29  ;;  %v1553_v52 = vadd.f32 %v1534_v16, %v2937_v25  ;;  %v1536_v12 = vpop.f32.mrb[47].mxu1 }
 0x23f   : > { %2053 = vst [vmem:[%s2945_s27 + $0x18] sm:$0xff] %v2029_v56  }
 0x240   : > { %v1576_v30 = vadd.f32 %v2934_v1, %v1553_v52  ;;  %v1591_v43 = vmax.f32 %v1575_v9, 0.0 }
 0x242   : > { %v1592_v48 = vmax.f32 %v1576_v30, 0.0 }
 0x244   : > { %v2049_v47 = vpack.c.bf16 %v1592_v48, %v1591_v43 }
 0x246   : > { %2057 = vst [vmem:[%s2945_s27 + $0x38] sm:$0xff] %v2049_v47  }
 0x247 PF: > { %s15_s22 = sadd.s32 1, %s2198_s22   ;;  %s3007_s18 = smov %s2190_s20 }
 0x248   : > { %p12_p12 = scmp.ge.s32.totalorder %s15_s22, 6   ;;  %s3008_s19 = smov %s2194_s21 }
 0x249   : > { %s3009_s20 = smov %s3012_s23  ;;  %s3010_s21 = smov %s3016_s24 }
 0x24a   :  { %14 = sbr.rel (!%p12_p12) target bundleno = 3 (0x3), region = 78 }

// kernel: vgg16_relu2_2.5
= control target key start
LH: loop header
LB: loop body
LE: loop exit
PB: predicated region body
PF: predicated region fallthrough
CT: control target
= control target key end

     0   :  { %s4319_s18 = smov 0   ;;  %s4321_s19 = smov 0   ;;  %s5981_s0 = inlined_call_operand.vmem [shape: bf16[2,32,32,64], index: 0, kind: input, shape index: {}, may-alias: {0,1,2}]   ;;  %s5982_s1 = inlined_call_operand.vmem [shape: bf16[2,32,32,64], index: 1, kind: input, shape index: {}, may-alias: {0,1,2}]   ;;  %s5983_s2 = inlined_call_operand.vmem [shape: bf16[2,32,32,64], index: 2, kind: input, shape index: {}, may-alias: {0,1,2}]   ;;  %s5984_s3 = inlined_call_operand.vmem [shape: bf16[3,192,64], index: 3, kind: input, shape index: {}]   ;;  %s5985_s4 = inlined_call_operand.vmem [shape: f32[1,64], index: 4, kind: input, shape index: {}]   ;;  %s5986_s5 = inlined_call_operand.vmem [shape: bf16[2,32,32,64], index: 5, kind: output, shape index: {}]  }
   0x1   :  { %s4323_s20 = smov 0   ;;  %s4325_s21 = smov 0  }
   0x2   :  { %s4327_s22 = smov 0  }
   0x3 LB: > { %s24_s23 = sadd.s32 1, %s4277_s20  ;;  %s27_s24 = sadd.s32 1, %s4281_s21  ;;  %s4285_s22 = sphi %s4327_s22, %s15_s22   ;;  %s4281_s21 = sphi %s4325_s21, %s6155_s21   ;;  %s4277_s20 = sphi %s4323_s20, %s6154_s20   ;;  %s4273_s19 = sphi %s4321_s19, %s6153_s19   ;;  %s4269_s18 = sphi %s4319_s18, %s6152_s18  }
   0x4   : > { %p25_p0 = scmp.ge.s32.totalorder %s24_s23, 2  ;;  %p3705_p1 = scmp.ge.s32.totalorder %s4285_s22, 1 }
   0x5   : > { %p273_p2 = scmp.lt.s32.totalorder %s4285_s22, 5 }
   0x6   : > { %s6157_s23 = smov (%p25_p0, %s24_s23), 0  ;;  %s6159_s24 = smov (!%p25_p0, %s27_s24), %s4281_s21 }
   0x7   : > { %p274_p3 = pnand %p3705_p1, %p273_p2  ;;  %p29_p4 = scmp.ge.s32.totalorder %s6159_s24, 2 }
   0x9   : > { %s6161_s24 = smov (%p29_p4, %s6159_s24), 0  ;;  %277 = sbr.rel (%p274_p3) target bundleno = 746 (0x2ea), region = 40 }
  0x10   : > { %s4352_s25 = sshll.u32 %s4269_s18, 4  ;;  %p338_p5 = scmp.lt.s32.totalorder %s4273_s19, 1  ;;  %v4170_v0 = vld [vmem:[%s5984_s3 + $0x60] sm:$0xff]   ;;  %v5987_v1 = vmov 0   ;;  %v4172_v2 = vld [vmem:[%s5984_s3 + $0x68] sm:$0xff]   ;;  %v4174_v3 = vld [vmem:[%s5984_s3 + $0x70] sm:$0xff]  }
  0x11   : > { %p340_p6 = scmp.lt.s32.totalorder %s4352_s25, 31  ;;  %4086 = vmatprep.subr.bf16.mxu1 %v5987_v1  ;;  %1525 = vmatprep.subr.bf16.mxu0 %v5987_v1  ;;  %v4176_v4 = vld [vmem:[%s5984_s3 + $0x78] sm:$0xff]   ;;  %s4288_s17 = smov 64   ;;  %v4178_v8 = vld [vmem:[%s5984_s3 + $0x80] sm:$0xff]   ;;  %vm1051_vm0 = vcmask 523264   ;;  %v4180_v12 = vld [vmem:[%s5984_s3 + $0x88] sm:$0xff]  }
  0x12   : > { %s6163_s19 = smov (!%p338_p5, %s4273_s19), 1  ;;  %4098 = vmatpush1.bf16.msra.mxu1 %v4170_v0  ;;  %1526 = vmatpush1.bf16.msra.mxu0 %v4170_v0  ;;  %v4182_v15 = vld [vmem:[%s5984_s3 + $0x90] sm:$0xff]   ;;  %v4184_v18 = vld [vmem:[%s5984_s3 + $0x98] sm:$0xff]   ;;  %v4186_v24 = vld [vmem:[%s5984_s3 + $0xa0] sm:$0xff]   ;;  %vm951_vm1 = vcmask 1040384   ;;  %v6034_v52 = vmov 0 }
  0x13   : > { %s341_s30 = scalar_select %p340_p6, %s4352_s25, 31  ;;  %4087 = vmatprep.subr.bf16.mxu1 %v5987_v1  ;;  %1527 = vmatprep.subr.bf16.mxu0 %v5987_v1  ;;  %v4188_v26 = vld [vmem:[%s5984_s3 + $0xa8] sm:$0xff]   ;;  %v4190_v29 = vld [vmem:[%s5984_s3 + $0xb0] sm:$0xff]   ;;  %v4192_v32 = vld [vmem:[%s5984_s3 + $0xb8] sm:$0xff]   ;;  %vm662_vm2 = vsmask.f32 256 }
  0x14   : > { %s4366_s6 = sshll.u32 %s6163_s19, 7  ;;  %vm4595_vm3 = vmand %vm951_vm1, %vm662_vm2  ;;  %vm2243_vm4 = vsmask.f32 7424  ;;  %vm2352_vm5 = vcmask 1047552   ;;  %s4676_s28 = sadd.s32 4294967295, %s4352_s25  ;;  %vm3489_vm9 = vcmask 519168  }
  0x15   : > { %s3707_s7 = sshll.u32 %s341_s30, 2  ;;  %v6035_v52 = vsel %vm4595_vm3, 4294967295, %v6034_v52  ;;  %vm4619_vm6 = vmand %vm2352_vm5, %vm2243_vm4  ;;  %p350_p7 = scmp.gt.s32.totalorder %s4676_s28, 0 }
  0x16   : > { %s4369_s8 = sadd.s32 %s4366_s6, %s3707_s7  ;;  %4099 = vmatpush1.bf16.msra.mxu1 %v4172_v2  ;;  %1528 = vmatpush1.bf16.msra.mxu0 %v4172_v2  ;;  %6036 = vst [vmem:[#allocation2_spill] sm:$0xff] %v6035_v52  ;;  %p3712_p8 = scmp.lt.s32.totalorder %s4676_s28, 31 }
  0x17   : > { %s3709_s11 = sshll.u32 %s4369_s8, 2  ;;  %4088 = vmatprep.subr.bf16.mxu1 %v5987_v1  ;;  %1529 = vmatprep.subr.bf16.mxu0 %v5987_v1  ;;  %p466_p9 = scmp.gt.s32.totalorder %s4269_s18, 0 }
  0x18   : > { %s4382_s14 = scalar_lea.vmem %s5981_s0, %s3709_s11  ;;  %p474_p11 = scmp.lt.s32.totalorder %s4269_s18, 1 }
  0x19   : > { %v4388_v5 = vld [vmem:[%s4382_s14 + $0x80] sm:$0xff]   ;;  %v4396_v7 = vld [vmem:[%s4382_s14 + $0x88] sm:$0xff]   ;;  %v4409_v10 = vld [vmem:[%s4382_s14 + $0x90] sm:$0xff]   ;;  %s351_s29 = scalar_select %p350_p7, %s4676_s28, 0 }
  0x1a   : > { %v4391_v6 = vld [vmem:[%s4382_s14] sm:$0xff]   ;;  %4100 = vmatpush1.bf16.msra.mxu1 %v4174_v3  ;;  %1530 = vmatpush1.bf16.msra.mxu0 %v4174_v3  ;;  %v4406_v9 = vld [vmem:[%s4382_s14 + $0x8] sm:$0xff]   ;;  %v4414_v11 = vld [vmem:[%s4382_s14 + $0x10] sm:$0xff]   ;;  %s467_s9 = scalar_select %p466_p9, 1, 0 }
  0x1b   : > { %1236 = vrot.lane.b32.xlu0 %v4388_v5, %s4288_s17  ;;  %4089 = vmatprep.subr.bf16.mxu1 %v5987_v1  ;;  %v4430_v13 = vld [vmem:[%s4382_s14 + $0x98] sm:$0xff]   ;;  %v4445_v16 = vld [vmem:[%s4382_s14 + $0xa0] sm:$0xff]   ;;  %v4460_v19 = vld [vmem:[%s4382_s14 + $0xa8] sm:$0xff]   ;;  %v679_v38 = vshrl.u32 %v4391_v6, 16  ;;  %v682_v41 = vshll.u32 %v4391_v6, 16  ;;  %v689_v45 = vshll.u32 %v4406_v9, 16  ;;  %s5669_s28 = scalar_lea.vmem %s5986_s5, %s3709_s11 }
  0x1c   : > { %1531 = vmatprep.subr.bf16.mxu0 %v5987_v1  ;;  %1238 = vrot.lane.b32.xlu1 %v4396_v7, %s4288_s17  ;;  %v4437_v14 = vld [vmem:[%s4382_s14 + $0x18] sm:$0xff]   ;;  %v4452_v17 = vld [vmem:[%s4382_s14 + $0x20] sm:$0xff]   ;;  %v4467_v20 = vld [vmem:[%s4382_s14 + $0x28] sm:$0xff]   ;;  %v686_v46 = vshrl.u32 %v4406_v9, 16  ;;  %v694_v54 = vshrl.u32 %v4414_v11, 16  ;;  %v697_v61 = vshll.u32 %v4414_v11, 16 }
  0x1d   : > { %3819 = vmatprep.mubr.msk.bf16.mxu1 %vm1051_vm0, %v4409_v10  ;;  %3803 = vmatprep.mubr.msk.bf16.mxu0 %vm1051_vm0, %v4414_v11  ;;  %v4472_v21 = vld [vmem:[%s4382_s14 + $0xb0] sm:$0xff]   ;;  %v4482_v23 = vld [vmem:[%s4382_s14 + $0xb8] sm:$0xff]   ;;  %v4501_v27 = vld [vmem:[%s4382_s14 + $0xc0] sm:$0xff]   ;;  %v681_v42 = vrot.slane %v679_v38, 7  ;;  %v2249_v44 = vrot.slane %v682_v41, 1  ;;  %v2251_v56 = vrot.slane %v689_v45, 1 }
  0x1e   : > { %4101 = vmatpush1.bf16.msra.mxu1 %v4176_v4  ;;  %1532 = vmatpush1.bf16.msra.mxu0 %v4176_v4  ;;  %v4479_v22 = vld [vmem:[%s4382_s14 + $0x30] sm:$0xff]   ;;  %v4490_v25 = vld [vmem:[%s4382_s14 + $0x38] sm:$0xff]   ;;  %v4505_v28 = vld [vmem:[%s4382_s14 + $0x40] sm:$0xff]   ;;  %v688_v53 = vrot.slane %v686_v46, 7  ;;  %v701_v57 = vshrl.u32 %v4437_v14, 16  ;;  %v696_v60 = vrot.slane %v694_v54, 7 }
  0x1f   : > { %1204 = vrot.lane.b32.xlu0 %v4391_v6, %s4288_s17  ;;  %4090 = vmatprep.subr.bf16.mxu1 %v5987_v1  ;;  %v4516_v30 = vld [vmem:[%s4382_s14 + $0xc8] sm:$0xff]   ;;  %v4531_v33 = vld [vmem:[%s4382_s14 + $0xd0] sm:$0xff]   ;;  %v4543_v35 = vld [vmem:[%s4382_s14 + $0xd8] sm:$0xff]   ;;  %v684_v51 = vor.u32 %v682_v41, %v681_v42  ;;  %v2250_v55 = vor.u32 %v2249_v44, %v679_v38  ;;  %v2253_v63 = vor.u32 %v2251_v56, %v686_v46  ;;  %v2254_v0 = vrot.slane %v697_v61, 1  ;;  %s6165_s29 = smov (!%p3712_p8, %s351_s29), 31 }
  0x20   : > { %1533 = vmatprep.subr.bf16.mxu0 %v5987_v1  ;;  %1206 = vrot.lane.b32.xlu1 %v4406_v9, %s4288_s17  ;;  %v4522_v31 = vld [vmem:[%s4382_s14 + $0x48] sm:$0xff]   ;;  %v4537_v34 = vld [vmem:[%s4382_s14 + $0x50] sm:$0xff]   ;;  %v4549_v36 = vld [vmem:[%s4382_s14 + $0x58] sm:$0xff]   ;;  %v691_v59 = vor.u32 %v689_v45, %v688_v53  ;;  %v704_v2 = vshll.u32 %v4437_v14, 16  ;;  %v703_v4 = vrot.slane %v701_v57, 7  ;;  %v712_v38 = vshll.u32 %v4452_v17, 16 }
  0x21   : > { %v4554_v37 = vld [vmem:[%s4382_s14 + $0xe0] sm:$0xff]   ;;  %v4565_v40 = vld [vmem:[%s4382_s14 + $0xe8] sm:$0xff]   ;;  %v4578_v47 = vld [vmem:[%s4382_s14 + $0xf0] sm:$0xff]   ;;  %v4607_v58 = vsel %vm4595_vm3, 0, %v684_v51  ;;  %v4613_v62 = vsel %vm2243_vm4, %v2250_v55, %v2251_v56  ;;  %v716_v41 = vshrl.u32 %v4467_v20, 16  ;;  %v719_v46 = vshll.u32 %v4467_v20, 16 }
  0x22   : > { %4102 = vmatpush1.bf16.msra.mxu1 %v4178_v8  ;;  %1534 = vmatpush1.bf16.msra.mxu0 %v4178_v8  ;;  %v4560_v39 = vld [vmem:[%s4382_s14 + $0x60] sm:$0xff]   ;;  %v4571_v43 = vld [vmem:[%s4382_s14 + $0x68] sm:$0xff]   ;;  %v4581_v48 = vld [vmem:[%s4382_s14 + $0x70] sm:$0xff]   ;;  %v4624_v8 = vsel %vm662_vm2, %v681_v42, %v691_v59  ;;  %v2259_v45 = vrot.slane %v712_v38, 1  ;;  %v724_v51 = vshrl.u32 %v4479_v22, 16  ;;  %s3717_s30 = sshll.u32 %s6165_s29, 2 }
  0x23   : > { %1240 = vrot.lane.b32.xlu0 %v4409_v10, %s4288_s17  ;;  %4091 = vmatprep.subr.bf16.mxu1 %v5987_v1  ;;  %v4586_v49 = vld [vmem:[%s4382_s14 + $0xf8] sm:$0xff]   ;;  %6039 = vst [vmem:[#allocation3_spill] sm:$0xff] %v4624_v8  ;;  %v718_v55 = vrot.slane %v716_v41, 7  ;;  %v2261_v59 = vrot.slane %v719_v46, 1  ;;  %s358_s7 = sadd.s32 %s3717_s30, %s4366_s6 }
  0x24   : > { %1535 = vmatprep.subr.bf16.mxu0 %v5987_v1  ;;  %1208 = vrot.lane.b32.xlu1 %v4414_v11, %s4288_s17  ;;  %v4591_v50 = vld [vmem:[%s4382_s14 + $0x78] sm:$0xff]   ;;  %v699_v11 = vor.u32 %v697_v61, %v696_v60  ;;  %v726_v61 = vrot.slane %v724_v51, 7  ;;  %s3719_s10 = sshll.u32 %s358_s7, 2 }
  0x25   : > { %s4766_s15 = scalar_lea.vmem %s5982_s1, %s3719_s10  ;;  %s4021_s10 = sadd.s32 16, %s4352_s25 }
  0x26   : > { %4103 = vmatpush1.bf16.msra.mxu1 %v4180_v12  ;;  %1536 = vmatpush1.bf16.msra.mxu0 %v4180_v12  ;;  %v709_v12 = vshrl.u32 %v4452_v17, 16  ;;  %p5117_p10 = scmp.lt.s32.totalorder %s4021_s10, 31 }
  0x27   : > { %1242 = vrot.lane.b32.xlu0 %v4430_v13, %s4288_s17  ;;  %4092 = vmatprep.subr.bf16.mxu1 %v5987_v1  ;;  %s475_s18 = scalar_select %p474_p11, 1, 0 }
  0x28   : > { %1537 = vmatprep.subr.bf16.mxu0 %v5987_v1  ;;  %1210 = vrot.lane.b32.xlu1 %v4437_v14, %s4288_s17  ;;  %s6167_s10 = smov (!%p5117_p10, %s4021_s10), 31 }
  0x29   : > { %s6169_s10 = smov (!%p5117_p10, %s6167_s10), 31 }
  0x2a   : > { %4104 = vmatpush1.bf16.msra.mxu1 %v4182_v15  ;;  %1538 = vmatpush1.bf16.msra.mxu0 %v4182_v15  ;;  %v4631_v15 = vsel %vm4619_vm6, %v2253_v63, 0  ;;  %v727_v63 = vshll.u32 %v4479_v22, 16  ;;  %s3724_s25 = sshll.u32 %s6169_s10, 2 }
  0x2b   : > { %1244 = vrot.lane.b32.xlu0 %v4445_v16, %s4288_s17  ;;  %4093 = vmatprep.subr.bf16.mxu1 %v5987_v1  ;;  %6040 = vst [vmem:[#allocation4_spill] sm:$0xff] %v4631_v15  ;;  %s375_s13 = sadd.s32 %s3724_s25, %s4366_s6 }
  0x2c   : > { %1539 = vmatprep.subr.bf16.mxu0 %v5987_v1  ;;  %1212 = vrot.lane.b32.xlu1 %v4452_v17, %s4288_s17 }
  0x2e   : > { %4105 = vmatpush1.bf16.msra.mxu1 %v4184_v18  ;;  %1540 = vmatpush1.bf16.msra.mxu0 %v4184_v18  ;;  %v2255_v18 = vor.u32 %v2254_v0, %v694_v54  ;;  %v721_v0 = vor.u32 %v719_v46, %v718_v55 }
  0x2f   : > { %1246 = vrot.lane.b32.xlu0 %v4460_v19, %s4288_s17  ;;  %4094 = vmatprep.subr.bf16.mxu1 %v5987_v1 }
  0x30   : > { %1541 = vmatprep.subr.bf16.mxu0 %v5987_v1  ;;  %1214 = vrot.lane.b32.xlu1 %v4467_v20, %s4288_s17 }
  0x32   : > { %4106 = vmatpush1.bf16.msra.mxu1 %v4186_v24  ;;  %1542 = vmatpush1.bf16.msra.mxu0 %v4186_v24  ;;  %v2256_v24 = vrot.slane %v704_v2, 1 }
  0x33   : > { %1248 = vrot.lane.b32.xlu0 %v4472_v21, %s4288_s17  ;;  %4095 = vmatprep.subr.bf16.mxu1 %v5987_v1 }
  0x34   : > { %1216 = vrot.lane.b32.xlu1 %v4479_v22, %s4288_s17  ;;  %1543 = vmatprep.subr.bf16.mxu0 %v5987_v1  ;;  %v4644_v42 = vsel %vm2243_vm4, %v2255_v18, %v2256_v24  ;;  %v2258_v44 = vor.u32 %v2256_v24, %v701_v57  ;;  %v2260_v57 = vor.u32 %v2259_v45, %v709_v12  ;;  %v734_v18 = vshll.u32 %v4490_v25, 16 }
  0x35   : > { %v729_v24 = vor.u32 %v727_v63, %v726_v61 }
  0x36   : > { %4107 = vmatpush1.bf16.msra.mxu1 %v4188_v26  ;;  %1544 = vmatpush1.bf16.msra.mxu0 %v4188_v26  ;;  %v706_v26 = vor.u32 %v704_v2, %v703_v4  ;;  %v4657_v56 = vsel %vm4619_vm6, %v2258_v44, 0  ;;  %v731_v2 = vshrl.u32 %v4490_v25, 16  ;;  %v4670_v4 = vsel %vm2243_vm4, %v2260_v57, %v2261_v59 }
  0x37   : > { %1250 = vrot.lane.b32.xlu0 %v4482_v23, %s4288_s17  ;;  %4096 = vmatprep.subr.bf16.mxu1 %v5987_v1  ;;  %v739_v44 = vshrl.u32 %v4505_v28, 16  ;;  %v2266_v46 = vrot.slane %v734_v18, 1  ;;  %v742_v57 = vshll.u32 %v4505_v28, 16 }
  0x38   : > { %1218 = vrot.lane.b32.xlu1 %v4490_v25, %s4288_s17  ;;  %1545 = vmatprep.subr.bf16.mxu0 %v5987_v1  ;;  %v4651_v53 = vsel %vm662_vm2, %v696_v60, %v706_v26 }
  0x39   : > { %v741_v55 = vrot.slane %v739_v44, 7 }
  0x3a   : > { %4108 = vmatpush1.bf16.msra.mxu1 %v4190_v29  ;;  %1546 = vmatpush1.bf16.msra.mxu0 %v4190_v29  ;;  %v4637_v29 = vsel %vm4595_vm3, 0, %v699_v11  ;;  %v2263_v11 = vor.u32 %v2261_v59, %v716_v41  ;;  %v746_v59 = vshrl.u32 %v4522_v31, 16 }
  0x3b   : > { %1252 = vrot.lane.b32.xlu0 %v4501_v27, %s4288_s17  ;;  %4097 = vmatprep.subr.bf16.mxu1 %v5987_v1 }
  0x3c   : > { %1220 = vrot.lane.b32.xlu1 %v4505_v28, %s4288_s17  ;;  %1547 = vmatprep.subr.bf16.mxu0 %v5987_v1  ;;  %v4686_v41 = vsel %vm4619_vm6, %v2263_v11, 0  ;;  %v749_v11 = vshll.u32 %v4522_v31, 16 }
  0x3d   : > { %6042 = vst [vmem:[#allocation6_spill] sm:$0xff] %v4686_v41 }
  0x3e   : > { %4109 = vmatpush1.bf16.msra.mxu1 %v4192_v32  ;;  %1548 = vmatpush1.bf16.msra.mxu0 %v4192_v32  ;;  %v711_v32 = vrot.slane %v709_v12, 7  ;;  %v2264_v12 = vrot.slane %v727_v63, 1  ;;  %v2268_v63 = vor.u32 %v2266_v46, %v731_v2 }
  0x3f   : > { %1254 = vrot.lane.b32.xlu0 %v4516_v30, %s4288_s17  ;;  %1954 = vmatprep.subr.bf16.mxu1 %v5987_v1 }
  0x40   : > { %1222 = vrot.lane.b32.xlu1 %v4522_v31, %s4288_s17  ;;  %2745 = vmatprep.subr.bf16.mxu0 %v5987_v1  ;;  %v714_v54 = vor.u32 %v712_v38, %v711_v32  ;;  %v4679_v26 = vsel %vm662_vm2, %v711_v32, %v721_v0  ;;  %v733_v38 = vrot.slane %v731_v2, 7  ;;  %v2265_v45 = vor.u32 %v2264_v12, %v724_v51 }
  0x41   : > { %6041 = vst [vmem:[#allocation5_spill] sm:$0xff] %v4679_v26  ;;  %v4693_v32 = vsel %vm4595_vm3, 0, %v729_v24  ;;  %v2269_v0 = vrot.slane %v742_v57, 1  ;;  %v754_v12 = vshrl.u32 %v4537_v34, 16  ;;  %v744_v24 = vor.u32 %v742_v57, %v741_v55 }
  0x42   : > { %v4664_v60 = vsel %vm4595_vm3, 0, %v714_v54  ;;  %6043 = vst [vmem:[#allocation7_spill] sm:$0xff] %v4693_v32  ;;  %v736_v54 = vor.u32 %v734_v18, %v733_v38  ;;  %v4701_v51 = vsel %vm2243_vm4, %v2265_v45, %v2266_v46  ;;  %v748_v38 = vrot.slane %v746_v59, 7 }
  0x43   : > { %1256 = vrot.lane.b32.xlu0 %v4531_v33, %s4288_s17  ;;  %6044 = vst [vmem:[#allocation8_spill] sm:$0xff] %v4701_v51  ;;  %v4715_v2 = vsel %vm4619_vm6, %v2268_v63, 0  ;;  %v2270_v45 = vor.u32 %v2269_v0, %v739_v44  ;;  %v2271_v46 = vrot.slane %v749_v11, 1  ;;  %v756_v1 = vrot.slane %v754_v12, 7 }
  0x44   : > { %1224 = vrot.lane.b32.xlu1 %v4537_v34, %s4288_s17  ;;  %v4709_v18 = vsel %vm662_vm2, %v726_v61, %v736_v54  ;;  %6046 = vst [vmem:[#allocation10_spill] sm:$0xff] %v4715_v2  ;;  %v757_v61 = vshll.u32 %v4537_v34, 16  ;;  %v4724_v54 = vsel %vm4595_vm3, 0, %v744_v24  ;;  %v751_v57 = vor.u32 %v749_v11, %v748_v38 }
  0x45   : > { %6045 = vst [vmem:[#allocation9_spill] sm:$0xff] %v4709_v18  ;;  %6047 = vst [vmem:[#allocation11_spill] sm:$0xff] %v4724_v54  ;;  %v761_v63 = vshrl.u32 %v4549_v36, 16  ;;  %v4730_v44 = vsel %vm2243_vm4, %v2270_v45, %v2271_v46  ;;  %v2273_v0 = vor.u32 %v2271_v46, %v746_v59 }
  0x46   : > { %6048 = vst [vmem:[#allocation12_spill] sm:$0xff] %v4730_v44  ;;  %v759_v24 = vor.u32 %v757_v61, %v756_v1  ;;  %v4737_v11 = vsel %vm662_vm2, %v741_v55, %v751_v57 }
  0x47   : > { %1258 = vrot.lane.b32.xlu0 %v4543_v35, %s4288_s17  ;;  %6049 = vst [vmem:[#allocation13_spill] sm:$0xff] %v4737_v11  ;;  %v763_v38 = vrot.slane %v761_v63, 7  ;;  %v4745_v59 = vsel %vm4619_vm6, %v2273_v0, 0 }
  0x48   : > { %1226 = vrot.lane.b32.xlu1 %v4549_v36, %s4288_s17  ;;  %6050 = vst [vmem:[#allocation14_spill] sm:$0xff] %v4745_v59  ;;  %v4751_v55 = vsel %vm4595_vm3, 0, %v759_v24 }
  0x49   : > { %6051 = vst [vmem:[#allocation15_spill] sm:$0xff] %v4751_v55 }
  0x4b   : > { %1260 = vrot.lane.b32.xlu0 %v4554_v37, %s4288_s17 }
  0x4c   : > { %1228 = vrot.lane.b32.xlu1 %v4560_v39, %s4288_s17 }
  0x4f   : > { %1262 = vrot.lane.b32.xlu0 %v4565_v40, %s4288_s17 }
  0x50   : > { %1230 = vrot.lane.b32.xlu1 %v4571_v43, %s4288_s17 }
  0x53   : > { %1264 = vrot.lane.b32.xlu0 %v4578_v47, %s4288_s17 }
  0x54   : > { %1232 = vrot.lane.b32.xlu1 %v4581_v48, %s4288_s17 }
  0x57   : > { %1266 = vrot.lane.b32.xlu0 %v4586_v49, %s4288_s17 }
  0x58   : > { %1234 = vrot.lane.b32.xlu1 %v4591_v50, %s4288_s17 }
  0x5b   : > { %987 = vrot.lane.b32.xlu0 %v4607_v58, %s4288_s17 }
  0x5c   : > { %2388 = vrot.lane.b32.xlu1 %v4613_v62, %s4288_s17 }
  0x5f   : > { %989 = vrot.lane.b32.xlu0 %v4624_v8, %s4288_s17 }
  0x60   : > { %2390 = vrot.lane.b32.xlu1 %v4631_v15, %s4288_s17 }
  0x63   : > { %991 = vrot.lane.b32.xlu0 %v4637_v29, %s4288_s17 }
  0x64   : > { %2392 = vrot.lane.b32.xlu1 %v4644_v42, %s4288_s17 }
  0x67   : > { %993 = vrot.lane.b32.xlu0 %v4651_v53, %s4288_s17 }
  0x68   : > { %2394 = vrot.lane.b32.xlu1 %v4657_v56, %s4288_s17 }
  0x6b   : > { %995 = vrot.lane.b32.xlu0 %v4664_v60, %s4288_s17 }
  0x6c   : > { %2396 = vrot.lane.b32.xlu1 %v4670_v4, %s4288_s17 }
  0x6f   : > { %997 = vrot.lane.b32.xlu0 %v4679_v26, %s4288_s17 }
  0x70   : > { %2398 = vrot.lane.b32.xlu1 %v4686_v41, %s4288_s17  ;;  %v461_v41 = vld [vmem:[%s4766_s15 + $0xc] sm:$0xf] }
  0x73   : > { %999 = vrot.lane.b32.xlu0 %v4693_v32, %s4288_s17  ;;  %v769_v32 = vshrl.u32 %v4560_v39, 16 }
  0x74   : > { %2400 = vrot.lane.b32.xlu1 %v4701_v51, %s4288_s17  ;;  %v2274_v51 = vrot.slane %v757_v61, 1 }
  0x75   : > { %v771_v57 = vrot.slane %v769_v32, 7 }
  0x76   : > { %v2275_v45 = vor.u32 %v2274_v51, %v754_v12 }
  0x77   : > { %1001 = vrot.lane.b32.xlu0 %v4709_v18, %s4288_s17  ;;  %v764_v18 = vshll.u32 %v4549_v36, 16 }
  0x78   : > { %2402 = vrot.lane.b32.xlu1 %v4715_v2, %s4288_s17  ;;  %v468_v2 = vstv %s467_s9 }
  0x79   : > { %v2276_v46 = vrot.slane %v764_v18, 1  ;;  %v766_v61 = vor.u32 %v764_v18, %v763_v38  ;;  %vm4779_vm7 = vcmp.eq.s32.totalorder %v468_v2, 1 }
  0x7b   : > { %1003 = vrot.lane.b32.xlu0 %v4724_v54, %s4288_s17  ;;  %v772_v54 = vshll.u32 %v4560_v39, 16  ;;  %v4758_v51 = vsel %vm2243_vm4, %v2275_v45, %v2276_v46  ;;  %v2278_v12 = vor.u32 %v2276_v46, %v761_v63  ;;  %v4769_v18 = vsel %vm662_vm2, %v756_v1, %v766_v61  ;;  %v459_v1 = vld [vmem:[%s4766_s15 + $0x4] sm:$0xf] }
  0x7c   : > { %2404 = vrot.lane.b32.xlu1 %v4730_v44, %s4288_s17  ;;  %v776_v44 = vshrl.u32 %v4571_v43, 16  ;;  %6052 = vst [vmem:[#allocation16_spill] sm:$0xff] %v4758_v51  ;;  %6053 = vst [vmem:[#allocation17_spill] sm:$0xff] %v4769_v18  ;;  %v784_v63 = vshrl.u32 %v4581_v48, 16 }
  0x7d   : > { %v2279_v0 = vrot.slane %v772_v54, 1  ;;  %v774_v24 = vor.u32 %v772_v54, %v771_v57  ;;  %v4776_v45 = vsel %vm4619_vm6, %v2278_v12, 0  ;;  %v787_v12 = vshll.u32 %v4581_v48, 16 }
  0x7e   : > { %v778_v38 = vrot.slane %v776_v44, 7  ;;  %6054 = vst [vmem:[#allocation18_spill] sm:$0xff] %v4776_v45 }
  0x7f   : > { %1005 = vrot.lane.b32.xlu0 %v4737_v11, %s4288_s17  ;;  %v779_v11 = vshll.u32 %v4571_v43, 16  ;;  %v2280_v46 = vor.u32 %v2279_v0, %v769_v32  ;;  %v4788_v54 = vsel %vm4595_vm3, 0, %v774_v24  ;;  %v471_v24 = vsel %vm4779_vm7, %v459_v1, 0 }
  0x80   : > { %2406 = vrot.lane.b32.xlu1 %v4745_v59, %s4288_s17  ;;  %v458_v59 = vld [vmem:[%s4766_s15] sm:$0xf]  ;;  %6057 = vst [vmem:[#allocation19_spill] sm:$0xff] %v4788_v54 }
  0x81   : > { %v781_v61 = vor.u32 %v779_v11, %v778_v38  ;;  %v470_v0 = vsel %vm4779_vm7, %v458_v59, 0  ;;  %v794_v38 = vshll.u32 %v4591_v50, 16 }
  0x83   : > { %1007 = vrot.lane.b32.xlu0 %v4751_v55, %s4288_s17  ;;  %v2281_v55 = vrot.slane %v779_v11, 1  ;;  %v2284_v11 = vrot.slane %v787_v12, 1  ;;  %v2286_v26 = vrot.slane %v794_v38, 1 }
  0x84   : > { %2408 = vrot.lane.b32.xlu1 %v4758_v51, %s4288_s17  ;;  %v786_v51 = vrot.slane %v784_v63, 7 }
  0x85   : > { %v4794_v32 = vsel %vm2243_vm4, %v2280_v46, %v2281_v55  ;;  %v2283_v2 = vor.u32 %v2281_v55, %v776_v44  ;;  %v4807_v46 = vsel %vm662_vm2, %v771_v57, %v781_v61  ;;  %v791_v55 = vshrl.u32 %v4591_v50, 16 }
  0x86   : > { %v789_v44 = vor.u32 %v787_v12, %v786_v51  ;;  %v2285_v12 = vor.u32 %v2284_v11, %v784_v63  ;;  %v473_v63 = vsel %vm4779_vm7, %v461_v41, 0  ;;  %v4198_v11 = vld [vmem:[%s5984_s3 + $0x8] sm:$0xff]  }
  0x87   : > { %1009 = vrot.lane.b32.xlu0 %v4769_v18, %s4288_s17  ;;  %v460_v18 = vld [vmem:[%s4766_s15 + $0x8] sm:$0xf]  ;;  %v4820_v8 = vsel %vm4619_vm6, %v2283_v2, 0  ;;  %v793_v57 = vrot.slane %v791_v55, 7  ;;  %v2288_v15 = vor.u32 %v2286_v26, %v791_v55  ;;  %v802_v55 = vshll.u32 %v4388_v5, 16  ;;  %s3726_s15 = sshll.u32 %s375_s13, 2 }
  0x88   : > { %2410 = vrot.lane.b32.xlu1 %v4776_v45, %s4288_s17  ;;  %v4194_v45 = vld [vmem:[%s5984_s3] sm:$0xff]   ;;  %v4831_v2 = vsel %vm4595_vm3, 0, %v789_v44  ;;  %s5179_s19 = scalar_lea.vmem %s5983_s2, %s3726_s15 }
  0x8b   : > { %1011 = vrot.lane.b32.xlu0 %v4788_v54, %s4288_s17  ;;  %v4814_v54 = vcombine.low %v470_v0, %v471_v24  ;;  %v4196_v0 = vld [vmem:[%s5984_s3 + $0xc0] sm:$0xff]   ;;  %v796_v24 = vor.u32 %v794_v38, %v793_v57  ;;  %v4199_v57 = vld [vmem:[%s5984_s3 + $0xc8] sm:$0xff]  }
  0x8c   : > { %2412 = vrot.lane.b32.xlu1 %v4794_v32, %s4288_s17 }
  0x8d   : > { %v1237_v59 = vpop.permute.xlu0 %1236 }
  0x8e   : > { %v1317_v1 = vsel %vm1051_vm0, %v4581_v48, %v1237_v59  ;;  %v1239_v61 = vpop.permute.xlu1 %1238 }
  0x8f   : > { %1686 = vmatmul.mubr.bf16.vlgmr.msra.gmra.mrb[0].mxu1 %v1317_v1  ;;  %1013 = vrot.lane.b32.xlu0 %v4807_v46, %s4288_s17  ;;  %v472_v1 = vsel %vm4779_vm7, %v460_v18, 0  ;;  %v4848_v18 = vsel %vm2243_vm4, %v2285_v12, %v2286_v26  ;;  %v1320_v41 = vsel %vm1051_vm0, %v4591_v50, %v1239_v61  ;;  %v799_v12 = vshrl.u32 %v4388_v5, 16  ;;  %v4200_v26 = vld [vmem:[%s5984_s3 + $0x10] sm:$0xff]  }
  0x90   : > { %1955 = vmatpush1.bf16.msra.mxu1 %v4194_v45  ;;  %3820 = vmatprep.mubr.msk.bf16.mxu1 %vm1051_vm0, %v4430_v13  ;;  %v6058_v45 = vmov 0   ;;  %v4854_v38 = vcombine.low %v472_v1, %v473_v63  ;;  %v4202_v63 = vld [vmem:[%s5984_s3 + $0x18] sm:$0xff]  }
  0x91   : > { %v1205_v59 = vpop.permute.xlu0 %1204  ;;  %1956 = vmatprep.subr.bf16.mxu1 %v6058_v45  ;;  %2414 = vrot.lane.b32.xlu1 %v4820_v8, %s4288_s17 }
  0x92   : > { %v1269_v44 = vsel %vm1051_vm0, %v4814_v54, %v1205_v59  ;;  %v4860_v59 = vsel %vm662_vm2, %v786_v51, %v796_v24  ;;  %v4875_v51 = vsel %vm4619_vm6, %v2288_v15, 0  ;;  %v2289_v15 = vrot.slane %v802_v55, 1 }
  0x93   : > { %1558 = vmatmul.mubr.bf16.vlgmr.msra.gmra.mrb[0].mxu0 %v1269_v44  ;;  %1015 = vrot.lane.b32.xlu0 %v4831_v2, %s4288_s17  ;;  %v1207_v44 = vpop.permute.xlu1 %1206  ;;  %6059 = vst [vmem:[#allocation20_spill] sm:$0xff] %v4875_v51 }
  0x94   : > { %2746 = vmatpush1.bf16.msra.mxu0 %v4196_v0  ;;  %3804 = vmatprep.mubr.msk.bf16.mxu0 %vm1051_vm0, %v4437_v14  ;;  %v801_v14 = vrot.slane %v799_v12, 7  ;;  %v1272_v61 = vsel %vm1051_vm0, %v4854_v38, %v1207_v44  ;;  %v4201_v0 = vld [vmem:[%s5984_s3 + $0xd0] sm:$0xff]   ;;  %v4203_v44 = vld [vmem:[%s5984_s3 + $0xd8] sm:$0xff]  }
  0x95   : > { %1957 = vmatpush1.bf16.msra.mxu1 %v4198_v11  ;;  %2747 = vmatprep.subr.bf16.mxu0 %v6058_v45  ;;  %v1241_v1 = vpop.permute.xlu0 %1240 }
  0x96   : > { %1958 = vmatprep.subr.bf16.mxu1 %v6058_v45  ;;  %2416 = vrot.lane.b32.xlu1 %v4848_v18, %s4288_s17  ;;  %v804_v24 = vor.u32 %v802_v55, %v801_v14  ;;  %v806_v55 = vshrl.u32 %v4396_v7, 16 }
  0x97   : > { %1694 = vmatmul.mubr.bf16.gmra.mrb[4].mxu1 %v1320_v41  ;;  %1017 = vrot.lane.b32.xlu0 %v4860_v59, %s4288_s17  ;;  %v809_v41 = vshll.u32 %v4396_v7, 16 }
  0x98   : > { %3821 = vmatprep.mubr.msk.bf16.mxu1 %vm1051_vm0, %v4445_v16  ;;  %2748 = vmatpush1.bf16.msra.mxu0 %v4199_v57  ;;  %v4893_v11 = vsel %vm4595_vm3, 0, %v804_v24  ;;  %v1323_v57 = vsel %vm1051_vm0, %v4388_v5, %v1241_v1  ;;  %v4204_v5 = vld [vmem:[%s5984_s3 + $0x20] sm:$0xff]  }
  0x99   : > { %1959 = vmatpush1.bf16.msra.mxu1 %v4200_v26  ;;  %2749 = vmatprep.subr.bf16.mxu0 %v6058_v45  ;;  %v2290_v26 = vor.u32 %v2289_v15, %v799_v12  ;;  %v2291_v24 = vrot.slane %v809_v41, 1  ;;  %v4206_v15 = vld [vmem:[%s5984_s3 + $0x28] sm:$0xff]  }
  0x9a   : > { %1960 = vmatprep.subr.bf16.mxu1 %v6058_v45  ;;  %2418 = vrot.lane.b32.xlu1 %v4875_v51, %s4288_s17  ;;  %v1209_v51 = vpop.permute.xlu1 %1208 }
  0x9b   : > { %1566 = vmatmul.mubr.bf16.gmra.mrb[4].mxu0 %v1272_v61  ;;  %1019 = vrot.lane.b32.xlu0 %v4893_v11, %s4288_s17  ;;  %v808_v61 = vrot.slane %v806_v55, 7  ;;  %v1275_v12 = vsel %vm1051_vm0, %v4391_v6, %v1209_v51  ;;  %v2293_v51 = vor.u32 %v2291_v24, %v806_v55 }
  0x9c   : > { %3805 = vmatprep.mubr.msk.bf16.mxu0 %vm1051_vm0, %v4452_v17  ;;  %2750 = vmatpush1.bf16.msra.mxu0 %v4201_v0  ;;  %v4912_v17 = vsel %vm2243_vm4, %v2290_v26, %v2291_v24  ;;  %v4205_v0 = vld [vmem:[%s5984_s3 + $0xe0] sm:$0xff]   ;;  %v4208_v26 = vld [vmem:[%s5984_s3 + $0x30] sm:$0xff]   ;;  %v817_v24 = vshll.u32 %v4409_v10, 16 }
  0x9d   : > { %1961 = vmatpush1.bf16.msra.mxu1 %v4202_v63  ;;  %2751 = vmatprep.subr.bf16.mxu0 %v6058_v45  ;;  %v811_v1 = vor.u32 %v809_v41, %v808_v61  ;;  %v1243_v63 = vpop.permute.xlu0 %1242 }
  0x9e   : > { %1962 = vmatprep.subr.bf16.mxu1 %v6058_v45  ;;  %2420 = vrot.lane.b32.xlu1 %v4912_v17, %s4288_s17  ;;  %v1326_v41 = vsel %vm1051_vm0, %v4396_v7, %v1243_v63  ;;  %v4947_v7 = vsel %vm4619_vm6, %v2293_v51, 0 }
  0x9f   : > { %1702 = vmatmul.mubr.bf16.gmra.mrb[8].mxu1 %v1323_v57  ;;  %v4929_v6 = vsel %vm662_vm2, %v801_v14, %v811_v1  ;;  %v4207_v57 = vld [vmem:[%s5984_s3 + $0xe8] sm:$0xff]   ;;  %v1211_v14 = vpop.permute.xlu1 %1210  ;;  %v824_v1 = vshll.u32 %v4430_v13, 16 }
  0xa0   : > { %3822 = vmatprep.mubr.msk.bf16.mxu1 %vm1051_vm0, %v4460_v19  ;;  %2752 = vmatpush1.bf16.msra.mxu0 %v4203_v44  ;;  %v814_v44 = vshrl.u32 %v4409_v10, 16  ;;  %v1278_v55 = vsel %vm1051_vm0, %v4406_v9, %v1211_v14 }
  0xa1   : > { %1963 = vmatpush1.bf16.msra.mxu1 %v4204_v5  ;;  %2753 = vmatprep.subr.bf16.mxu0 %v6058_v45  ;;  %v4209_v5 = vld [vmem:[%s5984_s3 + $0xf0] sm:$0xff]  }
  0xa2   : > { %1964 = vmatprep.subr.bf16.mxu1 %v6058_v45  ;;  %1021 = vrot.lane.b32.xlu0 %v4929_v6, %s4288_s17 }
  0xa3   : > { %1574 = vmatmul.mubr.bf16.gmra.mrb[8].mxu0 %v1275_v12  ;;  %2422 = vrot.lane.b32.xlu1 %v4947_v7, %s4288_s17  ;;  %v1245_v12 = vpop.permute.xlu0 %1244  ;;  %v1213_v14 = vpop.permute.xlu1 %1212 }
  0xa4   : > { %3806 = vmatprep.mubr.msk.bf16.mxu0 %vm1051_vm0, %v4467_v20  ;;  %2754 = vmatpush1.bf16.msra.mxu0 %v4205_v0  ;;  %v816_v20 = vrot.slane %v814_v44, 7  ;;  %v4210_v0 = vld [vmem:[%s5984_s3 + $0x38] sm:$0xff]   ;;  %v1329_v63 = vsel %vm1051_vm0, %v4409_v10, %v1245_v12  ;;  %v4212_v10 = vld [vmem:[%s5984_s3 + $0x40] sm:$0xff]   ;;  %v4214_v12 = vld [vmem:[%s5984_s3 + $0x48] sm:$0xff]  }
  0xa5   : > { %1965 = vmatpush1.bf16.msra.mxu1 %v4206_v15  ;;  %2755 = vmatprep.subr.bf16.mxu0 %v6058_v45  ;;  %v4211_v15 = vld [vmem:[%s5984_s3 + $0xf8] sm:$0xff]  }
  0xa6   : > { %1966 = vmatprep.subr.bf16.mxu1 %v6058_v45  ;;  %v819_v61 = vor.u32 %v817_v24, %v816_v20 }
  0xa7   : > { %1710 = vmatmul.mubr.bf16.gmra.mrb[12].mxu1 %v1326_v41  ;;  %v2296_v41 = vrot.slane %v824_v1, 1 }
  0xa8   : > { %3823 = vmatprep.mubr.msk.bf16.mxu1 %vm1051_vm0, %v4472_v21  ;;  %2756 = vmatpush1.bf16.msra.mxu0 %v4207_v57  ;;  %v4967_v9 = vsel %vm4595_vm3, 0, %v819_v61  ;;  %v2294_v21 = vrot.slane %v817_v24, 1  ;;  %v821_v57 = vshrl.u32 %v4430_v13, 16  ;;  %v1247_v61 = vpop.permute.xlu0 %1246 }
  0xa9   : > { %1967 = vmatpush1.bf16.msra.mxu1 %v4208_v26  ;;  %2757 = vmatprep.subr.bf16.mxu0 %v6058_v45 }
  0xaa   : > { %1968 = vmatprep.subr.bf16.mxu1 %v6058_v45  ;;  %1023 = vrot.lane.b32.xlu0 %v4967_v9, %s4288_s17  ;;  %v2295_v51 = vor.u32 %v2294_v21, %v814_v44  ;;  %v823_v26 = vrot.slane %v821_v57, 7  ;;  %v4220_v44 = vld [vmem:[%s4382_s14 + $0x10] sm:$0xff]   ;;  %v1332_v21 = vsel %vm1051_vm0, %v4430_v13, %v1247_v61  ;;  %v4219_v61 = vld [vmem:[%s5984_s3 + $0x118] sm:$0xff]  }
  0xab   : > { %1582 = vmatmul.mubr.bf16.gmra.mrb[12].mxu0 %v1278_v55  ;;  %v1281_v24 = vsel %vm1051_vm0, %v4220_v44, %v1213_v14  ;;  %v4213_v55 = vld [vmem:[%s5984_s3 + $0x100] sm:$0xff]   ;;  %v4217_v14 = vld [vmem:[%s5984_s3 + $0x110] sm:$0xff]  }
  0xac   : > { %3807 = vmatprep.mubr.msk.bf16.mxu0 %vm1051_vm0, %v4479_v22  ;;  %2758 = vmatpush1.bf16.msra.mxu0 %v4209_v5  ;;  %v4986_v22 = vsel %vm2243_vm4, %v2295_v51, %v2296_v41  ;;  %v826_v5 = vor.u32 %v824_v1, %v823_v26  ;;  %v4215_v1 = vld [vmem:[%s5984_s3 + $0x108] sm:$0xff]   ;;  %v832_v51 = vshll.u32 %v4445_v16, 16  ;;  %v1249_v26 = vpop.permute.xlu0 %1248 }
  0xad   : > { %1969 = vmatpush1.bf16.msra.mxu1 %v4210_v0  ;;  %2759 = vmatprep.subr.bf16.mxu0 %v6058_v45 }
  0xae   : > { %1970 = vmatprep.subr.bf16.mxu1 %v6058_v45  ;;  %2424 = vrot.lane.b32.xlu1 %v4986_v22, %s4288_s17  ;;  %v5003_v0 = vsel %vm662_vm2, %v816_v20, %v826_v5  ;;  %v829_v20 = vshrl.u32 %v4445_v16, 16  ;;  %v4218_v16 = vld [vmem:[%s5984_s3 + $0x58] sm:$0xff]  }
  0xaf   : > { %1718 = vmatmul.mubr.bf16.gmra.mrb[16].mxu1 %v1329_v63  ;;  %1025 = vrot.lane.b32.xlu0 %v5003_v0, %s4288_s17  ;;  %v1215_v63 = vpop.permute.xlu1 %1214 }
  0xb0   : > { %3824 = vmatprep.mubr.msk.bf16.mxu1 %vm1051_vm0, %v4482_v23  ;;  %2760 = vmatpush1.bf16.msra.mxu0 %v4211_v15  ;;  %v2298_v23 = vor.u32 %v2296_v41, %v821_v57  ;;  %v4216_v15 = vld [vmem:[%s5984_s3 + $0x50] sm:$0xff]   ;;  %v4221_v41 = vld [vmem:[%s4382_s14 + $0x18] sm:$0xff]  }
  0xb1   : > { %1971 = vmatpush1.bf16.msra.mxu1 %v4212_v10  ;;  %2761 = vmatprep.subr.bf16.mxu0 %v6058_v45  ;;  %v1284_v57 = vsel %vm1051_vm0, %v4221_v41, %v1215_v63 }
  0xb2   : > { %1972 = vmatprep.subr.bf16.mxu1 %v6058_v45  ;;  %v5021_v13 = vsel %vm4619_vm6, %v2298_v23, 0 }
  0xb3   : > { %1590 = vmatmul.mubr.bf16.gmra.mrb[16].mxu0 %v1281_v24  ;;  %2426 = vrot.lane.b32.xlu1 %v5021_v13, %s4288_s17  ;;  %v839_v24 = vshll.u32 %v4460_v19, 16 }
  0xb4   : > { %3808 = vmatprep.mubr.msk.bf16.mxu0 %vm1051_vm0, %v4490_v25  ;;  %2762 = vmatpush1.bf16.msra.mxu0 %v4213_v55  ;;  %v831_v25 = vrot.slane %v829_v20, 7  ;;  %v4222_v55 = vld [vmem:[%s4382_s14 + $0xa0] sm:$0xff]  }
  0xb5   : > { %1973 = vmatpush1.bf16.msra.mxu1 %v4214_v12  ;;  %2763 = vmatprep.subr.bf16.mxu0 %v6058_v45  ;;  %v1335_v5 = vsel %vm1051_vm0, %v4222_v55, %v1249_v26  ;;  %v2301_v23 = vrot.slane %v839_v24, 1 }
  0xb6   : > { %1974 = vmatprep.subr.bf16.mxu1 %v6058_v45  ;;  %v834_v10 = vor.u32 %v832_v51, %v831_v25 }
  0xb7   : > { %1726 = vmatmul.mubr.bf16.gmra.mrb[20].mxu1 %v1332_v21  ;;  %v836_v21 = vshrl.u32 %v4460_v19, 16 }
  0xb8   : > { %3825 = vmatprep.mubr.msk.bf16.mxu1 %vm1051_vm0, %v4501_v27  ;;  %2764 = vmatpush1.bf16.msra.mxu0 %v4215_v1  ;;  %v5041_v44 = vsel %vm4595_vm3, 0, %v834_v10  ;;  %v2299_v27 = vrot.slane %v832_v51, 1  ;;  %v1217_v1 = vpop.permute.xlu1 %1216  ;;  %v1251_v51 = vpop.permute.xlu0 %1250 }
  0xb9   : > { %1975 = vmatpush1.bf16.msra.mxu1 %v4216_v15  ;;  %2765 = vmatprep.subr.bf16.mxu0 %v6058_v45  ;;  %v838_v15 = vrot.slane %v836_v21, 7  ;;  %v2303_v41 = vor.u32 %v2301_v23, %v836_v21 }
  0xba   : > { %1976 = vmatprep.subr.bf16.mxu1 %v6058_v45  ;;  %1027 = vrot.lane.b32.xlu0 %v5041_v44, %s4288_s17  ;;  %v2300_v12 = vor.u32 %v2299_v27, %v829_v20 }
  0xbb   : > { %1598 = vmatmul.mubr.bf16.gmra.mrb[20].mxu0 %v1284_v57  ;;  %v841_v19 = vor.u32 %v839_v24, %v838_v15  ;;  %v4224_v57 = vld [vmem:[%s4382_s14 + $0xa8] sm:$0xff]  }
  0xbc   : > { %3809 = vmatprep.mubr.msk.bf16.mxu0 %vm1051_vm0, %v4505_v28  ;;  %2766 = vmatpush1.bf16.msra.mxu0 %v4217_v14  ;;  %v5056_v63 = vsel %vm2243_vm4, %v2300_v12, %v2301_v23  ;;  %v4223_v28 = vld [vmem:[%s4382_s14 + $0x20] sm:$0xff]   ;;  %v1338_v14 = vsel %vm1051_vm0, %v4224_v57, %v1251_v51  ;;  %v1219_v26 = vpop.permute.xlu1 %1218  ;;  %v4226_v24 = vld [vmem:[%s4382_s14 + $0x28] sm:$0xff]   ;;  %v4227_v23 = vld [vmem:[%s4382_s14 + $0xb8] sm:$0xff]  }
  0xbd   : > { %1977 = vmatpush1.bf16.msra.mxu1 %v4218_v16  ;;  %2767 = vmatprep.subr.bf16.mxu0 %v6058_v45  ;;  %v1287_v20 = vsel %vm1051_vm0, %v4223_v28, %v1217_v1  ;;  %v5065_v45 = vsel %vm662_vm2, %v831_v25, %v841_v19  ;;  %v5076_v16 = vsel %vm4619_vm6, %v2303_v41, 0  ;;  %v1290_v55 = vsel %vm1051_vm0, %v4226_v24, %v1219_v26  ;;  %v4228_v41 = vld [vmem:[%s4382_s14 + $0x30] sm:$0xff]  }
  0xbe   : > { %2428 = vrot.lane.b32.xlu1 %v5056_v63, %s4288_s17  ;;  %1029 = vrot.lane.b32.xlu0 %v5065_v45, %s4288_s17  ;;  %v854_v21 = vshll.u32 %v4227_v23, 16  ;;  %v851_v28 = vshrl.u32 %v4227_v23, 16 }
  0xbf   : > { %1734 = vmatmul.mubr.bf16.gmra.mrb[24].mxu1 %v1335_v5  ;;  %v1253_v5 = vpop.permute.xlu0 %1252 }
  0xc0   : > { %3826 = vmatprep.mubr.msk.bf16.mxu1 %vm1051_vm0, %v4516_v30  ;;  %2768 = vmatpush1.bf16.msra.mxu0 %v4219_v61  ;;  %v4225_v30 = vld [vmem:[%s4382_s14 + $0xb0] sm:$0xff]   ;;  %v2306_v15 = vrot.slane %v854_v21, 1  ;;  %v853_v51 = vrot.slane %v851_v28, 7 }
  0xc1   : > { %v844_v10 = vshrl.u32 %v4225_v30, 16  ;;  %v847_v27 = vshll.u32 %v4225_v30, 16  ;;  %v1341_v1 = vsel %vm1051_vm0, %v4225_v30, %v1253_v5 }
  0xc2   : > { %2430 = vrot.lane.b32.xlu1 %v5076_v16, %s4288_s17 }
  0xc3   : > { %1606 = vmatmul.mubr.bf16.gmra.mrb[24].mxu0 %v1287_v20  ;;  %v846_v25 = vrot.slane %v844_v10, 7  ;;  %v2304_v12 = vrot.slane %v847_v27, 1  ;;  %v1221_v20 = vpop.permute.xlu1 %1220 }
  0xc4   : > { %3810 = vmatprep.mubr.msk.bf16.mxu0 %vm1051_vm0, %v4522_v31  ;;  %v1293_v57 = vsel %vm1051_vm0, %v4228_v41, %v1221_v20 }
  0xc5   : > { %v849_v31 = vor.u32 %v847_v27, %v846_v25  ;;  %v4229_v27 = vld [vmem:[%s4382_s14 + $0xc0] sm:$0xff]  }
  0xc6   : > { %v859_v24 = vshrl.u32 %v4229_v27, 16 }
  0xc7   : > { %1742 = vmatmul.mubr.bf16.gmra.mrb[28].mxu1 %v1338_v14  ;;  %v5086_v61 = vsel %vm4595_vm3, 0, %v849_v31  ;;  %v1255_v14 = vpop.permute.xlu0 %1254  ;;  %v862_v31 = vshll.u32 %v4229_v27, 16 }
  0xc8   : > { %3827 = vmatprep.mubr.msk.bf16.mxu1 %vm1051_vm0, %v4531_v33  ;;  %1031 = vrot.lane.b32.xlu0 %v5086_v61, %s4288_s17  ;;  %v2305_v33 = vor.u32 %v2304_v12, %v844_v10  ;;  %v2308_v10 = vor.u32 %v2306_v15, %v851_v28  ;;  %v1344_v26 = vsel %vm1051_vm0, %v4227_v23, %v1255_v14  ;;  %v4232_v14 = vld [vmem:[%s4382_s14 + $0x40] sm:$0xff]  }
  0xca   : > { %v5095_v19 = vsel %vm2243_vm4, %v2305_v33, %v2306_v15  ;;  %v4231_v33 = vld [vmem:[%s4382_s14 + $0xc8] sm:$0xff]  }
  0xcb   : > { %1614 = vmatmul.mubr.bf16.gmra.mrb[28].mxu0 %v1290_v55  ;;  %2432 = vrot.lane.b32.xlu1 %v5095_v19, %s4288_s17  ;;  %v861_v55 = vrot.slane %v859_v24, 7  ;;  %v1257_v23 = vpop.permute.xlu0 %1256  ;;  %v869_v15 = vshll.u32 %v4231_v33, 16 }
  0xcc   : > { %3811 = vmatprep.mubr.msk.bf16.mxu0 %vm1051_vm0, %v4537_v34  ;;  %v856_v34 = vor.u32 %v854_v21, %v853_v51  ;;  %v1347_v28 = vsel %vm1051_vm0, %v4229_v27, %v1257_v23  ;;  %v866_v51 = vshrl.u32 %v4231_v33, 16  ;;  %v4234_v23 = vld [vmem:[%s4382_s14 + $0x48] sm:$0xff]  }
  0xcd   : > { %v864_v12 = vor.u32 %v862_v31, %v861_v55  ;;  %v2311_v20 = vrot.slane %v869_v15, 1 }
  0xce   : > { %v5104_v30 = vsel %vm662_vm2, %v846_v25, %v856_v34  ;;  %v5115_v25 = vsel %vm4619_vm6, %v2308_v10, 0  ;;  %v868_v34 = vrot.slane %v866_v51, 7 }
  0xcf   : > { %1750 = vmatmul.mubr.bf16.gmra.mrb[32].mxu1 %v1341_v1  ;;  %1033 = vrot.lane.b32.xlu0 %v5104_v30, %s4288_s17  ;;  %v5131_v21 = vsel %vm4595_vm3, 0, %v864_v12  ;;  %v2309_v1 = vrot.slane %v862_v31, 1  ;;  %v4233_v31 = vld [vmem:[%s4382_s14 + $0xd0] sm:$0xff]  }
  0xd0   : > { %3828 = vmatprep.mubr.msk.bf16.mxu1 %vm1051_vm0, %v4543_v35  ;;  %v1223_v35 = vpop.permute.xlu1 %1222  ;;  %2434 = vrot.lane.b32.xlu1 %v5115_v25, %s4288_s17  ;;  %v871_v10 = vor.u32 %v869_v15, %v868_v34  ;;  %v877_v12 = vshll.u32 %v4233_v31, 16 }
  0xd2   : > { %v5151_v27 = vsel %vm662_vm2, %v861_v55, %v871_v10  ;;  %v462_v10 = vld [vmem:[%s5179_s19] sm:$0xf] }
  0xd3   : > { %1622 = vmatmul.mubr.bf16.gmra.mrb[32].mxu0 %v1293_v57  ;;  %1035 = vrot.lane.b32.xlu0 %v5131_v21, %s4288_s17 }
  0xd4   : > { %3812 = vmatprep.mubr.msk.bf16.mxu0 %vm1051_vm0, %v4549_v36  ;;  %v4230_v36 = vld [vmem:[%s4382_s14 + $0x38] sm:$0xff]   ;;  %v1225_v41 = vpop.permute.xlu1 %1224 }
  0xd5   : > { %v1296_v5 = vsel %vm1051_vm0, %v4230_v36, %v1223_v35  ;;  %v2313_v35 = vor.u32 %v2311_v20, %v866_v51 }
  0xd7   : > { %1758 = vmatmul.mubr.bf16.gmra.mrb[36].mxu1 %v1344_v26  ;;  %v1259_v26 = vpop.permute.xlu0 %1258  ;;  %1037 = vrot.lane.b32.xlu0 %v5151_v27, %s4288_s17  ;;  %v5163_v55 = vsel %vm4619_vm6, %v2313_v35, 0 }
  0xd8   : > { %3829 = vmatprep.mubr.msk.bf16.mxu1 %vm1051_vm0, %v4554_v37  ;;  %v2310_v37 = vor.u32 %v2309_v1, %v859_v24  ;;  %v1350_v24 = vsel %vm1051_vm0, %v4231_v33, %v1259_v26  ;;  %v1227_v36 = vpop.permute.xlu1 %1226  ;;  %v463_v26 = vld [vmem:[%s5179_s19 + $0x4] sm:$0xf] }
  0xda   : > { %v5142_v57 = vsel %vm2243_vm4, %v2310_v37, %v2311_v20  ;;  %v4235_v37 = vld [vmem:[%s4382_s14 + $0xd8] sm:$0xff]  }
  0xdb   : > { %1630 = vmatmul.mubr.bf16.gmra.mrb[36].mxu0 %v1296_v5  ;;  %2436 = vrot.lane.b32.xlu1 %v5142_v57, %s4288_s17  ;;  %v1261_v33 = vpop.permute.xlu0 %1260  ;;  %v884_v20 = vshll.u32 %v4235_v37, 16 }
  0xdc   : > { %3813 = vmatprep.mubr.msk.bf16.mxu0 %vm1051_vm0, %v4560_v39  ;;  %v1299_v39 = vsel %vm1051_vm0, %v4232_v14, %v1225_v41  ;;  %v1353_v51 = vsel %vm1051_vm0, %v4233_v31, %v1261_v33  ;;  %v881_v14 = vshrl.u32 %v4235_v37, 16 }
  0xdd   : > { %v2316_v34 = vrot.slane %v884_v20, 1 }
  0xdf   : > { %1766 = vmatmul.mubr.bf16.gmra.mrb[40].mxu1 %v1347_v28  ;;  %2438 = vrot.lane.b32.xlu1 %v5163_v55, %s4288_s17  ;;  %v2314_v28 = vrot.slane %v877_v12, 1 }
  0xe0   : > { %3830 = vmatprep.mubr.msk.bf16.mxu1 %vm1051_vm0, %v4565_v40  ;;  %v874_v40 = vshrl.u32 %v4233_v31, 16 }
  0xe2   : > { %v876_v5 = vrot.slane %v874_v40, 7  ;;  %v2315_v41 = vor.u32 %v2314_v28, %v874_v40  ;;  %v2318_v28 = vor.u32 %v2316_v34, %v881_v14 }
  0xe3   : > { %1638 = vmatmul.mubr.bf16.gmra.mrb[40].mxu0 %v1299_v39  ;;  %v1229_v39 = vpop.permute.xlu1 %1228 }
  0xe4   : > { %3814 = vmatprep.mubr.msk.bf16.mxu0 %vm1051_vm0, %v4571_v43  ;;  %v1302_v43 = vsel %vm1051_vm0, %v4234_v23, %v1227_v36  ;;  %v879_v1 = vor.u32 %v877_v12, %v876_v5  ;;  %v5193_v35 = vsel %vm2243_vm4, %v2315_v41, %v2316_v34  ;;  %v883_v36 = vrot.slane %v881_v14, 7  ;;  %v1263_v12 = vpop.permute.xlu0 %1262  ;;  %v464_v41 = vld [vmem:[%s5179_s19 + $0x8] sm:$0xf] }
  0xe5   : > { %2440 = vrot.lane.b32.xlu1 %v5193_v35, %s4288_s17  ;;  %v1356_v33 = vsel %vm1051_vm0, %v4235_v37, %v1263_v12  ;;  %v4239_v12 = vld [vmem:[%s4382_s14 + $0xe8] sm:$0xff]  }
  0xe6   : > { %v5173_v15 = vsel %vm4595_vm3, 0, %v879_v1  ;;  %v886_v40 = vor.u32 %v884_v20, %v883_v36  ;;  %v4237_v20 = vld [vmem:[%s4382_s14 + $0xe0] sm:$0xff]  }
  0xe7   : > { %1774 = vmatmul.mubr.bf16.gmra.mrb[44].mxu1 %v1350_v24  ;;  %1039 = vrot.lane.b32.xlu0 %v5173_v15, %s4288_s17  ;;  %v4240_v24 = vld [vmem:[%s4382_s14 + $0x80] sm:$0xff]  }
  0xe8   : > { %3831 = vmatprep.mubr.msk.bf16.mxu1 %vm1051_vm0, %v4578_v47  ;;  %v476_v47 = vstv %s475_s18  ;;  %v5206_v1 = vsel %vm662_vm2, %v876_v5, %v886_v40  ;;  %v465_v5 = vld [vmem:[%s5179_s19 + $0xc] sm:$0xf] }
  0xe9   : > { %vm5188_vm8 = vcmp.eq.s32.totalorder %v476_v47, 1  ;;  %v889_v47 = vshrl.u32 %v4237_v20, 16 }
  0xea   : > { %v478_v23 = vsel %vm5188_vm8, %v462_v10, 0  ;;  %v480_v34 = vsel %vm5188_vm8, %v464_v41, 0  ;;  %v481_v14 = vsel %vm5188_vm8, %v465_v5, 0  ;;  %v896_v41 = vshrl.u32 %v4239_v12, 16 }
  0xeb   : > { %1646 = vmatmul.mubr.bf16.gmra.mrb[44].mxu0 %v1302_v43  ;;  %v479_v43 = vsel %vm5188_vm8, %v463_v26, 0  ;;  %1041 = vrot.lane.b32.xlu0 %v5206_v1, %s4288_s17  ;;  %v891_v10 = vrot.slane %v889_v47, 7  ;;  %v892_v26 = vshll.u32 %v4237_v20, 16 }
  0xec   : > { %3815 = vmatprep.mubr.msk.bf16.mxu0 %vm1051_vm0, %v4581_v48  ;;  %v4236_v48 = vld [vmem:[%s4382_s14 + $0x50] sm:$0xff]  }
  0xed   : > { %v1305_v31 = vsel %vm1051_vm0, %v4236_v48, %v1229_v39  ;;  %v5220_v39 = vsel %vm4619_vm6, %v2318_v28, 0  ;;  %v894_v36 = vor.u32 %v892_v26, %v891_v10  ;;  %v1265_v48 = vpop.permute.xlu0 %1264  ;;  %v2319_v40 = vrot.slane %v892_v26, 1 }
  0xee   : > { %2442 = vrot.lane.b32.xlu1 %v5220_v39, %s4288_s17  ;;  %v664_v26 = vshrl.u32 %v4814_v54, 16 }
  0xef   : > { %1782 = vmatmul.mubr.bf16.gmra.mrb[48].mxu1 %v1353_v51  ;;  %v1231_v51 = vpop.permute.xlu1 %1230  ;;  %v2320_v28 = vor.u32 %v2319_v40, %v889_v47 }
  0xf0   : > { %3832 = vmatprep.mubr.msk.bf16.mxu1 %vm1051_vm0, %v4586_v49  ;;  %v5213_v49 = vcombine.low %v478_v23, %v479_v43  ;;  %v899_v23 = vshll.u32 %v4239_v12, 16  ;;  %v5237_v43 = vcombine.low %v480_v34, %v481_v14 }
  0xf1   : > { %v1267_v14 = vpop.permute.xlu0 %1266 }
  0xf2   : > { %6063 = vst [vmem:[#allocation21_spill] sm:$0xff] %v5213_v49  ;;  %6064 = vst [vmem:[#allocation22_spill] sm:$0xff] %v5237_v43 }
  0xf3   : > { %1654 = vmatmul.mubr.bf16.gmra.mrb[48].mxu0 %v1305_v31  ;;  %v5234_v31 = vsel %vm4595_vm3, 0, %v894_v36  ;;  %v1233_v5 = vpop.permute.xlu1 %1232  ;;  %v666_v36 = vrot.slane %v664_v26, 7 }
  0xf4   : > { %3816 = vmatprep.mubr.msk.bf16.mxu0 %vm1051_vm0, %v4591_v50  ;;  %v4238_v50 = vld [vmem:[%s4382_s14 + $0x58] sm:$0xff]   ;;  %1043 = vrot.lane.b32.xlu0 %v5234_v31, %s4288_s17 }
  0xf5   : > { %v1308_v37 = vsel %vm1051_vm0, %v4238_v50, %v1231_v51  ;;  %v2321_v51 = vrot.slane %v899_v23, 1 }
  0xf7   : > { %1790 = vmatmul.mubr.bf16.gmra.mrb[52].mxu1 %v1356_v33  ;;  %v1359_v33 = vsel %vm1051_vm0, %v4237_v20, %v1265_v48  ;;  %v5246_v50 = vsel %vm2243_vm4, %v2320_v28, %v2321_v51  ;;  %v4241_v20 = vld [vmem:[%s4382_s14 + $0x60] sm:$0xff]   ;;  %v667_v48 = vshll.u32 %v4814_v54, 16  ;;  %v2323_v28 = vor.u32 %v2321_v51, %v896_v41  ;;  %v4244_v51 = vld [vmem:[%s4382_s14 + $0x68] sm:$0xff]  }
  0xf8   : > { %3833 = vmatprep.mubr.msk.bf16.mxu1 %vm1051_vm0, %v5213_v49  ;;  %6065 = vst [vmem:[#allocation23_spill] sm:$0xff] %v5246_v50  ;;  %2444 = vrot.lane.b32.xlu1 %v5246_v50, %s4288_s17  ;;  %v1311_v34 = vsel %vm1051_vm0, %v4241_v20, %v1233_v5  ;;  %v4243_v5 = vld [vmem:[%s4382_s14 + $0xf0] sm:$0xff]   ;;  %v1235_v20 = vpop.permute.xlu1 %1234 }
  0xf9   : > { %v669_v54 = vor.u32 %v667_v48, %v666_v36 }
  0xfb   : > { %1662 = vmatmul.mubr.bf16.gmra.mrb[52].mxu0 %v1308_v37  ;;  %v898_v37 = vrot.slane %v896_v41, 7  ;;  %v1314_v41 = vsel %vm1051_vm0, %v4244_v51, %v1235_v20 }
  0xfc   : > { %3817 = vmatprep.mubr.msk.bf16.mxu0 %vm1051_vm0, %v4240_v24  ;;  %v4242_v24 = vld [vmem:[%s4382_s14 + $0x88] sm:$0xff]   ;;  %v2389_v52 = vpop.permute.xlu1 %2388 }
  0xfd   : > { %v901_v47 = vor.u32 %v899_v23, %v898_v37  ;;  %v904_v23 = vshrl.u32 %v4243_v5, 16  ;;  %v671_v37 = vshrl.u32 %v4854_v38, 16 }
  0xff   : > { %1798 = vmatmul.mubr.bf16.gmra.mrb[56].mxu1 %v1359_v33  ;;  %v5256_v40 = vsel %vm662_vm2, %v891_v10, %v901_v47  ;;  %v1362_v33 = vsel %vm1051_vm0, %v4239_v12, %v1267_v14  ;;  %v674_v10 = vshll.u32 %v4854_v38, 16  ;;  %v906_v12 = vrot.slane %v904_v23, 7 }
 0x100   : > { %3834 = vmatprep.mubr.msk.bf16.mxu1 %vm1051_vm0, %v5237_v43  ;;  %6066 = vst [vmem:[#allocation24_spill] sm:$0xff] %v5256_v40  ;;  %1045 = vrot.lane.b32.xlu0 %v5256_v40, %s4288_s17  ;;  %v2244_v43 = vrot.slane %v667_v48, 1  ;;  %v907_v47 = vshll.u32 %v4243_v5, 16  ;;  %v953_v38 = vsel %vm4595_vm3, 0, %v669_v54  ;;  %v988_v48 = vpop.permute.xlu0 %987  ;;  %v673_v49 = vrot.slane %v671_v37, 7 }
 0x101   : > { %v1054_v20 = vsel %vm1051_vm0, %v953_v38, %v988_v48 }
 0x102   : > { %v909_v14 = vor.u32 %v907_v47, %v906_v12  ;;  %v2324_v5 = vrot.slane %v907_v47, 1 }
 0x103   : > { %1670 = vmatmul.mubr.bf16.gmra.mrb[56].mxu0 %v1311_v34  ;;  %v5268_v34 = vsel %vm4619_vm6, %v2323_v28, 0  ;;  %v2246_v28 = vrot.slane %v674_v10, 1 }
 0x104   : > { %3818 = vmatprep.mubr.msk.bf16.mxu0 %vm1051_vm0, %v4242_v24  ;;  %6067 = vst [vmem:[#allocation25_spill] sm:$0xff] %v5268_v34  ;;  %2446 = vrot.lane.b32.xlu1 %v5268_v34, %s4288_s17  ;;  %v2245_v24 = vor.u32 %v2244_v43, %v664_v26  ;;  %v4245_v34 = vld [vmem:[%s4382_s14 + $0xf8] sm:$0xff]   ;;  %v2325_v54 = vor.u32 %v2324_v5, %v904_v23  ;;  %v990_v38 = vpop.permute.xlu0 %989 }
 0x105   : > { %v914_v40 = vshll.u32 %v4245_v34, 16  ;;  %v911_v26 = vshrl.u32 %v4245_v34, 16  ;;  %v2248_v48 = vor.u32 %v2246_v28, %v671_v37 }
 0x106   : > { %v2247_v51 = vsel %vm2243_vm4, %v2245_v24, %v2246_v28  ;;  %v2391_v24 = vpop.permute.xlu1 %2390 }
 0x107   : > { %1806 = vmatmul.mubr.bf16.gmra.mrb[60].mxu1 %v1362_v33  ;;  %v5280_v33 = vsel %vm4595_vm3, 0, %v909_v14  ;;  %v2326_v43 = vrot.slane %v914_v40, 1  ;;  %v676_v14 = vor.u32 %v674_v10, %v673_v49  ;;  %v913_v50 = vrot.slane %v911_v26, 7 }
 0x108   : > { %3847 = vmatprep.mubr.msk.bf16.mxu1 %vm1051_vm0, %v4637_v29  ;;  %1047 = vrot.lane.b32.xlu0 %v5280_v33, %s4288_s17  ;;  %v992_v37 = vpop.permute.xlu0 %991 }
 0x109   : > { %v5290_v47 = vsel %vm2243_vm4, %v2325_v54, %v2326_v43  ;;  %v916_v23 = vor.u32 %v914_v40, %v913_v50  ;;  %v677_v34 = vsel %vm662_vm2, %v666_v36, %v676_v14  ;;  %v2354_v50 = vsel %vm4619_vm6, %v2248_v48, 0  ;;  %v6071_v14 = vld [vmem:[#allocation4_spill] sm:$0xff] }
 0x10a   : > { %2448 = vrot.lane.b32.xlu1 %v5290_v47, %s4288_s17  ;;  %v1058_v10 = vsel %vm1051_vm0, %v677_v34, %v990_v38  ;;  %v2458_v40 = vsel %vm1051_vm0, %v2354_v50, %v2391_v24  ;;  %v2393_v28 = vpop.permute.xlu1 %2392  ;;  %v6073_v34 = vld [vmem:[#allocation8_spill] sm:$0xff] }
 0x10b   : > { %1678 = vmatmul.mubr.bf16.gmra.mrb[60].mxu0 %v1314_v41  ;;  %v2454_v41 = vsel %vm1051_vm0, %v2247_v51, %v2389_v52  ;;  %v5299_v49 = vsel %vm662_vm2, %v906_v12, %v916_v23  ;;  %v2328_v52 = vor.u32 %v2326_v43, %v911_v26  ;;  %v1062_v12 = vsel %vm1051_vm0, %v4607_v58, %v992_v37  ;;  %v6069_v43 = vld [vmem:[#allocation3_spill] sm:$0xff]  ;;  %v6070_v51 = vld [vmem:[#allocation6_spill] sm:$0xff] }
 0x10c   : > { %3915 = vmatprep.mubr.msk.bf16.mxu0 %vm1051_vm0, %v4644_v42  ;;  %1049 = vrot.lane.b32.xlu0 %v5299_v49, %s4288_s17  ;;  %v2462_v5 = vsel %vm1051_vm0, %v4613_v62, %v2393_v28  ;;  %v994_v54 = vpop.permute.xlu0 %993  ;;  %v6072_v23 = vld [vmem:[#allocation7_spill] sm:$0xff] }
 0x10d   : > { %v5310_v36 = vsel %vm4619_vm6, %v2328_v52, 0  ;;  %v1066_v26 = vsel %vm1051_vm0, %v6069_v43, %v994_v54  ;;  %v6074_v52 = vld [vmem:[#allocation9_spill] sm:$0xff] }
 0x10e   : > { %2450 = vrot.lane.b32.xlu1 %v5310_v36, %s4288_s17  ;;  %v2395_v58 = vpop.permute.xlu1 %2394  ;;  %v6078_v43 = vld [vmem:[#allocation13_spill] sm:$0xff] }
 0x10f   : > { %1987 = vmatmul.mubr.bf16.vlgmr.msra.gmra.mrb[64].mxu1 %v1054_v20  ;;  %v6068_v20 = vld [vmem:[#allocation5_spill] sm:$0xff] }
 0x110   : > { %3848 = vmatprep.mubr.msk.bf16.mxu1 %vm1051_vm0, %v4651_v53  ;;  %v996_v62 = vpop.permute.xlu0 %995 }
 0x111   : > { %v1070_v38 = vsel %vm1051_vm0, %v4637_v29, %v996_v62 }
 0x112   : > { %v2397_v48 = vpop.permute.xlu1 %2396 }
 0x113   : > { %2778 = vmatmul.mubr.bf16.vlgmr.msra.gmra.mrb[64].mxu0 %v2454_v41  ;;  %v2466_v41 = vsel %vm1051_vm0, %v6071_v14, %v2395_v58  ;;  %v6079_v58 = vld [vmem:[#allocation14_spill] sm:$0xff] }
 0x114   : > { %3916 = vmatprep.mubr.msk.bf16.mxu0 %vm1051_vm0, %v4657_v56  ;;  %v998_v24 = vpop.permute.xlu0 %997 }
 0x115   : > { %v1074_v50 = vsel %vm1051_vm0, %v4651_v53, %v998_v24 }
 0x116   : > { %v2399_v29 = vpop.permute.xlu1 %2398 }
 0x117   : > { %1995 = vmatmul.mubr.bf16.gmra.mrb[68].mxu1 %v1058_v10  ;;  %v2470_v10 = vsel %vm1051_vm0, %v4644_v42, %v2397_v48  ;;  %v2474_v37 = vsel %vm1051_vm0, %v4657_v56, %v2399_v29 }
 0x118   : > { %3849 = vmatprep.mubr.msk.bf16.mxu1 %vm1051_vm0, %v4664_v60  ;;  %v1000_v42 = vpop.permute.xlu0 %999 }
 0x119   : > { %v1078_v28 = vsel %vm1051_vm0, %v4664_v60, %v1000_v42 }
 0x11a   : > { %v2401_v53 = vpop.permute.xlu1 %2400 }
 0x11b   : > { %2786 = vmatmul.mubr.bf16.gmra.mrb[68].mxu0 %v2458_v40  ;;  %v6075_v40 = vld [vmem:[#allocation10_spill] sm:$0xff]  ;;  %v2478_v54 = vsel %vm1051_vm0, %v4670_v4, %v2401_v53 }
 0x11c   : > { %3917 = vmatprep.mubr.msk.bf16.mxu0 %vm1051_vm0, %v4670_v4  ;;  %v1002_v56 = vpop.permute.xlu0 %1001 }
 0x11e   : > { %v2403_v60 = vpop.permute.xlu1 %2402 }
 0x11f   : > { %2003 = vmatmul.mubr.bf16.gmra.mrb[72].mxu1 %v1062_v12  ;;  %v6076_v12 = vld [vmem:[#allocation11_spill] sm:$0xff]  ;;  %v2482_v14 = vsel %vm1051_vm0, %v6070_v51, %v2403_v60 }
 0x120   : > { %3850 = vmatprep.mubr.msk.bf16.mxu1 %vm1051_vm0, %v6068_v20  ;;  %v1004_v4 = vpop.permute.xlu0 %1003 }
 0x121   : > { %v1086_v62 = vsel %vm1051_vm0, %v6072_v23, %v1004_v4 }
 0x123   : > { %2794 = vmatmul.mubr.bf16.gmra.mrb[72].mxu0 %v2462_v5  ;;  %v6077_v5 = vld [vmem:[#allocation12_spill] sm:$0xff] }
 0x124   : > { %3918 = vmatprep.mubr.msk.bf16.mxu0 %vm1051_vm0, %v6070_v51  ;;  %v1006_v51 = vpop.permute.xlu0 %1005 }
 0x125   : > { %v1090_v24 = vsel %vm1051_vm0, %v6074_v52, %v1006_v51 }
 0x127   : > { %2011 = vmatmul.mubr.bf16.gmra.mrb[76].mxu1 %v1066_v26  ;;  %v1082_v26 = vsel %vm1051_vm0, %v6068_v20, %v1002_v56  ;;  %v2405_v20 = vpop.permute.xlu1 %2404 }
 0x128   : > { %3851 = vmatprep.mubr.msk.bf16.mxu1 %vm1051_vm0, %v6072_v23  ;;  %v2486_v48 = vsel %vm1051_vm0, %v6073_v34, %v2405_v20 }
 0x12b   : > { %2802 = vmatmul.mubr.bf16.gmra.mrb[76].mxu0 %v2466_v41  ;;  %v6080_v41 = vld [vmem:[#allocation15_spill] sm:$0xff]  ;;  %v2407_v23 = vpop.permute.xlu1 %2406 }
 0x12c   : > { %3919 = vmatprep.mubr.msk.bf16.mxu0 %vm1051_vm0, %v6073_v34  ;;  %v2490_v29 = vsel %vm1051_vm0, %v6075_v40, %v2407_v23  ;;  %v1008_v34 = vpop.permute.xlu0 %1007 }
 0x12d   : > { %v1094_v42 = vsel %vm1051_vm0, %v6076_v12, %v1008_v34 }
 0x12f   : > { %2019 = vmatmul.mubr.bf16.gmra.mrb[80].mxu1 %v1070_v38  ;;  %v6081_v38 = vld [vmem:[#allocation16_spill] sm:$0xff] }
 0x130   : > { %3852 = vmatprep.mubr.msk.bf16.mxu1 %vm1051_vm0, %v6074_v52  ;;  %v2409_v52 = vpop.permute.xlu1 %2408 }
 0x133   : > { %2810 = vmatmul.mubr.bf16.gmra.mrb[80].mxu0 %v2470_v10  ;;  %v6082_v10 = vld [vmem:[#allocation17_spill] sm:$0xff] }
 0x134   : > { %3920 = vmatprep.mubr.msk.bf16.mxu0 %vm1051_vm0, %v6075_v40  ;;  %v1010_v40 = vpop.permute.xlu0 %1009  ;;  %v2411_v60 = vpop.permute.xlu1 %2410 }
 0x137   : > { %2027 = vmatmul.mubr.bf16.gmra.mrb[84].mxu1 %v1074_v50  ;;  %v6083_v50 = vld [vmem:[#allocation18_spill] sm:$0xff] }
 0x138   : > { %3853 = vmatprep.mubr.msk.bf16.mxu1 %vm1051_vm0, %v6076_v12  ;;  %v1098_v12 = vsel %vm1051_vm0, %v6078_v43, %v1010_v40  ;;  %v2413_v34 = vpop.permute.xlu1 %2412 }
 0x13b   : > { %2818 = vmatmul.mubr.bf16.gmra.mrb[84].mxu0 %v2474_v37  ;;  %v6084_v37 = vld [vmem:[#allocation19_spill] sm:$0xff] }
 0x13c   : > { %3921 = vmatprep.mubr.msk.bf16.mxu0 %vm1051_vm0, %v6077_v5 }
 0x13f   : > { %2035 = vmatmul.mubr.bf16.gmra.mrb[88].mxu1 %v1078_v28  ;;  %v2494_v28 = vsel %vm1051_vm0, %v6077_v5, %v2409_v52 }
 0x140   : > { %3854 = vmatprep.mubr.msk.bf16.mxu1 %vm1051_vm0, %v6078_v43 }
 0x143   : > { %2826 = vmatmul.mubr.bf16.gmra.mrb[88].mxu0 %v2478_v54 }
 0x144   : > { %3922 = vmatprep.mubr.msk.bf16.mxu0 %vm1051_vm0, %v6079_v58 }
 0x147   : > { %2043 = vmatmul.mubr.bf16.gmra.mrb[92].mxu1 %v1082_v26 }
 0x148   : > { %3855 = vmatprep.mubr.msk.bf16.mxu1 %vm1051_vm0, %v6080_v41 }
 0x14b   : > { %2834 = vmatmul.mubr.bf16.gmra.mrb[92].mxu0 %v2482_v14 }
 0x14c   : > { %3923 = vmatprep.mubr.msk.bf16.mxu0 %vm1051_vm0, %v6081_v38 }
 0x14f   : > { %2051 = vmatmul.mubr.bf16.gmra.mrb[96].mxu1 %v1086_v62  ;;  %v2498_v62 = vsel %vm1051_vm0, %v6079_v58, %v2411_v60 }
 0x150   : > { %3856 = vmatprep.mubr.msk.bf16.mxu1 %vm1051_vm0, %v6082_v10 }
 0x153   : > { %2842 = vmatmul.mubr.bf16.gmra.mrb[96].mxu0 %v2486_v48  ;;  %v1012_v48 = vpop.permute.xlu0 %1011 }
 0x154   : > { %3924 = vmatprep.mubr.msk.bf16.mxu0 %vm1051_vm0, %v6083_v50  ;;  %v1102_v23 = vsel %vm1051_vm0, %v6080_v41, %v1012_v48 }
 0x157   : > { %2059 = vmatmul.mubr.bf16.gmra.mrb[100].mxu1 %v1090_v24 }
 0x158   : > { %3857 = vmatprep.mubr.msk.bf16.mxu1 %vm1051_vm0, %v6084_v37 }
 0x15b   : > { %2850 = vmatmul.mubr.bf16.gmra.mrb[100].mxu0 %v2490_v29 }
 0x15c   : > { %3925 = vmatprep.mubr.msk.bf16.mxu0 %vm1051_vm0, %v4794_v32 }
 0x15f   : > { %2067 = vmatmul.mubr.bf16.gmra.mrb[104].mxu1 %v1094_v42 }
 0x160   : > { %3858 = vmatprep.mubr.msk.bf16.mxu1 %vm1051_vm0, %v4807_v46 }
 0x162   : > { %v5389_v53 = vpop.f32.mrb[0].mxu1 }
 0x163   : > { %v1689_v54 = vpop.f32.mrb[1].mxu1  ;;  %2858 = vmatmul.mubr.bf16.gmra.mrb[104].mxu0 %v2494_v28  ;;  %v2502_v28 = vsel %vm1051_vm0, %v6081_v38, %v2413_v34 }
 0x164   : > { %v5391_v56 = vpop.f32.mrb[2].mxu1  ;;  %3926 = vmatprep.mubr.msk.bf16.mxu0 %vm1051_vm0, %v4820_v8  ;;  %v1014_v54 = vpop.permute.xlu0 %1013 }
 0x165   : > { %v1692_v26 = vpop.f32.mrb[3].mxu1  ;;  %v1106_v60 = vsel %vm1051_vm0, %v6082_v10, %v1014_v54 }
 0x166   : > { %v5397_v14 = vpop.f32.mrb[0].mxu0 }
 0x167   : > { %v1561_v5 = vpop.f32.mrb[1].mxu0  ;;  %2075 = vmatmul.mubr.bf16.gmra.mrb[108].mxu1 %v1098_v12 }
 0x168   : > { %v5399_v4 = vpop.f32.mrb[2].mxu0  ;;  %3859 = vmatprep.mubr.msk.bf16.mxu1 %vm1051_vm0, %v4831_v2  ;;  %v6089_v5 = vld [vmem:[#allocation20_spill] sm:$0xff]  ;;  %v1016_v34 = vpop.permute.xlu0 %1015 }
 0x169   : > { %v1564_v20 = vpop.f32.mrb[3].mxu0 }
 0x16a   : > { %v5405_v43 = vpop.f32.mrb[4].mxu1  ;;  %v2415_v20 = vpop.permute.xlu1 %2414 }
 0x16b   : > { %6085 = vst [vmem:[#allocation5_spill] sm:$0xff] %v5405_v43  ;;  %v1697_v51 = vpop.f32.mrb[5].mxu1  ;;  %2866 = vmatmul.mubr.bf16.gmra.mrb[108].mxu0 %v2498_v62 }
 0x16c   : > { %v5407_v24 = vpop.f32.mrb[6].mxu1  ;;  %3927 = vmatprep.mubr.msk.bf16.mxu0 %vm1051_vm0, %v4848_v18 }
 0x16d   : > { %6086 = vst [vmem:[#allocation3_spill] sm:$0xff] %v5407_v24  ;;  %v1700_v29 = vpop.f32.mrb[7].mxu1 }
 0x16e   : > { %v5413_v58 = vpop.f32.mrb[4].mxu0 }
 0x16f   : > { %v1569_v42 = vpop.f32.mrb[5].mxu0  ;;  %2083 = vmatmul.mubr.bf16.gmra.mrb[112].mxu1 %v1102_v23  ;;  %v2506_v23 = vsel %vm1051_vm0, %v6083_v50, %v2415_v20 }
 0x170   : > { %v5415_v52 = vpop.f32.mrb[6].mxu0  ;;  %3860 = vmatprep.mubr.msk.bf16.mxu1 %vm1051_vm0, %v4860_v59 }
 0x171   : > { %v1572_v40 = vpop.f32.mrb[7].mxu0 }
 0x172   : > { %v5421_v41 = vpop.f32.mrb[8].mxu1  ;;  %v1110_v40 = vsel %vm1051_vm0, %v6084_v37, %v1016_v34 }
 0x173   : > { %6087 = vst [vmem:[#allocation6_spill] sm:$0xff] %v5421_v41  ;;  %v1705_v12 = vpop.f32.mrb[9].mxu1  ;;  %2874 = vmatmul.mubr.bf16.gmra.mrb[112].mxu0 %v2502_v28 }
 0x174   : > { %v5423_v26 = vpop.f32.mrb[10].mxu1  ;;  %3928 = vmatprep.mubr.msk.bf16.mxu0 %vm1051_vm0, %v6089_v5  ;;  %v2417_v12 = vpop.permute.xlu1 %2416 }
 0x175   : > { %6088 = vst [vmem:[#allocation4_spill] sm:$0xff] %v5423_v26  ;;  %v1708_v62 = vpop.f32.mrb[11].mxu1  ;;  %v2510_v20 = vsel %vm1051_vm0, %v4794_v32, %v2417_v12 }
 0x176   : > { %v5429_v38 = vpop.f32.mrb[8].mxu0 }
 0x177   : > { %v1577_v48 = vpop.f32.mrb[9].mxu0  ;;  %2091 = vmatmul.mubr.bf16.gmra.mrb[116].mxu1 %v1106_v60 }
 0x178   : > { %v5431_v51 = vpop.f32.mrb[10].mxu0  ;;  %3861 = vmatprep.mubr.msk.bf16.mxu1 %vm1051_vm0, %v4893_v11 }
 0x179   : > { %v1580_v29 = vpop.f32.mrb[11].mxu0 }
 0x17a   : > { %v5437_v10 = vpop.f32.mrb[12].mxu1 }
 0x17b   : > { %6090 = vst [vmem:[#allocation7_spill] sm:$0xff] %v5437_v10  ;;  %v1713_v42 = vpop.f32.mrb[13].mxu1  ;;  %2882 = vmatmul.mubr.bf16.gmra.mrb[116].mxu0 %v2506_v23  ;;  %v1018_v23 = vpop.permute.xlu0 %1017 }
 0x17c   : > { %v5439_v28 = vpop.f32.mrb[14].mxu1  ;;  %3929 = vmatprep.mubr.msk.bf16.mxu0 %vm1051_vm0, %v4912_v17  ;;  %v1114_v42 = vsel %vm1051_vm0, %v4807_v46, %v1018_v23 }
 0x17d   : > { %6091 = vst [vmem:[#allocation8_spill] sm:$0xff] %v5439_v28  ;;  %v1716_v54 = vpop.f32.mrb[15].mxu1 }
 0x17e   : > { %v5445_v50 = vpop.f32.mrb[12].mxu0  ;;  %v2419_v54 = vpop.permute.xlu1 %2418 }
 0x17f   : > { %v1585_v60 = vpop.f32.mrb[13].mxu0  ;;  %2099 = vmatmul.mubr.bf16.gmra.mrb[120].mxu1 %v1110_v40 }
 0x180   : > { %v5447_v62 = vpop.f32.mrb[14].mxu0  ;;  %3862 = vmatprep.mubr.msk.bf16.mxu1 %vm1051_vm0, %v4929_v6 }
 0x181   : > { %v1588_v48 = vpop.f32.mrb[15].mxu0 }
 0x182   : > { %v5453_v37 = vpop.f32.mrb[16].mxu1  ;;  %v2514_v48 = vsel %vm1051_vm0, %v4820_v8, %v2419_v54 }
 0x183   : > { %6092 = vst [vmem:[#allocation9_spill] sm:$0xff] %v5453_v37  ;;  %v1721_v29 = vpop.f32.mrb[17].mxu1  ;;  %2890 = vmatmul.mubr.bf16.gmra.mrb[120].mxu0 %v2510_v20 }
 0x184   : > { %v5455_v34 = vpop.f32.mrb[18].mxu1  ;;  %3930 = vmatprep.mubr.msk.bf16.mxu0 %vm1051_vm0, %v4947_v7  ;;  %v1020_v29 = vpop.permute.xlu0 %1019 }
 0x185   : > { %6093 = vst [vmem:[#allocation10_spill] sm:$0xff] %v5455_v34  ;;  %v1724_v40 = vpop.f32.mrb[19].mxu1  ;;  %v2421_v34 = vpop.permute.xlu1 %2420 }
 0x186   : > { %v5461_v32 = vpop.f32.mrb[16].mxu0 }
 0x187   : > { %v1593_v12 = vpop.f32.mrb[17].mxu0  ;;  %2107 = vmatmul.mubr.bf16.gmra.mrb[124].mxu1 %v1114_v42 }
 0x188   : > { %v5463_v60 = vpop.f32.mrb[18].mxu0  ;;  %3863 = vmatprep.mubr.msk.bf16.mxu1 %vm1051_vm0, %v4967_v9  ;;  %v1118_v12 = vsel %vm1051_vm0, %v4831_v2, %v1020_v29 }
 0x189   : > { %v1596_v20 = vpop.f32.mrb[19].mxu0 }
 0x18a   : > { %v5469_v46 = vpop.f32.mrb[20].mxu1 }
 0x18b   : > { %6094 = vst [vmem:[#allocation11_spill] sm:$0xff] %v5469_v46  ;;  %v1729_v23 = vpop.f32.mrb[21].mxu1  ;;  %2898 = vmatmul.mubr.bf16.gmra.mrb[124].mxu0 %v2514_v48  ;;  %v2423_v46 = vpop.permute.xlu1 %2422 }
 0x18c   : > { %v5471_v40 = vpop.f32.mrb[22].mxu1  ;;  %3931 = vmatprep.mubr.msk.bf16.mxu0 %vm1051_vm0, %v4986_v22  ;;  %v2518_v23 = vsel %vm1051_vm0, %v4848_v18, %v2421_v34 }
 0x18d   : > { %6095 = vst [vmem:[#allocation12_spill] sm:$0xff] %v5471_v40  ;;  %v1732_v42 = vpop.f32.mrb[23].mxu1  ;;  %v1022_v40 = vpop.permute.xlu0 %1021 }
 0x18e   : > { %v5477_v8 = vpop.f32.mrb[20].mxu0 }
 0x18f   : > { %v1601_v54 = vpop.f32.mrb[21].mxu0  ;;  %2115 = vmatmul.mubr.bf16.gmra.mrb[128].mxu1 %v1118_v12 }
 0x190   : > { %v5479_v20 = vpop.f32.mrb[22].mxu0  ;;  %3864 = vmatprep.mubr.msk.bf16.mxu1 %vm1051_vm0, %v5003_v0  ;;  %v1122_v54 = vsel %vm1051_vm0, %v4860_v59, %v1022_v40 }
 0x191   : > { %v1604_v48 = vpop.f32.mrb[23].mxu0 }
 0x192   : > { %v5485_v2 = vpop.f32.mrb[24].mxu1 }
 0x193   : > { %6096 = vst [vmem:[#allocation13_spill] sm:$0xff] %v5485_v2  ;;  %v1737_v29 = vpop.f32.mrb[25].mxu1  ;;  %2906 = vmatmul.mubr.bf16.gmra.mrb[128].mxu0 %v2518_v23  ;;  %v2425_v2 = vpop.permute.xlu1 %2424 }
 0x194   : > { %v5487_v42 = vpop.f32.mrb[26].mxu1  ;;  %3932 = vmatprep.mubr.msk.bf16.mxu0 %vm1051_vm0, %v5021_v13  ;;  %v2522_v29 = vsel %vm1051_vm0, %v6089_v5, %v2423_v46 }
 0x195   : > { %6097 = vst [vmem:[#allocation14_spill] sm:$0xff] %v5487_v42  ;;  %v1740_v12 = vpop.f32.mrb[27].mxu1  ;;  %v1024_v42 = vpop.permute.xlu0 %1023 }
 0x196   : > { %v5493_v18 = vpop.f32.mrb[24].mxu0 }
 0x197   : > { %v1609_v34 = vpop.f32.mrb[25].mxu0  ;;  %2123 = vmatmul.mubr.bf16.gmra.mrb[132].mxu1 %v1122_v54 }
 0x198   : > { %v5495_v48 = vpop.f32.mrb[26].mxu0  ;;  %3865 = vmatprep.mubr.msk.bf16.mxu1 %vm1051_vm0, %v5041_v44  ;;  %v1126_v34 = vsel %vm1051_vm0, %v4893_v11, %v1024_v42 }
 0x199   : > { %v1612_v23 = vpop.f32.mrb[27].mxu0 }
 0x19a   : > { %v5501_v59 = vpop.f32.mrb[28].mxu1 }
 0x19b   : > { %6098 = vst [vmem:[#allocation15_spill] sm:$0xff] %v5501_v59  ;;  %v1745_v40 = vpop.f32.mrb[29].mxu1  ;;  %2914 = vmatmul.mubr.bf16.gmra.mrb[132].mxu0 %v2522_v29  ;;  %v2427_v59 = vpop.permute.xlu1 %2426 }
 0x19c   : > { %v5503_v12 = vpop.f32.mrb[30].mxu1  ;;  %3933 = vmatprep.mubr.msk.bf16.mxu0 %vm1051_vm0, %v5056_v63  ;;  %v2526_v40 = vsel %vm1051_vm0, %v4912_v17, %v2425_v2 }
 0x19d   : > { %6099 = vst [vmem:[#allocation16_spill] sm:$0xff] %v5503_v12  ;;  %v1748_v54 = vpop.f32.mrb[31].mxu1  ;;  %v1026_v12 = vpop.permute.xlu0 %1025 }
 0x19e   : > { %v5509_v5 = vpop.f32.mrb[28].mxu0 }
 0x19f   : > { %v1617_v46 = vpop.f32.mrb[29].mxu0  ;;  %2131 = vmatmul.mubr.bf16.gmra.mrb[136].mxu1 %v1126_v34 }
 0x1a0   : > { %v5511_v23 = vpop.f32.mrb[30].mxu0  ;;  %3866 = vmatprep.mubr.msk.bf16.mxu1 %vm1051_vm0, %v5065_v45  ;;  %v1130_v46 = vsel %vm1051_vm0, %v4929_v6, %v1026_v12 }
 0x1a1   : > { %v1620_v29 = vpop.f32.mrb[31].mxu0 }
 0x1a2   : > { %v5517_v11 = vpop.f32.mrb[32].mxu1 }
 0x1a3   : > { %6100 = vst [vmem:[#allocation17_spill] sm:$0xff] %v5517_v11  ;;  %v1753_v42 = vpop.f32.mrb[33].mxu1  ;;  %2922 = vmatmul.mubr.bf16.gmra.mrb[136].mxu0 %v2526_v40  ;;  %v2429_v11 = vpop.permute.xlu1 %2428 }
 0x1a4   : > { %v5519_v54 = vpop.f32.mrb[34].mxu1  ;;  %3934 = vmatprep.mubr.msk.bf16.mxu0 %vm1051_vm0, %v5076_v16  ;;  %v2530_v42 = vsel %vm1051_vm0, %v4947_v7, %v2427_v59 }
 0x1a5   : > { %6101 = vst [vmem:[#allocation18_spill] sm:$0xff] %v5519_v54  ;;  %v1756_v34 = vpop.f32.mrb[35].mxu1  ;;  %v1028_v54 = vpop.permute.xlu0 %1027 }
 0x1a6   : > { %v5525_v17 = vpop.f32.mrb[32].mxu0 }
 0x1a7   : > { %v1625_v2 = vpop.f32.mrb[33].mxu0  ;;  %2139 = vmatmul.mubr.bf16.gmra.mrb[140].mxu1 %v1130_v46 }
 0x1a8   : > { %v5527_v29 = vpop.f32.mrb[34].mxu0  ;;  %3867 = vmatprep.mubr.msk.bf16.mxu1 %vm1051_vm0, %v5086_v61  ;;  %v1134_v2 = vsel %vm1051_vm0, %v4967_v9, %v1028_v54 }
 0x1a9   : > { %v1628_v40 = vpop.f32.mrb[35].mxu0 }
 0x1aa   : > { %v5533_v6 = vpop.f32.mrb[36].mxu1 }
 0x1ab   : > { %6102 = vst [vmem:[#allocation19_spill] sm:$0xff] %v5533_v6  ;;  %v1761_v12 = vpop.f32.mrb[37].mxu1  ;;  %2930 = vmatmul.mubr.bf16.gmra.mrb[140].mxu0 %v2530_v42  ;;  %v2431_v6 = vpop.permute.xlu1 %2430 }
 0x1ac   : > { %v5535_v34 = vpop.f32.mrb[38].mxu1  ;;  %3935 = vmatprep.mubr.msk.bf16.mxu0 %vm1051_vm0, %v5095_v19  ;;  %v2534_v12 = vsel %vm1051_vm0, %v4986_v22, %v2429_v11 }
 0x1ad   : > { %6103 = vst [vmem:[#allocation20_spill] sm:$0xff] %v5535_v34  ;;  %v1764_v46 = vpop.f32.mrb[39].mxu1  ;;  %v1030_v34 = vpop.permute.xlu0 %1029 }
 0x1ae   : > { %v5541_v7 = vpop.f32.mrb[36].mxu0 }
 0x1af   : > { %v1633_v59 = vpop.f32.mrb[37].mxu0  ;;  %2147 = vmatmul.mubr.bf16.gmra.mrb[144].mxu1 %v1134_v2 }
 0x1b0   : > { %v5543_v40 = vpop.f32.mrb[38].mxu0  ;;  %3868 = vmatprep.mubr.msk.bf16.mxu1 %vm1051_vm0, %v5104_v30  ;;  %v1138_v59 = vsel %vm1051_vm0, %v5003_v0, %v1030_v34 }
 0x1b1   : > { %v1636_v42 = vpop.f32.mrb[39].mxu0 }
 0x1b2   : > { %v5549_v9 = vpop.f32.mrb[40].mxu1 }
 0x1b3   : > { %6104 = vst [vmem:[#allocation26_spill] sm:$0xff] %v5549_v9  ;;  %v1769_v54 = vpop.f32.mrb[41].mxu1  ;;  %2938 = vmatmul.mubr.bf16.gmra.mrb[144].mxu0 %v2534_v12  ;;  %v2433_v9 = vpop.permute.xlu1 %2432 }
 0x1b4   : > { %v5551_v46 = vpop.f32.mrb[42].mxu1  ;;  %3936 = vmatprep.mubr.msk.bf16.mxu0 %vm1051_vm0, %v5115_v25  ;;  %v2538_v54 = vsel %vm1051_vm0, %v5021_v13, %v2431_v6 }
 0x1b5   : > { %6105 = vst [vmem:[#allocation27_spill] sm:$0xff] %v5551_v46  ;;  %v1772_v2 = vpop.f32.mrb[43].mxu1  ;;  %v1032_v46 = vpop.permute.xlu0 %1031 }
 0x1b6   : > { %v5557_v22 = vpop.f32.mrb[40].mxu0 }
 0x1b7   : > { %v1641_v11 = vpop.f32.mrb[41].mxu0  ;;  %2155 = vmatmul.mubr.bf16.gmra.mrb[148].mxu1 %v1138_v59 }
 0x1b8   : > { %v5559_v42 = vpop.f32.mrb[42].mxu0  ;;  %3869 = vmatprep.mubr.msk.bf16.mxu1 %vm1051_vm0, %v5131_v21  ;;  %v1142_v11 = vsel %vm1051_vm0, %v5041_v44, %v1032_v46 }
 0x1b9   : > { %v1644_v12 = vpop.f32.mrb[43].mxu0 }
 0x1ba   : > { %v5565_v0 = vpop.f32.mrb[44].mxu1 }
 0x1bb   : > { %6106 = vst [vmem:[#allocation28_spill] sm:$0xff] %v5565_v0  ;;  %v1777_v34 = vpop.f32.mrb[45].mxu1  ;;  %2946 = vmatmul.mubr.bf16.gmra.mrb[148].mxu0 %v2538_v54  ;;  %v2435_v0 = vpop.permute.xlu1 %2434 }
 0x1bc   : > { %v5567_v2 = vpop.f32.mrb[46].mxu1  ;;  %3937 = vmatprep.mubr.msk.bf16.mxu0 %vm1051_vm0, %v5142_v57  ;;  %v2542_v34 = vsel %vm1051_vm0, %v5056_v63, %v2433_v9 }
 0x1bd   : > { %6107 = vst [vmem:[#allocation29_spill] sm:$0xff] %v5567_v2  ;;  %v1780_v59 = vpop.f32.mrb[47].mxu1  ;;  %v1034_v2 = vpop.permute.xlu0 %1033 }
 0x1be   : > { %v5573_v13 = vpop.f32.mrb[44].mxu0 }
 0x1bf   : > { %v1649_v6 = vpop.f32.mrb[45].mxu0  ;;  %2163 = vmatmul.mubr.bf16.gmra.mrb[152].mxu1 %v1142_v11 }
 0x1c0   : > { %v5575_v12 = vpop.f32.mrb[46].mxu0  ;;  %3870 = vmatprep.mubr.msk.bf16.mxu1 %vm1051_vm0, %v5151_v27  ;;  %v1146_v6 = vsel %vm1051_vm0, %v5065_v45, %v1034_v2 }
 0x1c1   : > { %v1652_v54 = vpop.f32.mrb[47].mxu0 }
 0x1c2   : > { %v5581_v44 = vpop.f32.mrb[48].mxu1 }
 0x1c3   : > { %6108 = vst [vmem:[#allocation30_spill] sm:$0xff] %v5581_v44  ;;  %v1785_v46 = vpop.f32.mrb[49].mxu1  ;;  %2954 = vmatmul.mubr.bf16.gmra.mrb[152].mxu0 %v2542_v34  ;;  %v2437_v44 = vpop.permute.xlu1 %2436 }
 0x1c4   : > { %v5583_v59 = vpop.f32.mrb[50].mxu1  ;;  %3938 = vmatprep.mubr.msk.bf16.mxu0 %vm1051_vm0, %v5163_v55  ;;  %v2546_v46 = vsel %vm1051_vm0, %v5076_v16, %v2435_v0 }
 0x1c5   : > { %6109 = vst [vmem:[#allocation31_spill] sm:$0xff] %v5583_v59  ;;  %v1788_v11 = vpop.f32.mrb[51].mxu1  ;;  %v1036_v59 = vpop.permute.xlu0 %1035 }
 0x1c6   : > { %v5589_v63 = vpop.f32.mrb[48].mxu0 }
 0x1c7   : > { %v1657_v9 = vpop.f32.mrb[49].mxu0  ;;  %2171 = vmatmul.mubr.bf16.gmra.mrb[156].mxu1 %v1146_v6 }
 0x1c8   : > { %v5591_v54 = vpop.f32.mrb[50].mxu0  ;;  %3871 = vmatprep.mubr.msk.bf16.mxu1 %vm1051_vm0, %v5173_v15  ;;  %v1150_v9 = vsel %vm1051_vm0, %v5086_v61, %v1036_v59 }
 0x1c9   : > { %v1660_v34 = vpop.f32.mrb[51].mxu0 }
 0x1ca   : > { %v5597_v45 = vpop.f32.mrb[52].mxu1 }
 0x1cb   : > { %6110 = vst [vmem:[#allocation32_spill] sm:$0xff] %v5597_v45  ;;  %v1793_v2 = vpop.f32.mrb[53].mxu1  ;;  %2962 = vmatmul.mubr.bf16.gmra.mrb[156].mxu0 %v2546_v46  ;;  %v2439_v45 = vpop.permute.xlu1 %2438 }
 0x1cc   : > { %v5599_v11 = vpop.f32.mrb[54].mxu1  ;;  %3939 = vmatprep.mubr.msk.bf16.mxu0 %vm1051_vm0, %v5193_v35  ;;  %v2550_v2 = vsel %vm1051_vm0, %v5095_v19, %v2437_v44 }
 0x1cd   : > { %6111 = vst [vmem:[#allocation33_spill] sm:$0xff] %v5599_v11  ;;  %v1796_v6 = vpop.f32.mrb[55].mxu1  ;;  %v1038_v11 = vpop.permute.xlu0 %1037 }
 0x1ce   : > { %v5605_v16 = vpop.f32.mrb[52].mxu0 }
 0x1cf   : > { %v1665_v0 = vpop.f32.mrb[53].mxu0  ;;  %2179 = vmatmul.mubr.bf16.gmra.mrb[160].mxu1 %v1150_v9  ;;  %v2441_v37 = vpop.permute.xlu1 %2440 }
 0x1d0   : > { %v5607_v34 = vpop.f32.mrb[54].mxu0  ;;  %3872 = vmatprep.mubr.msk.bf16.mxu1 %vm1051_vm0, %v5206_v1  ;;  %v1154_v0 = vsel %vm1051_vm0, %v5104_v30, %v1038_v11 }
 0x1d1   : > { %v1668_v46 = vpop.f32.mrb[55].mxu0 }
 0x1d2   : > { %v5613_v61 = vpop.f32.mrb[56].mxu1 }
 0x1d3   : > { %6112 = vst [vmem:[#allocation34_spill] sm:$0xff] %v5613_v61  ;;  %v1801_v59 = vpop.f32.mrb[57].mxu1  ;;  %2970 = vmatmul.mubr.bf16.gmra.mrb[160].mxu0 %v2550_v2 }
 0x1d4   : > { %v5615_v6 = vpop.f32.mrb[58].mxu1  ;;  %3940 = vmatprep.mubr.msk.bf16.mxu0 %vm1051_vm0, %v5220_v39  ;;  %v2554_v59 = vsel %vm1051_vm0, %v5115_v25, %v2439_v45 }
 0x1d5   : > { %6113 = vst [vmem:[#allocation35_spill] sm:$0xff] %v5615_v6  ;;  %v1804_v9 = vpop.f32.mrb[59].mxu1  ;;  %v1040_v6 = vpop.permute.xlu0 %1039 }
 0x1d6   : > { %v5621_v19 = vpop.f32.mrb[56].mxu0 }
 0x1d7   : > { %v1673_v44 = vpop.f32.mrb[57].mxu0  ;;  %2187 = vmatmul.mubr.bf16.gmra.mrb[164].mxu1 %v1154_v0  ;;  %v6116_v0 = vld [vmem:[#allocation23_spill] sm:$0xff] }
 0x1d8   : > { %v5623_v46 = vpop.f32.mrb[58].mxu0  ;;  %3873 = vmatprep.mubr.msk.bf16.mxu1 %vm1051_vm0, %v5234_v31  ;;  %v1158_v44 = vsel %vm1051_vm0, %v5131_v21, %v1040_v6 }
 0x1d9   : > { %v1676_v2 = vpop.f32.mrb[59].mxu0 }
 0x1da   : > { %v5629_v30 = vpop.f32.mrb[60].mxu1 }
 0x1db   : > { %6114 = vst [vmem:[#allocation36_spill] sm:$0xff] %v5629_v30  ;;  %v1809_v11 = vpop.f32.mrb[61].mxu1  ;;  %2978 = vmatmul.mubr.bf16.gmra.mrb[164].mxu0 %v2554_v59  ;;  %v6117_v59 = vld [vmem:[#allocation24_spill] sm:$0xff]  ;;  %v1042_v30 = vpop.permute.xlu0 %1041 }
 0x1dc   : > { %v5631_v9 = vpop.f32.mrb[62].mxu1  ;;  %3941 = vmatprep.mubr.msk.bf16.mxu0 %vm1051_vm0, %v6116_v0  ;;  %v2558_v11 = vsel %vm1051_vm0, %v5142_v57, %v2441_v37  ;;  %v2443_v37 = vpop.permute.xlu1 %2442 }
 0x1dd   : > { %6115 = vst [vmem:[#allocation37_spill] sm:$0xff] %v5631_v9  ;;  %v1812_v61 = vpop.f32.mrb[63].mxu1 }
 0x1de   : > { %v5637_v25 = vpop.f32.mrb[60].mxu0 }
 0x1df   : > { %v1681_v45 = vpop.f32.mrb[61].mxu0  ;;  %2195 = vmatmul.mubr.bf16.gmra.mrb[168].mxu1 %v1158_v44  ;;  %v6118_v44 = vld [vmem:[#allocation25_spill] sm:$0xff]  ;;  %v1044_v41 = vpop.permute.xlu0 %1043 }
 0x1e0   : > { %v5639_v2 = vpop.f32.mrb[62].mxu0  ;;  %3874 = vmatprep.mubr.msk.bf16.mxu1 %vm1051_vm0, %v6117_v59  ;;  %v1162_v45 = vsel %vm1051_vm0, %v5151_v27, %v1042_v30  ;;  %v2562_v27 = vsel %vm1051_vm0, %v5163_v55, %v2443_v37 }
 0x1e1   : > { %v1684_v9 = vpop.f32.mrb[63].mxu0 }
 0x1e2   : > { %v1988_v21 = vpop.f32.mrb[64].mxu1  ;;  %v5654_v9 = vld [vmem:[%s5985_s4] ss:$0 sm:$0xff] }
 0x1e3   : > { %v1989_v6 = vadd.f32 %v1988_v21, %v5397_v14  ;;  %v1990_v28 = vpop.f32.mrb[65].mxu1  ;;  %2986 = vmatmul.mubr.bf16.gmra.mrb[168].mxu0 %v2558_v11 }
 0x1e4   : > { %v1991_v61 = vpop.f32.mrb[66].mxu1  ;;  %3942 = vmatprep.mubr.msk.bf16.mxu0 %vm1051_vm0, %v6118_v44 }
 0x1e5   : > { %v1992_v10 = vadd.f32 %v1991_v61, %v5399_v4  ;;  %v1993_v57 = vpop.f32.mrb[67].mxu1  ;;  %v6119_v4 = vld [vmem:[#allocation21_spill] sm:$0xff] }
 0x1e6   : > { %v2779_v26 = vpop.f32.mrb[64].mxu0  ;;  %v919_v30 = vshrl.u32 %v6119_v4, 16 }
 0x1e7   : > { %v3034_v14 = vadd.f32 %v2779_v26, %v1989_v6  ;;  %2203 = vmatmul.mubr.bf16.gmra.mrb[172].mxu1 %v1162_v45  ;;  %v2781_v28 = vpop.f32.mrb[65].mxu0 }
 0x1e8   : > { %v2782_v11 = vpop.f32.mrb[66].mxu0  ;;  %3875 = vmatprep.mubr.msk.bf16.mxu1 %vm1051_vm0, %v5280_v33  ;;  %v1166_v33 = vsel %vm1051_vm0, %v5173_v15, %v1044_v41 }
 0x1e9   : > { %v3105_v21 = vadd.f32 %v5654_v9, %v3034_v14  ;;  %v3035_v61 = vadd.f32 %v2782_v11, %v1992_v10  ;;  %v2784_v57 = vpop.f32.mrb[67].mxu0  ;;  %v5675_v10 = vrot.slane %v919_v30, 7  ;;  %v2445_v11 = vpop.permute.xlu1 %2444 }
 0x1ea   : > { %v1996_v24 = vpop.f32.mrb[68].mxu1 }
 0x1eb   : > { %v3169_v43 = vmax.f32 %v3105_v21, 0.0  ;;  %v3106_v26 = vadd.f32 %v5654_v9, %v3035_v61  ;;  %v1997_v6 = vadd.f32 %v1996_v24, %v5413_v58  ;;  %v1998_v45 = vpop.f32.mrb[69].mxu1  ;;  %2994 = vmatmul.mubr.bf16.gmra.mrb[172].mxu0 %v2562_v27  ;;  %v922_v24 = vshll.u32 %v6119_v4, 16 }
 0x1ec   : > { %v1999_v55 = vpop.f32.mrb[70].mxu1  ;;  %3943 = vmatprep.mubr.msk.bf16.mxu0 %vm1051_vm0, %v5290_v47  ;;  %v2566_v47 = vsel %vm1051_vm0, %v5193_v35, %v2445_v11 }
 0x1ed   : > { %v4022_v58 = vpack.c.bf16 %v3169_v43, %v3169_v43  ;;  %v3170_v37 = vmax.f32 %v3106_v26, 0.0  ;;  %v2000_v14 = vadd.f32 %v1999_v55, %v5415_v52  ;;  %v2001_v28 = vpop.f32.mrb[71].mxu1  ;;  %v924_v43 = vor.u32 %v922_v24, %v5675_v10  ;;  %v6120_v52 = vld [vmem:[#allocation22_spill] sm:$0xff]  ;;  %v1046_v55 = vpop.permute.xlu0 %1045 }
 0x1ee   : > { %v2787_v27 = vpop.f32.mrb[68].mxu0  ;;  %v2329_v4 = vrot.slane %v922_v24, 1  ;;  %v926_v57 = vshrl.u32 %v6120_v52, 16  ;;  %v1170_v11 = vsel %vm1051_vm0, %v5206_v1, %v1046_v55 }
 0x1ef   : > { %3490 = vst.msk [vmem:[%s5669_s28] sm:$0xf] %vm3489_vm9, %v4022_v58  ;;  %v4023_v21 = vpack.c.bf16 %v3170_v37, %v3170_v37  ;;  %v3036_v61 = vadd.f32 %v2787_v27, %v1997_v6  ;;  %2211 = vmatmul.mubr.bf16.gmra.mrb[176].mxu1 %v1166_v33  ;;  %v2789_v15 = vpop.f32.mrb[69].mxu0  ;;  %v929_v33 = vshll.u32 %v6120_v52, 16  ;;  %v970_v27 = vsel %vm4595_vm3, 0, %v924_v43 }
 0x1f0   : > { %v2790_v41 = vpop.f32.mrb[70].mxu0  ;;  %3876 = vmatprep.mubr.msk.bf16.mxu1 %vm1051_vm0, %v5299_v49 }
 0x1f1   : > { %3491 = vst.msk [vmem:[%s5669_s28 + $0x4] sm:$0xf] %vm3489_vm9, %v4023_v21  ;;  %v3107_v26 = vadd.f32 %v5654_v9, %v3036_v61  ;;  %v3037_v45 = vadd.f32 %v2790_v41, %v2000_v14  ;;  %v2792_v6 = vpop.f32.mrb[71].mxu0  ;;  %v2330_v21 = vor.u32 %v2329_v4, %v919_v30  ;;  %v928_v61 = vrot.slane %v926_v57, 7 }
 0x1f2   : > { %v2004_v58 = vpop.f32.mrb[72].mxu1 }
 0x1f3   : > { %v3171_v37 = vmax.f32 %v3107_v26, 0.0  ;;  %v3108_v35 = vadd.f32 %v5654_v9, %v3037_v45  ;;  %v2005_v49 = vadd.f32 %v2004_v58, %v5429_v38  ;;  %v2006_v28 = vpop.f32.mrb[73].mxu1  ;;  %3002 = vmatmul.mubr.bf16.gmra.mrb[176].mxu0 %v2566_v47  ;;  %v2447_v26 = vpop.permute.xlu1 %2446  ;;  %v2331_v47 = vrot.slane %v929_v33, 1 }
 0x1f4   : > { %v2007_v24 = vpop.f32.mrb[74].mxu1  ;;  %3944 = vmatprep.mubr.msk.bf16.mxu0 %vm1051_vm0, %v5310_v36  ;;  %v2570_v30 = vsel %vm1051_vm0, %v5220_v39, %v2447_v26  ;;  %v931_v43 = vor.u32 %v929_v33, %v928_v61 }
 0x1f5   : > { %v4024_v15 = vpack.c.bf16 %v3171_v37, %v3171_v37  ;;  %v3172_v41 = vmax.f32 %v3108_v35, 0.0  ;;  %v2008_v38 = vadd.f32 %v2007_v24, %v5431_v51  ;;  %v2009_v52 = vpop.f32.mrb[75].mxu1  ;;  %v1048_v37 = vpop.permute.xlu0 %1047  ;;  %v2332_v35 = vsel %vm2243_vm4, %v2330_v21, %v2331_v47 }
 0x1f6   : > { %v2795_v45 = vpop.f32.mrb[72].mxu0  ;;  %v1174_v33 = vsel %vm1051_vm0, %v5234_v31, %v1048_v37  ;;  %v2333_v52 = vor.u32 %v2331_v47, %v926_v57 }
 0x1f7   : > { %3492 = vst.msk [vmem:[%s5669_s28 + $0x8] sm:$0xf] %vm3489_vm9, %v4024_v15  ;;  %v4025_v1 = vpack.c.bf16 %v3172_v41, %v3172_v41  ;;  %v3038_v6 = vadd.f32 %v2795_v45, %v2005_v49  ;;  %2219 = vmatmul.mubr.bf16.gmra.mrb[180].mxu1 %v1170_v11  ;;  %v2797_v36 = vpop.f32.mrb[73].mxu0 }
 0x1f8   : > { %v2798_v55 = vpop.f32.mrb[74].mxu0  ;;  %3877 = vmatprep.mubr.msk.bf16.mxu1 %vm1051_vm0, %v970_v27  ;;  %v932_v27 = vsel %vm662_vm2, %v5675_v10, %v931_v43  ;;  %v2371_v47 = vsel %vm4619_vm6, %v2333_v52, 0 }
 0x1f9   : > { %3493 = vst.msk [vmem:[%s5669_s28 + $0xc] sm:$0xf] %vm3489_vm9, %v4025_v1  ;;  %v3109_v51 = vadd.f32 %v5654_v9, %v3038_v6  ;;  %v3039_v4 = vadd.f32 %v2798_v55, %v2008_v38  ;;  %v2800_v58 = vpop.f32.mrb[75].mxu0  ;;  %v2449_v38 = vpop.permute.xlu1 %2448 }
 0x1fa   : > { %v2012_v28 = vpop.f32.mrb[76].mxu1  ;;  %v2574_v6 = vsel %vm1051_vm0, %v6116_v0, %v2449_v38  ;;  %v1050_v57 = vpop.permute.xlu0 %1049 }
 0x1fb   : > { %v3173_v49 = vmax.f32 %v3109_v51, 0.0  ;;  %v3110_v24 = vadd.f32 %v5654_v9, %v3039_v4  ;;  %v2013_v11 = vadd.f32 %v2012_v28, %v5445_v50  ;;  %v2014_v39 = vpop.f32.mrb[77].mxu1  ;;  %3010 = vmatmul.mubr.bf16.gmra.mrb[180].mxu0 %v2570_v30  ;;  %v1178_v58 = vsel %vm1051_vm0, %v6117_v59, %v1050_v57 }
 0x1fc   : > { %v2015_v14 = vpop.f32.mrb[78].mxu1  ;;  %3945 = vmatprep.mubr.msk.bf16.mxu0 %vm1051_vm0, %v2332_v35 }
 0x1fd   : > { %v4026_v21 = vpack.c.bf16 %v3173_v49, %v3173_v49  ;;  %v3174_v61 = vmax.f32 %v3110_v24, 0.0  ;;  %v2016_v15 = vadd.f32 %v2015_v14, %v5447_v62  ;;  %v2017_v41 = vpop.f32.mrb[79].mxu1  ;;  %v2451_v49 = vpop.permute.xlu1 %2450 }
 0x1fe   : > { %v2803_v50 = vpop.f32.mrb[76].mxu0 }
 0x1ff   : > { %3494 = vst.msk [vmem:[%s5669_s28 + $0x10] sm:$0xf] %vm3489_vm9, %v4026_v21  ;;  %v4027_v26 = vpack.c.bf16 %v3174_v61, %v3174_v61  ;;  %v3040_v45 = vadd.f32 %v2803_v50, %v2013_v11  ;;  %2227 = vmatmul.mubr.bf16.gmra.mrb[184].mxu1 %v1174_v33  ;;  %v2805_v31 = vpop.f32.mrb[77].mxu0  ;;  %v2578_v33 = vsel %vm1051_vm0, %v6118_v44, %v2451_v49 }
 0x200   : > { %v2806_v1 = vpop.f32.mrb[78].mxu0  ;;  %3878 = vmatprep.mubr.msk.bf16.mxu1 %vm1051_vm0, %v932_v27 }
 0x201   : > { %3495 = vst.msk [vmem:[%s5669_s28 + $0x14] sm:$0xf] %vm3489_vm9, %v4027_v26  ;;  %v3111_v62 = vadd.f32 %v5654_v9, %v3040_v45  ;;  %v3041_v10 = vadd.f32 %v2806_v1, %v2016_v15  ;;  %v2808_v36 = vpop.f32.mrb[79].mxu0 }
 0x202   : > { %v2020_v55 = vpop.f32.mrb[80].mxu1 }
 0x203   : > { %v3175_v30 = vmax.f32 %v3111_v62, 0.0  ;;  %v3112_v43 = vadd.f32 %v5654_v9, %v3041_v10  ;;  %v2021_v51 = vadd.f32 %v2020_v55, %v5461_v32  ;;  %v2022_v0 = vpop.f32.mrb[81].mxu1  ;;  %3018 = vmatmul.mubr.bf16.gmra.mrb[184].mxu0 %v2574_v6 }
 0x204   : > { %v2023_v4 = vpop.f32.mrb[82].mxu1  ;;  %3946 = vmatprep.mubr.msk.bf16.mxu0 %vm1051_vm0, %v2371_v47 }
 0x205   : > { %v4028_v37 = vpack.c.bf16 %v3175_v30, %v3175_v30  ;;  %v3176_v35 = vmax.f32 %v3112_v43, 0.0  ;;  %v2024_v3 = vadd.f32 %v2023_v4, %v5463_v60  ;;  %v2025_v28 = vpop.f32.mrb[83].mxu1 }
 0x206   : > { %v2811_v24 = vpop.f32.mrb[80].mxu0 }
 0x207   : > { %3496 = vst.msk [vmem:[%s5669_s28 + $0x18] sm:$0xf] %vm3489_vm9, %v4028_v37  ;;  %v4029_v11 = vpack.c.bf16 %v3176_v35, %v3176_v35  ;;  %v3042_v32 = vadd.f32 %v2811_v24, %v2021_v51  ;;  %2235 = vmatmul.mubr.bf16.gmra.mrb[188].mxu1 %v1178_v58  ;;  %v2813_v39 = vpop.f32.mrb[81].mxu0 }
 0x208   : > { %v2814_v14 = vpop.f32.mrb[82].mxu0 }
 0x209   : > { %3497 = vst.msk [vmem:[%s5669_s28 + $0x1c] sm:$0xf] %vm3489_vm9, %v4029_v11  ;;  %v3113_v59 = vadd.f32 %v5654_v9, %v3042_v32  ;;  %v3043_v27 = vadd.f32 %v2814_v14, %v2024_v3  ;;  %v2816_v60 = vpop.f32.mrb[83].mxu0 }
 0x20a   : > { %v2028_v21 = vpop.f32.mrb[84].mxu1 }
 0x20b   : > { %v3177_v61 = vmax.f32 %v3113_v59, 0.0  ;;  %v3114_v15 = vadd.f32 %v5654_v9, %v3043_v27  ;;  %v2029_v41 = vadd.f32 %v2028_v21, %v5477_v8  ;;  %v2030_v38 = vpop.f32.mrb[85].mxu1  ;;  %3026 = vmatmul.mubr.bf16.gmra.mrb[188].mxu0 %v2578_v33 }
 0x20c   : > { %v2031_v52 = vpop.f32.mrb[86].mxu1 }
 0x20d   : > { %v4030_v50 = vpack.c.bf16 %v3177_v61, %v3177_v61  ;;  %v3178_v26 = vmax.f32 %v3114_v15, 0.0  ;;  %v2032_v44 = vadd.f32 %v2031_v52, %v5479_v20  ;;  %v2033_v45 = vpop.f32.mrb[87].mxu1 }
 0x20e   : > { %v2819_v31 = vpop.f32.mrb[84].mxu0 }
 0x20f   : > { %3498 = vst.msk [vmem:[%s5669_s28 + $0x20] sm:$0xf] %vm3489_vm9, %v4030_v50  ;;  %v4031_v1 = vpack.c.bf16 %v3178_v26, %v3178_v26  ;;  %v3044_v6 = vadd.f32 %v2819_v31, %v2029_v41  ;;  %v2821_v62 = vpop.f32.mrb[85].mxu0 }
 0x210   : > { %v2822_v10 = vpop.f32.mrb[86].mxu0 }
 0x211   : > { %3499 = vst.msk [vmem:[%s5669_s28 + $0x24] sm:$0xf] %vm3489_vm9, %v4031_v1  ;;  %v3115_v8 = vadd.f32 %v5654_v9, %v3044_v6  ;;  %v3045_v36 = vadd.f32 %v2822_v10, %v2032_v44  ;;  %v2824_v57 = vpop.f32.mrb[87].mxu0 }
 0x212   : > { %v2036_v47 = vpop.f32.mrb[88].mxu1 }
 0x213   : > { %v3179_v55 = vmax.f32 %v3115_v8, 0.0  ;;  %v3116_v20 = vadd.f32 %v5654_v9, %v3045_v36  ;;  %v2037_v30 = vadd.f32 %v2036_v47, %v5493_v18  ;;  %v2038_v43 = vpop.f32.mrb[89].mxu1 }
 0x214   : > { %v2039_v51 = vpop.f32.mrb[90].mxu1 }
 0x215   : > { %v4032_v0 = vpack.c.bf16 %v3179_v55, %v3179_v55  ;;  %v3180_v4 = vmax.f32 %v3116_v20, 0.0  ;;  %v2040_v58 = vadd.f32 %v2039_v51, %v5495_v48  ;;  %v2041_v37 = vpop.f32.mrb[91].mxu1 }
 0x216   : > { %v2827_v35 = vpop.f32.mrb[88].mxu0 }
 0x217   : > { %3500 = vst.msk [vmem:[%s5669_s28 + $0x28] sm:$0xf] %vm3489_vm9, %v4032_v0  ;;  %v4033_v3 = vpack.c.bf16 %v3180_v4, %v3180_v4  ;;  %v3046_v28 = vadd.f32 %v2827_v35, %v2037_v30  ;;  %v2829_v49 = vpop.f32.mrb[89].mxu0 }
 0x218   : > { %v2830_v24 = vpop.f32.mrb[90].mxu0 }
 0x219   : > { %3501 = vst.msk [vmem:[%s5669_s28 + $0x2c] sm:$0xf] %vm3489_vm9, %v4033_v3  ;;  %v3117_v11 = vadd.f32 %v5654_v9, %v3046_v28  ;;  %v3047_v18 = vadd.f32 %v2830_v24, %v2040_v58  ;;  %v2832_v32 = vpop.f32.mrb[91].mxu0 }
 0x21a   : > { %v2044_v39 = vpop.f32.mrb[92].mxu1 }
 0x21b   : > { %v3181_v14 = vmax.f32 %v3117_v11, 0.0  ;;  %v3118_v48 = vadd.f32 %v5654_v9, %v3047_v18  ;;  %v2045_v33 = vadd.f32 %v2044_v39, %v5509_v5  ;;  %v2046_v59 = vpop.f32.mrb[93].mxu1 }
 0x21c   : > { %v2047_v27 = vpop.f32.mrb[94].mxu1 }
 0x21d   : > { %v4034_v60 = vpack.c.bf16 %v3181_v14, %v3181_v14  ;;  %v3182_v21 = vmax.f32 %v3118_v48, 0.0  ;;  %v2048_v61 = vadd.f32 %v2047_v27, %v5511_v23  ;;  %v2049_v15 = vpop.f32.mrb[95].mxu1 }
 0x21e   : > { %v2835_v41 = vpop.f32.mrb[92].mxu0 }
 0x21f   : > { %3502 = vst.msk [vmem:[%s5669_s28 + $0x30] sm:$0xf] %vm3489_vm9, %v4034_v60  ;;  %v4035_v38 = vpack.c.bf16 %v3182_v21, %v3182_v21  ;;  %v3048_v52 = vadd.f32 %v2835_v41, %v2045_v33  ;;  %v2837_v50 = vpop.f32.mrb[93].mxu0 }
 0x220   : > { %v2838_v26 = vpop.f32.mrb[94].mxu0 }
 0x221   : > { %3503 = vst.msk [vmem:[%s5669_s28 + $0x34] sm:$0xf] %vm3489_vm9, %v4035_v38  ;;  %v3119_v44 = vadd.f32 %v5654_v9, %v3048_v52  ;;  %v3049_v5 = vadd.f32 %v2838_v26, %v2048_v61  ;;  %v2840_v45 = vpop.f32.mrb[95].mxu0 }
 0x222   : > { %v2052_v31 = vpop.f32.mrb[96].mxu1 }
 0x223   : > { %v3183_v1 = vmax.f32 %v3119_v44, 0.0  ;;  %v3120_v23 = vadd.f32 %v5654_v9, %v3049_v5  ;;  %v2053_v6 = vadd.f32 %v2052_v31, %v5525_v17  ;;  %v2054_v62 = vpop.f32.mrb[97].mxu1 }
 0x224   : > { %v2055_v10 = vpop.f32.mrb[98].mxu1 }
 0x225   : > { %v4036_v8 = vpack.c.bf16 %v3183_v1, %v3183_v1  ;;  %v3184_v36 = vmax.f32 %v3120_v23, 0.0  ;;  %v2056_v57 = vadd.f32 %v2055_v10, %v5527_v29  ;;  %v2057_v47 = vpop.f32.mrb[99].mxu1 }
 0x226   : > { %v2843_v55 = vpop.f32.mrb[96].mxu0 }
 0x227   : > { %3504 = vst.msk [vmem:[%s5669_s28 + $0x38] sm:$0xf] %vm3489_vm9, %v4036_v8  ;;  %v4037_v20 = vpack.c.bf16 %v3184_v36, %v3184_v36  ;;  %v3050_v30 = vadd.f32 %v2843_v55, %v2053_v6  ;;  %v2845_v43 = vpop.f32.mrb[97].mxu0 }
 0x228   : > { %v2846_v51 = vpop.f32.mrb[98].mxu0 }
 0x229   : > { %3505 = vst.msk [vmem:[%s5669_s28 + $0x3c] sm:$0xf] %vm3489_vm9, %v4037_v20  ;;  %v3121_v0 = vadd.f32 %v5654_v9, %v3050_v30  ;;  %v3051_v17 = vadd.f32 %v2846_v51, %v2056_v57  ;;  %v2848_v4 = vpop.f32.mrb[99].mxu0 }
 0x22a   : > { %v2060_v58 = vpop.f32.mrb[100].mxu1 }
 0x22b   : > { %v3185_v37 = vmax.f32 %v3121_v0, 0.0  ;;  %v3122_v29 = vadd.f32 %v5654_v9, %v3051_v17  ;;  %v2061_v35 = vadd.f32 %v2060_v58, %v5541_v7  ;;  %v2062_v3 = vpop.f32.mrb[101].mxu1 }
 0x22c   : > { %v2063_v28 = vpop.f32.mrb[102].mxu1 }
 0x22d   : > { %v4038_v49 = vpack.c.bf16 %v3185_v37, %v3185_v37  ;;  %v3186_v24 = vmax.f32 %v3122_v29, 0.0  ;;  %v2064_v11 = vadd.f32 %v2063_v28, %v5543_v40  ;;  %v2065_v18 = vpop.f32.mrb[103].mxu1 }
 0x22e   : > { %v2851_v32 = vpop.f32.mrb[100].mxu0 }
 0x22f   : > { %3506 = vst.msk [vmem:[%s5669_s28 + $0x40] sm:$0xf] %vm3489_vm9, %v4038_v49  ;;  %v4039_v39 = vpack.c.bf16 %v3186_v24, %v3186_v24  ;;  %v3052_v14 = vadd.f32 %v2851_v32, %v2061_v35  ;;  %v2853_v48 = vpop.f32.mrb[101].mxu0 }
 0x230   : > { %v2854_v33 = vpop.f32.mrb[102].mxu0 }
 0x231   : > { %3507 = vst.msk [vmem:[%s5669_s28 + $0x44] sm:$0xf] %vm3489_vm9, %v4039_v39  ;;  %v3123_v59 = vadd.f32 %v5654_v9, %v3052_v14  ;;  %v3053_v7 = vadd.f32 %v2854_v33, %v2064_v11  ;;  %v2856_v27 = vpop.f32.mrb[103].mxu0 }
 0x232   : > { %v2068_v60 = vpop.f32.mrb[104].mxu1 }
 0x233   : > { %v3187_v21 = vmax.f32 %v3123_v59, 0.0  ;;  %v3124_v40 = vadd.f32 %v5654_v9, %v3053_v7  ;;  %v2069_v61 = vadd.f32 %v2068_v60, %v5557_v22  ;;  %v2070_v15 = vpop.f32.mrb[105].mxu1 }
 0x234   : > { %v2071_v41 = vpop.f32.mrb[106].mxu1 }
 0x235   : > { %v4040_v38 = vpack.c.bf16 %v3187_v21, %v3187_v21  ;;  %v3188_v52 = vmax.f32 %v3124_v40, 0.0  ;;  %v2072_v50 = vadd.f32 %v2071_v41, %v5559_v42  ;;  %v2073_v26 = vpop.f32.mrb[107].mxu1 }
 0x236   : > { %v2859_v44 = vpop.f32.mrb[104].mxu0 }
 0x237   : > { %3508 = vst.msk [vmem:[%s5669_s28 + $0x48] sm:$0xf] %vm3489_vm9, %v4040_v38  ;;  %v4041_v5 = vpack.c.bf16 %v3188_v52, %v3188_v52  ;;  %v3054_v45 = vadd.f32 %v2859_v44, %v2069_v61  ;;  %v2861_v31 = vpop.f32.mrb[105].mxu0 }
 0x238   : > { %v2862_v1 = vpop.f32.mrb[106].mxu0 }
 0x239   : > { %3509 = vst.msk [vmem:[%s5669_s28 + $0x4c] sm:$0xf] %vm3489_vm9, %v4041_v5  ;;  %v3125_v23 = vadd.f32 %v5654_v9, %v3054_v45  ;;  %v3055_v22 = vadd.f32 %v2862_v1, %v2072_v50  ;;  %v2864_v6 = vpop.f32.mrb[107].mxu0 }
 0x23a   : > { %v2076_v62 = vpop.f32.mrb[108].mxu1 }
 0x23b   : > { %v3189_v10 = vmax.f32 %v3125_v23, 0.0  ;;  %v3126_v42 = vadd.f32 %v5654_v9, %v3055_v22  ;;  %v2077_v8 = vadd.f32 %v2076_v62, %v5573_v13  ;;  %v2078_v36 = vpop.f32.mrb[109].mxu1 }
 0x23c   : > { %v2079_v57 = vpop.f32.mrb[110].mxu1 }
 0x23d   : > { %v4042_v47 = vpack.c.bf16 %v3189_v10, %v3189_v10  ;;  %v3190_v55 = vmax.f32 %v3126_v42, 0.0  ;;  %v2080_v20 = vadd.f32 %v2079_v57, %v5575_v12  ;;  %v2081_v30 = vpop.f32.mrb[111].mxu1 }
 0x23e   : > { %v2867_v43 = vpop.f32.mrb[108].mxu0 }
 0x23f   : > { %3510 = vst.msk [vmem:[%s5669_s28 + $0x50] sm:$0xf] %vm3489_vm9, %v4042_v47  ;;  %v4043_v51 = vpack.c.bf16 %v3190_v55, %v3190_v55  ;;  %v3056_v0 = vadd.f32 %v2867_v43, %v2077_v8  ;;  %v2869_v17 = vpop.f32.mrb[109].mxu0 }
 0x240   : > { %v2870_v4 = vpop.f32.mrb[110].mxu0 }
 0x241   : > { %3511 = vst.msk [vmem:[%s5669_s28 + $0x54] sm:$0xf] %vm3489_vm9, %v4043_v51  ;;  %v3127_v58 = vadd.f32 %v5654_v9, %v3056_v0  ;;  %v3057_v13 = vadd.f32 %v2870_v4, %v2080_v20  ;;  %v2872_v37 = vpop.f32.mrb[111].mxu0 }
 0x242   : > { %v2084_v29 = vpop.f32.mrb[112].mxu1 }
 0x243   : > { %v3191_v35 = vmax.f32 %v3127_v58, 0.0  ;;  %v3128_v12 = vadd.f32 %v5654_v9, %v3057_v13  ;;  %v2085_v3 = vadd.f32 %v2084_v29, %v5589_v63  ;;  %v2086_v28 = vpop.f32.mrb[113].mxu1 }
 0x244   : > { %v2087_v49 = vpop.f32.mrb[114].mxu1 }
 0x245   : > { %v4044_v24 = vpack.c.bf16 %v3191_v35, %v3191_v35  ;;  %v3192_v11 = vmax.f32 %v3128_v12, 0.0  ;;  %v2088_v18 = vadd.f32 %v2087_v49, %v5591_v54  ;;  %v2089_v32 = vpop.f32.mrb[115].mxu1 }
 0x246   : > { %v2875_v39 = vpop.f32.mrb[112].mxu0 }
 0x247   : > { %3512 = vst.msk [vmem:[%s5669_s28 + $0x58] sm:$0xf] %vm3489_vm9, %v4044_v24  ;;  %v4045_v14 = vpack.c.bf16 %v3192_v11, %v3192_v11  ;;  %v3058_v48 = vadd.f32 %v2875_v39, %v2085_v3  ;;  %v2877_v33 = vpop.f32.mrb[113].mxu0 }
 0x248   : > { %v2878_v59 = vpop.f32.mrb[114].mxu0 }
 0x249   : > { %3513 = vst.msk [vmem:[%s5669_s28 + $0x5c] sm:$0xf] %vm3489_vm9, %v4045_v14  ;;  %v3129_v7 = vadd.f32 %v5654_v9, %v3058_v48  ;;  %v3059_v63 = vadd.f32 %v2878_v59, %v2088_v18  ;;  %v2880_v27 = vpop.f32.mrb[115].mxu0 }
 0x24a   : > { %v2092_v60 = vpop.f32.mrb[116].mxu1 }
 0x24b   : > { %v3193_v21 = vmax.f32 %v3129_v7, 0.0  ;;  %v3130_v54 = vadd.f32 %v5654_v9, %v3059_v63  ;;  %v2093_v40 = vadd.f32 %v2092_v60, %v5605_v16  ;;  %v2094_v61 = vpop.f32.mrb[117].mxu1 }
 0x24c   : > { %v2095_v15 = vpop.f32.mrb[118].mxu1 }
 0x24d   : > { %v4046_v41 = vpack.c.bf16 %v3193_v21, %v3193_v21  ;;  %v3194_v38 = vmax.f32 %v3130_v54, 0.0  ;;  %v2096_v52 = vadd.f32 %v2095_v15, %v5607_v34  ;;  %v2097_v50 = vpop.f32.mrb[119].mxu1 }
 0x24e   : > { %v2883_v26 = vpop.f32.mrb[116].mxu0 }
 0x24f   : > { %3514 = vst.msk [vmem:[%s5669_s28 + $0x60] sm:$0xf] %vm3489_vm9, %v4046_v41  ;;  %v4047_v44 = vpack.c.bf16 %v3194_v38, %v3194_v38  ;;  %v3060_v5 = vadd.f32 %v2883_v26, %v2093_v40  ;;  %v2885_v45 = vpop.f32.mrb[117].mxu0 }
 0x250   : > { %v2886_v31 = vpop.f32.mrb[118].mxu0 }
 0x251   : > { %3515 = vst.msk [vmem:[%s5669_s28 + $0x64] sm:$0xf] %vm3489_vm9, %v4047_v44  ;;  %v3131_v1 = vadd.f32 %v5654_v9, %v3060_v5  ;;  %v3061_v16 = vadd.f32 %v2886_v31, %v2096_v52  ;;  %v2888_v23 = vpop.f32.mrb[119].mxu0  ;;  %v6122_v5 = vld [vmem:[#allocation5_spill] sm:$0xff] }
 0x252   : > { %v2100_v22 = vpop.f32.mrb[120].mxu1 }
 0x253   : > { %v3195_v6 = vmax.f32 %v3131_v1, 0.0  ;;  %v3132_v34 = vadd.f32 %v5654_v9, %v3061_v16  ;;  %v2101_v62 = vadd.f32 %v2100_v22, %v5621_v19  ;;  %v2102_v10 = vpop.f32.mrb[121].mxu1  ;;  %v6123_v22 = vld [vmem:[#allocation3_spill] sm:$0xff] }
 0x254   : > { %v2103_v42 = vpop.f32.mrb[122].mxu1 }
 0x255   : > { %v4048_v8 = vpack.c.bf16 %v3195_v6, %v3195_v6  ;;  %v3196_v36 = vmax.f32 %v3132_v34, 0.0  ;;  %v2104_v57 = vadd.f32 %v2103_v42, %v5623_v46  ;;  %v2105_v47 = vpop.f32.mrb[123].mxu1 }
 0x256   : > { %v2891_v55 = vpop.f32.mrb[120].mxu0 }
 0x257   : > { %3516 = vst.msk [vmem:[%s5669_s28 + $0x68] sm:$0xf] %vm3489_vm9, %v4048_v8  ;;  %v4049_v20 = vpack.c.bf16 %v3196_v36, %v3196_v36  ;;  %v3062_v30 = vadd.f32 %v2891_v55, %v2101_v62  ;;  %v2893_v43 = vpop.f32.mrb[121].mxu0 }
 0x258   : > { %v2894_v51 = vpop.f32.mrb[122].mxu0 }
 0x259   : > { %3517 = vst.msk [vmem:[%s5669_s28 + $0x6c] sm:$0xf] %vm3489_vm9, %v4049_v20  ;;  %v3133_v0 = vadd.f32 %v5654_v9, %v3062_v30  ;;  %v3063_v19 = vadd.f32 %v2894_v51, %v2104_v57  ;;  %v2896_v17 = vpop.f32.mrb[123].mxu0  ;;  %v6124_v51 = vld [vmem:[#allocation6_spill] sm:$0xff] }
 0x25a   : > { %v2108_v4 = vpop.f32.mrb[124].mxu1 }
 0x25b   : > { %v3197_v58 = vmax.f32 %v3133_v0, 0.0  ;;  %v3134_v46 = vadd.f32 %v5654_v9, %v3063_v19  ;;  %v2109_v13 = vadd.f32 %v2108_v4, %v5637_v25  ;;  %v2110_v37 = vpop.f32.mrb[125].mxu1 }
 0x25c   : > { %v2111_v29 = vpop.f32.mrb[126].mxu1 }
 0x25d   : > { %v4050_v35 = vpack.c.bf16 %v3197_v58, %v3197_v58  ;;  %v3198_v12 = vmax.f32 %v3134_v46, 0.0  ;;  %v2112_v3 = vadd.f32 %v2111_v29, %v5639_v2  ;;  %v2113_v28 = vpop.f32.mrb[127].mxu1  ;;  %v6125_v46 = vld [vmem:[#allocation4_spill] sm:$0xff] }
 0x25e   : > { %v2899_v49 = vpop.f32.mrb[124].mxu0 }
 0x25f   : > { %3518 = vst.msk [vmem:[%s5669_s28 + $0x70] sm:$0xf] %vm3489_vm9, %v4050_v35  ;;  %v4051_v24 = vpack.c.bf16 %v3198_v12, %v3198_v12  ;;  %v3064_v11 = vadd.f32 %v2899_v49, %v2109_v13  ;;  %v2901_v18 = vpop.f32.mrb[125].mxu0 }
 0x260   : > { %v2902_v32 = vpop.f32.mrb[126].mxu0 }
 0x261   : > { %3519 = vst.msk [vmem:[%s5669_s28 + $0x74] sm:$0xf] %vm3489_vm9, %v4051_v24  ;;  %v3135_v39 = vadd.f32 %v5654_v9, %v3064_v11  ;;  %v3065_v25 = vadd.f32 %v2902_v32, %v2112_v3  ;;  %v2904_v14 = vpop.f32.mrb[127].mxu0 }
 0x262   : > { %v2116_v48 = vpop.f32.mrb[128].mxu1 }
 0x263   : > { %v3199_v33 = vmax.f32 %v3135_v39, 0.0  ;;  %v3136_v2 = vadd.f32 %v5654_v9, %v3065_v25  ;;  %v2117_v59 = vadd.f32 %v2116_v48, %v5389_v53  ;;  %v2118_v7 = vpop.f32.mrb[129].mxu1  ;;  %v6126_v25 = vld [vmem:[#allocation7_spill] sm:$0xff] }
 0x264   : > { %v2119_v63 = vpop.f32.mrb[130].mxu1  ;;  %v6127_v7 = vld [vmem:[#allocation8_spill] sm:$0xff] }
 0x265   : > { %v4052_v27 = vpack.c.bf16 %v3199_v33, %v3199_v33  ;;  %v3200_v60 = vmax.f32 %v3136_v2, 0.0  ;;  %v2120_v21 = vadd.f32 %v2119_v63, %v5391_v56  ;;  %v2121_v54 = vpop.f32.mrb[131].mxu1 }
 0x266   : > { %v2907_v40 = vpop.f32.mrb[128].mxu0 }
 0x267   : > { %3520 = vst.msk [vmem:[%s5669_s28 + $0x78] sm:$0xf] %vm3489_vm9, %v4052_v27  ;;  %v4053_v61 = vpack.c.bf16 %v3200_v60, %v3200_v60  ;;  %v3066_v15 = vadd.f32 %v2907_v40, %v2117_v59  ;;  %v2909_v41 = vpop.f32.mrb[129].mxu0 }
 0x268   : > { %v2910_v38 = vpop.f32.mrb[130].mxu0 }
 0x269   : > { %3521 = vst.msk [vmem:[%s5669_s28 + $0x7c] sm:$0xf] %vm3489_vm9, %v4053_v61  ;;  %v3137_v52 = vadd.f32 %v5654_v9, %v3066_v15  ;;  %v3067_v53 = vadd.f32 %v2910_v38, %v2120_v21  ;;  %v2912_v50 = vpop.f32.mrb[131].mxu0 }
 0x26a   : > { %v2124_v26 = vpop.f32.mrb[132].mxu1 }
 0x26b   : > { %v3201_v44 = vmax.f32 %v3137_v52, 0.0  ;;  %v3138_v56 = vadd.f32 %v5654_v9, %v3067_v53  ;;  %v2125_v45 = vadd.f32 %v2124_v26, %v6122_v5  ;;  %v2126_v31 = vpop.f32.mrb[133].mxu1  ;;  %v6128_v26 = vld [vmem:[#allocation9_spill] sm:$0xff] }
 0x26c   : > { %v2127_v1 = vpop.f32.mrb[134].mxu1 }
 0x26d   : > { %v4054_v16 = vpack.c.bf16 %v3201_v44, %v3201_v44  ;;  %v3202_v23 = vmax.f32 %v3138_v56, 0.0  ;;  %v2128_v6 = vadd.f32 %v2127_v1, %v6123_v22  ;;  %v2129_v34 = vpop.f32.mrb[135].mxu1  ;;  %v6129_v1 = vld [vmem:[#allocation10_spill] sm:$0xff] }
 0x26e   : > { %v2915_v62 = vpop.f32.mrb[132].mxu0 }
 0x26f   : > { %3522 = vst.msk [vmem:[%s5669_s28 + $0x80] sm:$0xf] %vm3489_vm9, %v4054_v16  ;;  %v4055_v10 = vpack.c.bf16 %v3202_v23, %v3202_v23  ;;  %v3068_v42 = vadd.f32 %v2915_v62, %v2125_v45  ;;  %v2917_v8 = vpop.f32.mrb[133].mxu0 }
 0x270   : > { %v2918_v36 = vpop.f32.mrb[134].mxu0 }
 0x271   : > { %3523 = vst.msk [vmem:[%s5669_s28 + $0x84] sm:$0xf] %vm3489_vm9, %v4055_v10  ;;  %v3139_v57 = vadd.f32 %v5654_v9, %v3068_v42  ;;  %v3069_v47 = vadd.f32 %v2918_v36, %v2128_v6  ;;  %v2920_v55 = vpop.f32.mrb[135].mxu0 }
 0x272   : > { %v2132_v20 = vpop.f32.mrb[136].mxu1 }
 0x273   : > { %v3203_v30 = vmax.f32 %v3139_v57, 0.0  ;;  %v3140_v43 = vadd.f32 %v5654_v9, %v3069_v47  ;;  %v2133_v0 = vadd.f32 %v2132_v20, %v6124_v51  ;;  %v2134_v19 = vpop.f32.mrb[137].mxu1  ;;  %v6130_v20 = vld [vmem:[#allocation11_spill] sm:$0xff] }
 0x274   : > { %v2135_v17 = vpop.f32.mrb[138].mxu1 }
 0x275   : > { %v4056_v4 = vpack.c.bf16 %v3203_v30, %v3203_v30  ;;  %v3204_v58 = vmax.f32 %v3140_v43, 0.0  ;;  %v2136_v13 = vadd.f32 %v2135_v17, %v6125_v46  ;;  %v2137_v37 = vpop.f32.mrb[139].mxu1  ;;  %v6131_v17 = vld [vmem:[#allocation12_spill] sm:$0xff] }
 0x276   : > { %v2923_v29 = vpop.f32.mrb[136].mxu0 }
 0x277   : > { %3524 = vst.msk [vmem:[%s5669_s28 + $0x88] sm:$0xf] %vm3489_vm9, %v4056_v4  ;;  %v4057_v35 = vpack.c.bf16 %v3204_v58, %v3204_v58  ;;  %v3070_v12 = vadd.f32 %v2923_v29, %v2133_v0  ;;  %v2925_v3 = vpop.f32.mrb[137].mxu0 }
 0x278   : > { %v2926_v28 = vpop.f32.mrb[138].mxu0 }
 0x279   : > { %3525 = vst.msk [vmem:[%s5669_s28 + $0x8c] sm:$0xf] %vm3489_vm9, %v4057_v35  ;;  %v3141_v49 = vadd.f32 %v5654_v9, %v3070_v12  ;;  %v3071_v24 = vadd.f32 %v2926_v28, %v2136_v13  ;;  %v2928_v11 = vpop.f32.mrb[139].mxu0 }
 0x27a   : > { %v2140_v18 = vpop.f32.mrb[140].mxu1 }
 0x27b   : > { %v3205_v32 = vmax.f32 %v3141_v49, 0.0  ;;  %v3142_v39 = vadd.f32 %v5654_v9, %v3071_v24  ;;  %v2141_v14 = vadd.f32 %v2140_v18, %v6126_v25  ;;  %v2142_v48 = vpop.f32.mrb[141].mxu1  ;;  %v6132_v18 = vld [vmem:[#allocation13_spill] sm:$0xff] }
 0x27c   : > { %v2143_v33 = vpop.f32.mrb[142].mxu1 }
 0x27d   : > { %v4058_v2 = vpack.c.bf16 %v3205_v32, %v3205_v32  ;;  %v3206_v59 = vmax.f32 %v3142_v39, 0.0  ;;  %v2144_v63 = vadd.f32 %v2143_v33, %v6127_v7  ;;  %v2145_v27 = vpop.f32.mrb[143].mxu1  ;;  %v6133_v33 = vld [vmem:[#allocation14_spill] sm:$0xff] }
 0x27e   : > { %v2931_v60 = vpop.f32.mrb[140].mxu0 }
 0x27f   : > { %3526 = vst.msk [vmem:[%s5669_s28 + $0x90] sm:$0xf] %vm3489_vm9, %v4058_v2  ;;  %v4059_v21 = vpack.c.bf16 %v3206_v59, %v3206_v59  ;;  %v3072_v54 = vadd.f32 %v2931_v60, %v2141_v14  ;;  %v2933_v40 = vpop.f32.mrb[141].mxu0 }
 0x280   : > { %v2934_v61 = vpop.f32.mrb[142].mxu0 }
 0x281   : > { %3527 = vst.msk [vmem:[%s5669_s28 + $0x94] sm:$0xf] %vm3489_vm9, %v4059_v21  ;;  %v3143_v15 = vadd.f32 %v5654_v9, %v3072_v54  ;;  %v3073_v41 = vadd.f32 %v2934_v61, %v2144_v63  ;;  %v2936_v38 = vpop.f32.mrb[143].mxu0 }
 0x282   : > { %v2148_v52 = vpop.f32.mrb[144].mxu1 }
 0x283   : > { %v3207_v53 = vmax.f32 %v3143_v15, 0.0  ;;  %v3144_v50 = vadd.f32 %v5654_v9, %v3073_v41  ;;  %v2149_v44 = vadd.f32 %v2148_v52, %v6128_v26  ;;  %v2150_v56 = vpop.f32.mrb[145].mxu1  ;;  %v6134_v52 = vld [vmem:[#allocation15_spill] sm:$0xff] }
 0x284   : > { %v2151_v5 = vpop.f32.mrb[146].mxu1 }
 0x285   : > { %v4060_v45 = vpack.c.bf16 %v3207_v53, %v3207_v53  ;;  %v3208_v31 = vmax.f32 %v3144_v50, 0.0  ;;  %v2152_v16 = vadd.f32 %v2151_v5, %v6129_v1  ;;  %v2153_v23 = vpop.f32.mrb[147].mxu1  ;;  %v6135_v5 = vld [vmem:[#allocation16_spill] sm:$0xff] }
 0x286   : > { %v2939_v22 = vpop.f32.mrb[144].mxu0 }
 0x287   : > { %3528 = vst.msk [vmem:[%s5669_s28 + $0x98] sm:$0xf] %vm3489_vm9, %v4060_v45  ;;  %v4061_v6 = vpack.c.bf16 %v3208_v31, %v3208_v31  ;;  %v3074_v34 = vadd.f32 %v2939_v22, %v2149_v44  ;;  %v2941_v62 = vpop.f32.mrb[145].mxu0 }
 0x288   : > { %v2942_v10 = vpop.f32.mrb[146].mxu0 }
 0x289   : > { %3529 = vst.msk [vmem:[%s5669_s28 + $0x9c] sm:$0xf] %vm3489_vm9, %v4061_v6  ;;  %v3145_v42 = vadd.f32 %v5654_v9, %v3074_v34  ;;  %v3075_v8 = vadd.f32 %v2942_v10, %v2152_v16  ;;  %v2944_v36 = vpop.f32.mrb[147].mxu0 }
 0x28a   : > { %v2156_v57 = vpop.f32.mrb[148].mxu1 }
 0x28b   : > { %v3209_v47 = vmax.f32 %v3145_v42, 0.0  ;;  %v3146_v55 = vadd.f32 %v5654_v9, %v3075_v8  ;;  %v2157_v30 = vadd.f32 %v2156_v57, %v6130_v20  ;;  %v2158_v43 = vpop.f32.mrb[149].mxu1  ;;  %v6136_v57 = vld [vmem:[#allocation17_spill] sm:$0xff] }
 0x28c   : > { %v2159_v51 = vpop.f32.mrb[150].mxu1 }
 0x28d   : > { %v4062_v0 = vpack.c.bf16 %v3209_v47, %v3209_v47  ;;  %v3210_v19 = vmax.f32 %v3146_v55, 0.0  ;;  %v2160_v4 = vadd.f32 %v2159_v51, %v6131_v17  ;;  %v2161_v58 = vpop.f32.mrb[151].mxu1  ;;  %v6137_v51 = vld [vmem:[#allocation18_spill] sm:$0xff] }
 0x28e   : > { %v2947_v46 = vpop.f32.mrb[148].mxu0 }
 0x28f   : > { %3530 = vst.msk [vmem:[%s5669_s28 + $0xa0] sm:$0xf] %vm3489_vm9, %v4062_v0  ;;  %v4063_v13 = vpack.c.bf16 %v3210_v19, %v3210_v19  ;;  %v3076_v37 = vadd.f32 %v2947_v46, %v2157_v30  ;;  %v2949_v29 = vpop.f32.mrb[149].mxu0 }
 0x290   : > { %v2950_v35 = vpop.f32.mrb[150].mxu0 }
 0x291   : > { %3531 = vst.msk [vmem:[%s5669_s28 + $0xa4] sm:$0xf] %vm3489_vm9, %v4063_v13  ;;  %v3147_v12 = vadd.f32 %v5654_v9, %v3076_v37  ;;  %v3077_v3 = vadd.f32 %v2950_v35, %v2160_v4  ;;  %v2952_v28 = vpop.f32.mrb[151].mxu0 }
 0x292   : > { %v2164_v49 = vpop.f32.mrb[152].mxu1 }
 0x293   : > { %v3211_v24 = vmax.f32 %v3147_v12, 0.0  ;;  %v3148_v11 = vadd.f32 %v5654_v9, %v3077_v3  ;;  %v2165_v32 = vadd.f32 %v2164_v49, %v6132_v18  ;;  %v2166_v39 = vpop.f32.mrb[153].mxu1  ;;  %v6138_v49 = vld [vmem:[#allocation19_spill] sm:$0xff] }
 0x294   : > { %v2167_v25 = vpop.f32.mrb[154].mxu1 }
 0x295   : > { %v4064_v14 = vpack.c.bf16 %v3211_v24, %v3211_v24  ;;  %v3212_v48 = vmax.f32 %v3148_v11, 0.0  ;;  %v2168_v2 = vadd.f32 %v2167_v25, %v6133_v33  ;;  %v2169_v59 = vpop.f32.mrb[155].mxu1  ;;  %v6139_v25 = vld [vmem:[#allocation20_spill] sm:$0xff] }
 0x296   : > { %v2955_v7 = vpop.f32.mrb[152].mxu0 }
 0x297   : > { %3532 = vst.msk [vmem:[%s5669_s28 + $0xa8] sm:$0xf] %vm3489_vm9, %v4064_v14  ;;  %v4065_v63 = vpack.c.bf16 %v3212_v48, %v3212_v48  ;;  %v3078_v27 = vadd.f32 %v2955_v7, %v2165_v32  ;;  %v2957_v60 = vpop.f32.mrb[153].mxu0 }
 0x298   : > { %v2958_v21 = vpop.f32.mrb[154].mxu0 }
 0x299   : > { %3533 = vst.msk [vmem:[%s5669_s28 + $0xac] sm:$0xf] %vm3489_vm9, %v4065_v63  ;;  %v3149_v54 = vadd.f32 %v5654_v9, %v3078_v27  ;;  %v3079_v40 = vadd.f32 %v2958_v21, %v2168_v2  ;;  %v2960_v61 = vpop.f32.mrb[155].mxu0 }
 0x29a   : > { %v2172_v15 = vpop.f32.mrb[156].mxu1 }
 0x29b   : > { %v3213_v41 = vmax.f32 %v3149_v54, 0.0  ;;  %v3150_v38 = vadd.f32 %v5654_v9, %v3079_v40  ;;  %v2173_v53 = vadd.f32 %v2172_v15, %v6134_v52  ;;  %v2174_v50 = vpop.f32.mrb[157].mxu1  ;;  %v5894_v9 = vld [vmem:[%s5985_s4] ss:$0 sm:$0xff] }
 0x29c   : > { %v2175_v26 = vpop.f32.mrb[158].mxu1  ;;  %v6140_v15 = vld [vmem:[#allocation26_spill] sm:$0xff] }
 0x29d   : > { %v4066_v44 = vpack.c.bf16 %v3213_v41, %v3213_v41  ;;  %v3214_v56 = vmax.f32 %v3150_v38, 0.0  ;;  %v2176_v45 = vadd.f32 %v2175_v26, %v6135_v5  ;;  %v2177_v31 = vpop.f32.mrb[159].mxu1  ;;  %v6141_v26 = vld [vmem:[#allocation27_spill] sm:$0xff] }
 0x29e   : > { %v2963_v1 = vpop.f32.mrb[156].mxu0 }
 0x29f   : > { %3534 = vst.msk [vmem:[%s5669_s28 + $0xb0] sm:$0xf] %vm3489_vm9, %v4066_v44  ;;  %v4067_v16 = vpack.c.bf16 %v3214_v56, %v3214_v56  ;;  %v3080_v23 = vadd.f32 %v2963_v1, %v2173_v53  ;;  %v2965_v22 = vpop.f32.mrb[157].mxu0 }
 0x2a0   : > { %v2966_v6 = vpop.f32.mrb[158].mxu0 }
 0x2a1   : > { %3535 = vst.msk [vmem:[%s5669_s28 + $0xb4] sm:$0xf] %vm3489_vm9, %v4067_v16  ;;  %v3151_v34 = vadd.f32 %v5894_v9, %v3080_v23  ;;  %v3081_v62 = vadd.f32 %v2966_v6, %v2176_v45  ;;  %v2968_v10 = vpop.f32.mrb[159].mxu0 }
 0x2a2   : > { %v2180_v42 = vpop.f32.mrb[160].mxu1 }
 0x2a3   : > { %v3215_v8 = vmax.f32 %v3151_v34, 0.0  ;;  %v3152_v36 = vadd.f32 %v5894_v9, %v3081_v62  ;;  %v2181_v47 = vadd.f32 %v2180_v42, %v6136_v57  ;;  %v2182_v55 = vpop.f32.mrb[161].mxu1  ;;  %v6142_v42 = vld [vmem:[#allocation28_spill] sm:$0xff] }
 0x2a4   : > { %v2183_v20 = vpop.f32.mrb[162].mxu1 }
 0x2a5   : > { %v4068_v30 = vpack.c.bf16 %v3215_v8, %v3215_v8  ;;  %v3216_v43 = vmax.f32 %v3152_v36, 0.0  ;;  %v2184_v0 = vadd.f32 %v2183_v20, %v6137_v51  ;;  %v2185_v19 = vpop.f32.mrb[163].mxu1  ;;  %v6143_v20 = vld [vmem:[#allocation29_spill] sm:$0xff] }
 0x2a6   : > { %v2971_v17 = vpop.f32.mrb[160].mxu0 }
 0x2a7   : > { %3536 = vst.msk [vmem:[%s5669_s28 + $0xb8] sm:$0xf] %vm3489_vm9, %v4068_v30  ;;  %v4069_v4 = vpack.c.bf16 %v3216_v43, %v3216_v43  ;;  %v3082_v58 = vadd.f32 %v2971_v17, %v2181_v47  ;;  %v2973_v46 = vpop.f32.mrb[161].mxu0 }
 0x2a8   : > { %v2974_v13 = vpop.f32.mrb[162].mxu0 }
 0x2a9   : > { %3537 = vst.msk [vmem:[%s5669_s28 + $0xbc] sm:$0xf] %vm3489_vm9, %v4069_v4  ;;  %v3153_v37 = vadd.f32 %v5894_v9, %v3082_v58  ;;  %v3083_v29 = vadd.f32 %v2974_v13, %v2184_v0  ;;  %v2976_v35 = vpop.f32.mrb[163].mxu0 }
 0x2aa   : > { %v2188_v12 = vpop.f32.mrb[164].mxu1 }
 0x2ab   : > { %v3217_v3 = vmax.f32 %v3153_v37, 0.0  ;;  %v3154_v28 = vadd.f32 %v5894_v9, %v3083_v29  ;;  %v2189_v24 = vadd.f32 %v2188_v12, %v6138_v49  ;;  %v2190_v11 = vpop.f32.mrb[165].mxu1  ;;  %v6144_v12 = vld [vmem:[#allocation30_spill] sm:$0xff] }
 0x2ac   : > { %v2191_v18 = vpop.f32.mrb[166].mxu1 }
 0x2ad   : > { %v4070_v32 = vpack.c.bf16 %v3217_v3, %v3217_v3  ;;  %v3218_v39 = vmax.f32 %v3154_v28, 0.0  ;;  %v2192_v14 = vadd.f32 %v2191_v18, %v6139_v25  ;;  %v2193_v48 = vpop.f32.mrb[167].mxu1  ;;  %v6145_v18 = vld [vmem:[#allocation31_spill] sm:$0xff] }
 0x2ae   : > { %v2979_v33 = vpop.f32.mrb[164].mxu0 }
 0x2af   : > { %3538 = vst.msk [vmem:[%s5669_s28 + $0xc0] sm:$0xf] %vm3489_vm9, %v4070_v32  ;;  %v4071_v2 = vpack.c.bf16 %v3218_v39, %v3218_v39  ;;  %v3084_v59 = vadd.f32 %v2979_v33, %v2189_v24  ;;  %v2981_v7 = vpop.f32.mrb[165].mxu0 }
 0x2b0   : > { %v2982_v63 = vpop.f32.mrb[166].mxu0 }
 0x2b1   : > { %3539 = vst.msk [vmem:[%s5669_s28 + $0xc4] sm:$0xf] %vm3489_vm9, %v4071_v2  ;;  %v3155_v27 = vadd.f32 %v5894_v9, %v3084_v59  ;;  %v3085_v60 = vadd.f32 %v2982_v63, %v2192_v14  ;;  %v2984_v21 = vpop.f32.mrb[167].mxu0 }
 0x2b2   : > { %v2196_v54 = vpop.f32.mrb[168].mxu1 }
 0x2b3   : > { %v3219_v40 = vmax.f32 %v3155_v27, 0.0  ;;  %v3156_v61 = vadd.f32 %v5894_v9, %v3085_v60  ;;  %v2197_v41 = vadd.f32 %v2196_v54, %v6140_v15  ;;  %v2198_v38 = vpop.f32.mrb[169].mxu1  ;;  %v6146_v54 = vld [vmem:[#allocation32_spill] sm:$0xff] }
 0x2b4   : > { %v2199_v52 = vpop.f32.mrb[170].mxu1 }
 0x2b5   : > { %v4072_v53 = vpack.c.bf16 %v3219_v40, %v3219_v40  ;;  %v3220_v50 = vmax.f32 %v3156_v61, 0.0  ;;  %v2200_v44 = vadd.f32 %v2199_v52, %v6141_v26  ;;  %v2201_v56 = vpop.f32.mrb[171].mxu1  ;;  %v6147_v52 = vld [vmem:[#allocation33_spill] sm:$0xff] }
 0x2b6   : > { %v2987_v5 = vpop.f32.mrb[168].mxu0 }
 0x2b7   : > { %3540 = vst.msk [vmem:[%s5669_s28 + $0xc8] sm:$0xf] %vm3489_vm9, %v4072_v53  ;;  %v4073_v45 = vpack.c.bf16 %v3220_v50, %v3220_v50  ;;  %v3086_v31 = vadd.f32 %v2987_v5, %v2197_v41  ;;  %v2989_v1 = vpop.f32.mrb[169].mxu0 }
 0x2b8   : > { %v2990_v16 = vpop.f32.mrb[170].mxu0 }
 0x2b9   : > { %3541 = vst.msk [vmem:[%s5669_s28 + $0xcc] sm:$0xf] %vm3489_vm9, %v4073_v45  ;;  %v3157_v23 = vadd.f32 %v5894_v9, %v3086_v31  ;;  %v3087_v22 = vadd.f32 %v2990_v16, %v2200_v44  ;;  %v2992_v6 = vpop.f32.mrb[171].mxu0 }
 0x2ba   : > { %v2204_v34 = vpop.f32.mrb[172].mxu1 }
 0x2bb   : > { %v3221_v62 = vmax.f32 %v3157_v23, 0.0  ;;  %v3158_v10 = vadd.f32 %v5894_v9, %v3087_v22  ;;  %v2205_v8 = vadd.f32 %v2204_v34, %v6142_v42  ;;  %v2206_v36 = vpop.f32.mrb[173].mxu1  ;;  %v6148_v34 = vld [vmem:[#allocation34_spill] sm:$0xff] }
 0x2bc   : > { %v2207_v57 = vpop.f32.mrb[174].mxu1 }
 0x2bd   : > { %v4074_v47 = vpack.c.bf16 %v3221_v62, %v3221_v62  ;;  %v3222_v55 = vmax.f32 %v3158_v10, 0.0  ;;  %v2208_v30 = vadd.f32 %v2207_v57, %v6143_v20  ;;  %v2209_v43 = vpop.f32.mrb[175].mxu1  ;;  %v6149_v57 = vld [vmem:[#allocation35_spill] sm:$0xff] }
 0x2be   : > { %v2995_v51 = vpop.f32.mrb[172].mxu0 }
 0x2bf   : > { %3542 = vst.msk [vmem:[%s5669_s28 + $0xd0] sm:$0xf] %vm3489_vm9, %v4074_v47  ;;  %v4075_v0 = vpack.c.bf16 %v3222_v55, %v3222_v55  ;;  %v3088_v19 = vadd.f32 %v2995_v51, %v2205_v8  ;;  %v2997_v17 = vpop.f32.mrb[173].mxu0 }
 0x2c0   : > { %v2998_v4 = vpop.f32.mrb[174].mxu0 }
 0x2c1   : > { %3543 = vst.msk [vmem:[%s5669_s28 + $0xd4] sm:$0xf] %vm3489_vm9, %v4075_v0  ;;  %v3159_v58 = vadd.f32 %v5894_v9, %v3088_v19  ;;  %v3089_v46 = vadd.f32 %v2998_v4, %v2208_v30  ;;  %v3000_v13 = vpop.f32.mrb[175].mxu0 }
 0x2c2   : > { %v2212_v37 = vpop.f32.mrb[176].mxu1 }
 0x2c3   : > { %v3223_v29 = vmax.f32 %v3159_v58, 0.0  ;;  %v3160_v35 = vadd.f32 %v5894_v9, %v3089_v46  ;;  %v2213_v3 = vadd.f32 %v2212_v37, %v6144_v12  ;;  %v2214_v28 = vpop.f32.mrb[177].mxu1  ;;  %v6150_v37 = vld [vmem:[#allocation36_spill] sm:$0xff] }
 0x2c4   : > { %v2215_v49 = vpop.f32.mrb[178].mxu1 }
 0x2c5   : > { %v4076_v24 = vpack.c.bf16 %v3223_v29, %v3223_v29  ;;  %v3224_v11 = vmax.f32 %v3160_v35, 0.0  ;;  %v2216_v32 = vadd.f32 %v2215_v49, %v6145_v18  ;;  %v2217_v39 = vpop.f32.mrb[179].mxu1  ;;  %v6151_v49 = vld [vmem:[#allocation37_spill] sm:$0xff] }
 0x2c6   : > { %v3003_v25 = vpop.f32.mrb[176].mxu0 }
 0x2c7   : > { %3544 = vst.msk [vmem:[%s5669_s28 + $0xd8] sm:$0xf] %vm3489_vm9, %v4076_v24  ;;  %v4077_v14 = vpack.c.bf16 %v3224_v11, %v3224_v11  ;;  %v3090_v48 = vadd.f32 %v3003_v25, %v2213_v3  ;;  %v3005_v33 = vpop.f32.mrb[177].mxu0 }
 0x2c8   : > { %v3006_v2 = vpop.f32.mrb[178].mxu0 }
 0x2c9   : > { %3545 = vst.msk [vmem:[%s5669_s28 + $0xdc] sm:$0xf] %vm3489_vm9, %v4077_v14  ;;  %v3161_v59 = vadd.f32 %v5894_v9, %v3090_v48  ;;  %v3091_v7 = vadd.f32 %v3006_v2, %v2216_v32  ;;  %v3008_v63 = vpop.f32.mrb[179].mxu0 }
 0x2ca   : > { %v2220_v27 = vpop.f32.mrb[180].mxu1 }
 0x2cb   : > { %v3225_v60 = vmax.f32 %v3161_v59, 0.0  ;;  %v3162_v21 = vadd.f32 %v5894_v9, %v3091_v7  ;;  %v2221_v40 = vadd.f32 %v2220_v27, %v6146_v54  ;;  %v2222_v61 = vpop.f32.mrb[181].mxu1 }
 0x2cc   : > { %v2223_v15 = vpop.f32.mrb[182].mxu1 }
 0x2cd   : > { %v4078_v41 = vpack.c.bf16 %v3225_v60, %v3225_v60  ;;  %v3226_v38 = vmax.f32 %v3162_v21, 0.0  ;;  %v2224_v53 = vadd.f32 %v2223_v15, %v6147_v52  ;;  %v2225_v50 = vpop.f32.mrb[183].mxu1 }
 0x2ce   : > { %v3011_v26 = vpop.f32.mrb[180].mxu0 }
 0x2cf   : > { %3546 = vst.msk [vmem:[%s5669_s28 + $0xe0] sm:$0xf] %vm3489_vm9, %v4078_v41  ;;  %v4079_v44 = vpack.c.bf16 %v3226_v38, %v3226_v38  ;;  %v3092_v56 = vadd.f32 %v3011_v26, %v2221_v40  ;;  %v3013_v5 = vpop.f32.mrb[181].mxu0 }
 0x2d0   : > { %v3014_v45 = vpop.f32.mrb[182].mxu0 }
 0x2d1   : > { %3547 = vst.msk [vmem:[%s5669_s28 + $0xe4] sm:$0xf] %vm3489_vm9, %v4079_v44  ;;  %v3163_v31 = vadd.f32 %v5894_v9, %v3092_v56  ;;  %v3093_v1 = vadd.f32 %v3014_v45, %v2224_v53  ;;  %v3016_v16 = vpop.f32.mrb[183].mxu0 }
 0x2d2   : > { %v2228_v23 = vpop.f32.mrb[184].mxu1 }
 0x2d3   : > { %v3227_v22 = vmax.f32 %v3163_v31, 0.0  ;;  %v3164_v6 = vadd.f32 %v5894_v9, %v3093_v1  ;;  %v2229_v62 = vadd.f32 %v2228_v23, %v6148_v34  ;;  %v2230_v10 = vpop.f32.mrb[185].mxu1 }
 0x2d4   : > { %v2231_v42 = vpop.f32.mrb[186].mxu1 }
 0x2d5   : > { %v4080_v8 = vpack.c.bf16 %v3227_v22, %v3227_v22  ;;  %v3228_v36 = vmax.f32 %v3164_v6, 0.0  ;;  %v2232_v47 = vadd.f32 %v2231_v42, %v6149_v57  ;;  %v2233_v55 = vpop.f32.mrb[187].mxu1 }
 0x2d6   : > { %v3019_v20 = vpop.f32.mrb[184].mxu0 }
 0x2d7   : > { %3548 = vst.msk [vmem:[%s5669_s28 + $0xe8] sm:$0xf] %vm3489_vm9, %v4080_v8  ;;  %v4081_v30 = vpack.c.bf16 %v3228_v36, %v3228_v36  ;;  %v3094_v43 = vadd.f32 %v3019_v20, %v2229_v62  ;;  %v3021_v51 = vpop.f32.mrb[185].mxu0 }
 0x2d8   : > { %v3022_v0 = vpop.f32.mrb[186].mxu0 }
 0x2d9   : > { %3549 = vst.msk [vmem:[%s5669_s28 + $0xec] sm:$0xf] %vm3489_vm9, %v4081_v30  ;;  %v3165_v19 = vadd.f32 %v5894_v9, %v3094_v43  ;;  %v3095_v17 = vadd.f32 %v3022_v0, %v2232_v47  ;;  %v3024_v4 = vpop.f32.mrb[187].mxu0 }
 0x2da   : > { %v2236_v58 = vpop.f32.mrb[188].mxu1 }
 0x2db   : > { %v3229_v46 = vmax.f32 %v3165_v19, 0.0  ;;  %v3166_v13 = vadd.f32 %v5894_v9, %v3095_v17  ;;  %v2237_v29 = vadd.f32 %v2236_v58, %v6150_v37  ;;  %v2238_v35 = vpop.f32.mrb[189].mxu1 }
 0x2dc   : > { %v2239_v12 = vpop.f32.mrb[190].mxu1 }
 0x2dd   : > { %v4082_v3 = vpack.c.bf16 %v3229_v46, %v3229_v46  ;;  %v3230_v28 = vmax.f32 %v3166_v13, 0.0  ;;  %v2240_v24 = vadd.f32 %v2239_v12, %v6151_v49  ;;  %v2241_v11 = vpop.f32.mrb[191].mxu1 }
 0x2de   : > { %v3027_v18 = vpop.f32.mrb[188].mxu0 }
 0x2df   : > { %3550 = vst.msk [vmem:[%s5669_s28 + $0xf0] sm:$0xf] %vm3489_vm9, %v4082_v3  ;;  %v4083_v32 = vpack.c.bf16 %v3230_v28, %v3230_v28  ;;  %v3096_v39 = vadd.f32 %v3027_v18, %v2237_v29  ;;  %v3029_v25 = vpop.f32.mrb[189].mxu0 }
 0x2e0   : > { %v3030_v14 = vpop.f32.mrb[190].mxu0 }
 0x2e1   : > { %3551 = vst.msk [vmem:[%s5669_s28 + $0xf4] sm:$0xf] %vm3489_vm9, %v4083_v32  ;;  %v3167_v48 = vadd.f32 %v5894_v9, %v3096_v39  ;;  %v3097_v33 = vadd.f32 %v3030_v14, %v2240_v24  ;;  %v3032_v2 = vpop.f32.mrb[191].mxu0 }
 0x2e3   : > { %v3231_v59 = vmax.f32 %v3167_v48, 0.0  ;;  %v3168_v7 = vadd.f32 %v5894_v9, %v3097_v33 }
 0x2e5   : > { %v4084_v63 = vpack.c.bf16 %v3231_v59, %v3231_v59  ;;  %v3232_v27 = vmax.f32 %v3168_v7, 0.0 }
 0x2e7   : > { %3552 = vst.msk [vmem:[%s5669_s28 + $0xf8] sm:$0xf] %vm3489_vm9, %v4084_v63  ;;  %v4085_v60 = vpack.c.bf16 %v3232_v27, %v3232_v27 }
 0x2e9   : > { %3553 = vst.msk [vmem:[%s5669_s28 + $0xfc] sm:$0xf] %vm3489_vm9, %v4085_v60 }
 0x2ea PF: > { %s15_s22 = sadd.s32 1, %s4285_s22   ;;  %s6152_s18 = smov %s4277_s20 }
 0x2eb   : > { %p12_p12 = scmp.ge.s32.totalorder %s15_s22, 6   ;;  %s6153_s19 = smov %s4281_s21 }
 0x2ec   : > { %s6154_s20 = smov %s6157_s23  ;;  %s6155_s21 = smov %s6161_s24 }
 0x2ed   :  { %14 = sbr.rel (!%p12_p12) target bundleno = 3 (0x3), region = 78 }

// kernel: vgg16_relu2_2.7
= control target key start
LH: loop header
LB: loop body
LE: loop exit
PB: predicated region body
PF: predicated region fallthrough
CT: control target
= control target key end

     0   :  { %10 = vsyncpa [#allocation3], 0  ;;  %s3676_s0 = inlined_call_operand.vmem [shape: bf16[2,16,16,128], index: 0, kind: input, shape index: {}, may-alias: {0,1,2}]   ;;  %s3677_s1 = inlined_call_operand.vmem [shape: bf16[2,16,16,128], index: 1, kind: input, shape index: {}, may-alias: {0,1,2}]   ;;  %s3678_s2 = inlined_call_operand.vmem [shape: bf16[2,16,16,128], index: 2, kind: input, shape index: {}, may-alias: {0,1,2}]   ;;  %s3679_s3 = inlined_call_operand.vmem [shape: bf16[3,384,128], index: 3, kind: input, shape index: {}]   ;;  %s3680_s4 = inlined_call_operand.vmem [shape: f32[1,128], index: 4, kind: input, shape index: {}]   ;;  %s3681_s5 = inlined_call_operand.hbm [shape: f32[2,16,16,128], index: 5, kind: output, shape index: {}]  }
   0x1   :  { %12 = vsyncpa [#allocation3 + $0x1], 0  ;;  %s2927_s18 = smov 0   ;;  %s2929_s19 = smov 0  }
   0x2   :  { %s2931_s20 = smov 0   ;;  %s2933_s21 = smov 0  }
   0x3   :  { %s2935_s22 = smov 0   ;;  %s2937_s23 = smov 0  }
   0x4   :  { %s2939_s24 = smov 0   ;;  %s2941_s25 = smov 0  }
   0x5 LB: > { %3685 = sst [smem:[#allocation5_spill]] %s2888_s24  ;;  %s1985_s26 = sadd.s32 4294967295, %s2892_s25   ;;  %s2892_s25 = sphi %s2941_s25, %s18_s25   ;;  %s2888_s24 = sphi %s2939_s24, %s3697_s24   ;;  %s2884_s23 = sphi %s2937_s23, %s3702_s23   ;;  %s2880_s22 = sphi %s2935_s22, %s3695_s22   ;;  %s2876_s21 = sphi %s2933_s21, %s3701_s21   ;;  %s2872_s20 = sphi %s2931_s20, %s3700_s20   ;;  %s2868_s19 = sphi %s2929_s19, %s3699_s19   ;;  %s2864_s18 = sphi %s2927_s18, %s3698_s18  }
   0x6   : > { %s1986_s27 = sadd.s32 4294967294, %s2892_s25   ;;  %s27_s28 = sadd.s32 1, %s2884_s23 }
   0x7   : > { %p28_p0 = scmp.ge.s32.totalorder %s27_s28, 2  ;;  %s30_s29 = sadd.s32 1, %s2888_s24 }
   0x8   : > { %p191_p1 = scmp.ne.s32.totalorder %s2872_s20, %s2868_s19  ;;  %p192_p2 = scmp.eq.s32.totalorder %s1985_s26, 3 }
   0x9   : > { %s3704_s28 = smov (%p28_p0, %s27_s28), 0  ;;  %s3706_s29 = smov (!%p28_p0, %s30_s29), %s2888_s24 }
   0xa   : > { %3686 = sst [smem:[#allocation6_spill]] %s3704_s28  ;;  %s177_s30 = ssub.s32 %s2884_s23, %s3704_s28 }
   0xb   : > { %p2978_p3 = por %p192_p2, %p191_p1  ;;  %p32_p4 = scmp.ge.s32.totalorder %s3706_s29, 2 }
   0xc   : > { %p197_p5 = scmp.ne.s32.totalorder %s2868_s19, %s2864_s18  ;;  %p198_p6 = scmp.eq.s32.totalorder %s1986_s27, 3 }
   0xd   : > { %p1995_p7 = scmp.ge.s32.totalorder %s2892_s25, 1  ;;  %s3708_s29 = smov (%p32_p4, %s3706_s29), 0 }
   0xe   : > { %3688 = sst [smem:[#allocation7_spill]] %s3708_s29  ;;  %p2987_p8 = por %p198_p6, %p197_p5 }
   0xf   : > { %p276_p9 = scmp.lt.s32.totalorder %s2892_s25, 5  ;;  %s176_s8 = ssub.s32 %s2888_s24, %s3708_s29 }
  0x10   : > { %s181_s9 = sadd.s32 1, %s2872_s20  ;;  %s178_s10 = sor.u32 %s177_s30, %s176_s8 }
  0x11   : > { %p277_p10 = pnand %p1995_p7, %p276_p9  ;;  %p179_p11 = scmp.eq.s32.totalorder %s178_s10, 0 }
  0x12   : > { %v2718_v0 = vld [vmem:[%s3679_s3 + $0x100] sm:$0xff] (!%p277_p10)   ;;  %s3002_s14 = sshll.u32 (!%p277_p10), %s2876_s21, 3  ;;  %p336_p12 = scmp.lt.s32.totalorder (!%p277_p10), %s2880_s22, 1  ;;  %v2721_v3 = vld [vmem:[%s3679_s3 + $0x108] sm:$0xff] (!%p277_p10)   ;;  %v2724_v6 = vld [vmem:[%s3679_s3 + $0x110] sm:$0xff] (!%p277_p10)   ;;  %vm544_vm1 = vcmask (!%p277_p10), 1040384  }
  0x13   : > { %s2996_s11 = scalar_select %p179_p11, %s2872_s20, %s181_s9  }
  0x14   : > { %280 = sbr.rel (%p277_p10) target bundleno = 425 (0x1a9), region = 40  ;;  %v2719_v1 = vld [vmem:[%s3679_s3 + $0x140] sm:$0xff] (!%p277_p10)   ;;  %2213 = vmatprep.subr.bf16.mxu0 (!%p277_p10), %v2718_v0  ;;  %p338_p13 = scmp.lt.s32.totalorder (!%p277_p10), %s3002_s14, 15  ;;  %v2722_v4 = vld [vmem:[%s3679_s3 + $0x148] sm:$0xff] (!%p277_p10)   ;;  %v2725_v7 = vld [vmem:[%s3679_s3 + $0x150] sm:$0xff] (!%p277_p10)   ;;  %vm1370_vm5 = vcmask (!%p277_p10), 1047552  }
  0x15   : > { %v2720_v2 = vld [vmem:[%s3679_s3 + $0xc0] sm:$0xff] (!%p277_p10)   ;;  %2453 = vmatprep.subr.bf16.mxu1 (!%p277_p10), %v2719_v1  ;;  %v2723_v5 = vld [vmem:[%s3679_s3 + $0xc8] sm:$0xff] (!%p277_p10)   ;;  %s2002_s30 = sadd.s32 (!%p277_p10), 4294967295, %s3002_s14  ;;  %v2726_v8 = vld [vmem:[%s3679_s3 + $0xd0] sm:$0xff] (!%p277_p10)   ;;  %p402_p2 = scmp.gt.s32.totalorder (!%p277_p10), %s2876_s21, 0 }
  0x16   : > { %2214 = vmatpush3.bf16.msra.mxu0 (!%p277_p10), %v2720_v2  ;;  %2454 = vmatpush3.bf16.msra.mxu1 (!%p277_p10), %v2719_v1  ;;  %v2727_v9 = vld [vmem:[%s3679_s3 + $0x118] sm:$0xff] (!%p277_p10)   ;;  %p348_p0 = scmp.gt.s32.totalorder (!%p277_p10), %s2002_s30, 0  ;;  %p2003_p1 = scmp.lt.s32.totalorder (!%p277_p10), %s2002_s30, 15  ;;  %v2730_v12 = vld [vmem:[%s3679_s3 + $0x120] sm:$0xff] (!%p277_p10)   ;;  %v2733_v15 = vld [vmem:[%s3679_s3 + $0x128] sm:$0xff] (!%p277_p10)  }
  0x17   : > { %2215 = vmatprep.subr.bf16.mxu0 (!%p277_p10), %v2721_v3  ;;  %2455 = vmatprep.subr.bf16.mxu1 (!%p277_p10), %v2722_v4  ;;  %v2728_v10 = vld [vmem:[%s3679_s3 + $0x158] sm:$0xff] (!%p277_p10)   ;;  %v2731_v13 = vld [vmem:[%s3679_s3 + $0x160] sm:$0xff] (!%p277_p10)   ;;  %v2734_v16 = vld [vmem:[%s3679_s3 + $0x168] sm:$0xff] (!%p277_p10)   ;;  %p408_p5 = scmp.lt.s32.totalorder (!%p277_p10), %s2876_s21, 1  ;;  %vm545_vm3 = vsmask.f32 (!%p277_p10), 256 }
  0x18   : > { %v2729_v11 = vld [vmem:[%s3679_s3 + $0xd8] sm:$0xff] (!%p277_p10)   ;;  %v2732_v14 = vld [vmem:[%s3679_s3 + $0xe0] sm:$0xff] (!%p277_p10)   ;;  %v2735_v17 = vld [vmem:[%s3679_s3 + $0xe8] sm:$0xff] (!%p277_p10)   ;;  %vm1371_vm6 = vsmask.f32 (!%p277_p10), 7424  ;;  %s2200_s8 = sshll.u32 (!%p277_p10), %s2880_s22, 5 }
  0x19   : > { %v2736_v18 = vld [vmem:[%s3679_s3 + $0x130] sm:$0xff] (!%p277_p10)   ;;  %v2739_v21 = vld [vmem:[%s3679_s3 + $0x138] sm:$0xff] (!%p277_p10)   ;;  %v2745_v29 = vld [vmem:[%s3679_s3 + $0x40] sm:$0xff] (!%p277_p10)   ;;  %s2894_s24 = smov (!%p277_p10), [#allocation2]  }
  0x1a   : > { %2216 = vmatpush3.bf16.msra.mxu0 (!%p277_p10), %v2723_v5  ;;  %2456 = vmatpush3.bf16.msra.mxu1 (!%p277_p10), %v2722_v4  ;;  %v2737_v19 = vld [vmem:[%s3679_s3 + $0x170] sm:$0xff] (!%p277_p10)   ;;  %v2740_v22 = vld [vmem:[%s3679_s3 + $0x178] sm:$0xff] (!%p277_p10)   ;;  %v2746_v31 = vld [vmem:[%s3679_s3 + $0x1c0] sm:$0xff] (!%p277_p10)  }
  0x1b   : > { %s337_s10 = scalar_select %p336_p12, %s2880_s22, 1  ;;  %2217 = vmatprep.subr.bf16.mxu0 %v2724_v6  ;;  %2457 = vmatprep.subr.bf16.mxu1 %v2725_v7  ;;  %v2738_v20 = vld [vmem:[%s3679_s3 + $0xf0] sm:$0xff]   ;;  %v2741_v25 = vld [vmem:[%s3679_s3 + $0xf8] sm:$0xff]   ;;  %v2747_v35 = vld [vmem:[%s3679_s3] sm:$0xff]  }
  0x1c   : > { %s339_s17 = scalar_select %p338_p13, %s3002_s14, 15  ;;  %v2748_v36 = vld [vmem:[%s3679_s3 + $0x180] sm:$0xff]   ;;  %v2749_v37 = vld [vmem:[%s3679_s3 + $0x48] sm:$0xff]   ;;  %v2753_v41 = vld [vmem:[%s3679_s3 + $0x50] sm:$0xff]  }
  0x1d   : > { %s3033_s29 = sshll.u32 %s337_s10, 5  ;;  %s3710_s30 = smov (!%p348_p0, %s2002_s30), 0  ;;  %v2750_v39 = vld [vmem:[%s3679_s3 + $0x8] sm:$0xff]   ;;  %v2755_v43 = vld [vmem:[%s3679_s3 + $0x10] sm:$0xff]   ;;  %v2757_v45 = vld [vmem:[%s3679_s3 + $0x58] sm:$0xff]  }
  0x1e   : > { %2218 = vmatpush3.bf16.msra.mxu0 %v2726_v8  ;;  %2458 = vmatpush3.bf16.msra.mxu1 %v2725_v7  ;;  %s1998_s9 = sshll.u32 %s339_s17, 1  ;;  %s3712_s30 = smov (!%p2003_p1, %s3710_s30), 15  ;;  %v2754_v42 = vld [vmem:[%s3679_s3 + $0x1c8] sm:$0xff]   ;;  %v2758_v47 = vld [vmem:[%s3679_s3 + $0x18] sm:$0xff]   ;;  %v2761_v50 = vld [vmem:[%s3679_s3 + $0x60] sm:$0xff]  }
  0x1f   : > { %2219 = vmatprep.subr.bf16.mxu0 %v2727_v9  ;;  %2459 = vmatprep.subr.bf16.mxu1 %v2728_v10  ;;  %s342_s26 = sadd.s32 %s3033_s29, %s1998_s9  ;;  %s2008_s27 = sshll.u32 %s3712_s30, 1  ;;  %v2756_v44 = vld [vmem:[%s3679_s3 + $0x188] sm:$0xff]   ;;  %v2762_v51 = vld [vmem:[%s3679_s3 + $0x1d0] sm:$0xff]   ;;  %v2763_v52 = vld [vmem:[%s3679_s3 + $0x20] sm:$0xff]  }
  0x20   : > { %s356_s12 = sadd.s32 %s2008_s27, %s3033_s29  ;;  %s2000_s13 = sshll.u32 %s342_s26, 2  ;;  %v2764_v54 = vld [vmem:[%s3679_s3 + $0x190] sm:$0xff]   ;;  %v2765_v57 = vld [vmem:[%s3679_s3 + $0x68] sm:$0xff]   ;;  %v2769_v3 = vld [vmem:[%s3679_s3 + $0x1d8] sm:$0xff]  }
  0x21   : > { %s2010_s28 = sshll.u32 %s356_s12, 2  ;;  %s3073_s17 = scalar_lea.vmem %s3676_s0, %s2000_s13  ;;  %v2766_v58 = vld [vmem:[%s3679_s3 + $0x28] sm:$0xff]   ;;  %v2768_v0 = vld [vmem:[%s3679_s3 + $0x70] sm:$0xff]   ;;  %v2771_v8 = vld [vmem:[%s3679_s3 + $0x198] sm:$0xff]  }
  0x22   : > { %2220 = vmatpush3.bf16.msra.mxu0 %v2729_v11  ;;  %2460 = vmatpush3.bf16.msra.mxu1 %v2728_v10  ;;  %s2211_s12 = sadd.s32 8, %s3002_s14  ;;  %s358_s27 = scalar_lea.vmem %s3677_s1, %s2010_s28  ;;  %v3090_v23 = vld [vmem:[%s3073_s17] sm:$0xff]   ;;  %v3093_v24 = vld [vmem:[%s3073_s17 + $0x8] sm:$0xff]   ;;  %v3112_v30 = vld [vmem:[%s3073_s17 + $0x10] sm:$0xff]  }
  0x23   : > { %2221 = vmatprep.subr.bf16.mxu0 %v2730_v12  ;;  %2461 = vmatprep.subr.bf16.mxu1 %v2731_v13  ;;  %p3097_p4 = scmp.lt.s32.totalorder %s2211_s12, 15  ;;  %v398_v26 = vld [vmem:[%s358_s27] sm:$0xf]  ;;  %v399_v27 = vld [vmem:[%s358_s27 + $0x4] sm:$0xf]  ;;  %v3135_v38 = vld [vmem:[%s3073_s17 + $0x18] sm:$0xff]  }
  0x24   : > { %840 = vmatprep.mubr.bf16.mxu0 %v3090_v23  ;;  %s403_s28 = scalar_select %p402_p2, 1, 0  ;;  %2469 = vmatprep.mubr.bf16.mxu1 %v3093_v24  ;;  %v3144_v40 = vld [vmem:[%s3073_s17 + $0x20] sm:$0xff]   ;;  %v3166_v46 = vld [vmem:[%s3073_s17 + $0x28] sm:$0xff]   ;;  %v472_v48 = vshrl.u32 %v3090_v23, 16  ;;  %v3175_v49 = vld [vmem:[%s3073_s17 + $0x30] sm:$0xff]  }
  0x25   : > { %s3714_s12 = smov (!%p3097_p4, %s2211_s12), 15  ;;  %v475_v53 = vshll.u32 %v3090_v23, 16  ;;  %v479_v59 = vshrl.u32 %v3093_v24, 16  ;;  %v3208_v61 = vld [vmem:[%s3073_s17 + $0x38] sm:$0xff]   ;;  %v2770_v5 = vld [vmem:[%s3679_s3 + $0x30] sm:$0xff]   ;;  %vm3244_vm4 = vmand %vm544_vm1, %vm545_vm3  ;;  %s332_s9 = sand.u32 1, %s2868_s19  }
  0x26   : > { %2222 = vmatpush3.bf16.msra.mxu0 %v2732_v14  ;;  %2462 = vmatpush3.bf16.msra.mxu1 %v2731_v13  ;;  %v404_v28 = vstv %s403_s28  ;;  %s3716_s12 = smov (!%p3097_p4, %s3714_s12), 15  ;;  %v474_v55 = vrot.slane %v472_v48, 7  ;;  %v2772_v9 = vld [vmem:[%s3679_s3 + $0x78] sm:$0xff]   ;;  %v482_v13 = vshll.u32 %v3093_v24, 16  ;;  %vm3352_vm7 = vmand %vm1370_vm5, %vm1371_vm6  ;;  %s1996_s13 = sshll.u32 %s332_s9, 7 }
  0x27   : > { %2223 = vmatprep.subr.bf16.mxu0 %v2733_v15  ;;  %2463 = vmatprep.subr.bf16.mxu1 %v2734_v16  ;;  %vm405_vm0 = vcmp.eq.s32.totalorder %v404_v28, 1  ;;  %s2015_s27 = sshll.u32 %s3716_s12, 1  ;;  %v481_v4 = vrot.slane %v479_v59, 7  ;;  %v2773_v12 = vld [vmem:[%s3679_s3 + $0x38] sm:$0xff]   ;;  %s3579_s15 = scalar_lea.vmem [#allocation2], %s1996_s13 }
  0x28   : > { %v406_v32 = vsel %vm405_vm0, %v398_v26, 0  ;;  %v407_v33 = vsel %vm405_vm0, %v399_v27, 0  ;;  %s373_s16 = sadd.s32 %s2015_s27, %s3033_s29  ;;  %v477_v10 = vor.u32 %v475_v53, %v474_v55  ;;  %v489_v26 = vshll.u32 %v3112_v30, 16  ;;  %v2777_v27 = vld [vmem:[%s3679_s3 + $0x88] sm:$0xff]   ;;  %s2212_s27 = sshll.u32 %s2876_s21, 4 }
  0x29   : > { %v3117_v34 = vcombine.low %v406_v32, %v407_v33  ;;  %s2017_s26 = sshll.u32 %s373_s16, 2  ;;  %v2781_v32 = vld [vmem:[%s3679_s3 + $0x1f0] sm:$0xff]   ;;  %v493_v33 = vshrl.u32 %v3135_v38, 16  ;;  %v503_v55 = vshll.u32 %v3144_v40, 16  ;;  %s3588_s21 = sadd.s32 %s2212_s27, %s2200_s8 }
  0x2a   : > { %2224 = vmatpush3.bf16.msra.mxu0 %v2735_v17  ;;  %2464 = vmatpush3.bf16.msra.mxu1 %v2734_v16  ;;  %s375_s16 = scalar_lea.vmem %s3678_s2, %s2017_s26  ;;  %v548_v15 = vsel %vm3244_vm4, 0, %v477_v10  ;;  %v2775_v17 = vld [vmem:[%s3679_s3 + $0x1e0] sm:$0xff]   ;;  %s2201_s22 = sshll.u32 %s3588_s21, 7 }
  0x2b   : > { %2225 = vmatprep.subr.bf16.mxu0 %v2736_v18  ;;  %2465 = vmatprep.subr.bf16.mxu1 %v2737_v19  ;;  %v465_v56 = vshrl.u32 %v3117_v34, 16  ;;  %v468_v60 = vshll.u32 %v3117_v34, 16  ;;  %v400_v62 = vld [vmem:[%s375_s16] sm:$0xf]  ;;  %v401_v63 = vld [vmem:[%s375_s16 + $0x4] sm:$0xf]  ;;  %s3612_s12 = scalar_lea.hbm %s3681_s5, %s2201_s22 }
  0x2c   : > { %s409_s26 = scalar_select %p408_p5, 1, 0  ;;  %v2776_v18 = vld [vmem:[%s3679_s3 + $0x1a0] sm:$0xff]  }
  0x2d   : > { %v467_v1 = vrot.slane %v465_v56, 7  ;;  %s1858_s28 = sshll.u32 %s3579_s15, 4  ;;  %s3624_s30 = scalar_lea.sflag [#allocation3], %s332_s9  ;;  %s3614_s28 = int_to_ptr.vmem [resolvable:$true] %s1858_s28 }
  0x2e   : > { %2226 = vmatpush3.bf16.msra.mxu0 %v2738_v20  ;;  %2466 = vmatpush3.bf16.msra.mxu1 %v2737_v19  ;;  %v410_v2 = vstv %s409_s26  ;;  %v2774_v19 = vld [vmem:[%s3679_s3 + $0x80] sm:$0xff]   ;;  %v486_v20 = vshrl.u32 %v3112_v30, 16  ;;  %s2798_s29 = scalar_lea.vmem %s3614_s28, 2048  ;;  %s2802_s26 = sshll.u32 %s2894_s24, 4  ;;  %s2803_s26 = int_to_ptr.vmem [resolvable:$false] %s2802_s26 }
  0x2f   : > { %2227 = vmatprep.subr.bf16.mxu0 %v2739_v21  ;;  %2467 = vmatprep.subr.bf16.mxu1 %v2740_v22  ;;  %vm411_vm2 = vcmp.eq.s32.totalorder %v410_v2, 1  ;;  %v470_v16 = vor.u32 %v468_v60, %v467_v1  ;;  %v484_v21 = vor.u32 %v482_v13, %v481_v4  ;;  %v507_v4 = vshrl.u32 %v3166_v46, 16  ;;  %p2799_p6 = scmp.ne.s32.totalorder %s3614_s28, %s2798_s29  ;;  %s2804_s10 = scalar_lea.vmem %s2803_s26, 4096 }
  0x30   : > { %v412_v6 = vsel %vm411_vm2, %v400_v62, 0  ;;  %v413_v7 = vsel %vm411_vm2, %v401_v63, 0  ;;  %v488_v28 = vrot.slane %v486_v20, 7  ;;  %v2788_v62 = vld [vmem:[%s3679_s3 + $0xa8] sm:$0xff]   ;;  %p2805_p10 = scmp.lt.s32.totalorder %s3614_s28, %s2803_s26  ;;  %p2806_p11 = scmp.lt.s32.totalorder %s2804_s10, %s2798_s29 }
  0x31   : > { %v3235_v11 = vcombine.low %v412_v6, %v413_v7  ;;  %v2790_v6 = vld [vmem:[%s3679_s3 + $0xb0] sm:$0xff]   ;;  %p2800_p7 = pnand %p2799_p6, %p2978_p3 }
  0x32   : > { %2228 = vmatpush3.bf16.msra.mxu0 %v2741_v25  ;;  %2468 = vmatpush3.bf16.msra.mxu1 %v2740_v22  ;;  %v2778_v22 = vld [vmem:[%s3679_s3 + $0x1e8] sm:$0xff]   ;;  %v547_v25 = vsel %vm3244_vm4, 0, %v470_v16  ;;  %v2792_v16 = vld [vmem:[%s3679_s3 + $0xb8] sm:$0xff]   ;;  %p2807_p12 = por %p2806_p11, %p2805_p10 }
  0x33   : > { %2293 = vmatprep.subr.bf16.mxu1 %v2745_v29  ;;  %2373 = vmatprep.subr.bf16.mxu0 %v2746_v31  ;;  %v3278_v29 = vsel %vm3244_vm4, 0, %v484_v21  ;;  %v2779_v31 = vld [vmem:[%s3679_s3 + $0x1a8] sm:$0xff]   ;;  %v528_v63 = vshrl.u32 %v3235_v11, 16  ;;  %p2801_p9 = pneg %p2800_p7 }
  0x35   : > { %841 = vmatmul.mubr.bf16.vlgmr.msra.gmra.mrb[0].mxu0 %v3117_v34  ;;  %2470 = vmatmul.mubr.bf16.vlgmr.msra.gmra.mrb[0].mxu1 %v3112_v30  ;;  %v3404_v34 = vld [vmem:[%s3679_s3 + $0x208] sm:$0xff]   ;;  %p2808_p13 = pnand %p2807_p12, %p2801_p9 }
  0x36   : > { %2294 = vmatpush3.bf16.msra.mxu1 %v2747_v35  ;;  %2374 = vmatpush3.bf16.msra.mxu0 %v2748_v36  ;;  %v491_v35 = vor.u32 %v489_v26, %v488_v28  ;;  %v2780_v36 = vld [vmem:[%s3679_s3 + $0x90] sm:$0xff]  }
  0x37   : > { %2295 = vmatprep.subr.bf16.mxu1 %v2749_v37  ;;  %848 = vmatprep.mubr.bf16.mxu0 %v3093_v24  ;;  %v2782_v37 = vld [vmem:[%s3679_s3 + $0x1b0] sm:$0xff]  }
  0x38   : > { %2473 = vmatprep.mubr.bf16.mxu1 %v3135_v38  ;;  %2375 = vmatprep.subr.bf16.mxu0 %v2754_v42  ;;  %v2783_v42 = vld [vmem:[%s3679_s3 + $0x98] sm:$0xff]   ;;  %v2791_v28 = vld [vmem:[%s3679_s3 + $0x210] sm:$0xff]  }
  0x3a   : > { %2296 = vmatpush3.bf16.msra.mxu1 %v2750_v39  ;;  %2376 = vmatpush3.bf16.msra.mxu0 %v2756_v44  ;;  %v496_v39 = vshll.u32 %v3135_v38, 16  ;;  %v2784_v44 = vld [vmem:[%s3679_s3 + $0x1f8] sm:$0xff]  }
  0x3b   : > { %2297 = vmatprep.subr.bf16.mxu1 %v2753_v41  ;;  %2377 = vmatprep.subr.bf16.mxu0 %v2762_v51  ;;  %v495_v41 = vrot.slane %v493_v33, 7 }
  0x3d   : > { %849 = vmatmul.mubr.bf16.gmra.mrb[4].mxu0 %v3090_v23  ;;  %2474 = vmatmul.mubr.bf16.gmra.mrb[4].mxu1 %v3144_v40  ;;  %v498_v51 = vor.u32 %v496_v39, %v495_v41  ;;  %v1340_v23 = vrot.slane %v468_v60, 1  ;;  %v510_v60 = vshll.u32 %v3166_v46, 16 }
  0x3e   : > { %2298 = vmatpush3.bf16.msra.mxu1 %v2755_v43  ;;  %856 = vmatprep.mubr.bf16.mxu0 %v3112_v30  ;;  %v3306_v43 = vsel %vm3244_vm4, 0, %v491_v35 }
  0x3f   : > { %2299 = vmatprep.subr.bf16.mxu1 %v2757_v45  ;;  %2477 = vmatprep.mubr.bf16.mxu1 %v3166_v46  ;;  %v2785_v45 = vld [vmem:[%s3679_s3 + $0x1b8] sm:$0xff]  }
  0x40   : > { %2378 = vmatpush3.bf16.msra.mxu0 %v2764_v54 }
  0x41   : > { %2379 = vmatprep.subr.bf16.mxu0 %v2769_v3 }
  0x42   : > { %2300 = vmatpush3.bf16.msra.mxu1 %v2758_v47  ;;  %v3318_v47 = vld [vmem:[%s3679_s3 + $0x200] sm:$0xff]  }
  0x43   : > { %2301 = vmatprep.subr.bf16.mxu1 %v2761_v50  ;;  %v500_v50 = vshrl.u32 %v3144_v40, 16 }
  0x44   : > { %2380 = vmatpush3.bf16.msra.mxu0 %v2771_v8 }
  0x45   : > { %857 = vmatmul.mubr.bf16.gmra.mrb[8].mxu0 %v3093_v24  ;;  %2478 = vmatmul.mubr.bf16.gmra.mrb[8].mxu1 %v3175_v49  ;;  %v502_v54 = vrot.slane %v500_v50, 7  ;;  %v1346_v24 = vrot.slane %v489_v26, 1 }
  0x46   : > { %2302 = vmatpush3.bf16.msra.mxu1 %v2763_v52  ;;  %864 = vmatprep.mubr.bf16.mxu0 %v3135_v38  ;;  %v2786_v52 = vld [vmem:[%s3679_s3 + $0xa0] sm:$0xff]  }
  0x47   : > { %2303 = vmatprep.subr.bf16.mxu1 %v2765_v57  ;;  %2481 = vmatprep.mubr.bf16.mxu1 %v3208_v61  ;;  %v3334_v57 = vsel %vm3244_vm4, 0, %v498_v51  ;;  %v505_v2 = vor.u32 %v503_v55, %v502_v54  ;;  %v1347_v26 = vor.u32 %v1346_v24, %v486_v20  ;;  %v1348_v20 = vrot.slane %v496_v39, 1  ;;  %v2794_v39 = vld [vmem:[%s3679_s3 + $0x220] sm:$0xff]  }
  0x48   : > { %2381 = vmatprep.subr.bf16.mxu0 %v2775_v17  ;;  %v1341_v17 = vor.u32 %v1340_v23, %v465_v56  ;;  %v1350_v51 = vrot.slane %v503_v55, 1  ;;  %v1352_v55 = vrot.slane %v510_v60, 1 }
  0x49   : > { %2382 = vmatpush3.bf16.msra.mxu0 %v2776_v18  ;;  %v3373_v10 = vsel %vm3244_vm4, 0, %v505_v2 }
  0x4a   : > { %2304 = vmatpush3.bf16.msra.mxu1 %v2766_v58  ;;  %2383 = vmatprep.subr.bf16.mxu0 %v2778_v22  ;;  %v1342_v58 = vrot.slane %v475_v53, 1  ;;  %v530_v53 = vrot.slane %v528_v63, 7  ;;  %v1373_v21 = vsel %vm3352_vm7, %v1341_v17, 0 }
  0x4b   : > { %2305 = vmatprep.subr.bf16.mxu1 %v2768_v0  ;;  %v531_v0 = vshll.u32 %v3235_v11, 16 }
  0x4c   : > { %v1343_v3 = vor.u32 %v1342_v58, %v472_v48  ;;  %v2797_v58 = vld [vmem:[%s3679_s3 + $0x238] sm:$0xff]  }
  0x4d   : > { %865 = vmatmul.mubr.bf16.gmra.mrb[12].mxu0 %v3112_v30  ;;  %2482 = vmatmul.mubr.bf16.gmra.mrb[12].mxu1 %v3235_v11  ;;  %v1358_v1 = vrot.slane %v531_v0, 1  ;;  %v3359_v7 = vor.u32 %v531_v0, %v530_v53 }
  0x4e   : > { %2306 = vmatpush3.bf16.msra.mxu1 %v2770_v5  ;;  %872 = vmatprep.mubr.bf16.mxu0 %v3144_v40  ;;  %v1374_v11 = vsel %vm3352_vm7, %v1343_v3, 0 }
  0x4f   : > { %2307 = vmatprep.subr.bf16.mxu1 %v2772_v9  ;;  %1178 = vmatprep.mubr.bf16.mxu1 %v548_v15  ;;  %v3361_v8 = vor.u32 %v1358_v1, %v528_v63  ;;  %v556_v48 = vsel %vm3244_vm4, 0, %v3359_v7 }
  0x50   : > { %2384 = vmatpush3.bf16.msra.mxu0 %v2779_v31  ;;  %v521_v31 = vshrl.u32 %v3208_v61, 16 }
  0x51   : > { %2385 = vmatprep.subr.bf16.mxu0 %v2781_v32  ;;  %v1382_v9 = vsel %vm3352_vm7, %v3361_v8, 0  ;;  %v524_v32 = vshll.u32 %v3208_v61, 16 }
  0x52   : > { %2308 = vmatpush3.bf16.msra.mxu1 %v2773_v12  ;;  %v509_v12 = vrot.slane %v507_v4, 7  ;;  %v523_v30 = vrot.slane %v521_v31, 7 }
  0x53   : > { %2485 = vmatprep.subr.bf16.mxu1 %v2774_v19  ;;  %v1356_v63 = vrot.slane %v524_v32, 1 }
  0x54   : > { %2386 = vmatpush3.bf16.msra.mxu0 %v2782_v37  ;;  %v512_v18 = vor.u32 %v510_v60, %v509_v12  ;;  %v2793_v37 = vld [vmem:[%s3679_s3 + $0x218] sm:$0xff]   ;;  %v526_v41 = vor.u32 %v524_v32, %v523_v30 }
  0x55   : > { %873 = vmatmul.mubr.bf16.gmra.mrb[16].mxu0 %v3135_v38  ;;  %1179 = vmatmul.mubr.bf16.vlgmr.msra.gmra.mrb[16].mxu1 %v547_v25  ;;  %v517_v25 = vshll.u32 %v3175_v49, 16  ;;  %v2795_v38 = vld [vmem:[%s3679_s3 + $0x228] sm:$0xff]  }
  0x56   : > { %2486 = vmatpush3.bf16.msra.mxu1 %v2774_v19  ;;  %880 = vmatprep.mubr.bf16.mxu0 %v3166_v46  ;;  %v3399_v22 = vsel %vm3244_vm4, 0, %v512_v18 }
  0x57   : > { %1186 = vmatprep.mubr.bf16.mxu1 %v3278_v29  ;;  %2487 = vmatprep.subr.bf16.mxu1 %v2777_v27 }
  0x58   : > { %2387 = vmatprep.subr.bf16.mxu0 %v2784_v44  ;;  %v555_v44 = vsel %vm3244_vm4, 0, %v526_v41 }
  0x59   : > { %2388 = vmatpush3.bf16.msra.mxu0 %v2785_v45 }
  0x5a   : > { %2488 = vmatpush3.bf16.msra.mxu1 %v2777_v27  ;;  %2517 = vmatprep.subr.bf16.mxu0 %v3318_v47 }
  0x5b   : > { %2489 = vmatprep.subr.bf16.mxu1 %v2780_v36 }
  0x5d   : > { %881 = vmatmul.mubr.bf16.gmra.mrb[20].mxu0 %v3144_v40  ;;  %1187 = vmatmul.mubr.bf16.gmra.mrb[20].mxu1 %v548_v15  ;;  %v1344_v15 = vrot.slane %v482_v13, 1  ;;  %v514_v13 = vshrl.u32 %v3175_v49, 16  ;;  %v1353_v40 = vor.u32 %v1352_v55, %v507_v4 }
  0x5e   : > { %888 = vmatprep.mubr.bf16.mxu0 %v3175_v49  ;;  %1194 = vmatprep.mubr.bf16.mxu1 %v3306_v43 }
  0x5f   : > { %2490 = vmatpush3.bf16.msra.mxu1 %v2780_v36  ;;  %v1345_v19 = vor.u32 %v1344_v15, %v479_v59  ;;  %v516_v56 = vrot.slane %v514_v13, 7  ;;  %v3435_v36 = vsel %vm3352_vm7, %v1347_v26, 0 }
  0x60   : > { %2491 = vmatprep.subr.bf16.mxu1 %v2783_v42 }
  0x61   : > { %v3413_v59 = vsel %vm3352_vm7, %v1345_v19, 0  ;;  %v519_v27 = vor.u32 %v517_v25, %v516_v56 }
  0x63   : > { %2492 = vmatpush3.bf16.msra.mxu1 %v2783_v42  ;;  %v3431_v35 = vsel %vm3244_vm4, 0, %v519_v27  ;;  %v1349_v42 = vor.u32 %v1348_v20, %v493_v33  ;;  %v1351_v33 = vor.u32 %v1350_v51, %v500_v50  ;;  %v1379_v50 = vsel %vm3352_vm7, %v1353_v40, 0 }
  0x64   : > { %2493 = vmatprep.subr.bf16.mxu1 %v2786_v52 }
  0x65   : > { %889 = vmatmul.mubr.bf16.gmra.mrb[24].mxu0 %v3166_v46  ;;  %1195 = vmatmul.mubr.bf16.gmra.mrb[24].mxu1 %v3278_v29  ;;  %v3456_v45 = vsel %vm3352_vm7, %v1349_v42, 0  ;;  %v1378_v54 = vsel %vm3352_vm7, %v1351_v33, 0 }
  0x66   : > { %896 = vmatprep.mubr.bf16.mxu0 %v3208_v61  ;;  %1202 = vmatprep.mubr.bf16.mxu1 %v3334_v57 }
  0x67   : > { %2494 = vmatpush3.bf16.msra.mxu1 %v2786_v52  ;;  %v2796_v52 = vld [vmem:[%s3679_s3 + $0x230] sm:$0xff]  }
  0x68   : > { %2495 = vmatprep.subr.bf16.mxu1 %v2788_v62 }
  0x6b   : > { %2496 = vmatpush3.bf16.msra.mxu1 %v2788_v62  ;;  %v1354_v62 = vrot.slane %v517_v25, 1 }
  0x6c   : > { %2497 = vmatprep.subr.bf16.mxu1 %v2790_v6 }
  0x6d   : > { %897 = vmatmul.mubr.bf16.gmra.mrb[28].mxu0 %v3175_v49  ;;  %1203 = vmatmul.mubr.bf16.gmra.mrb[28].mxu1 %v3306_v43  ;;  %v1355_v46 = vor.u32 %v1354_v62, %v514_v13 }
  0x6e   : > { %1210 = vmatprep.mubr.bf16.mxu1 %v3373_v10  ;;  %1608 = vmatprep.mubr.bf16.mxu0 %v1374_v11 }
  0x6f   : > { %2498 = vmatpush3.bf16.msra.mxu1 %v2790_v6 }
  0x70   : > { %2499 = vmatprep.subr.bf16.mxu1 %v2792_v16 }
  0x73   : > { %2500 = vmatpush3.bf16.msra.mxu1 %v2792_v16 }
  0x74   : > { %2549 = vmatprep.subr.bf16.mxu1 %v3318_v47 }
  0x75   : > { %1211 = vmatmul.mubr.bf16.gmra.mrb[32].mxu1 %v3334_v57  ;;  %1609 = vmatmul.mubr.bf16.vlgmr.msra.gmra.mrb[32].mxu0 %v1373_v21 }
  0x76   : > { %2518 = vmatpush3.bf16.msra.mxu0 %v3318_v47  ;;  %1218 = vmatprep.mubr.bf16.mxu1 %v3399_v22 }
  0x77   : > { %1616 = vmatprep.mubr.bf16.mxu0 %v3413_v59  ;;  %2519 = vmatprep.subr.bf16.mxu0 %v3404_v34 }
  0x7a   : > { %2520 = vmatpush3.bf16.msra.mxu0 %v3404_v34 }
  0x7b   : > { %2521 = vmatprep.subr.bf16.mxu0 %v2791_v28 }
  0x7d   : > { %1219 = vmatmul.mubr.bf16.gmra.mrb[36].mxu1 %v3373_v10  ;;  %1617 = vmatmul.mubr.bf16.gmra.mrb[36].mxu0 %v1374_v11 }
  0x7e   : > { %1226 = vmatprep.mubr.bf16.mxu1 %v3431_v35  ;;  %1624 = vmatprep.mubr.bf16.mxu0 %v3435_v36 }
  0x7f   : > { %2522 = vmatpush3.bf16.msra.mxu0 %v2791_v28 }
  0x80   : > { %2523 = vmatprep.subr.bf16.mxu0 %v2793_v37 }
  0x83   : > { %2524 = vmatpush3.bf16.msra.mxu0 %v2793_v37 }
  0x84   : > { %2525 = vmatprep.subr.bf16.mxu0 %v2794_v39 }
  0x85   : > { %1227 = vmatmul.mubr.bf16.gmra.mrb[40].mxu1 %v3399_v22  ;;  %1625 = vmatmul.mubr.bf16.gmra.mrb[40].mxu0 %v3413_v59 }
  0x86   : > { %1234 = vmatprep.mubr.bf16.mxu1 %v555_v44  ;;  %1632 = vmatprep.mubr.bf16.mxu0 %v3456_v45 }
  0x87   : > { %2526 = vmatpush3.bf16.msra.mxu0 %v2794_v39 }
  0x88   : > { %2527 = vmatprep.subr.bf16.mxu0 %v2795_v38 }
  0x8b   : > { %2528 = vmatpush3.bf16.msra.mxu0 %v2795_v38 }
  0x8c   : > { %2529 = vmatprep.subr.bf16.mxu0 %v2796_v52 }
  0x8d   : > { %1235 = vmatmul.mubr.bf16.gmra.mrb[44].mxu1 %v3431_v35  ;;  %1633 = vmatmul.mubr.bf16.gmra.mrb[44].mxu0 %v3435_v36 }
  0x8e   : > { %2501 = vmatprep.mubr.bf16.mxu1 %v3278_v29  ;;  %1640 = vmatprep.mubr.bf16.mxu0 %v1378_v54  ;;  %v1380_v29 = vsel %vm3352_vm7, %v1355_v46, 0 }
  0x8f   : > { %2530 = vmatpush3.bf16.msra.mxu0 %v2796_v52 }
  0x90   : > { %2531 = vmatprep.subr.bf16.mxu0 %v2797_v58 }
  0x93   : > { %2532 = vmatpush3.bf16.msra.mxu0 %v2797_v58 }
  0x95   : > { %2502 = vmatmul.mubr.bf16.vlgmr.msra.gmra.mrb[0].mxu1 %v3306_v43  ;;  %1641 = vmatmul.mubr.bf16.gmra.mrb[48].mxu0 %v3456_v45  ;;  %v1357_v43 = vor.u32 %v1356_v63, %v521_v31 }
  0x96   : > { %2557 = vmatpush3.bf16.msra.mxu1 %v3318_v47  ;;  %2505 = vmatprep.mubr.bf16.mxu1 %v3334_v57 }
  0x97   : > { %2550 = vmatprep.subr.bf16.mxu1 %v3404_v34  ;;  %1648 = vmatprep.mubr.bf16.mxu0 %v1379_v50  ;;  %v1381_v49 = vsel %vm3352_vm7, %v1357_v43, 0 }
  0x9a   : > { %2558 = vmatpush3.bf16.msra.mxu1 %v3404_v34 }
  0x9b   : > { %2551 = vmatprep.subr.bf16.mxu1 %v2791_v28 }
  0x9d   : > { %2506 = vmatmul.mubr.bf16.gmra.mrb[4].mxu1 %v3373_v10  ;;  %1649 = vmatmul.mubr.bf16.gmra.mrb[52].mxu0 %v1378_v54 }
  0x9e   : > { %2559 = vmatpush3.bf16.msra.mxu1 %v2791_v28  ;;  %2509 = vmatprep.mubr.bf16.mxu1 %v3399_v22 }
  0x9f   : > { %2552 = vmatprep.subr.bf16.mxu1 %v2793_v37  ;;  %1656 = vmatprep.mubr.bf16.mxu0 %v1380_v29 }
  0xa2   : > { %2560 = vmatpush3.bf16.msra.mxu1 %v2793_v37 }
  0xa3   : > { %2553 = vmatprep.subr.bf16.mxu1 %v2794_v39 }
  0xa5   : > { %2510 = vmatmul.mubr.bf16.gmra.mrb[8].mxu1 %v3431_v35  ;;  %1657 = vmatmul.mubr.bf16.gmra.mrb[56].mxu0 %v1379_v50 }
  0xa6   : > { %2561 = vmatpush3.bf16.msra.mxu1 %v2794_v39  ;;  %2513 = vmatprep.mubr.bf16.mxu1 %v555_v44 }
  0xa7   : > { %2554 = vmatprep.subr.bf16.mxu1 %v2795_v38  ;;  %1664 = vmatprep.mubr.bf16.mxu0 %v1381_v49 }
  0xaa   : > { %2562 = vmatpush3.bf16.msra.mxu1 %v2795_v38 }
  0xab   : > { %2555 = vmatprep.subr.bf16.mxu1 %v2796_v52 }
  0xad   : > { %2514 = vmatmul.mubr.bf16.gmra.mrb[12].mxu1 %v556_v48  ;;  %1665 = vmatmul.mubr.bf16.gmra.mrb[60].mxu0 %v1380_v29 }
  0xae   : > { %2563 = vmatpush3.bf16.msra.mxu1 %v2796_v52  ;;  %2533 = vmatprep.mubr.bf16.mxu0 %v3413_v59 }
  0xaf   : > { %2556 = vmatprep.subr.bf16.mxu1 %v2797_v58  ;;  %2541 = vmatprep.mubr.bf16.mxu1 %v1379_v50 }
  0xb2   : > { %2564 = vmatpush3.bf16.msra.mxu1 %v2797_v58 }
  0xb5   : > { %2534 = vmatmul.mubr.bf16.vlgmr.msra.gmra.mrb[64].mxu0 %v3435_v36  ;;  %2542 = vmatmul.mubr.bf16.vlgmr.msra.gmra.mrb[8].mxu1 %v1380_v29 }
  0xb6   : > { %2537 = vmatprep.mubr.bf16.mxu0 %v3456_v45  ;;  %2545 = vmatprep.mubr.bf16.mxu1 %v1381_v49 }
  0xbd   : > { %2538 = vmatmul.mubr.bf16.gmra.mrb[68].mxu0 %v1378_v54  ;;  %2546 = vmatmul.mubr.bf16.gmra.mrb[12].mxu1 %v1382_v9 }
 0x108   : > { %v2229_v61 = vpop.f32.mrb[0].mxu0 }
 0x109   : > { %v2230_v14 = vpop.f32.mrb[1].mxu0 }
 0x10a   : > { %v2231_v47 = vadd.f32 %v2230_v14, %v2229_v61  ;;  %v2232_v57 = vpop.f32.mrb[2].mxu0 }
 0x10b   : > { %v2233_v0 = vpop.f32.mrb[3].mxu0 }
 0x10c   : > { %v2234_v53 = vadd.f32 %v2233_v0, %v2232_v57 }
 0x110   : > { %v2235_v1 = vpop.f32.mrb[4].mxu0 }
 0x111   : > { %v2236_v2 = vpop.f32.mrb[5].mxu0 }
 0x112   : > { %v2237_v3 = vadd.f32 %v2236_v2, %v2235_v1  ;;  %v2238_v4 = vpop.f32.mrb[6].mxu0 }
 0x113   : > { %v2239_v6 = vpop.f32.mrb[7].mxu0 }
 0x114   : > { %v2240_v7 = vadd.f32 %v2239_v6, %v2238_v4 }
 0x118   : > { %v2241_v23 = vpop.f32.mrb[8].mxu0 }
 0x119   : > { %v2242_v48 = vpop.f32.mrb[9].mxu0 }
 0x11a   : > { %v2243_v10 = vadd.f32 %v2242_v48, %v2241_v23  ;;  %v2244_v11 = vpop.f32.mrb[10].mxu0 }
 0x11b   : > { %v2245_v5 = vpop.f32.mrb[11].mxu0 }
 0x11c   : > { %v2246_v12 = vadd.f32 %v2245_v5, %v2244_v11 }
 0x120   : > { %v2247_v8 = vpop.f32.mrb[12].mxu0 }
 0x121   : > { %v2248_v9 = vpop.f32.mrb[13].mxu0 }
 0x122   : > { %v2249_v60 = vadd.f32 %v2248_v9, %v2247_v8  ;;  %v2250_v15 = vpop.f32.mrb[14].mxu0 }
 0x123   : > { %v2251_v16 = vpop.f32.mrb[15].mxu0 }
 0x124   : > { %v2252_v17 = vadd.f32 %v2251_v16, %v2250_v15 }
 0x128   : > { %v2253_v18 = vpop.f32.mrb[16].mxu0  ;;  %v2309_v13 = vpop.f32.mrb[16].mxu1 }
 0x129   : > { %v2254_v19 = vpop.f32.mrb[17].mxu0  ;;  %v2310_v21 = vpop.f32.mrb[17].mxu1 }
 0x12a   : > { %v2255_v22 = vadd.f32 %v2254_v19, %v2253_v18  ;;  %v2311_v34 = vadd.f32 %v2310_v21, %v2309_v13  ;;  %v2256_v56 = vpop.f32.mrb[18].mxu0  ;;  %v2312_v25 = vpop.f32.mrb[18].mxu1 }
 0x12b   : > { %v2257_v24 = vpop.f32.mrb[19].mxu0  ;;  %v2313_v59 = vpop.f32.mrb[19].mxu1 }
 0x12c   : > { %v2258_v27 = vadd.f32 %v2257_v24, %v2256_v56  ;;  %v2314_v26 = vadd.f32 %v2313_v59, %v2312_v25  ;;  %v3513_v28 = vadd.f32 %v2311_v34, %v2231_v47 }
 0x12e   : > { %v3515_v31 = vadd.f32 %v2314_v26, %v2234_v53 }
 0x130   : > { %v2259_v32 = vpop.f32.mrb[20].mxu0  ;;  %v2315_v35 = vpop.f32.mrb[20].mxu1 }
 0x131   : > { %v2260_v36 = vpop.f32.mrb[21].mxu0  ;;  %v2316_v30 = vpop.f32.mrb[21].mxu1 }
 0x132   : > { %v2261_v20 = vadd.f32 %v2260_v36, %v2259_v32  ;;  %v2317_v37 = vadd.f32 %v2316_v30, %v2315_v35  ;;  %v2262_v41 = vpop.f32.mrb[22].mxu0  ;;  %v2318_v42 = vpop.f32.mrb[22].mxu1 }
 0x133   : > { %v2263_v39 = vpop.f32.mrb[23].mxu0  ;;  %v2319_v44 = vpop.f32.mrb[23].mxu1 }
 0x134   : > { %v2264_v45 = vadd.f32 %v2263_v39, %v2262_v41  ;;  %v2320_v51 = vadd.f32 %v2319_v44, %v2318_v42  ;;  %v3517_v38 = vadd.f32 %v2317_v37, %v2237_v3 }
 0x136   : > { %v3519_v33 = vadd.f32 %v2320_v51, %v2240_v7 }
 0x138   : > { %v2265_v52 = vpop.f32.mrb[24].mxu0  ;;  %v2321_v54 = vpop.f32.mrb[24].mxu1 }
 0x139   : > { %v2266_v55 = vpop.f32.mrb[25].mxu0  ;;  %v2322_v58 = vpop.f32.mrb[25].mxu1 }
 0x13a   : > { %v2267_v40 = vadd.f32 %v2266_v55, %v2265_v52  ;;  %v2323_v50 = vadd.f32 %v2322_v58, %v2321_v54  ;;  %v2268_v62 = vpop.f32.mrb[26].mxu0  ;;  %v2324_v46 = vpop.f32.mrb[26].mxu1 }
 0x13b   : > { %v2269_v29 = vpop.f32.mrb[27].mxu0  ;;  %v2325_v63 = vpop.f32.mrb[27].mxu1 }
 0x13c   : > { %v2270_v43 = vadd.f32 %v2269_v29, %v2268_v62  ;;  %v2326_v49 = vadd.f32 %v2325_v63, %v2324_v46  ;;  %v3521_v61 = vadd.f32 %v2323_v50, %v2243_v10 }
 0x13e   : > { %v3523_v14 = vadd.f32 %v2326_v49, %v2246_v12 }
 0x140   : > { %v2271_v47 = vpop.f32.mrb[28].mxu0  ;;  %v2327_v57 = vpop.f32.mrb[28].mxu1 }
 0x141   : > { %v2272_v0 = vpop.f32.mrb[29].mxu0  ;;  %v2328_v53 = vpop.f32.mrb[29].mxu1 }
 0x142   : > { %v2273_v1 = vadd.f32 %v2272_v0, %v2271_v47  ;;  %v2329_v2 = vadd.f32 %v2328_v53, %v2327_v57  ;;  %v2274_v3 = vpop.f32.mrb[30].mxu0  ;;  %v2330_v4 = vpop.f32.mrb[30].mxu1 }
 0x143   : > { %v2275_v6 = vpop.f32.mrb[31].mxu0  ;;  %v2331_v7 = vpop.f32.mrb[31].mxu1 }
 0x144   : > { %v2276_v23 = vadd.f32 %v2275_v6, %v2274_v3  ;;  %v2332_v48 = vadd.f32 %v2331_v7, %v2330_v4  ;;  %v3525_v11 = vadd.f32 %v2329_v2, %v2249_v60 }
 0x146   : > { %v3527_v5 = vadd.f32 %v2332_v48, %v2252_v17 }
 0x148   : > { %v2333_v10 = vpop.f32.mrb[32].mxu1  ;;  %v2389_v8 = vpop.f32.mrb[32].mxu0 }
 0x149   : > { %v2334_v12 = vpop.f32.mrb[33].mxu1  ;;  %v2390_v9 = vpop.f32.mrb[33].mxu0 }
 0x14a   : > { %v2335_v15 = vadd.f32 %v2334_v12, %v2333_v10  ;;  %v3529_v16 = vadd.f32 %v2390_v9, %v2389_v8  ;;  %v2336_v18 = vpop.f32.mrb[34].mxu1  ;;  %v2392_v13 = vpop.f32.mrb[34].mxu0 }
 0x14b   : > { %v2337_v19 = vpop.f32.mrb[35].mxu1  ;;  %v2393_v21 = vpop.f32.mrb[35].mxu0 }
 0x14c   : > { %v2600_v34 = vadd.f32 %v2335_v15, %v2255_v22  ;;  %v2338_v56 = vadd.f32 %v2337_v19, %v2336_v18  ;;  %v2394_v25 = vadd.f32 %v2393_v21, %v2392_v13 }
 0x14e   : > { %v2606_v24 = vadd.f32 %v2338_v56, %v2258_v27 }
 0x150   : > { %v2339_v59 = vpop.f32.mrb[36].mxu1  ;;  %v2395_v60 = vpop.f32.mrb[36].mxu0 }
 0x151   : > { %v2340_v26 = vpop.f32.mrb[37].mxu1  ;;  %v2396_v17 = vpop.f32.mrb[37].mxu0 }
 0x152   : > { %v2341_v32 = vadd.f32 %v2340_v26, %v2339_v59  ;;  %v2397_v35 = vadd.f32 %v2396_v17, %v2395_v60  ;;  %v2342_v36 = vpop.f32.mrb[38].mxu1  ;;  %v2398_v30 = vpop.f32.mrb[38].mxu0 }
 0x153   : > { %v2343_v37 = vpop.f32.mrb[39].mxu1  ;;  %v2399_v41 = vpop.f32.mrb[39].mxu0 }
 0x154   : > { %v3531_v42 = vadd.f32 %v2341_v32, %v2261_v20  ;;  %v2344_v39 = vadd.f32 %v2343_v37, %v2342_v36  ;;  %v2400_v44 = vadd.f32 %v2399_v41, %v2398_v30 }
 0x156   : > { %v3533_v51 = vadd.f32 %v2344_v39, %v2264_v45 }
 0x158   : > { %v2345_v22 = vpop.f32.mrb[40].mxu1  ;;  %v2401_v52 = vpop.f32.mrb[40].mxu0 }
 0x159   : > { %v2346_v54 = vpop.f32.mrb[41].mxu1  ;;  %v2402_v27 = vpop.f32.mrb[41].mxu0 }
 0x15a   : > { %v2347_v55 = vadd.f32 %v2346_v54, %v2345_v22  ;;  %v2403_v58 = vadd.f32 %v2402_v27, %v2401_v52  ;;  %v2348_v50 = vpop.f32.mrb[42].mxu1  ;;  %v2404_v62 = vpop.f32.mrb[42].mxu0 }
 0x15b   : > { %v2349_v46 = vpop.f32.mrb[43].mxu1  ;;  %v2405_v29 = vpop.f32.mrb[43].mxu0 }
 0x15c   : > { %v3535_v63 = vadd.f32 %v2347_v55, %v2267_v40  ;;  %v2350_v49 = vadd.f32 %v2349_v46, %v2348_v50  ;;  %v2406_v47 = vadd.f32 %v2405_v29, %v2404_v62 }
 0x15e   : > { %v2618_v20 = vadd.f32 %v2350_v49, %v2270_v43 }
 0x160   : > { %v2351_v57 = vpop.f32.mrb[44].mxu1  ;;  %v2407_v0 = vpop.f32.mrb[44].mxu0 }
 0x161   : > { %v2352_v53 = vpop.f32.mrb[45].mxu1  ;;  %v2408_v45 = vpop.f32.mrb[45].mxu0 }
 0x162   : > { %v2353_v2 = vadd.f32 %v2352_v53, %v2351_v57  ;;  %v2409_v3 = vadd.f32 %v2408_v45, %v2407_v0  ;;  %v2354_v4 = vpop.f32.mrb[46].mxu1  ;;  %v2410_v6 = vpop.f32.mrb[46].mxu0 }
 0x163   : > { %v2355_v7 = vpop.f32.mrb[47].mxu1  ;;  %v2411_v48 = vpop.f32.mrb[47].mxu0 }
 0x164   : > { %v2609_v10 = vadd.f32 %v2353_v2, %v2273_v1  ;;  %v2356_v8 = vadd.f32 %v2355_v7, %v2354_v4  ;;  %v2412_v12 = vadd.f32 %v2411_v48, %v2410_v6  ;;  %v3565_v48 = vld [vmem:[%s3680_s4] ss:$0 sm:$0xff] }
 0x166   : > { %v2615_v9 = vadd.f32 %v2356_v8, %v2276_v23 }
 0x168   : > { %v2503_v15 = vpop.f32.mrb[0].mxu1  ;;  %v2413_v40 = vpop.f32.mrb[48].mxu0 }
 0x169   : > { %v2566_v18 = vadd.f32 %v3517_v38, %v2503_v15  ;;  %v1277_v13 = vpop.f32.mrb[1].mxu1  ;;  %v2414_v43 = vpop.f32.mrb[49].mxu0 }
 0x16a   : > { %v2570_v19 = vadd.f32 %v3513_v28, %v1277_v13  ;;  %v2415_v21 = vadd.f32 %v2414_v43, %v2413_v40  ;;  %v2504_v56 = vpop.f32.mrb[2].mxu1  ;;  %v2416_v59 = vpop.f32.mrb[50].mxu0 }
 0x16b   : > { %v2574_v60 = vadd.f32 %v3519_v33, %v2504_v56  ;;  %v1280_v26 = vpop.f32.mrb[3].mxu1  ;;  %v2417_v17 = vpop.f32.mrb[51].mxu0  ;;  %v2567_v32 = vadd.f32 %v2566_v18, %v2397_v35 }
 0x16c   : > { %v2578_v1 = vadd.f32 %v3515_v31, %v1280_v26  ;;  %v2418_v36 = vadd.f32 %v2417_v17, %v2416_v59  ;;  %v2571_v23 = vadd.f32 %v2570_v19, %v3529_v16  ;;  %v2601_v30 = vadd.f32 %v2600_v34, %v2415_v21 }
 0x16d   : > { %v2575_v37 = vadd.f32 %v2574_v60, %v2400_v44 }
 0x16e   : > { %v2579_v38 = vadd.f32 %v2578_v1, %v2394_v25  ;;  %v2607_v41 = vadd.f32 %v2606_v24, %v2418_v36 }
 0x170   : > { %v2507_v39 = vpop.f32.mrb[4].mxu1  ;;  %v2419_v22 = vpop.f32.mrb[52].mxu0 }
 0x171   : > { %v2582_v28 = vadd.f32 %v3525_v11, %v2507_v39  ;;  %v1293_v52 = vpop.f32.mrb[5].mxu1  ;;  %v2420_v54 = vpop.f32.mrb[53].mxu0 }
 0x172   : > { %v2586_v33 = vadd.f32 %v3521_v61, %v1293_v52  ;;  %v2421_v27 = vadd.f32 %v2420_v54, %v2419_v22  ;;  %v2508_v55 = vpop.f32.mrb[6].mxu1  ;;  %v2422_v35 = vpop.f32.mrb[54].mxu0 }
 0x173   : > { %v2590_v31 = vadd.f32 %v3527_v5, %v2508_v55  ;;  %v1296_v50 = vpop.f32.mrb[7].mxu1  ;;  %v2423_v62 = vpop.f32.mrb[55].mxu0  ;;  %v3545_v16 = vadd.f32 %v2582_v28, %v2409_v3 }
 0x174   : > { %v2594_v34 = vadd.f32 %v3523_v14, %v1296_v50  ;;  %v2424_v25 = vadd.f32 %v2423_v62, %v2422_v35  ;;  %v2598_v24 = vadd.f32 %v3531_v42, %v2421_v27  ;;  %v3549_v44 = vadd.f32 %v2586_v33, %v2403_v58 }
 0x175   : > { %v3551_v11 = vadd.f32 %v2590_v31, %v2412_v12 }
 0x176   : > { %v2604_v61 = vadd.f32 %v3533_v51, %v2424_v25  ;;  %v3554_v46 = vadd.f32 %v2594_v34, %v2406_v47 }
 0x178   : > { %v2425_v29 = vpop.f32.mrb[56].mxu0 }
 0x179   : > { %v2426_v5 = vpop.f32.mrb[57].mxu0 }
 0x17a   : > { %v2427_v49 = vadd.f32 %v2426_v5, %v2425_v29  ;;  %v2428_v57 = vpop.f32.mrb[58].mxu0 }
 0x17b   : > { %v2429_v0 = vpop.f32.mrb[59].mxu0 }
 0x17c   : > { %v2430_v53 = vadd.f32 %v2429_v0, %v2428_v57  ;;  %v3557_v14 = vadd.f32 %v3535_v63, %v2427_v49 }
 0x17e   : > { %v3559_v42 = vadd.f32 %v2618_v20, %v2430_v53 }
 0x180   : > { %v2431_v58 = vpop.f32.mrb[60].mxu0 }
 0x181   : > { %v2432_v45 = vpop.f32.mrb[61].mxu0 }
 0x182   : > { %v2433_v2 = vadd.f32 %v2432_v45, %v2431_v58  ;;  %v2434_v3 = vpop.f32.mrb[62].mxu0 }
 0x183   : > { %v2435_v51 = vpop.f32.mrb[63].mxu0 }
 0x184   : > { %v2436_v47 = vadd.f32 %v2435_v51, %v2434_v3  ;;  %v2610_v4 = vadd.f32 %v2609_v10, %v2433_v2 }
 0x186   : > { %v2616_v6 = vadd.f32 %v2615_v9, %v2436_v47 }
 0x188   : > { %v2535_v7 = vpop.f32.mrb[64].mxu0  ;;  %v2543_v8 = vpop.f32.mrb[8].mxu1 }
 0x189   : > { %v2568_v63 = vadd.f32 %v2567_v32, %v2535_v7  ;;  %v2599_v20 = vadd.f32 %v2598_v24, %v2543_v8  ;;  %v1707_v12 = vpop.f32.mrb[65].mxu0  ;;  %v1739_v15 = vpop.f32.mrb[9].mxu1 }
 0x18a   : > { %v2572_v40 = vadd.f32 %v2571_v23, %v1707_v12  ;;  %v2602_v18 = vadd.f32 %v2601_v30, %v1739_v15  ;;  %v2536_v13 = vpop.f32.mrb[66].mxu0  ;;  %v2544_v43 = vpop.f32.mrb[10].mxu1 }
 0x18b   : > { %v1795_v10 = vadd.f32 %v2568_v63, %v3565_v48  ;;  %v1803_v9 = vadd.f32 %v2599_v20, %v3565_v48  ;;  %v2576_v19 = vadd.f32 %v2575_v37, %v2536_v13  ;;  %v2605_v21 = vadd.f32 %v2604_v61, %v2544_v43  ;;  %v1710_v56 = vpop.f32.mrb[67].mxu0  ;;  %v1742_v59 = vpop.f32.mrb[11].mxu1 }
 0x18c   : > { %v1793_v60 = vadd.f32 %v2572_v40, %v3565_v48  ;;  %v1801_v26 = vadd.f32 %v2602_v18, %v3565_v48  ;;  %v2580_v17 = vadd.f32 %v2579_v38, %v1710_v56  ;;  %v2608_v32 = vadd.f32 %v2607_v41, %v1742_v59 }
 0x18d   : > { %v1811_v1 = vmax.f32 %v1795_v10, 0.0  ;;  %v1819_v36 = vmax.f32 %v1803_v9, 0.0  ;;  %v1796_v23 = vadd.f32 %v2576_v19, %v3565_v48  ;;  %v1804_v30 = vadd.f32 %v2605_v21, %v3565_v48 }
 0x18e   : > { %v1809_v39 = vmax.f32 %v1793_v60, 0.0  ;;  %v1817_v22 = vmax.f32 %v1801_v26, 0.0  ;;  %v1794_v37 = vadd.f32 %v2580_v17, %v3565_v48  ;;  %v1802_v28 = vadd.f32 %v2608_v32, %v3565_v48 }
 0x18f   : > { %1827 = vst [vmem:[%s3579_s15 + $0x10] sm:$0xff] %v1811_v1  ;;  %1835 = vst [vmem:[%s3579_s15 + $0x50] sm:$0xff] %v1819_v36  ;;  %v1812_v38 = vmax.f32 %v1796_v23, 0.0  ;;  %v1820_v41 = vmax.f32 %v1804_v30, 0.0 }
 0x190   : > { %1825 = vst [vmem:[%s3579_s15] sm:$0xff] %v1809_v39  ;;  %1833 = vst [vmem:[%s3579_s15 + $0x40] sm:$0xff] %v1817_v22  ;;  %v1810_v52 = vmax.f32 %v1794_v37, 0.0  ;;  %v1818_v54 = vmax.f32 %v1802_v28, 0.0  ;;  %v2539_v33 = vpop.f32.mrb[68].mxu0  ;;  %v2547_v27 = vpop.f32.mrb[12].mxu1 }
 0x191   : > { %1828 = vst [vmem:[%s3579_s15 + $0x18] sm:$0xff] %v1812_v38  ;;  %1836 = vst [vmem:[%s3579_s15 + $0x58] sm:$0xff] %v1820_v41  ;;  %v2584_v55 = vadd.f32 %v3545_v16, %v2539_v33  ;;  %v2611_v35 = vadd.f32 %v2610_v4, %v2547_v27  ;;  %v1723_v31 = vpop.f32.mrb[69].mxu0  ;;  %v1755_v50 = vpop.f32.mrb[13].mxu1 }
 0x192   : > { %1826 = vst [vmem:[%s3579_s15 + $0x8] sm:$0xff] %v1810_v52  ;;  %1834 = vst [vmem:[%s3579_s15 + $0x48] sm:$0xff] %v1818_v54  ;;  %v2588_v62 = vadd.f32 %v3549_v44, %v1723_v31  ;;  %v2614_v34 = vadd.f32 %v3557_v14, %v1755_v50  ;;  %v2540_v25 = vpop.f32.mrb[70].mxu0  ;;  %v2548_v24 = vpop.f32.mrb[14].mxu1 }
 0x193   : > { %v1799_v61 = vadd.f32 %v2584_v55, %v3565_v48  ;;  %v1807_v29 = vadd.f32 %v2611_v35, %v3565_v48  ;;  %v2592_v16 = vadd.f32 %v3551_v11, %v2540_v25  ;;  %v2617_v5 = vadd.f32 %v2616_v6, %v2548_v24  ;;  %v1726_v49 = vpop.f32.mrb[71].mxu0  ;;  %v1758_v57 = vpop.f32.mrb[15].mxu1 }
 0x194   : > { %v1797_v0 = vadd.f32 %v2588_v62, %v3565_v48  ;;  %v1805_v53 = vadd.f32 %v2614_v34, %v3565_v48  ;;  %v2596_v44 = vadd.f32 %v3554_v46, %v1726_v49  ;;  %v2620_v14 = vadd.f32 %v3559_v42, %v1758_v57 }
 0x195   : > { %v1815_v58 = vmax.f32 %v1799_v61, 0.0  ;;  %v1823_v45 = vmax.f32 %v1807_v29, 0.0  ;;  %v1800_v11 = vadd.f32 %v2592_v16, %v3565_v48  ;;  %v1808_v2 = vadd.f32 %v2617_v5, %v3565_v48 }
 0x196   : > { %v1813_v3 = vmax.f32 %v1797_v0, 0.0  ;;  %v1821_v51 = vmax.f32 %v1805_v53, 0.0  ;;  %v1798_v46 = vadd.f32 %v2596_v44, %v3565_v48  ;;  %v1806_v42 = vadd.f32 %v2620_v14, %v3565_v48 }
 0x197   : > { %1831 = vst [vmem:[%s3579_s15 + $0x30] sm:$0xff] %v1815_v58  ;;  %1839 = vst [vmem:[%s3579_s15 + $0x70] sm:$0xff] %v1823_v45  ;;  %v1816_v47 = vmax.f32 %v1800_v11, 0.0  ;;  %v1824_v4 = vmax.f32 %v1808_v2, 0.0 }
 0x198   : > { %1829 = vst [vmem:[%s3579_s15 + $0x20] sm:$0xff] %v1813_v3  ;;  %1837 = vst [vmem:[%s3579_s15 + $0x60] sm:$0xff] %v1821_v51  ;;  %v1814_v6 = vmax.f32 %v1798_v46, 0.0  ;;  %v1822_v7 = vmax.f32 %v1806_v42, 0.0 }
 0x199   : > { %1832 = vst [vmem:[%s3579_s15 + $0x38] sm:$0xff] %v1816_v47  ;;  %1840 = vst [vmem:[%s3579_s15 + $0x78] sm:$0xff] %v1824_v4 }
 0x19a   : > { %1830 = vst [vmem:[%s3579_s15 + $0x28] sm:$0xff] %v1814_v6  ;;  %1838 = vst [vmem:[%s3579_s15 + $0x68] sm:$0xff] %v1822_v7 }
 0x19b   : > { %2811 = shalt.err (!%p2808_p13)
}
 0x19c   : > { %s2812_s9 = scalar_lea.hbm %s3612_s12, 2048  ;;  %s2816_s27 = scalar_lea.hbm %s3681_s5, 8192 }
 0x19d   : > { %p2813_p0 = scmp.ne.s32.totalorder %s3612_s12, %s2812_s9  ;;  %p2817_p4 = scmp.lt.u32.totalorder %s3612_s12, %s3681_s5 }
 0x19e   : > { %p2818_p5 = scmp.lt.u32.totalorder %s2816_s27, %s2812_s9  ;;  %p2820_p7 = scmp.lt.u32.totalorder %s2812_s9, %s3612_s12 }
 0x19f   : > { %p2814_p1 = pnand %p2813_p0, %p2978_p3 }
 0x1a0   : > { %p2819_p6 = por %p2818_p5, %p2817_p4 }
 0x1a1   : > { %p2815_p2 = pneg %p2814_p1 }
 0x1a2   : > { %p2821_p9 = por %p2820_p7, %p2819_p6 }
 0x1a4   : > { %p2822_p10 = pnand %p2821_p9, %p2815_p2 }
 0x1a6   : > { %2825 = shalt.err (!%p2822_p10)
}
 0x1a7   : > { %s2895_s21 = smov 128   ;;  %s2896_s22 = smov 8  }
 0x1a8   : > { %2645 = dma.vmem_to_hbm [thread:$0]  (%p2978_p3), %s3614_s28, 2048, %s3612_s12, %s3624_s30, %s2895_s21, %s2895_s21, %s2896_s22  }
 0x1a9 PF: > { %p2651_p11 = scmp.ge.s32.totalorder %s2892_s25, 2  ;;  %s1873_s14 = sand.u32 1, %s2864_s18  }
 0x1aa   : > { %s1874_s16 = scalar_lea.sflag [#allocation3], %s1873_s14 }
 0x1ab   : > { %p2648_p12 = pnand %p2651_p11, %p2987_p8 }
 0x1ad   : > { %2859 = dma.done.wait (!%p2648_p12), %s1874_s16, 2048  }
 0x1ae   : > { %2861 = vsyncadd (!%p2648_p12), %s1874_s16, 4294965248  ;;  %s18_s25 = sadd.s32 1, %s2892_s25   ;;  %s3695_s22 = sld [smem:[#allocation5_spill]] }
 0x1af   : > { %p15_p13 = scmp.ge.s32.totalorder %s18_s25, 6   ;;  %s3696_s6 = sld [smem:[#allocation6_spill]] }
 0x1b0   : > { %s3697_s24 = sld [smem:[#allocation7_spill]]  ;;  %s3698_s18 = smov %s2868_s19 }
 0x1b1   : > { %s3699_s19 = smov %s2872_s20  ;;  %s3700_s20 = smov %s2996_s11 }
 0x1b2   : > { %s3701_s21 = smov %s2884_s23  ;;  %17 = sbr.rel (!%p15_p13) target bundleno = 5 (0x5), region = 83 }
 0x1b5   : > { %s3702_s23 = smov %s3696_s6 }
 0x1b9   :  { %1879 = vsyncpa [#allocation3], 1 }
 0x1ba   :  { %1881 = vsyncpa [#allocation3 + $0x1], 1 }

</bundles_post_ra>
